<compile_context>
chip_gen: v6e
topology: v6e:2x2x1
jax: 0.10.0
libtpu: 0.0.40
codegen_flags: <defaults>
</compile_context>

<pallas_src>
import jax
import jax.numpy as jnp
from jax import lax
from jax.experimental import pallas as pl
from jax.experimental.pallas import tpu as pltpu

D_MODEL = 256
HEADS = 8
D_K = 256          # == D_V == D_MODEL for this module
D_V = 256
N_ACTIONS = 4
ACT_PAD = 128      # action logits padded to one full lane group
LN_EPS = 1e-5


def recovery_kernel(imgf_ref, vismem_ref, gamma_ref, beta_ref,
                    wqk_i8_ref, wqk_scale_ref, wvo_hbm_ref, wvo_scale_ref,
                    wfc_ref, bfc_ref,
                    out_ref, attn_ref, action_ref,
                    wqk_deq_ref, wvo_deq_ref, wvo_i8_ref, dma_sem):
    L = vismem_ref.shape[0]
    L_pad = attn_ref.shape[-1]
    is_first = pl.program_id(0) == 0

    # --- step 0 only: start the wvo HBM->VMEM copy (overlaps with the QK /
    # softmax compute below) and dequantize wqk int8 -> bf16 into scratch.
    @pl.when(is_first)
    def _():
        pltpu.make_async_copy(wvo_hbm_ref, wvo_i8_ref, dma_sem).start()
        wqk_deq_ref[...] = (wqk_i8_ref[...].astype(jnp.float32)
                            * wqk_scale_ref[...]).astype(jnp.bfloat16)

    q = imgf_ref[0]                                      # (1, 256) f32 residual
    kv = vismem_ref[...]                                 # (L, 256) f32

    # --- LayerNorm(d_model) on the query (biased variance, eps=1e-5) ---
    mean = jnp.mean(q, axis=-1, keepdims=True)
    cent = q - mean
    var = jnp.mean(cent * cent, axis=-1, keepdims=True)
    qn = cent * lax.rsqrt(var + LN_EPS) * gamma_ref[...] + beta_ref[...]

    # --- fused query/key projection: c[0, h*Dk+d] = (qn @ Wq_h @ Wk_h^T)[d] ---
    c = jnp.dot(qn.astype(jnp.bfloat16), wqk_deq_ref[...],
                preferred_element_type=jnp.float32)      # (1, H*Dk) f32
    c_r = c.reshape(HEADS, D_K)                          # (H, Dk)

    # per-head scores s[l, h] = <kv[l], c_r[h]>
    scores = lax.dot_general(kv, c_r, (((1,), (1,)), ((), ())),
                             preferred_element_type=jnp.float32)   # (L, H)

    # F.softmax with implicit dim on the 4-D score (B, heads, 1, L) == dim=1,
    # i.e. softmax ACROSS HEADS (PyTorch deprecated implicit-dim behaviour).
    m = jnp.max(scores, axis=-1, keepdims=True)
    e = jnp.exp(scores - m)
    den = jnp.sum(e, axis=-1, keepdims=True)
    p = e * pl.reciprocal(den, approx=True)              # (L, H)

    # attention map = score.sum(heads) -> lane-major (1, L), padded to L_pad
    ones_h = jnp.ones((1, HEADS), jnp.float32)
    attn_row = lax.dot_general(ones_h, p, (((1,), (1,)), ((), ())),
                               preferred_element_type=jnp.float32)  # (1, L)
    if L_pad > L:
        attn_row = jnp.concatenate(
            [attn_row, jnp.zeros((1, L_pad - L), jnp.float32)], axis=1)

    # per-head context ctx[h] = sum_l p[l, h] * kv[l]  -> (H, Dv), then flatten
    ctx = lax.dot_general(p, kv, (((0,), (0,)), ((), ())),
                          preferred_element_type=jnp.float32)       # (H, Dv)
    ctx_flat = ctx.reshape(1, HEADS * D_V)                           # (1, H*Dv)

    # --- step 0 only: finish the wvo transfer, dequantize once into scratch ---
    @pl.when(is_first)
    def _():
        pltpu.make_async_copy(wvo_hbm_ref, wvo_i8_ref, dma_sem).wait()
        wvo_deq_ref[...] = (wvo_i8_ref[...].astype(jnp.float32)
                            * wvo_scale_ref[...]).astype(jnp.bfloat16)

    # fused value/output projection + residual: out = sum_h ctx_h @ (Wv_h Wout_h)
    out_vec = jnp.dot(ctx_flat.astype(jnp.bfloat16), wvo_deq_ref[...],
                      preferred_element_type=jnp.float32) + q        # (1, 256)
    out_ref[0] = out_vec

    # --- recovery action head: fc(out) -> 4 logits (wfc zero-padded to 128) ---
    action_ref[0] = (jnp.dot(out_vec, wfc_ref[...],
                             preferred_element_type=jnp.float32) + bfc_ref[...])
    attn_ref[0] = attn_row


def init_params(key):
    """Deterministic raw parameter init (shapes follow the torch module)."""
    ks = jax.random.split(key, 6)

    def lin(k, fan_in, fan_out):
        bound = 1.0 / jnp.sqrt(jnp.float32(fan_in))
        return jax.random.uniform(k, (fan_in, fan_out), jnp.float32, -bound, bound)

    return dict(
        wq=lin(ks[0], D_MODEL, HEADS * D_K),
        wk=lin(ks[1], D_MODEL, HEADS * D_K),
        wv=lin(ks[2], D_MODEL, HEADS * D_V),
        wout=lin(ks[3], HEADS * D_V, D_MODEL),
        wfc=lin(ks[4], D_MODEL, N_ACTIONS),
        bfc=jax.random.uniform(ks[5], (1, N_ACTIONS), jnp.float32,
                               -1.0 / jnp.sqrt(jnp.float32(D_MODEL)),
                               1.0 / jnp.sqrt(jnp.float32(D_MODEL))),
        gamma=jnp.ones((1, D_MODEL), jnp.float32),   # LayerNorm defaults
        beta=jnp.zeros((1, D_MODEL), jnp.float32),
    )


def quantize_per_column(w):
    """Symmetric int8 weight-only quantization with per-output-column scales."""
    amax = jnp.max(jnp.abs(w), axis=0, keepdims=True)
    scale = jnp.maximum(amax, 1e-8) / 127.0
    q = jnp.clip(jnp.round(w / scale), -127.0, 127.0).astype(jnp.int8)
    return q, scale.astype(jnp.float32)


def fuse_params(raw):
    """Offline per-head weight fusion + int8 quantization (4x fewer HBM bytes)."""
    wq3 = raw["wq"].reshape(D_MODEL, HEADS, D_K).transpose(1, 0, 2)    # (H,256,256)
    wk3 = raw["wk"].reshape(D_MODEL, HEADS, D_K).transpose(1, 0, 2)
    wv3 = raw["wv"].reshape(D_MODEL, HEADS, D_V).transpose(1, 0, 2)
    wout3 = raw["wout"].reshape(HEADS, D_V, D_MODEL)
    wqk3 = jnp.einsum("hek,hdk->hed", wq3, wk3)      # Wq_h @ Wk_h^T
    wvo3 = jnp.einsum("hdv,hvj->hdj", wv3, wout3)    # Wv_h @ Wout_h
    wqk = wqk3.transpose(1, 0, 2).reshape(D_MODEL, HEADS * D_K)        # (256, 2048)
    wvo = wvo3.reshape(HEADS * D_V, D_MODEL)                           # (2048, 256)
    wqk_q, wqk_scale = quantize_per_column(wqk)
    wvo_q, wvo_scale = quantize_per_column(wvo)
    wfc_pad = jnp.zeros((D_MODEL, ACT_PAD), jnp.float32).at[:, :N_ACTIONS].set(raw["wfc"])
    bfc_pad = jnp.zeros((1, ACT_PAD), jnp.float32).at[:, :N_ACTIONS].set(raw["bfc"])
    return dict(wqk_q=wqk_q, wqk_scale=wqk_scale,
                wvo_q=wvo_q, wvo_scale=wvo_scale,
                wfc_pad=wfc_pad, bfc_pad=bfc_pad,
                gamma=raw["gamma"], beta=raw["beta"])


def recovery_attention_pallas(fused, vis_mem_2d, img_features):
    """Batched attention: img_features is (N, 256); weights DMA'd once for all N."""
    N = img_features.shape[0]
    L = vis_mem_2d.shape[0]
    L_pad = ((L + 127) // 128) * 128
    img3 = img_features.reshape(N, 1, D_MODEL)

    const2 = lambda n: (0, 0)
    out_shapes = [
        jax.ShapeDtypeStruct((N, 1, D_MODEL), jnp.float32),   # attention output
        jax.ShapeDtypeStruct((N, 1, L_pad), jnp.float32),     # attn map (padded)
        jax.ShapeDtypeStruct((N, 1, ACT_PAD), jnp.float32),   # action logits (padded)
    ]
    in_specs = [
        pl.BlockSpec((1, 1, D_MODEL), lambda n: (n, 0, 0)),   # query n
        pl.BlockSpec((L, D_MODEL), const2),                   # vis_mem (resident)
        pl.BlockSpec((1, D_MODEL), const2),                   # LN gamma
        pl.BlockSpec((1, D_MODEL), const2),                   # LN beta
        pl.BlockSpec((D_MODEL, HEADS * D_K), const2),         # wqk int8
        pl.BlockSpec((1, HEADS * D_K), const2),               # wqk scales
        pl.BlockSpec(memory_space=pl.ANY),                    # wvo int8 (HBM, manual DMA)
        pl.BlockSpec((1, D_MODEL), const2),                   # wvo scales
        pl.BlockSpec((D_MODEL, ACT_PAD), const2),             # fc weight (padded)
        pl.BlockSpec((1, ACT_PAD), const2),                   # fc bias (padded)
    ]
    out_specs = [
        pl.BlockSpec((1, 1, D_MODEL), lambda n: (n, 0, 0)),
        pl.BlockSpec((1, 1, L_pad), lambda n: (n, 0, 0)),
        pl.BlockSpec((1, 1, ACT_PAD), lambda n: (n, 0, 0)),
    ]
    scratch_shapes = [
        pltpu.VMEM((D_MODEL, HEADS * D_K), jnp.bfloat16),     # dequantized wqk
        pltpu.VMEM((HEADS * D_V, D_MODEL), jnp.bfloat16),     # dequantized wvo
        pltpu.VMEM((HEADS * D_V, D_MODEL), jnp.int8),         # wvo int8 landing buffer
        pltpu.SemaphoreType.DMA(()),
    ]
    call = pl.pallas_call(
        recovery_kernel,
        out_shape=out_shapes,
        grid=(N,),
        in_specs=in_specs,
        out_specs=out_specs,
        scratch_shapes=scratch_shapes,
        compiler_params=pltpu.CompilerParams(
            dimension_semantics=("arbitrary",),   # step-0 scratch fill is reused later
            vmem_limit_bytes=32 << 20),
    )
    return call(img3, vis_mem_2d, fused["gamma"], fused["beta"],
                fused["wqk_q"], fused["wqk_scale"],
                fused["wvo_q"], fused["wvo_scale"],
                fused["wfc_pad"], fused["bfc_pad"])


@jax.jit
def _forward_device(fused, vis_mem_2d, img_feature, entropy_th):
    """Kernel + decision glue all on device (one dispatch, one later sync)."""
    out3, attn_pad, action_pad = recovery_attention_pallas(fused, vis_mem_2d,
                                                           img_feature)
    L = vis_mem_2d.shape[0]
    attn = attn_pad[:, :, :L]                               # (B, 1, L)
    weight = jax.nn.softmax(attn, axis=0)                   # implicit dim (3-D) == 0
    probs = weight / jnp.sum(weight, axis=-1, keepdims=True)  # Categorical normalize
    entropy = -jnp.sum(probs * jnp.log(probs), axis=-1)       # (1, 1)
    info = entropy[0, 0] <= entropy_th

    action = action_pad[:, :, :N_ACTIONS]                   # (B, 1, 4)
    act_probs = jax.nn.softmax(action, axis=0)               # implicit dim (3-D) == 0
    ra = jnp.argmax(act_probs)                               # argmax over flattened
    done = ra == 0
    return ra, done, info, out3[:, 0, :], attn, action


def recovery_forward(fused, vis_mem, img_feature, entropy_th=1.0):
    """Mirrors Recovery.forward for B=1 (the query is a single image feature)."""
    vis_mem = jnp.asarray(vis_mem, jnp.float32)
    if vis_mem.ndim == 2:
        vis_mem = vis_mem[None]
    img_feature = jnp.asarray(img_feature, jnp.float32)
    assert vis_mem.shape[0] == 1 and img_feature.shape[0] == 1, "forward assumes B=1"

    ra, done, info, out, attn, action = _forward_device(
        fused, vis_mem[0], img_feature, jnp.float32(entropy_th))

    # single host sync for the three tiny control scalars
    ra_i, done_b, info_b = jax.device_get((ra, done, info))
    # TODO(synk): the data-dependent action-list mapping stays host-side Python,
    # as in the original module (it returns a Python list).
    mapping = {0: [0.0, 0.4, 0.0], 1: [-30.0, 0.0, 0.0],
               2: [30.0, 0.0, 0.0], 3: [0.0, -0.4, 0.0]}
    return mapping[int(ra_i)], bool(done_b), bool(info_b), (out, attn, action)


def reference_parts(fused, kv, q):
    """Pure-JAX reference using the same dequantized int8 weights (sanity check)."""
    wqk = (fused["wqk_q"].astype(jnp.float32) * fused["wqk_scale"]
           ).astype(jnp.bfloat16).astype(jnp.float32)
    wvo = (fused["wvo_q"].astype(jnp.float32) * fused["wvo_scale"]
           ).astype(jnp.bfloat16).astype(jnp.float32)
    wfc = fused["wfc_pad"][:, :N_ACTIONS]
    bfc = fused["bfc_pad"][:, :N_ACTIONS]
    mean = jnp.mean(q, axis=-1, keepdims=True)
    cent = q - mean
    var = jnp.mean(cent * cent, axis=-1, keepdims=True)
    qn = cent * lax.rsqrt(var + LN_EPS) * fused["gamma"] + fused["beta"]
    qn = qn.astype(jnp.bfloat16).astype(jnp.float32)         # mirror kernel cast
    c = qn @ wqk                                             # (1, H*Dk)
    cr = c.reshape(HEADS, D_K)                               # (H, Dk)
    s = kv @ cr.T                                            # (L, H)
    p = jax.nn.softmax(s, axis=-1)                           # softmax across heads
    attn = jnp.sum(p, axis=-1)[None, :]                      # (1, L)
    ctx = (p.T @ kv).reshape(1, HEADS * D_V)                 # (1, H*Dv)
    ctx = ctx.astype(jnp.bfloat16).astype(jnp.float32)       # mirror kernel cast
    out = ctx @ wvo + q
    action = out @ wfc + bfc
    return out, attn, action


if __name__ == "__main__":
    key = jax.random.PRNGKey(0)
    k_param, k_mem, k_img, k_batch = jax.random.split(key, 4)
    raw_params = init_params(k_param)
    fused_params = fuse_params(raw_params)

    L = 8                                                    # visual-memory length
    vis_mem = jax.random.normal(k_mem, (1, L, D_MODEL), jnp.float32)
    img_feature = jax.random.normal(k_img, (1, D_MODEL), jnp.float32)

    # --- module-faithful single-query forward ---
    return_action, done, info, (out, attn, action) = recovery_forward(
        fused_params, vis_mem, img_feature)
    jax.block_until_ready((out, attn, action))

    out_r, attn_r, action_r = reference_parts(fused_params, vis_mem[0], img_feature)
    assert jnp.allclose(out, out_r, rtol=5e-2, atol=5e-2)
    assert jnp.allclose(attn.reshape(1, -1), attn_r, rtol=5e-2, atol=5e-2)
    assert jnp.allclose(action.reshape(1, -1), action_r, rtol=5e-2, atol=5e-2)

    # --- batched-query path: weights DMA'd + dequantized once for all N queries ---
    Nb = 4
    img_batch = jax.random.normal(k_batch, (Nb, D_MODEL), jnp.float32)
    outs, attns, actions = recovery_attention_pallas(fused_params, vis_mem[0],
                                                     img_batch)
    jax.block_until_ready((outs, attns, actions))
    for i in range(Nb):
        o_r, a_r, ac_r = reference_parts(fused_params, vis_mem[0],
                                         img_batch[i:i + 1])
        assert jnp.allclose(outs[i, 0:1, :], o_r, rtol=5e-2, atol=5e-2)
        assert jnp.allclose(attns[i, 0:1, :L], a_r, rtol=5e-2, atol=5e-2)
        assert jnp.allclose(actions[i, 0:1, :N_ACTIONS], ac_r, rtol=5e-2, atol=5e-2)

    print("KERNEL_OK")
</pallas_src>

<mosaic_0001>
module attributes {stable_mosaic.version = 11 : i64} {
  func.func @recovery_kernel(%arg0: i32, %arg1: memref<1x1x256xf32, #tpu.memory_space<vmem>>, %arg2: memref<8x256xf32, #tpu.memory_space<vmem>>, %arg3: memref<1x256xf32, #tpu.memory_space<vmem>>, %arg4: memref<1x256xf32, #tpu.memory_space<vmem>>, %arg5: memref<256x2048xi8, #tpu.memory_space<vmem>>, %arg6: memref<1x2048xf32, #tpu.memory_space<vmem>>, %arg7: memref<2048x256xi8, #tpu.memory_space<any>>, %arg8: memref<1x256xf32, #tpu.memory_space<vmem>>, %arg9: memref<256x128xf32, #tpu.memory_space<vmem>>, %arg10: memref<1x128xf32, #tpu.memory_space<vmem>>, %arg11: memref<1x1x256xf32, #tpu.memory_space<vmem>>, %arg12: memref<1x1x128xf32, #tpu.memory_space<vmem>>, %arg13: memref<1x1x128xf32, #tpu.memory_space<vmem>>, %arg14: memref<256x2048xbf16, #tpu.memory_space<vmem>>, %arg15: memref<2048x256xbf16, #tpu.memory_space<vmem>>, %arg16: memref<2048x256xi8, #tpu.memory_space<vmem>>, %arg17: memref<!tpu.dma_semaphore, #tpu.memory_space<semaphore_mem>>) attributes {dimension_semantics = [#tpu.dimension_semantics<arbitrary>], iteration_bounds = array<i64: 1>, scalar_prefetch = 0 : i64, scratch_operands = 4 : i64, tpu.core_type = #tpu.core_type<tc>, window_params = [{transform_indices = @transform_0, window_bounds = array<i64: 1, 1, 256>}, {pipeline_mode = #tpu.pipeline_mode<synchronous>, transform_indices = @transform_1, window_bounds = array<i64: 8, 256>}, {pipeline_mode = #tpu.pipeline_mode<synchronous>, transform_indices = @transform_2, window_bounds = array<i64: 1, 256>}, {pipeline_mode = #tpu.pipeline_mode<synchronous>, transform_indices = @transform_3, window_bounds = array<i64: 1, 256>}, {pipeline_mode = #tpu.pipeline_mode<synchronous>, transform_indices = @transform_4, window_bounds = array<i64: 256, 2048>}, {pipeline_mode = #tpu.pipeline_mode<synchronous>, transform_indices = @transform_5, window_bounds = array<i64: 1, 2048>}, {}, {pipeline_mode = #tpu.pipeline_mode<synchronous>, transform_indices = @transform_7, window_bounds = array<i64: 1, 256>}, {pipeline_mode = #tpu.pipeline_mode<synchronous>, transform_indices = @transform_8, window_bounds = array<i64: 256, 128>}, {pipeline_mode = #tpu.pipeline_mode<synchronous>, transform_indices = @transform_9, window_bounds = array<i64: 1, 128>}, {transform_indices = @transform_10, window_bounds = array<i64: 1, 1, 256>}, {transform_indices = @transform_11, window_bounds = array<i64: 1, 1, 128>}, {transform_indices = @transform_12, window_bounds = array<i64: 1, 1, 128>}]} {
    %c0_i32 = arith.constant 0 : i32
    %0 = arith.cmpi eq, %arg0, %c0_i32 : i32
    %1 = arith.extui %0 : i1 to i32
    %c0_i32_0 = arith.constant 0 : i32
    %2 = arith.cmpi ne, %1, %c0_i32_0 : i32
    scf.if %2 {
      tpu.enqueue_dma source(%arg7 : memref<2048x256xi8, #tpu.memory_space<any>>) target(%arg16 : memref<2048x256xi8, #tpu.memory_space<vmem>>) target_semaphore(%arg17 : memref<!tpu.dma_semaphore, #tpu.memory_space<semaphore_mem>>)
      %c0_41 = arith.constant 0 : index
      %c0_42 = arith.constant 0 : index
      %66 = vector.load %arg5[%c0_41, %c0_42] : memref<256x2048xi8, #tpu.memory_space<vmem>>, vector<256x2048xi8>
      %67 = arith.sitofp %66 : vector<256x2048xi8> to vector<256x2048xf32>
      %c0_43 = arith.constant 0 : index
      %c0_44 = arith.constant 0 : index
      %68 = vector.load %arg6[%c0_43, %c0_44] : memref<1x2048xf32, #tpu.memory_space<vmem>>, vector<1x2048xf32>
      %69 = vector.broadcast %68 : vector<1x2048xf32> to vector<256x2048xf32>
      %70 = arith.mulf %67, %69 : vector<256x2048xf32>
      %71 = arith.truncf %70 : vector<256x2048xf32> to vector<256x2048xbf16>
      %c0_45 = arith.constant 0 : index
      %c0_46 = arith.constant 0 : index
      %72 = vector.load %arg14[%c0_45, %c0_46] : memref<256x2048xbf16, #tpu.memory_space<vmem>>, vector<256x2048xbf16>
      tpu.vector_store %arg14[%c0_45, %c0_46], %71 {strides = array<i32>} : memref<256x2048xbf16, #tpu.memory_space<vmem>>, vector<256x2048xbf16>,
    } else {
    }
    %c0 = arith.constant 0 : index
    %c0_1 = arith.constant 0 : index
    %c0_2 = arith.constant 0 : index
    %3 = vector.load %arg1[%c0, %c0_1, %c0_2] : memref<1x1x256xf32, #tpu.memory_space<vmem>>, vector<1x1x256xf32>
    %4 = vector.shape_cast %3 : vector<1x1x256xf32> to vector<1x256xf32>
    %c0_3 = arith.constant 0 : index
    %c0_4 = arith.constant 0 : index
    %5 = vector.load %arg2[%c0_3, %c0_4] : memref<8x256xf32, #tpu.memory_space<vmem>>, vector<8x256xf32>
    %cst = arith.constant dense<0.000000e+00> : vector<1xf32>
    %6 = vector.multi_reduction <add>, %4, %cst [1] : vector<1x256xf32> to vector<1xf32>
    %7 = vector.shape_cast %6 : vector<1xf32> to vector<1x1xf32>
    %cst_5 = arith.constant 2.560000e+02 : f32
    %8 = vector.broadcast %cst_5 : f32 to vector<1x1xf32>
    %9 = arith.divf %7, %8 : vector<1x1xf32>
    %10 = vector.broadcast %9 : vector<1x1xf32> to vector<1x256xf32>
    %11 = arith.subf %4, %10 : vector<1x256xf32>
    %12 = arith.mulf %11, %11 : vector<1x256xf32>
    %cst_6 = arith.constant dense<0.000000e+00> : vector<1xf32>
    %13 = vector.multi_reduction <add>, %12, %cst_6 [1] : vector<1x256xf32> to vector<1xf32>
    %14 = vector.shape_cast %13 : vector<1xf32> to vector<1x1xf32>
    %cst_7 = arith.constant 2.560000e+02 : f32
    %15 = vector.broadcast %cst_7 : f32 to vector<1x1xf32>
    %16 = arith.divf %14, %15 : vector<1x1xf32>
    %cst_8 = arith.constant 9.99999974E-6 : f32
    %17 = vector.broadcast %cst_8 : f32 to vector<1x1xf32>
    %18 = arith.addf %16, %17 : vector<1x1xf32>
    %19 = math.rsqrt %18 : vector<1x1xf32>
    %20 = vector.broadcast %19 : vector<1x1xf32> to vector<1x256xf32>
    %21 = arith.mulf %11, %20 : vector<1x256xf32>
    %c0_9 = arith.constant 0 : index
    %c0_10 = arith.constant 0 : index
    %22 = vector.load %arg3[%c0_9, %c0_10] : memref<1x256xf32, #tpu.memory_space<vmem>>, vector<1x256xf32>
    %23 = arith.mulf %21, %22 : vector<1x256xf32>
    %c0_11 = arith.constant 0 : index
    %c0_12 = arith.constant 0 : index
    %24 = vector.load %arg4[%c0_11, %c0_12] : memref<1x256xf32, #tpu.memory_space<vmem>>, vector<1x256xf32>
    %25 = arith.addf %23, %24 : vector<1x256xf32>
    %26 = arith.truncf %25 : vector<1x256xf32> to vector<1x256xbf16>
    %c0_13 = arith.constant 0 : index
    %c0_14 = arith.constant 0 : index
    %27 = vector.load %arg14[%c0_13, %c0_14] : memref<256x2048xbf16, #tpu.memory_space<vmem>>, vector<256x2048xbf16>
    %cst_15 = arith.constant dense<0.000000e+00> : vector<1x2048xf32>
    %28 = tpu.matmul %26, %27, %cst_15 {dimension_numbers = #tpu.dot_dimension_numbers<[1], [0], [0], [1], [0, 0, 1, 1], [], []>} : vector<1x256xbf16>, vector<256x2048xbf16>, vector<1x2048xf32> -> vector<1x2048xf32>
    %29 = vector.shape_cast %28 : vector<1x2048xf32> to vector<8x256xf32>
    %cst_16 = arith.constant dense<0.000000e+00> : vector<8x8xf32>
    %30 = tpu.matmul %5, %29, %cst_16 {dimension_numbers = #tpu.dot_dimension_numbers<[1], [1], [0], [0], [0, 0, 1, 0], [], []>} : vector<8x256xf32>, vector<8x256xf32>, vector<8x8xf32> -> vector<8x8xf32>
    %cst_17 = arith.constant dense<0xFF800000> : vector<8xf32>
    %31 = vector.multi_reduction <maximumf>, %30, %cst_17 [1] : vector<8x8xf32> to vector<8xf32>
    %32 = vector.shape_cast %31 : vector<8xf32> to vector<8x1xf32>
    %33 = vector.broadcast %32 : vector<8x1xf32> to vector<8x8xf32>
    %34 = arith.subf %30, %33 : vector<8x8xf32>
    %35 = math.exp %34 : vector<8x8xf32>
    %cst_18 = arith.constant dense<0.000000e+00> : vector<8xf32>
    %36 = vector.multi_reduction <add>, %35, %cst_18 [1] : vector<8x8xf32> to vector<8xf32>
    %37 = vector.shape_cast %36 : vector<8xf32> to vector<8x1xf32>
    %38 = tpu.reciprocal %37 {approx = true} : vector<8x1xf32> -> vector<8x1xf32>
    %39 = vector.broadcast %38 : vector<8x1xf32> to vector<8x8xf32>
    %40 = arith.mulf %35, %39 : vector<8x8xf32>
    %cst_19 = arith.constant 1.000000e+00 : f32
    %41 = vector.broadcast %cst_19 : f32 to vector<1x8xf32>
    %cst_20 = arith.constant dense<0.000000e+00> : vector<1x8xf32>
    %42 = tpu.matmul %41, %40, %cst_20 {dimension_numbers = #tpu.dot_dimension_numbers<[1], [1], [0], [0], [0, 0, 1, 0], [], []>} : vector<1x8xf32>, vector<8x8xf32>, vector<1x8xf32> -> vector<1x8xf32>
    %cst_21 = arith.constant 0.000000e+00 : f32
    %43 = vector.broadcast %cst_21 : f32 to vector<1x120xf32>
    %44 = tpu.concatenate %42, %43 in 1 : vector<1x8xf32>, vector<1x120xf32> -> vector<1x128xf32>
    %cst_22 = arith.constant dense<0.000000e+00> : vector<8x256xf32>
    %45 = tpu.matmul %40, %5, %cst_22 {dimension_numbers = #tpu.dot_dimension_numbers<[0], [0], [1], [1], [0, 1, 1, 1], [], []>} : vector<8x8xf32>, vector<8x256xf32>, vector<8x256xf32> -> vector<8x256xf32>
    %46 = vector.shape_cast %45 : vector<8x256xf32> to vector<1x2048xf32>
    %47 = arith.extui %0 : i1 to i32
    %c0_i32_23 = arith.constant 0 : i32
    %48 = arith.cmpi ne, %47, %c0_i32_23 : i32
    scf.if %48 {
      tpu.wait_dma2 semaphore(%arg17 : memref<!tpu.dma_semaphore, #tpu.memory_space<semaphore_mem>>) src(%arg7 : memref<2048x256xi8, #tpu.memory_space<any>>) dst(%arg16 : memref<2048x256xi8, #tpu.memory_space<vmem>>)
      %c0_41 = arith.constant 0 : index
      %c0_42 = arith.constant 0 : index
      %66 = vector.load %arg16[%c0_41, %c0_42] : memref<2048x256xi8, #tpu.memory_space<vmem>>, vector<2048x256xi8>
      %67 = arith.sitofp %66 : vector<2048x256xi8> to vector<2048x256xf32>
      %c0_43 = arith.constant 0 : index
      %c0_44 = arith.constant 0 : index
      %68 = vector.load %arg8[%c0_43, %c0_44] : memref<1x256xf32, #tpu.memory_space<vmem>>, vector<1x256xf32>
      %69 = vector.broadcast %68 : vector<1x256xf32> to vector<2048x256xf32>
      %70 = arith.mulf %67, %69 : vector<2048x256xf32>
      %71 = arith.truncf %70 : vector<2048x256xf32> to vector<2048x256xbf16>
      %c0_45 = arith.constant 0 : index
      %c0_46 = arith.constant 0 : index
      %72 = vector.load %arg15[%c0_45, %c0_46] : memref<2048x256xbf16, #tpu.memory_space<vmem>>, vector<2048x256xbf16>
      tpu.vector_store %arg15[%c0_45, %c0_46], %71 {strides = array<i32>} : memref<2048x256xbf16, #tpu.memory_space<vmem>>, vector<2048x256xbf16>,
    } else {
    }
    %49 = arith.truncf %46 : vector<1x2048xf32> to vector<1x2048xbf16>
    %c0_24 = arith.constant 0 : index
    %c0_25 = arith.constant 0 : index
    %50 = vector.load %arg15[%c0_24, %c0_25] : memref<2048x256xbf16, #tpu.memory_space<vmem>>, vector<2048x256xbf16>
    %cst_26 = arith.constant dense<0.000000e+00> : vector<1x256xf32>
    %51 = tpu.matmul %49, %50, %cst_26 {dimension_numbers = #tpu.dot_dimension_numbers<[1], [0], [0], [1], [0, 0, 1, 1], [], []>} : vector<1x2048xbf16>, vector<2048x256xbf16>, vector<1x256xf32> -> vector<1x256xf32>
    %52 = arith.addf %51, %4 : vector<1x256xf32>
    %c0_27 = arith.constant 0 : index
    %c0_28 = arith.constant 0 : index
    %c0_29 = arith.constant 0 : index
    %53 = vector.load %arg11[%c0_27, %c0_28, %c0_29] : memref<1x1x256xf32, #tpu.memory_space<vmem>>, vector<1x1x256xf32>
    %54 = vector.shape_cast %53 : vector<1x1x256xf32> to vector<1x256xf32>
    %55 = vector.shape_cast %52 : vector<1x256xf32> to vector<1x1x256xf32>
    tpu.vector_store %arg11[%c0_27, %c0_28, %c0_29], %55 {strides = array<i32>} : memref<1x1x256xf32, #tpu.memory_space<vmem>>, vector<1x1x256xf32>,
    %c0_30 = arith.constant 0 : index
    %c0_31 = arith.constant 0 : index
    %56 = vector.load %arg9[%c0_30, %c0_31] : memref<256x128xf32, #tpu.memory_space<vmem>>, vector<256x128xf32>
    %cst_32 = arith.constant dense<0.000000e+00> : vector<1x128xf32>
    %57 = tpu.matmul %52, %56, %cst_32 {dimension_numbers = #tpu.dot_dimension_numbers<[1], [0], [0], [1], [0, 0, 1, 1], [], []>} : vector<1x256xf32>, vector<256x128xf32>, vector<1x128xf32> -> vector<1x128xf32>
    %c0_33 = arith.constant 0 : index
    %c0_34 = arith.constant 0 : index
    %58 = vector.load %arg10[%c0_33, %c0_34] : memref<1x128xf32, #tpu.memory_space<vmem>>, vector<1x128xf32>
    %59 = arith.addf %57, %58 : vector<1x128xf32>
    %c0_35 = arith.constant 0 : index
    %c0_36 = arith.constant 0 : index
    %c0_37 = arith.constant 0 : index
    %60 = vector.load %arg13[%c0_35, %c0_36, %c0_37] : memref<1x1x128xf32, #tpu.memory_space<vmem>>, vector<1x1x128xf32>
    %61 = vector.shape_cast %60 : vector<1x1x128xf32> to vector<1x128xf32>
    %62 = vector.shape_cast %59 : vector<1x128xf32> to vector<1x1x128xf32>
    tpu.vector_store %arg13[%c0_35, %c0_36, %c0_37], %62 {strides = array<i32>} : memref<1x1x128xf32, #tpu.memory_space<vmem>>, vector<1x1x128xf32>,
    %c0_38 = arith.constant 0 : index
    %c0_39 = arith.constant 0 : index
    %c0_40 = arith.constant 0 : index
    %63 = vector.load %arg12[%c0_38, %c0_39, %c0_40] : memref<1x1x128xf32, #tpu.memory_space<vmem>>, vector<1x1x128xf32>
    %64 = vector.shape_cast %63 : vector<1x1x128xf32> to vector<1x128xf32>
    %65 = vector.shape_cast %44 : vector<1x128xf32> to vector<1x1x128xf32>
    tpu.vector_store %arg12[%c0_38, %c0_39, %c0_40], %65 {strides = array<i32>} : memref<1x1x128xf32, #tpu.memory_space<vmem>>, vector<1x1x128xf32>,
    return
  }
  func.func @transform_0(%arg0: i32) -> (i32, i32, i32) {
    %c0_i32 = arith.constant 0 : i32
    %c0_i32_0 = arith.constant 0 : i32
    %c0_i32_1 = arith.constant 0 : i32
    return %arg0, %c0_i32, %c0_i32_0 : i32, i32, i32
  }
  func.func @transform_1(%arg0: i32) -> (i32, i32) {
    %c0_i32 = arith.constant 0 : i32
    %c0_i32_0 = arith.constant 0 : i32
    %c0_i32_1 = arith.constant 0 : i32
    return %c0_i32, %c0_i32_0 : i32, i32
  }
  func.func @transform_2(%arg0: i32) -> (i32, i32) {
    %c0_i32 = arith.constant 0 : i32
    %c0_i32_0 = arith.constant 0 : i32
    %c0_i32_1 = arith.constant 0 : i32
    return %c0_i32, %c0_i32_0 : i32, i32
  }
  func.func @transform_3(%arg0: i32) -> (i32, i32) {
    %c0_i32 = arith.constant 0 : i32
    %c0_i32_0 = arith.constant 0 : i32
    %c0_i32_1 = arith.constant 0 : i32
    return %c0_i32, %c0_i32_0 : i32, i32
  }
  func.func @transform_4(%arg0: i32) -> (i32, i32) {
    %c0_i32 = arith.constant 0 : i32
    %c0_i32_0 = arith.constant 0 : i32
    %c0_i32_1 = arith.constant 0 : i32
    return %c0_i32, %c0_i32_0 : i32, i32
  }
  func.func @transform_5(%arg0: i32) -> (i32, i32) {
    %c0_i32 = arith.constant 0 : i32
    %c0_i32_0 = arith.constant 0 : i32
    %c0_i32_1 = arith.constant 0 : i32
    return %c0_i32, %c0_i32_0 : i32, i32
  }
  func.func @transform_7(%arg0: i32) -> (i32, i32) {
    %c0_i32 = arith.constant 0 : i32
    %c0_i32_0 = arith.constant 0 : i32
    %c0_i32_1 = arith.constant 0 : i32
    return %c0_i32, %c0_i32_0 : i32, i32
  }
  func.func @transform_8(%arg0: i32) -> (i32, i32) {
    %c0_i32 = arith.constant 0 : i32
    %c0_i32_0 = arith.constant 0 : i32
    %c0_i32_1 = arith.constant 0 : i32
    return %c0_i32, %c0_i32_0 : i32, i32
  }
  func.func @transform_9(%arg0: i32) -> (i32, i32) {
    %c0_i32 = arith.constant 0 : i32
    %c0_i32_0 = arith.constant 0 : i32
    %c0_i32_1 = arith.constant 0 : i32
    return %c0_i32, %c0_i32_0 : i32, i32
  }
  func.func @transform_10(%arg0: i32) -> (i32, i32, i32) {
    %c0_i32 = arith.constant 0 : i32
    %c0_i32_0 = arith.constant 0 : i32
    %c0_i32_1 = arith.constant 0 : i32
    return %arg0, %c0_i32, %c0_i32_0 : i32, i32, i32
  }
  func.func @transform_11(%arg0: i32) -> (i32, i32, i32) {
    %c0_i32 = arith.constant 0 : i32
    %c0_i32_0 = arith.constant 0 : i32
    %c0_i32_1 = arith.constant 0 : i32
    return %arg0, %c0_i32, %c0_i32_0 : i32, i32, i32
  }
  func.func @transform_12(%arg0: i32) -> (i32, i32, i32) {
    %c0_i32 = arith.constant 0 : i32
    %c0_i32_0 = arith.constant 0 : i32
    %c0_i32_1 = arith.constant 0 : i32
    return %arg0, %c0_i32, %c0_i32_0 : i32, i32, i32
  }
}

</mosaic_0001>

<bundles_post_ra>
// kernel: _forward_device.1
= control target key start
LH: loop header
LB: loop body
LE: loop exit
PB: predicated region body
PF: predicated region fallthrough
CT: control target
= control target key end

     0   :  { %18 = vsyncpa [#allocation7], 0  ;;  %s16907_s0 = inlined_call_operand.vmem [shape: f32[1,1,256], index: 0, kind: input, shape index: {}]   ;;  %s16908_s1 = inlined_call_operand.vmem [shape: f32[8,256], index: 1, kind: input, shape index: {}]   ;;  %s16909_s2 = inlined_call_operand.hbm [shape: f32[1,256], index: 2, kind: input, shape index: {}]   ;;  %s16910_s3 = inlined_call_operand.hbm [shape: f32[1,256], index: 3, kind: input, shape index: {}]   ;;  %s16911_s4 = inlined_call_operand.hbm [shape: s8[256,2048], index: 4, kind: input, shape index: {}]   ;;  %s16912_s5 = inlined_call_operand.hbm [shape: f32[1,2048], index: 5, kind: input, shape index: {}]   ;;  %s16913_s6 = inlined_call_operand.hbm [shape: s8[2048,256], index: 6, kind: input, shape index: {}]   ;;  %s16914_s7 = inlined_call_operand.hbm [shape: f32[1,256], index: 7, kind: input, shape index: {}]   ;;  %s16915_s8 = inlined_call_operand.hbm [shape: f32[256,128], index: 8, kind: input, shape index: {}]   ;;  %s16916_s9 = inlined_call_operand.hbm [shape: f32[1,128], index: 9, kind: input, shape index: {}]   ;;  %s16917_s10 = inlined_call_operand.hbm [shape: f32[1,1,256], index: 10, kind: output, shape index: {0}]   ;;  %s16918_s11 = inlined_call_operand.vmem [shape: f32[1,1,128], index: 11, kind: output, shape index: {1}]   ;;  %s16919_s12 = inlined_call_operand.vmem [shape: f32[1,1,128], index: 12, kind: output, shape index: {2}]  }
   0x1   :  { %19 = vsyncpa [#allocation10], 0 }
   0x2   :  { %20 = vsyncpa [#allocation13], 0 }
   0x3   :  { %21 = vsyncpa [#allocation16], 0 }
   0x4   :  { %22 = vsyncpa [#allocation8], 0  ;;  %s13941_s21 = smov [#allocation9]   ;;  %s13942_s23 = smov [#allocation12]  }
   0x5   :  { %s43_s22 = sshll.u32 %s13941_s21, 4  ;;  %s65_s24 = sshll.u32 %s13942_s23, 4  ;;  %s44_s22 = int_to_ptr.vmem [resolvable:$true] %s43_s22  ;;  %s66_s24 = int_to_ptr.vmem [resolvable:$true] %s65_s24 }
   0x6   :  { %s13757_s25 = scalar_lea.vmem %s44_s22, 32  ;;  %p13762_p1 = scmp.lt.s32.totalorder %s44_s22, %s44_s22 }
   0x7   :  { %p13758_p0 = scmp.ne.s32.totalorder %s44_s22, %s13757_s25  ;;  %p13763_p2 = scmp.lt.s32.totalorder %s13757_s25, %s13757_s25 }
   0x9   :  { %p13764_p3 = por %p13763_p2, %p13762_p1 }
   0xb   :  { %p13765_p4 = pnand %p13764_p3, %p13758_p0 }
   0xd   :  { %13768 = shalt.err (!%p13765_p4)
}
   0xe   :  { %46 = dma.hbm_to_vmem [thread:$0]  %s16910_s3, 32, %s44_s22, [#allocation10]  }
   0xf   :  { %s13777_s28 = scalar_lea.vmem %s66_s24, 256  ;;  %p13782_p6 = scmp.lt.s32.totalorder %s66_s24, %s66_s24 }
  0x10   :  { %p13778_p5 = scmp.ne.s32.totalorder %s66_s24, %s13777_s28  ;;  %p13783_p7 = scmp.lt.s32.totalorder %s13777_s28, %s13777_s28 }
  0x12   :  { %p13784_p8 = por %p13783_p7, %p13782_p6 }
  0x14   :  { %p13785_p9 = pnand %p13784_p8, %p13778_p5 }
  0x16   :  { %13788 = shalt.err (!%p13785_p9)
}
  0x17   :  { %68 = dma.hbm_to_vmem [thread:$0]  %s16912_s5, 256, %s66_s24, [#allocation13]  }
  0x18   :  { %s13943_s13 = smov [#allocation15]  }
  0x19   :  { %s84_s14 = sshll.u32 %s13943_s13, 4  ;;  %s85_s14 = int_to_ptr.vmem [resolvable:$true] %s84_s14 }
  0x1a   :  { %s13797_s15 = scalar_lea.vmem %s85_s14, 4096  ;;  %p13802_p11 = scmp.lt.s32.totalorder %s85_s14, %s85_s14 }
  0x1b   :  { %p13798_p10 = scmp.ne.s32.totalorder %s85_s14, %s13797_s15  ;;  %p13803_p12 = scmp.lt.s32.totalorder %s13797_s15, %s13797_s15 }
  0x1d   :  { %p13804_p13 = por %p13803_p12, %p13802_p11 }
  0x1f   :  { %p13805_p0 = pnand %p13804_p13, %p13798_p10 }
  0x21   :  { %13808 = shalt.err (!%p13805_p0)
}
  0x22   :  { %s13944_s3 = smov 128   ;;  %s13945_s16 = smov 8  }
  0x23   :  { %90 = dma.hbm_to_vmem [thread:$0]  %s16915_s8, 4096, %s85_s14, [#allocation16], %s13944_s3, %s13944_s3, %s13945_s16  }
  0x24   :  { %s13946_s19 = smov [#allocation6]   ;;  %s13947_s5 = smov [#allocation11]  }
  0x25   :  { %s33_s20 = sshll.u32 %s13946_s19, 4  ;;  %s52_s21 = sshll.u32 %s13947_s5, 4  ;;  %s34_s20 = int_to_ptr.vmem [resolvable:$true] %s33_s20  ;;  %s53_s21 = int_to_ptr.vmem [resolvable:$true] %s52_s21 }
  0x26   :  { %s13817_s22 = scalar_lea.vmem %s34_s20, 32  ;;  %p13822_p2 = scmp.lt.s32.totalorder %s34_s20, %s34_s20 }
  0x27   :  { %p13818_p1 = scmp.ne.s32.totalorder %s34_s20, %s13817_s22  ;;  %p13823_p3 = scmp.lt.s32.totalorder %s13817_s22, %s13817_s22 }
  0x29   :  { %p13824_p4 = por %p13823_p3, %p13822_p2 }
  0x2b   :  { %p13825_p5 = pnand %p13824_p4, %p13818_p1 }
  0x2d   :  { %13828 = shalt.err (!%p13825_p5)
}
  0x2e   :  { %36 = dma.hbm_to_vmem [thread:$0]  %s16909_s2, 32, %s34_s20, [#allocation7]  }
  0x2f   :  { %s13837_s25 = scalar_lea.vmem %s53_s21, 16384  ;;  %p13842_p7 = scmp.lt.s32.totalorder %s53_s21, %s53_s21 }
  0x30   :  { %p13838_p6 = scmp.ne.s32.totalorder %s53_s21, %s13837_s25  ;;  %p13843_p8 = scmp.lt.s32.totalorder %s13837_s25, %s13837_s25 }
  0x32   :  { %p13844_p9 = por %p13843_p8, %p13842_p7 }
  0x34   :  { %p13845_p10 = pnand %p13844_p9, %p13838_p6 }
  0x36   :  { %13848 = shalt.err (!%p13845_p10)
}
  0x37   :  { %s13948_s8 = smov 2048   ;;  %s13949_s28 = smov [#allocation14]  }
  0x38   :  { %58 = dma.hbm_to_vmem [thread:$0]  %s16911_s4, 16384, %s53_s21, [#allocation10], %s13948_s8, %s13948_s8, %s13944_s3  }
  0x39   :  { %s75_s29 = sshll.u32 %s13949_s28, 4  ;;  %s13950_s30 = smov [#allocation17]   ;;  %s76_s29 = int_to_ptr.vmem [resolvable:$true] %s75_s29 }
  0x3a   :  { %s97_s13 = sshll.u32 %s13950_s30, 4  ;;  %s13857_s2 = scalar_lea.vmem %s76_s29, 32  ;;  %s98_s13 = int_to_ptr.vmem [resolvable:$true] %s97_s13 }
  0x3b   :  { %p13858_p11 = scmp.ne.s32.totalorder %s76_s29, %s13857_s2  ;;  %p13862_p12 = scmp.lt.s32.totalorder %s76_s29, %s76_s29 }
  0x3c   :  { %p13863_p13 = scmp.lt.s32.totalorder %s13857_s2, %s13857_s2 }
  0x3e   :  { %p13864_p0 = por %p13863_p13, %p13862_p12 }
  0x40   :  { %p13865_p1 = pnand %p13864_p0, %p13858_p11 }
  0x42   :  { %13868 = shalt.err (!%p13865_p1)
}
  0x43   :  { %78 = dma.hbm_to_vmem [thread:$0]  %s16914_s7, 32, %s76_s29, [#allocation13]  }
  0x44   :  { %s13877_s16 = scalar_lea.vmem %s98_s13, 16  ;;  %s13881_s4 = scalar_lea.vmem %s98_s13, 32 }
  0x45   :  { %p13878_p2 = scmp.ne.s32.totalorder %s98_s13, %s13877_s16  ;;  %p13882_p3 = scmp.lt.s32.totalorder %s98_s13, %s98_s13 }
  0x46   :  { %p13883_p4 = scmp.lt.s32.totalorder %s13881_s4, %s13877_s16 }
  0x48   :  { %p13884_p5 = por %p13883_p4, %p13882_p3 }
  0x4a   :  { %p13885_p6 = pnand %p13884_p5, %p13878_p2 }
  0x4c   :  { %13888 = shalt.err (!%p13885_p6)
}
  0x4d   :  { %100 = dma.hbm_to_vmem [thread:$0]  %s16916_s9, 16, %s98_s13, [#allocation16]  }
  0x4e   :  { %13929 = dma.done.wait [#allocation7], 32  }
  0x4f   :  { %13930 = vsyncadd [#allocation7], 4294967264 }
  0x50   :  { %13931 = dma.done.wait [#allocation10], 16416  }
  0x51   :  { %13932 = vsyncadd [#allocation10], 4294950880 }
  0x52   :  { %13933 = dma.done.wait [#allocation13], 288  }
  0x53   :  { %13934 = vsyncadd [#allocation13], 4294967008 }
  0x54   :  { %13935 = dma.done.wait [#allocation16], 4112  }
  0x55   :  { %13936 = vsyncadd [#allocation16], 4294963184  ;;  %v16920_v0 = vlaneseq  ;;  %v14056_v4 = vld [vmem:[%s16907_s0] sm:$0x3]  ;;  %vm3691_vm0 = vcmask 1040384   ;;  %v14082_v14 = vld [vmem:[#allocation12 + $0x8] sm:$0xff] }
  0x56   :  { %v14106_v21 = vld [vmem:[#allocation12] sm:$0xff]  ;;  %v186_v26 = vld [vmem:[#allocation11 + $0x188] sm:$0xff]  ;;  %v188_v27 = vld [vmem:[#allocation11 + $0x198] sm:$0xff]  ;;  %vm5820_vm1 = vcmask 64512   ;;  %vm13953_vm2 = vmmov 0  }
  0x57   :  { %v14045_v1 = vshrl.u32 %v16920_v0, 7  ;;  %v185_v28 = vld [vmem:[#allocation11 + $0x180] sm:$0xff]  ;;  %v490_v29 = vunpack.c.2.s8 %v186_v26  ;;  %v506_v30 = vunpack.c.3.s8 %v186_v26  ;;  %v492_v31 = vunpack.c.2.s8 %v188_v27  ;;  %v187_v33 = vld [vmem:[#allocation11 + $0x190] sm:$0xff] }
  0x58   :  { %v508_v32 = vunpack.c.3.s8 %v188_v27  ;;  %v489_v34 = vunpack.c.2.s8 %v185_v28  ;;  %v505_v35 = vunpack.c.3.s8 %v185_v28  ;;  %v491_v36 = vunpack.c.2.s8 %v187_v33 }
  0x59   :  { %17072 = vst [vmem:[#allocation29_spill] sm:$0xff] %v14045_v1  ;;  %v14048_v2 = vsub.s32 0, %v14045_v1  ;;  %v14051_v3 = vsub.s32 1, %v14045_v1  ;;  %v14067_v7 = vsub.s32 4, %v14045_v1  ;;  %v14070_v8 = vsub.s32 5, %v14045_v1 }
  0x5a   :  { %v14073_v9 = vsub.s32 6, %v14045_v1  ;;  %v14080_v12 = vsub.s32 7, %v14045_v1  ;;  %v14101_v19 = vsub.s32 2, %v14045_v1  ;;  %v14104_v20 = vsub.s32 3, %v14045_v1 }
  0x5b   :  { %17073 = vst [vmem:[#allocation30_spill] sm:$0xff] %v14048_v2  ;;  %17074 = vst [vmem:[#allocation31_spill] sm:$0xff] %v14051_v3  ;;  %v14060_v5 = vrot.slane %v14056_v4, %v14048_v2  ;;  %v14064_v6 = vrot.slane %v14056_v4, %v14051_v3  ;;  %v14086_v15 = vrot.slane %v14082_v14, %v14067_v7  ;;  %v507_v37 = vunpack.c.3.s8 %v187_v33 }
  0x5c   :  { %17077 = vst [vmem:[#allocation34_spill] sm:$0xff] %v14067_v7  ;;  %17078 = vst [vmem:[#allocation35_spill] sm:$0xff] %v14070_v8  ;;  %v14090_v16 = vrot.slane %v14082_v14, %v14070_v8  ;;  %v14094_v17 = vrot.slane %v14082_v14, %v14073_v9  ;;  %v14098_v18 = vrot.slane %v14082_v14, %v14080_v12  ;;  %v1002_v38 = vcvt.s32.f32 %v490_v29 }
  0x5d   :  { %17075 = vst [vmem:[#allocation32_spill] sm:$0xff] %v14060_v5  ;;  %17076 = vst [vmem:[#allocation33_spill] sm:$0xff] %v14064_v6  ;;  %v3692_v10 = vsel %vm3691_vm0, %v14060_v5, 0.0  ;;  %v3693_v11 = vsel %vm3691_vm0, %v14064_v6, 0.0  ;;  %v14110_v22 = vrot.slane %v14106_v21, %v14048_v2  ;;  %v14114_v23 = vrot.slane %v14106_v21, %v14051_v3 }
  0x5e   :  { %17079 = vst [vmem:[#allocation36_spill] sm:$0xff] %v14073_v9  ;;  %17080 = vst [vmem:[#allocation37_spill] sm:$0xff] %v14080_v12  ;;  %v3694_v13 = vadd.f32 %v3693_v11, %v3692_v10  ;;  %v14118_v24 = vrot.slane %v14106_v21, %v14101_v19  ;;  %v14122_v25 = vrot.slane %v14106_v21, %v14104_v20  ;;  %v1018_v39 = vcvt.s32.f32 %v506_v30 }
  0x5f   :  { %17081 = vst [vmem:[#allocation38_spill] sm:$0xff] %v14086_v15  ;;  %17082 = vst [vmem:[#allocation39_spill] sm:$0xff] %v14090_v16  ;;  %v1004_v40 = vcvt.s32.f32 %v492_v31  ;;  %v1020_v41 = vcvt.s32.f32 %v508_v32  ;;  %v1001_v42 = vcvt.s32.f32 %v489_v34  ;;  %v1017_v43 = vcvt.s32.f32 %v505_v35  ;;  %v170_v32 = vld [vmem:[#allocation11 + $0x108] sm:$0xff] }
  0x60   :  { %17083 = vst [vmem:[#allocation40_spill] sm:$0xff] %v14094_v17  ;;  %3695 = vadd.xlane.f32.xlu0 %v3694_v13  ;;  %17084 = vst [vmem:[#allocation41_spill] sm:$0xff] %v14098_v18  ;;  %v1003_v44 = vcvt.s32.f32 %v491_v36  ;;  %v1019_v45 = vcvt.s32.f32 %v507_v37  ;;  %v1598_v46 = vmul.f32 %v14114_v23, %v1002_v38  ;;  %v1614_v47 = vmul.f32 %v14114_v23, %v1018_v39 }
  0x61   :  { %17085 = vst [vmem:[#allocation42_spill] sm:$0xff] %v14101_v19  ;;  %17086 = vst [vmem:[#allocation43_spill] sm:$0xff] %v14104_v20  ;;  %v1600_v48 = vmul.f32 %v14122_v25, %v1004_v40  ;;  %v1616_v49 = vmul.f32 %v14122_v25, %v1020_v41  ;;  %v1597_v50 = vmul.f32 %v14110_v22, %v1001_v42  ;;  %v458_v56 = vunpack.c.0.s8 %v186_v26 }
  0x62   :  { %v1613_v51 = vmul.f32 %v14110_v22, %v1017_v43  ;;  %v1599_v52 = vmul.f32 %v14118_v24, %v1003_v44  ;;  %v1615_v53 = vmul.f32 %v14118_v24, %v1019_v45  ;;  %v13285_v54 = vpack.c.bf16 %v1614_v47, %v1598_v46  ;;  %v169_v43 = vld [vmem:[#allocation11 + $0x100] sm:$0xff] }
  0x63   :  { %v13287_v55 = vpack.c.bf16 %v1616_v49, %v1600_v48  ;;  %v474_v57 = vunpack.c.1.s8 %v186_v26  ;;  %v460_v60 = vunpack.c.0.s8 %v188_v27  ;;  %v476_v61 = vunpack.c.1.s8 %v188_v27  ;;  %v171_v48 = vld [vmem:[#allocation11 + $0x110] sm:$0xff] }
  0x64   :  { %v13284_v58 = vpack.c.bf16 %v1613_v51, %v1597_v50  ;;  %v13286_v59 = vpack.c.bf16 %v1615_v53, %v1599_v52  ;;  %5286 = vmatprep.subr.bf16.mxu0 %v13285_v54  ;;  %v970_v62 = vcvt.s32.f32 %v458_v56  ;;  %v457_v10 = vunpack.c.0.s8 %v185_v28 }
  0x65   :  { %5327 = vmatprep.subr.bf16.mxu1 %v13287_v55  ;;  %v986_v63 = vcvt.s32.f32 %v474_v57  ;;  %v473_v11 = vunpack.c.1.s8 %v185_v28  ;;  %v972_v13 = vcvt.s32.f32 %v460_v60  ;;  %v988_v29 = vcvt.s32.f32 %v476_v61  ;;  %v172_v28 = vld [vmem:[#allocation11 + $0x118] sm:$0xff] }
  0x66   :  { %5287 = vmatpush1.bf16.msra.mxu0 %v13284_v58  ;;  %5328 = vmatpush1.bf16.msra.mxu1 %v13286_v59  ;;  %v459_v30 = vunpack.c.0.s8 %v187_v33  ;;  %v475_v31 = vunpack.c.1.s8 %v187_v33  ;;  %v1566_v34 = vmul.f32 %v14114_v23, %v970_v62  ;;  %v969_v35 = vcvt.s32.f32 %v457_v10 }
  0x67   :  { %v1582_v26 = vmul.f32 %v14114_v23, %v986_v63  ;;  %v985_v36 = vcvt.s32.f32 %v473_v11  ;;  %v1568_v27 = vmul.f32 %v14122_v25, %v972_v13  ;;  %v1584_v37 = vmul.f32 %v14122_v25, %v988_v29 }
  0x68   :  { %v971_v38 = vcvt.s32.f32 %v459_v30  ;;  %v987_v39 = vcvt.s32.f32 %v475_v31  ;;  %v1565_v41 = vmul.f32 %v14110_v22, %v969_v35  ;;  %v426_v33 = vunpack.c.2.s8 %v170_v32 }
  0x69   :  { %v13269_v40 = vpack.c.bf16 %v1582_v26, %v1566_v34  ;;  %v1581_v42 = vmul.f32 %v14110_v22, %v985_v36  ;;  %v13271_v44 = vpack.c.bf16 %v1584_v37, %v1568_v27  ;;  %v442_v47 = vunpack.c.3.s8 %v170_v32 }
  0x6a   :  { %v1567_v45 = vmul.f32 %v14118_v24, %v971_v38  ;;  %v1583_v46 = vmul.f32 %v14118_v24, %v987_v39  ;;  %v938_v50 = vcvt.s32.f32 %v426_v33  ;;  %v428_v51 = vunpack.c.2.s8 %v172_v28 }
  0x6b   :  { %5288 = vmatprep.subr.bf16.mxu0 %v13269_v40  ;;  %v13268_v49 = vpack.c.bf16 %v1581_v42, %v1565_v41  ;;  %v444_v52 = vunpack.c.3.s8 %v172_v28  ;;  %5329 = vmatprep.subr.bf16.mxu1 %v13271_v44  ;;  %v954_v54 = vcvt.s32.f32 %v442_v47  ;;  %v425_v55 = vunpack.c.2.s8 %v169_v43  ;;  %v14149_v47 = vld [vmem:[#allocation11 + $0x88] sm:$0xff] }
  0x6c   :  { %v13270_v53 = vpack.c.bf16 %v1583_v46, %v1567_v45  ;;  %v441_v56 = vunpack.c.3.s8 %v169_v43  ;;  %v1534_v57 = vmul.f32 %v14114_v23, %v938_v50  ;;  %v940_v58 = vcvt.s32.f32 %v428_v51 }
  0x6d   :  { %5289 = vmatpush1.bf16.msra.mxu0 %v13268_v49  ;;  %v956_v59 = vcvt.s32.f32 %v444_v52  ;;  %v427_v60 = vunpack.c.2.s8 %v171_v48  ;;  %v1550_v61 = vmul.f32 %v14114_v23, %v954_v54  ;;  %v937_v62 = vcvt.s32.f32 %v425_v55 }
  0x6e   :  { %5330 = vmatpush1.bf16.msra.mxu1 %v13270_v53  ;;  %v953_v63 = vcvt.s32.f32 %v441_v56  ;;  %v443_v10 = vunpack.c.3.s8 %v171_v48  ;;  %v1536_v11 = vmul.f32 %v14122_v25, %v940_v58  ;;  %v394_v30 = vunpack.c.0.s8 %v170_v32  ;;  %v156_v58 = vld [vmem:[#allocation11 + $0x98] sm:$0xff] }
  0x6f   :  { %v1552_v13 = vmul.f32 %v14122_v25, %v956_v59  ;;  %v939_v29 = vcvt.s32.f32 %v427_v60  ;;  %v13253_v31 = vpack.c.bf16 %v1550_v61, %v1534_v57  ;;  %v1533_v34 = vmul.f32 %v14110_v22, %v937_v62 }
  0x70   :  { %v1549_v26 = vmul.f32 %v14110_v22, %v953_v63  ;;  %v955_v35 = vcvt.s32.f32 %v443_v10  ;;  %v410_v37 = vunpack.c.1.s8 %v170_v32  ;;  %v906_v38 = vcvt.s32.f32 %v394_v30  ;;  %v153_v63 = vld [vmem:[#allocation11 + $0x80] sm:$0xff] }
  0x71   :  { %v13255_v36 = vpack.c.bf16 %v1552_v13, %v1536_v11  ;;  %v1535_v27 = vmul.f32 %v14118_v24, %v939_v29  ;;  %5290 = vmatprep.subr.bf16.mxu0 %v13253_v31  ;;  %v396_v41 = vunpack.c.0.s8 %v172_v28  ;;  %v412_v42 = vunpack.c.1.s8 %v172_v28  ;;  %v155_v29 = vld [vmem:[#allocation11 + $0x90] sm:$0xff] }
  0x72   :  { %v13252_v39 = vpack.c.bf16 %v1549_v26, %v1533_v34  ;;  %v1551_v40 = vmul.f32 %v14118_v24, %v955_v35  ;;  %v922_v33 = vcvt.s32.f32 %v410_v37  ;;  %v1502_v44 = vmul.f32 %v14114_v23, %v906_v38 }
  0x73   :  { %5331 = vmatprep.subr.bf16.mxu1 %v13255_v36  ;;  %v393_v45 = vunpack.c.0.s8 %v169_v43  ;;  %v409_v46 = vunpack.c.1.s8 %v169_v43  ;;  %v908_v50 = vcvt.s32.f32 %v396_v41  ;;  %v924_v51 = vcvt.s32.f32 %v412_v42 }
  0x74   :  { %5291 = vmatpush1.bf16.msra.mxu0 %v13252_v39  ;;  %v13254_v49 = vpack.c.bf16 %v1551_v40, %v1535_v27  ;;  %v395_v32 = vunpack.c.0.s8 %v171_v48  ;;  %v1518_v52 = vmul.f32 %v14114_v23, %v922_v33  ;;  %v411_v55 = vunpack.c.1.s8 %v171_v48 }
  0x75   :  { %v905_v53 = vcvt.s32.f32 %v393_v45  ;;  %v921_v54 = vcvt.s32.f32 %v409_v46  ;;  %v1504_v28 = vmul.f32 %v14122_v25, %v908_v50  ;;  %v1520_v56 = vmul.f32 %v14122_v25, %v924_v51 }
  0x76   :  { %5332 = vmatpush1.bf16.msra.mxu1 %v13254_v49  ;;  %v907_v57 = vcvt.s32.f32 %v395_v32  ;;  %v362_v43 = vunpack.c.2.s8 %v14149_v47  ;;  %v13237_v59 = vpack.c.bf16 %v1518_v52, %v1502_v44  ;;  %v923_v62 = vcvt.s32.f32 %v411_v55 }
  0x77   :  { %v1501_v60 = vmul.f32 %v14110_v22, %v905_v53  ;;  %v1517_v61 = vmul.f32 %v14110_v22, %v921_v54  ;;  %v13239_v10 = vpack.c.bf16 %v1520_v56, %v1504_v28  ;;  %v378_v48 = vunpack.c.3.s8 %v14149_v47 }
  0x78   :  { %v1503_v11 = vmul.f32 %v14118_v24, %v907_v57  ;;  %v874_v13 = vcvt.s32.f32 %v362_v43  ;;  %5292 = vmatprep.subr.bf16.mxu0 %v13237_v59  ;;  %v1519_v31 = vmul.f32 %v14118_v24, %v923_v62  ;;  %v364_v34 = vunpack.c.2.s8 %v156_v58 }
  0x79   :  { %v13236_v30 = vpack.c.bf16 %v1517_v61, %v1501_v60  ;;  %v380_v26 = vunpack.c.3.s8 %v156_v58  ;;  %5333 = vmatprep.subr.bf16.mxu1 %v13239_v10  ;;  %v890_v35 = vcvt.s32.f32 %v378_v48  ;;  %v361_v27 = vunpack.c.2.s8 %v153_v63 }
  0x7a   :  { %v1470_v36 = vmul.f32 %v14114_v23, %v874_v13  ;;  %v377_v37 = vunpack.c.3.s8 %v153_v63  ;;  %v13238_v38 = vpack.c.bf16 %v1519_v31, %v1503_v11  ;;  %v876_v39 = vcvt.s32.f32 %v364_v34  ;;  %v14171_v13 = vld [vmem:[#allocation11 + $0x8] sm:$0xff] }
  0x7b   :  { %5293 = vmatpush1.bf16.msra.mxu0 %v13236_v30  ;;  %v892_v40 = vcvt.s32.f32 %v380_v26  ;;  %v363_v41 = vunpack.c.2.s8 %v155_v29  ;;  %v1486_v42 = vmul.f32 %v14114_v23, %v890_v35  ;;  %v873_v33 = vcvt.s32.f32 %v361_v27 }
  0x7c   :  { %v889_v44 = vcvt.s32.f32 %v377_v37  ;;  %v379_v45 = vunpack.c.3.s8 %v155_v29  ;;  %5334 = vmatpush1.bf16.msra.mxu1 %v13238_v38  ;;  %v1472_v46 = vmul.f32 %v14122_v25, %v876_v39  ;;  %v330_v51 = vunpack.c.0.s8 %v14149_v47  ;;  %v140_v39 = vld [vmem:[#allocation11 + $0x18] sm:$0xff] }
  0x7d   :  { %v1488_v49 = vmul.f32 %v14122_v25, %v892_v40  ;;  %v875_v50 = vcvt.s32.f32 %v363_v41  ;;  %v13221_v32 = vpack.c.bf16 %v1486_v42, %v1470_v36  ;;  %v1469_v52 = vmul.f32 %v14110_v22, %v873_v33 }
  0x7e   :  { %v1485_v53 = vmul.f32 %v14110_v22, %v889_v44  ;;  %v891_v54 = vcvt.s32.f32 %v379_v45  ;;  %v346_v56 = vunpack.c.1.s8 %v14149_v47  ;;  %v842_v57 = vcvt.s32.f32 %v330_v51  ;;  %v137_v44 = vld [vmem:[#allocation11] sm:$0xff] }
  0x7f   :  { %v13223_v55 = vpack.c.bf16 %v1488_v49, %v1472_v46  ;;  %v1471_v28 = vmul.f32 %v14118_v24, %v875_v50  ;;  %5294 = vmatprep.subr.bf16.mxu0 %v13221_v32  ;;  %v332_v60 = vunpack.c.0.s8 %v156_v58  ;;  %v348_v61 = vunpack.c.1.s8 %v156_v58  ;;  %v139_v50 = vld [vmem:[#allocation11 + $0x10] sm:$0xff] }
  0x80   :  { %v13220_v43 = vpack.c.bf16 %v1485_v53, %v1469_v52  ;;  %v1487_v59 = vmul.f32 %v14118_v24, %v891_v54  ;;  %v858_v62 = vcvt.s32.f32 %v346_v56  ;;  %v1438_v10 = vmul.f32 %v14114_v23, %v842_v57 }
  0x81   :  { %5335 = vmatprep.subr.bf16.mxu1 %v13223_v55  ;;  %v329_v11 = vunpack.c.0.s8 %v153_v63  ;;  %v345_v48 = vunpack.c.1.s8 %v153_v63  ;;  %v844_v31 = vcvt.s32.f32 %v332_v60  ;;  %v860_v34 = vcvt.s32.f32 %v348_v61 }
  0x82   :  { %5295 = vmatpush1.bf16.msra.mxu0 %v13220_v43  ;;  %v13222_v30 = vpack.c.bf16 %v1487_v59, %v1471_v28  ;;  %v331_v47 = vunpack.c.0.s8 %v155_v29  ;;  %v1454_v26 = vmul.f32 %v14114_v23, %v858_v62  ;;  %v347_v27 = vunpack.c.1.s8 %v155_v29 }
  0x83   :  { %v841_v35 = vcvt.s32.f32 %v329_v11  ;;  %v857_v36 = vcvt.s32.f32 %v345_v48  ;;  %v1440_v58 = vmul.f32 %v14122_v25, %v844_v31  ;;  %v1456_v37 = vmul.f32 %v14122_v25, %v860_v34 }
  0x84   :  { %5336 = vmatpush1.bf16.msra.mxu1 %v13222_v30  ;;  %v843_v38 = vcvt.s32.f32 %v331_v47  ;;  %v298_v63 = vunpack.c.2.s8 %v14171_v13  ;;  %v13205_v40 = vpack.c.bf16 %v1454_v26, %v1438_v10  ;;  %v859_v33 = vcvt.s32.f32 %v347_v27 }
  0x85   :  { %v1437_v41 = vmul.f32 %v14110_v22, %v841_v35  ;;  %v1453_v42 = vmul.f32 %v14110_v22, %v857_v36  ;;  %v13207_v45 = vpack.c.bf16 %v1456_v37, %v1440_v58  ;;  %v314_v29 = vunpack.c.3.s8 %v14171_v13 }
  0x86   :  { %v1439_v46 = vmul.f32 %v14118_v24, %v843_v38  ;;  %v810_v49 = vcvt.s32.f32 %v298_v63  ;;  %5296 = vmatprep.subr.bf16.mxu0 %v13205_v40  ;;  %v1455_v32 = vmul.f32 %v14118_v24, %v859_v33  ;;  %v300_v52 = vunpack.c.2.s8 %v140_v39 }
  0x87   :  { %v13204_v51 = vpack.c.bf16 %v1453_v42, %v1437_v41  ;;  %v316_v53 = vunpack.c.3.s8 %v140_v39  ;;  %5337 = vmatprep.subr.bf16.mxu1 %v13207_v45  ;;  %v826_v54 = vcvt.s32.f32 %v314_v29  ;;  %v297_v28 = vunpack.c.2.s8 %v137_v44 }
  0x88   :  { %v1406_v55 = vmul.f32 %v14114_v23, %v810_v49  ;;  %v313_v56 = vunpack.c.3.s8 %v137_v44  ;;  %v13206_v57 = vpack.c.bf16 %v1455_v32, %v1439_v46  ;;  %v812_v43 = vcvt.s32.f32 %v300_v52  ;;  %v14193_v49 = vld [vmem:[#allocation11 + $0x388] sm:$0xff] }
  0x89   :  { %5297 = vmatpush1.bf16.msra.mxu0 %v13204_v51  ;;  %v828_v59 = vcvt.s32.f32 %v316_v53  ;;  %v299_v60 = vunpack.c.2.s8 %v139_v50  ;;  %v1422_v61 = vmul.f32 %v14114_v23, %v826_v54  ;;  %v809_v62 = vcvt.s32.f32 %v297_v28 }
  0x8a   :  { %v825_v10 = vcvt.s32.f32 %v313_v56  ;;  %v315_v11 = vunpack.c.3.s8 %v139_v50  ;;  %5338 = vmatpush1.bf16.msra.mxu1 %v13206_v57  ;;  %v1408_v48 = vmul.f32 %v14122_v25, %v812_v43  ;;  %v266_v34 = vunpack.c.0.s8 %v14171_v13  ;;  %v14199_v43 = vld [vmem:[#allocation11 + $0x398] sm:$0xff] }
  0x8b   :  { %v1424_v30 = vmul.f32 %v14122_v25, %v828_v59  ;;  %v811_v31 = vcvt.s32.f32 %v299_v60  ;;  %v13189_v47 = vpack.c.bf16 %v1422_v61, %v1406_v55  ;;  %v1405_v26 = vmul.f32 %v14110_v22, %v809_v62 }
  0x8c   :  { %v1421_v35 = vmul.f32 %v14110_v22, %v825_v10  ;;  %v827_v36 = vcvt.s32.f32 %v315_v11  ;;  %v282_v37 = vunpack.c.1.s8 %v14171_v13  ;;  %v778_v38 = vcvt.s32.f32 %v266_v34 }
  0x8d   :  { %v13191_v27 = vpack.c.bf16 %v1424_v30, %v1408_v48  ;;  %v1407_v58 = vmul.f32 %v14118_v24, %v811_v31  ;;  %5298 = vmatprep.subr.bf16.mxu0 %v13189_v47  ;;  %v268_v41 = vunpack.c.0.s8 %v140_v39  ;;  %v284_v42 = vunpack.c.1.s8 %v140_v39 }
  0x8e   :  { %v13188_v63 = vpack.c.bf16 %v1421_v35, %v1405_v26  ;;  %v1423_v40 = vmul.f32 %v14118_v24, %v827_v36  ;;  %v794_v33 = vcvt.s32.f32 %v282_v37  ;;  %v1374_v45 = vmul.f32 %v14114_v23, %v778_v38 }
  0x8f   :  { %5339 = vmatprep.subr.bf16.mxu1 %v13191_v27  ;;  %v265_v46 = vunpack.c.0.s8 %v137_v44  ;;  %v281_v29 = vunpack.c.1.s8 %v137_v44  ;;  %v780_v32 = vcvt.s32.f32 %v268_v41  ;;  %v796_v52 = vcvt.s32.f32 %v284_v42 }
  0x90   :  { %5299 = vmatpush1.bf16.msra.mxu0 %v13188_v63  ;;  %v13190_v51 = vpack.c.bf16 %v1423_v40, %v1407_v58  ;;  %v267_v13 = vunpack.c.0.s8 %v139_v50  ;;  %v1390_v53 = vmul.f32 %v14114_v23, %v794_v33  ;;  %v283_v28 = vunpack.c.1.s8 %v139_v50 }
  0x91   :  { %v777_v54 = vcvt.s32.f32 %v265_v46  ;;  %v793_v55 = vcvt.s32.f32 %v281_v29  ;;  %v1376_v39 = vmul.f32 %v14122_v25, %v780_v32  ;;  %v1392_v56 = vmul.f32 %v14122_v25, %v796_v52 }
  0x92   :  { %5340 = vmatpush1.bf16.msra.mxu1 %v13190_v51  ;;  %v779_v57 = vcvt.s32.f32 %v267_v13  ;;  %v746_v44 = vunpack.c.2.s8 %v14193_v49  ;;  %v13173_v59 = vpack.c.bf16 %v1390_v53, %v1374_v45  ;;  %v795_v62 = vcvt.s32.f32 %v283_v28 }
  0x93   :  { %v1373_v60 = vmul.f32 %v14110_v22, %v777_v54  ;;  %v1389_v61 = vmul.f32 %v14110_v22, %v793_v55  ;;  %v13175_v10 = vpack.c.bf16 %v1392_v56, %v1376_v39  ;;  %v762_v50 = vunpack.c.3.s8 %v14193_v49  ;;  %v249_v39 = vld [vmem:[#allocation11 + $0x380] sm:$0xff]  ;;  %v251_v56 = vld [vmem:[#allocation11 + $0x390] sm:$0xff] }
  0x94   :  { %v1375_v11 = vmul.f32 %v14118_v24, %v779_v57  ;;  %v1258_v48 = vcvt.s32.f32 %v746_v44  ;;  %5300 = vmatprep.subr.bf16.mxu0 %v13173_v59  ;;  %v1391_v31 = vmul.f32 %v14118_v24, %v795_v62  ;;  %v748_v34 = vunpack.c.2.s8 %v14199_v43 }
  0x95   :  { %v13172_v30 = vpack.c.bf16 %v1389_v61, %v1373_v60  ;;  %v764_v47 = vunpack.c.3.s8 %v14199_v43  ;;  %5341 = vmatprep.subr.bf16.mxu1 %v13175_v10  ;;  %v1274_v26 = vcvt.s32.f32 %v762_v50  ;;  %v14224_v54 = vrot.slane %v14106_v21, %v14067_v7  ;;  %v159_v7 = vld [vmem:[#allocation11 + $0xb0] sm:$0xff] }
  0x96   :  { %v1854_v35 = vmul.f32 %v14114_v23, %v1258_v48  ;;  %v13174_v36 = vpack.c.bf16 %v1391_v31, %v1375_v11  ;;  %v1260_v27 = vcvt.s32.f32 %v748_v34  ;;  %v14232_v55 = vrot.slane %v14106_v21, %v14073_v9 }
  0x97   :  { %5301 = vmatpush1.bf16.msra.mxu0 %v13172_v30  ;;  %v1276_v58 = vcvt.s32.f32 %v764_v47  ;;  %v1870_v37 = vmul.f32 %v14114_v23, %v1274_v26  ;;  %v14236_v28 = vrot.slane %v14106_v21, %v14080_v12  ;;  %v745_v57 = vunpack.c.2.s8 %v249_v39 }
  0x98   :  { %5342 = vmatpush1.bf16.msra.mxu1 %v13174_v36  ;;  %v1856_v38 = vmul.f32 %v14122_v25, %v1260_v27  ;;  %v761_v44 = vunpack.c.3.s8 %v249_v39  ;;  %v747_v59 = vunpack.c.2.s8 %v251_v56  ;;  %v763_v60 = vunpack.c.3.s8 %v251_v56 }
  0x99   :  { %v1872_v63 = vmul.f32 %v14122_v25, %v1276_v58  ;;  %v13413_v40 = vpack.c.bf16 %v1870_v37, %v1854_v35  ;;  %v14240_v61 = vrot.slane %v14082_v14, %v14048_v2  ;;  %v14244_v62 = vrot.slane %v14082_v14, %v14051_v3 }
  0x9a   :  { %v14248_v10 = vrot.slane %v14082_v14, %v14101_v19  ;;  %v1257_v11 = vcvt.s32.f32 %v745_v57  ;;  %v1273_v50 = vcvt.s32.f32 %v761_v44  ;;  %v1259_v48 = vcvt.s32.f32 %v747_v59  ;;  %v236_v57 = vld [vmem:[#allocation11 + $0x318] sm:$0xff] }
  0x9b   :  { %v13415_v41 = vpack.c.bf16 %v1872_v63, %v1856_v38  ;;  %5302 = vmatprep.subr.bf16.mxu0 %v13413_v40  ;;  %v1275_v30 = vcvt.s32.f32 %v763_v60  ;;  %v714_v31 = vunpack.c.0.s8 %v14193_v49  ;;  %v730_v34 = vunpack.c.1.s8 %v14193_v49 }
  0x9c   :  { %v716_v47 = vunpack.c.0.s8 %v14199_v43  ;;  %v732_v26 = vunpack.c.1.s8 %v14199_v43  ;;  %v1853_v35 = vmul.f32 %v14110_v22, %v1257_v11  ;;  %v1869_v36 = vmul.f32 %v14110_v22, %v1273_v50  ;;  %v233_v11 = vld [vmem:[#allocation11 + $0x300] sm:$0xff] }
  0x9d   :  { %5343 = vmatprep.subr.bf16.mxu1 %v13415_v41  ;;  %v1855_v27 = vmul.f32 %v14118_v24, %v1259_v48  ;;  %v1226_v58 = vcvt.s32.f32 %v714_v31  ;;  %v1242_v37 = vcvt.s32.f32 %v730_v34  ;;  %v729_v49 = vunpack.c.1.s8 %v249_v39 }
  0x9e   :  { %v1228_v38 = vcvt.s32.f32 %v716_v47  ;;  %v1244_v63 = vcvt.s32.f32 %v732_v26  ;;  %v13412_v40 = vpack.c.bf16 %v1869_v36, %v1853_v35  ;;  %v684_v26 = vunpack.c.2.s8 %v236_v57  ;;  %v235_v36 = vld [vmem:[#allocation11 + $0x310] sm:$0xff] }
  0x9f   :  { %v1838_v43 = vmul.f32 %v14114_v23, %v1242_v37  ;;  %v700_v35 = vunpack.c.3.s8 %v236_v57  ;;  %v367_v19 = vunpack.c.2.s8 %v159_v7 }
  0xa0   :  { %5303 = vmatpush2.bf16.msra.mxu0 %v13412_v40 }
  0xa1   :  { %v1212_v40 = vcvt.s32.f32 %v700_v35 }
  0xe9   :  { %v3696_v42 = vpop.xlane.xlu0 %3695 }
  0xea   :  { %v3698_v33 = vmul.f32 0.00390625, %v3696_v42  ;;  %v713_v42 = vunpack.c.0.s8 %v249_v39 }
  0xec   :  { %v3703_v45 = vrot.slane %v3698_v33, %v14048_v2  ;;  %v234_v33 = vld [vmem:[#allocation11 + $0x308] sm:$0xff] }
  0xed   :  { %v682_v60 = vunpack.c.2.s8 %v234_v33  ;;  %v698_v39 = vunpack.c.3.s8 %v234_v33 }
  0xee   :  { %v14214_v46 = vsub.f32 %v14056_v4, %v3703_v45  ;;  %v14228_v4 = vrot.slane %v14106_v21, %v14070_v8  ;;  %v14252_v21 = vrot.slane %v14082_v14, %v14104_v20  ;;  %v1871_v14 = vmul.f32 %v14118_v24, %v1275_v30 }
  0xef   :  { %v1822_v45 = vmul.f32 %v14114_v23, %v1226_v58  ;;  %v1194_v34 = vcvt.s32.f32 %v682_v60  ;;  %v1210_v47 = vcvt.s32.f32 %v698_v39  ;;  %v681_v58 = vunpack.c.2.s8 %v233_v11 }
  0xf0   :  { %v3706_v29 = vmul.f32 %v14214_v46, %v14214_v46  ;;  %v13414_v41 = vpack.c.bf16 %v1871_v14, %v1855_v27  ;;  %v666_v39 = vunpack.c.1.s8 %v234_v33  ;;  %v383_v20 = vunpack.c.3.s8 %v159_v7 }
  0xf1   :  { %v13397_v44 = vpack.c.bf16 %v1838_v43, %v1822_v45  ;;  %v1790_v37 = vmul.f32 %v14114_v23, %v1194_v34  ;;  %v683_v45 = vunpack.c.2.s8 %v235_v36  ;;  %v668_v34 = vunpack.c.1.s8 %v236_v57 }
  0xf2   :  { %v3711_v51 = vrot.slane %v3706_v29, %v14048_v2  ;;  %v3715_v32 = vrot.slane %v3706_v29, %v14051_v3  ;;  %v1824_v29 = vmul.f32 %v14122_v25, %v1228_v38  ;;  %5344 = vmatpush2.bf16.msra.mxu1 %v13414_v41  ;;  %v1806_v38 = vmul.f32 %v14114_v23, %v1210_v47 }
  0xf3   :  { %5304 = vmatprep.subr.bf16.mxu0 %v13397_v44  ;;  %v650_v44 = vunpack.c.0.s8 %v234_v33 }
  0xf4   :  { %v3718_v52 = vsel %vm3691_vm0, %v3711_v51, 0.0  ;;  %v3719_v13 = vsel %vm3691_vm0, %v3715_v32, 0.0  ;;  %v1840_v51 = vmul.f32 %v14122_v25, %v1244_v63  ;;  %v1225_v32 = vcvt.s32.f32 %v713_v42 }
  0xf5   :  { %v3720_v53 = vadd.f32 %v3719_v13, %v3718_v52  ;;  %v1241_v52 = vcvt.s32.f32 %v729_v49  ;;  %v715_v13 = vunpack.c.0.s8 %v251_v56  ;;  %v1196_v63 = vcvt.s32.f32 %v684_v26 }
  0xf6   :  { %v13399_v59 = vpack.c.bf16 %v1840_v51, %v1824_v29  ;;  %v1821_v50 = vmul.f32 %v14110_v22, %v1225_v32  ;;  %v697_v42 = vunpack.c.3.s8 %v233_v11  ;;  %v1193_v49 = vcvt.s32.f32 %v681_v58 }
  0xf7   :  { %3721 = vadd.xlane.f32.xlu0 %v3720_v53  ;;  %v731_v53 = vunpack.c.1.s8 %v251_v56  ;;  %v1837_v48 = vmul.f32 %v14110_v22, %v1241_v52  ;;  %v1227_v30 = vcvt.s32.f32 %v715_v13  ;;  %v13381_v43 = vpack.c.bf16 %v1806_v38, %v1790_v37  ;;  %v218_v38 = vld [vmem:[#allocation11 + $0x288] sm:$0xff] }
  0xf8   :  { %5345 = vmatprep.subr.bf16.mxu1 %v13399_v59  ;;  %v1792_v29 = vmul.f32 %v14122_v25, %v1196_v63  ;;  %v1808_v51 = vmul.f32 %v14122_v25, %v1212_v40  ;;  %v699_v32 = vunpack.c.3.s8 %v235_v36  ;;  %v1209_v52 = vcvt.s32.f32 %v697_v42 }
  0xf9   :  { %v1243_v31 = vcvt.s32.f32 %v731_v53  ;;  %v13396_v56 = vpack.c.bf16 %v1837_v48, %v1821_v50  ;;  %v1823_v27 = vmul.f32 %v14118_v24, %v1227_v30  ;;  %v1789_v13 = vmul.f32 %v14110_v22, %v1193_v49 }
  0xfa   :  { %v1195_v53 = vcvt.s32.f32 %v683_v45  ;;  %v13383_v59 = vpack.c.bf16 %v1808_v51, %v1792_v29  ;;  %v1211_v60 = vcvt.s32.f32 %v699_v32  ;;  %v652_v50 = vunpack.c.0.s8 %v236_v57 }
  0xfb   :  { %v1839_v14 = vmul.f32 %v14118_v24, %v1243_v31  ;;  %5305 = vmatpush2.bf16.msra.mxu0 %v13396_v56  ;;  %v1805_v48 = vmul.f32 %v14110_v22, %v1209_v52  ;;  %v1162_v31 = vcvt.s32.f32 %v650_v44  ;;  %v1178_v26 = vcvt.s32.f32 %v666_v39  ;;  %v217_v52 = vld [vmem:[#allocation11 + $0x280] sm:$0xff] }
  0xfc   :  { %5306 = vmatprep.subr.bf16.mxu0 %v13381_v43  ;;  %v1791_v30 = vmul.f32 %v14118_v24, %v1195_v53  ;;  %v1807_v47 = vmul.f32 %v14118_v24, %v1211_v60  ;;  %v1164_v35 = vcvt.s32.f32 %v652_v50  ;;  %v649_v56 = vunpack.c.0.s8 %v233_v11  ;;  %v220_v43 = vld [vmem:[#allocation11 + $0x298] sm:$0xff] }
  0xfd   :  { %v13398_v41 = vpack.c.bf16 %v1839_v14, %v1823_v27  ;;  %v13380_v27 = vpack.c.bf16 %v1805_v48, %v1789_v13  ;;  %v1758_v14 = vmul.f32 %v14114_v23, %v1162_v31  ;;  %v1180_v58 = vcvt.s32.f32 %v668_v34 }
  0xfe   :  { %v665_v37 = vunpack.c.1.s8 %v233_v11  ;;  %v13382_v33 = vpack.c.bf16 %v1807_v47, %v1791_v30  ;;  %v1774_v63 = vmul.f32 %v14114_v23, %v1178_v26  ;;  %v1760_v40 = vmul.f32 %v14122_v25, %v1164_v35  ;;  %v219_v30 = vld [vmem:[#allocation11 + $0x290] sm:$0xff] }
  0xff   :  { %5346 = vmatpush2.bf16.msra.mxu1 %v13398_v41  ;;  %v1161_v41 = vcvt.s32.f32 %v649_v56  ;;  %5307 = vmatpush2.bf16.msra.mxu0 %v13380_v27  ;;  %v1776_v57 = vmul.f32 %v14122_v25, %v1180_v58  ;;  %v651_v49 = vunpack.c.0.s8 %v235_v36  ;;  %v667_v45 = vunpack.c.1.s8 %v235_v36 }
 0x100   :  { %5347 = vmatprep.subr.bf16.mxu1 %v13383_v59  ;;  %v1177_v42 = vcvt.s32.f32 %v665_v37  ;;  %v13365_v29 = vpack.c.bf16 %v1774_v63, %v1758_v14  ;;  %v618_v32 = vunpack.c.2.s8 %v218_v38  ;;  %v634_v11 = vunpack.c.3.s8 %v218_v38 }
 0x101   :  { %v1757_v51 = vmul.f32 %v14110_v22, %v1161_v41  ;;  %v13367_v13 = vpack.c.bf16 %v1776_v57, %v1760_v40  ;;  %v1163_v44 = vcvt.s32.f32 %v651_v49  ;;  %v1179_v59 = vcvt.s32.f32 %v667_v45 }
 0x102   :  { %v1773_v53 = vmul.f32 %v14110_v22, %v1177_v42  ;;  %5308 = vmatprep.subr.bf16.mxu0 %v13365_v29  ;;  %v1130_v60 = vcvt.s32.f32 %v618_v32  ;;  %v1146_v39 = vcvt.s32.f32 %v634_v11  ;;  %v620_v50 = vunpack.c.2.s8 %v220_v43 }
 0x103   :  { %5348 = vmatpush2.bf16.msra.mxu1 %v13382_v33  ;;  %v636_v48 = vunpack.c.3.s8 %v220_v43  ;;  %v1759_v31 = vmul.f32 %v14118_v24, %v1163_v44  ;;  %v1775_v34 = vmul.f32 %v14118_v24, %v1179_v59  ;;  %v617_v47 = vunpack.c.2.s8 %v217_v52 }
 0x104   :  { %5349 = vmatprep.subr.bf16.mxu1 %v13367_v13  ;;  %v13364_v36 = vpack.c.bf16 %v1773_v53, %v1757_v51  ;;  %v1726_v26 = vmul.f32 %v14114_v23, %v1130_v60  ;;  %v1742_v35 = vmul.f32 %v14114_v23, %v1146_v39  ;;  %v1132_v56 = vcvt.s32.f32 %v620_v50 }
 0x105   :  { %v1148_v27 = vcvt.s32.f32 %v636_v48  ;;  %v13366_v14 = vpack.c.bf16 %v1775_v34, %v1759_v31  ;;  %v633_v58 = vunpack.c.3.s8 %v217_v52  ;;  %v1129_v37 = vcvt.s32.f32 %v617_v47 }
 0x106   :  { %5309 = vmatpush2.bf16.msra.mxu0 %v13364_v36  ;;  %v619_v33 = vunpack.c.2.s8 %v219_v30  ;;  %v13349_v63 = vpack.c.bf16 %v1742_v35, %v1726_v26  ;;  %v1728_v40 = vmul.f32 %v14122_v25, %v1132_v56  ;;  %v635_v57 = vunpack.c.3.s8 %v219_v30  ;;  %v202_v35 = vld [vmem:[#allocation11 + $0x208] sm:$0xff] }
 0x107   :  { %v1744_v41 = vmul.f32 %v14122_v25, %v1148_v27  ;;  %5350 = vmatpush2.bf16.msra.mxu1 %v13366_v14  ;;  %v1145_v42 = vcvt.s32.f32 %v633_v58  ;;  %v1725_v49 = vmul.f32 %v14110_v22, %v1129_v37  ;;  %v586_v29 = vunpack.c.0.s8 %v218_v38 }
 0x108   :  { %v1131_v45 = vcvt.s32.f32 %v619_v33  ;;  %5310 = vmatprep.subr.bf16.mxu0 %v13349_v63  ;;  %v1147_v32 = vcvt.s32.f32 %v635_v57  ;;  %v602_v11 = vunpack.c.1.s8 %v218_v38  ;;  %v588_v13 = vunpack.c.0.s8 %v220_v43  ;;  %v204_v63 = vld [vmem:[#allocation11 + $0x218] sm:$0xff] }
 0x109   :  { %v13351_v51 = vpack.c.bf16 %v1744_v41, %v1728_v40  ;;  %v1741_v53 = vmul.f32 %v14110_v22, %v1145_v42  ;;  %v1098_v59 = vcvt.s32.f32 %v586_v29  ;;  %v604_v60 = vunpack.c.1.s8 %v220_v43  ;;  %v201_v42 = vld [vmem:[#allocation11 + $0x200] sm:$0xff] }
 0x10a   :  { %v1727_v44 = vmul.f32 %v14118_v24, %v1131_v45  ;;  %v1743_v39 = vmul.f32 %v14118_v24, %v1147_v32  ;;  %v1114_v50 = vcvt.s32.f32 %v602_v11  ;;  %v1100_v48 = vcvt.s32.f32 %v588_v13 }
 0x10b   :  { %5351 = vmatprep.subr.bf16.mxu1 %v13351_v51  ;;  %v585_v36 = vunpack.c.0.s8 %v217_v52  ;;  %v13348_v31 = vpack.c.bf16 %v1741_v53, %v1725_v49  ;;  %v1694_v34 = vmul.f32 %v14114_v23, %v1098_v59  ;;  %v1116_v47 = vcvt.s32.f32 %v604_v60 }
 0x10c   :  { %v601_v26 = vunpack.c.1.s8 %v217_v52  ;;  %v13350_v38 = vpack.c.bf16 %v1743_v39, %v1727_v44  ;;  %v1710_v56 = vmul.f32 %v14114_v23, %v1114_v50  ;;  %v1696_v27 = vmul.f32 %v14122_v25, %v1100_v48  ;;  %v203_v44 = vld [vmem:[#allocation11 + $0x210] sm:$0xff] }
 0x10d   :  { %v1097_v14 = vcvt.s32.f32 %v585_v36  ;;  %5311 = vmatpush2.bf16.msra.mxu0 %v13348_v31  ;;  %v1712_v43 = vmul.f32 %v14122_v25, %v1116_v47  ;;  %v587_v37 = vunpack.c.0.s8 %v219_v30  ;;  %v603_v33 = vunpack.c.1.s8 %v219_v30 }
 0x10e   :  { %v1113_v58 = vcvt.s32.f32 %v601_v26  ;;  %5352 = vmatpush2.bf16.msra.mxu1 %v13350_v38  ;;  %v13333_v40 = vpack.c.bf16 %v1710_v56, %v1694_v34  ;;  %v554_v57 = vunpack.c.2.s8 %v202_v35  ;;  %v570_v52 = vunpack.c.3.s8 %v202_v35 }
 0x10f   :  { %v1693_v41 = vmul.f32 %v14110_v22, %v1097_v14  ;;  %v13335_v49 = vpack.c.bf16 %v1712_v43, %v1696_v27  ;;  %v1099_v29 = vcvt.s32.f32 %v587_v37  ;;  %v1115_v51 = vcvt.s32.f32 %v603_v33 }
 0x110   :  { %v1709_v45 = vmul.f32 %v14110_v22, %v1113_v58  ;;  %5312 = vmatprep.subr.bf16.mxu0 %v13333_v40  ;;  %v1066_v32 = vcvt.s32.f32 %v554_v57  ;;  %v1082_v11 = vcvt.s32.f32 %v570_v52  ;;  %v556_v13 = vunpack.c.2.s8 %v204_v63 }
 0x111   :  { %v572_v53 = vunpack.c.3.s8 %v204_v63  ;;  %5353 = vmatprep.subr.bf16.mxu1 %v13335_v49  ;;  %v1695_v59 = vmul.f32 %v14118_v24, %v1099_v29  ;;  %v1711_v60 = vmul.f32 %v14118_v24, %v1115_v51  ;;  %v553_v39 = vunpack.c.2.s8 %v201_v42 }
 0x112   :  { %v13332_v30 = vpack.c.bf16 %v1709_v45, %v1693_v41  ;;  %v1662_v50 = vmul.f32 %v14114_v23, %v1066_v32  ;;  %v1678_v48 = vmul.f32 %v14114_v23, %v1082_v11  ;;  %v1068_v36 = vcvt.s32.f32 %v556_v13 }
 0x113   :  { %v1084_v31 = vcvt.s32.f32 %v572_v53  ;;  %v13334_v34 = vpack.c.bf16 %v1711_v60, %v1695_v59  ;;  %v569_v47 = vunpack.c.3.s8 %v201_v42  ;;  %v1065_v26 = vcvt.s32.f32 %v553_v39 }
 0x114   :  { %5313 = vmatpush2.bf16.msra.mxu0 %v13332_v30  ;;  %v555_v38 = vunpack.c.2.s8 %v203_v44  ;;  %v13317_v56 = vpack.c.bf16 %v1678_v48, %v1662_v50  ;;  %v1664_v27 = vmul.f32 %v14122_v25, %v1068_v36  ;;  %v571_v43 = vunpack.c.3.s8 %v203_v44  ;;  %v190_v48 = vld [vmem:[#allocation11 + $0x1a8] sm:$0xff] }
 0x115   :  { %v1680_v14 = vmul.f32 %v14122_v25, %v1084_v31  ;;  %5354 = vmatpush2.bf16.msra.mxu1 %v13334_v34  ;;  %v1081_v58 = vcvt.s32.f32 %v569_v47  ;;  %v1661_v37 = vmul.f32 %v14110_v22, %v1065_v26  ;;  %v522_v40 = vunpack.c.0.s8 %v202_v35 }
 0x116   :  { %v1067_v33 = vcvt.s32.f32 %v555_v38  ;;  %5314 = vmatprep.subr.bf16.mxu0 %v13317_v56  ;;  %v1083_v57 = vcvt.s32.f32 %v571_v43  ;;  %v538_v52 = vunpack.c.1.s8 %v202_v35  ;;  %v524_v49 = vunpack.c.0.s8 %v204_v63  ;;  %v192_v56 = vld [vmem:[#allocation11 + $0x1b8] sm:$0xff] }
 0x117   :  { %v13319_v41 = vpack.c.bf16 %v1680_v14, %v1664_v27  ;;  %v1677_v45 = vmul.f32 %v14110_v22, %v1081_v58  ;;  %v1034_v51 = vcvt.s32.f32 %v522_v40  ;;  %v540_v32 = vunpack.c.1.s8 %v204_v63  ;;  %v189_v58 = vld [vmem:[#allocation11 + $0x1a0] sm:$0xff] }
 0x118   :  { %v1663_v29 = vmul.f32 %v14118_v24, %v1067_v33  ;;  %v1679_v11 = vmul.f32 %v14118_v24, %v1083_v57  ;;  %v1050_v13 = vcvt.s32.f32 %v538_v52  ;;  %v1036_v53 = vcvt.s32.f32 %v524_v49  ;;  %v191_v49 = vld [vmem:[#allocation11 + $0x1b0] sm:$0xff] }
 0x119   :  { %5355 = vmatprep.subr.bf16.mxu1 %v13319_v41  ;;  %v521_v30 = vunpack.c.0.s8 %v201_v42  ;;  %v13316_v59 = vpack.c.bf16 %v1677_v45, %v1661_v37  ;;  %v1630_v60 = vmul.f32 %v14114_v23, %v1034_v51  ;;  %v1052_v39 = vcvt.s32.f32 %v540_v32 }
 0x11a   :  { %v537_v50 = vunpack.c.1.s8 %v201_v42  ;;  %v13318_v35 = vpack.c.bf16 %v1679_v11, %v1663_v29  ;;  %v1646_v36 = vmul.f32 %v14114_v23, %v1050_v13  ;;  %v1632_v31 = vmul.f32 %v14122_v25, %v1036_v53 }
 0x11b   :  { %v1033_v34 = vcvt.s32.f32 %v521_v30  ;;  %5315 = vmatpush2.bf16.msra.mxu0 %v13316_v59  ;;  %v1648_v63 = vmul.f32 %v14122_v25, %v1052_v39  ;;  %v523_v26 = vunpack.c.0.s8 %v203_v44  ;;  %v539_v38 = vunpack.c.1.s8 %v203_v44 }
 0x11c   :  { %v1049_v47 = vcvt.s32.f32 %v537_v50  ;;  %5356 = vmatpush2.bf16.msra.mxu1 %v13318_v35  ;;  %v13301_v27 = vpack.c.bf16 %v1646_v36, %v1630_v60  ;;  %v494_v43 = vunpack.c.2.s8 %v190_v48  ;;  %v510_v42 = vunpack.c.3.s8 %v190_v48 }
 0x11d   :  { %v1629_v14 = vmul.f32 %v14110_v22, %v1033_v34  ;;  %v13303_v37 = vpack.c.bf16 %v1648_v63, %v1632_v31  ;;  %v1035_v33 = vcvt.s32.f32 %v523_v26  ;;  %v1051_v40 = vcvt.s32.f32 %v539_v38 }
 0x11e   :  { %v1645_v23 = vmul.f32 %v14110_v22, %v1049_v47  ;;  %5316 = vmatprep.subr.bf16.mxu0 %v13301_v27  ;;  %v1006_v41 = vcvt.s32.f32 %v494_v43  ;;  %v1022_v57 = vcvt.s32.f32 %v510_v42  ;;  %v496_v25 = vunpack.c.2.s8 %v192_v56 }
 0x11f   :  { %v512_v52 = vunpack.c.3.s8 %v192_v56  ;;  %5357 = vmatprep.subr.bf16.mxu1 %v13303_v37  ;;  %v1631_v45 = vmul.f32 %v14118_v24, %v1035_v33  ;;  %v1647_v29 = vmul.f32 %v14118_v24, %v1051_v40  ;;  %v493_v51 = vunpack.c.2.s8 %v189_v58 }
 0x120   :  { %v13300_v44 = vpack.c.bf16 %v1645_v23, %v1629_v14  ;;  %v1602_v32 = vmul.f32 %v14228_v4, %v1006_v41  ;;  %v1618_v11 = vmul.f32 %v14228_v4, %v1022_v57  ;;  %v1008_v22 = vcvt.s32.f32 %v496_v25  ;;  %v157_v57 = vld [vmem:[#allocation11 + $0xa0] sm:$0xff] }
 0x121   :  { %v1024_v13 = vcvt.s32.f32 %v512_v52  ;;  %v13302_v53 = vpack.c.bf16 %v1647_v29, %v1631_v45  ;;  %v509_v30 = vunpack.c.3.s8 %v189_v58  ;;  %v1005_v59 = vcvt.s32.f32 %v493_v51  ;;  %v160_v45 = vld [vmem:[#allocation11 + $0xb8] sm:$0xff] }
 0x122   :  { %5317 = vmatpush2.bf16.msra.mxu0 %v13300_v44  ;;  %v495_v60 = vunpack.c.2.s8 %v191_v49  ;;  %v13289_v39 = vpack.c.bf16 %v1618_v11, %v1602_v32  ;;  %v1604_v50 = vmul.f32 %v14236_v28, %v1008_v22  ;;  %v511_v36 = vunpack.c.3.s8 %v191_v49  ;;  %v174_v44 = vld [vmem:[#allocation11 + $0x128] sm:$0xff] }
 0x123   :  { %v1620_v35 = vmul.f32 %v14236_v28, %v1024_v13  ;;  %5358 = vmatpush2.bf16.msra.mxu1 %v13302_v53  ;;  %v1021_v24 = vcvt.s32.f32 %v509_v30  ;;  %v14323_v31 = vmul.f32 %v14224_v54, %v1005_v59  ;;  %v462_v63 = vunpack.c.0.s8 %v190_v48  ;;  %v176_v53 = vld [vmem:[#allocation11 + $0x138] sm:$0xff] }
 0x124   :  { %v1007_v34 = vcvt.s32.f32 %v495_v60  ;;  %5368 = vmatprep.subr.bf16.mxu0 %v13289_v39  ;;  %v1023_v26 = vcvt.s32.f32 %v511_v36  ;;  %v478_v38 = vunpack.c.1.s8 %v190_v48  ;;  %v464_v27 = vunpack.c.0.s8 %v192_v56  ;;  %v173_v39 = vld [vmem:[#allocation11 + $0x120] sm:$0xff] }
 0x125   :  { %v13291_v47 = vpack.c.bf16 %v1620_v35, %v1604_v50  ;;  %v14326_v14 = vmul.f32 %v14224_v54, %v1021_v24  ;;  %v974_v42 = vcvt.s32.f32 %v462_v63  ;;  %v480_v37 = vunpack.c.1.s8 %v192_v56 }
 0x126   :  { %v14329_v43 = vmul.f32 %v14232_v55, %v1007_v34  ;;  %v14332_v23 = vmul.f32 %v14232_v55, %v1023_v26  ;;  %v990_v33 = vcvt.s32.f32 %v478_v38  ;;  %v976_v40 = vcvt.s32.f32 %v464_v27  ;;  %v175_v26 = vld [vmem:[#allocation11 + $0x130] sm:$0xff] }
 0x127   :  { %5409 = vmatprep.subr.bf16.mxu1 %v13291_v47  ;;  %v461_v41 = vunpack.c.0.s8 %v189_v58  ;;  %v14337_v48 = vmul.f32 %v14228_v4, %v974_v42  ;;  %v992_v25 = vcvt.s32.f32 %v480_v37  ;;  %v477_v52 = vunpack.c.1.s8 %v189_v58  ;;  %v158_v58 = vld [vmem:[#allocation11 + $0xa8] sm:$0xff] }
 0x128   :  { %v14342_v56 = vmul.f32 %v14228_v4, %v990_v33  ;;  %v14345_v29 = vmul.f32 %v14236_v28, %v976_v40  ;;  %v463_v22 = vunpack.c.0.s8 %v191_v49  ;;  %v479_v13 = vunpack.c.1.s8 %v191_v49 }
 0x129   :  { %v973_v51 = vcvt.s32.f32 %v461_v41  ;;  %v14348_v32 = vmul.f32 %v14236_v28, %v992_v25  ;;  %v989_v11 = vcvt.s32.f32 %v477_v52  ;;  %v430_v59 = vunpack.c.2.s8 %v174_v44 }
 0x12a   :  { %v446_v60 = vunpack.c.3.s8 %v174_v44  ;;  %v975_v36 = vcvt.s32.f32 %v463_v22  ;;  %v991_v24 = vcvt.s32.f32 %v479_v13  ;;  %v432_v63 = vunpack.c.2.s8 %v176_v53 }
 0x12b   :  { %v14353_v30 = vmul.f32 %v14224_v54, %v973_v51  ;;  %v14358_v35 = vmul.f32 %v14224_v54, %v989_v11  ;;  %v942_v34 = vcvt.s32.f32 %v430_v59  ;;  %v448_v47 = vunpack.c.3.s8 %v176_v53 }
 0x12c   :  { %v958_v49 = vcvt.s32.f32 %v446_v60  ;;  %v14363_v27 = vmul.f32 %v14232_v55, %v975_v36  ;;  %v14366_v42 = vmul.f32 %v14232_v55, %v991_v24  ;;  %v429_v37 = vunpack.c.2.s8 %v173_v39 }
 0x12d   :  { %v14369_v33 = vmul.f32 %v14228_v4, %v942_v34  ;;  %v944_v41 = vcvt.s32.f32 %v432_v63  ;;  %v960_v25 = vcvt.s32.f32 %v448_v47  ;;  %v445_v51 = vunpack.c.3.s8 %v173_v39 }
 0x12e   :  { %v14372_v40 = vmul.f32 %v14228_v4, %v958_v49  ;;  %v941_v11 = vcvt.s32.f32 %v429_v37  ;;  %v431_v22 = vunpack.c.2.s8 %v175_v26  ;;  %v447_v36 = vunpack.c.3.s8 %v175_v26 }
 0x12f   :  { %v14379_v59 = vmul.f32 %v14236_v28, %v944_v41  ;;  %v14382_v60 = vmul.f32 %v14236_v28, %v960_v25  ;;  %v957_v24 = vcvt.s32.f32 %v445_v51  ;;  %v398_v63 = vunpack.c.0.s8 %v174_v44 }
 0x130   :  { %v14385_v34 = vmul.f32 %v14224_v54, %v941_v11  ;;  %v943_v49 = vcvt.s32.f32 %v431_v22  ;;  %v959_v37 = vcvt.s32.f32 %v447_v36  ;;  %v414_v0 = vunpack.c.1.s8 %v174_v44 }
 0x131   :  { %v400_v52 = vunpack.c.0.s8 %v176_v53  ;;  %v14390_v13 = vmul.f32 %v14224_v54, %v957_v24  ;;  %v910_v25 = vcvt.s32.f32 %v398_v63  ;;  %v416_v38 = vunpack.c.1.s8 %v176_v53 }
 0x132   :  { %v14393_v41 = vmul.f32 %v14232_v55, %v943_v49  ;;  %v14396_v51 = vmul.f32 %v14232_v55, %v959_v37  ;;  %v926_v11 = vcvt.s32.f32 %v414_v0  ;;  %v397_v50 = vunpack.c.0.s8 %v173_v39 }
 0x133   :  { %v912_v22 = vcvt.s32.f32 %v400_v52  ;;  %v14401_v44 = vmul.f32 %v14228_v4, %v910_v25  ;;  %v928_v36 = vcvt.s32.f32 %v416_v38  ;;  %v413_v24 = vunpack.c.1.s8 %v173_v39 }
 0x134   :  { %v14406_v53 = vmul.f32 %v14228_v4, %v926_v11  ;;  %v909_v0 = vcvt.s32.f32 %v397_v50  ;;  %v399_v47 = vunpack.c.0.s8 %v175_v26  ;;  %v415_v25 = vunpack.c.1.s8 %v175_v26 }
 0x135   :  { %v14409_v63 = vmul.f32 %v14236_v28, %v912_v22  ;;  %v14412_v52 = vmul.f32 %v14236_v28, %v928_v36  ;;  %v925_v37 = vcvt.s32.f32 %v413_v24  ;;  %v366_v49 = vunpack.c.2.s8 %v158_v58 }
 0x136   :  { %v14417_v38 = vmul.f32 %v14224_v54, %v909_v0  ;;  %v382_v11 = vunpack.c.3.s8 %v158_v58  ;;  %v911_v36 = vcvt.s32.f32 %v399_v47  ;;  %v927_v24 = vcvt.s32.f32 %v415_v25 }
 0x137   :  { %v14422_v50 = vmul.f32 %v14224_v54, %v925_v37  ;;  %v878_v6 = vcvt.s32.f32 %v366_v49  ;;  %v368_v5 = vunpack.c.2.s8 %v160_v45  ;;  %v384_v9 = vunpack.c.3.s8 %v160_v45 }
 0x138   :  { %v894_v26 = vcvt.s32.f32 %v382_v11  ;;  %v14427_v39 = vmul.f32 %v14232_v55, %v911_v36  ;;  %v14430_v12 = vmul.f32 %v14232_v55, %v927_v24  ;;  %v365_v22 = vunpack.c.2.s8 %v157_v57 }
 0x139   :  { %v14433_v37 = vmul.f32 %v14228_v4, %v878_v6  ;;  %v880_v49 = vcvt.s32.f32 %v368_v5  ;;  %v896_v25 = vcvt.s32.f32 %v384_v9  ;;  %v381_v8 = vunpack.c.3.s8 %v157_v57 }
 0x13a   :  { %17087 = vst [vmem:[#allocation44_spill] sm:$0xff] %v14427_v39  ;;  %v14436_v47 = vmul.f32 %v14228_v4, %v894_v26  ;;  %v877_v0 = vcvt.s32.f32 %v365_v22  ;;  %v879_v9 = vcvt.s32.f32 %v367_v19  ;;  %v334_v1 = vunpack.c.0.s8 %v158_v58 }
 0x13b   :  { %17088 = vst [vmem:[#allocation45_spill] sm:$0xff] %v14433_v37  ;;  %v14443_v24 = vmul.f32 %v14236_v28, %v880_v49  ;;  %v14446_v6 = vmul.f32 %v14236_v28, %v896_v25  ;;  %v893_v26 = vcvt.s32.f32 %v381_v8  ;;  %v895_v11 = vcvt.s32.f32 %v383_v20  ;;  %v143_v37 = vld [vmem:[#allocation11 + $0x30] sm:$0xff] }
 0x13c   :  { %17089 = vst [vmem:[#allocation46_spill] sm:$0xff] %v14436_v47  ;;  %v14449_v5 = vmul.f32 %v14224_v54, %v877_v0  ;;  %v350_v17 = vunpack.c.1.s8 %v158_v58  ;;  %v336_v15 = vunpack.c.0.s8 %v160_v45  ;;  %v14457_v49 = vmul.f32 %v14232_v55, %v879_v9 }
 0x13d   :  { %17090 = vst [vmem:[#allocation47_spill] sm:$0xff] %v14443_v24  ;;  %17091 = vst [vmem:[#allocation48_spill] sm:$0xff] %v14446_v6  ;;  %v14454_v36 = vmul.f32 %v14224_v54, %v893_v26  ;;  %v846_v25 = vcvt.s32.f32 %v334_v1  ;;  %v352_v18 = vunpack.c.1.s8 %v160_v45  ;;  %v14460_v8 = vmul.f32 %v14232_v55, %v895_v11  ;;  %v142_v24 = vld [vmem:[#allocation11 + $0x28] sm:$0xff] }
 0x13e   :  { %17092 = vst [vmem:[#allocation49_spill] sm:$0xff] %v14449_v5  ;;  %17094 = vst [vmem:[#allocation51_spill] sm:$0xff] %v14457_v49  ;;  %v862_v0 = vcvt.s32.f32 %v350_v17  ;;  %v848_v19 = vcvt.s32.f32 %v336_v15  ;;  %v333_v16 = vunpack.c.0.s8 %v157_v57  ;;  %v349_v26 = vunpack.c.1.s8 %v157_v57  ;;  %v144_v5 = vld [vmem:[#allocation11 + $0x38] sm:$0xff]  ;;  %v141_v49 = vld [vmem:[#allocation11 + $0x20] sm:$0xff] }
 0x13f   :  { %17093 = vst [vmem:[#allocation50_spill] sm:$0xff] %v14454_v36  ;;  %17095 = vst [vmem:[#allocation52_spill] sm:$0xff] %v14460_v8  ;;  %v14465_v20 = vmul.f32 %v14228_v4, %v846_v25  ;;  %v864_v58 = vcvt.s32.f32 %v352_v18  ;;  %v335_v22 = vunpack.c.0.s8 %v159_v7  ;;  %v351_v25 = vunpack.c.1.s8 %v159_v7 }
 0x140   :  { %v14470_v1 = vmul.f32 %v14228_v4, %v862_v0  ;;  %v14473_v45 = vmul.f32 %v14236_v28, %v848_v19  ;;  %v845_v15 = vcvt.s32.f32 %v333_v16  ;;  %v861_v11 = vcvt.s32.f32 %v349_v26 }
 0x141   :  { %17096 = vst [vmem:[#allocation53_spill] sm:$0xff] %v14465_v20  ;;  %v14476_v17 = vmul.f32 %v14236_v28, %v864_v58  ;;  %v302_v9 = vunpack.c.2.s8 %v142_v24  ;;  %v318_v0 = vunpack.c.3.s8 %v142_v24  ;;  %v847_v58 = vcvt.s32.f32 %v335_v22 }
 0x142   :  { %17097 = vst [vmem:[#allocation54_spill] sm:$0xff] %v14470_v1  ;;  %17098 = vst [vmem:[#allocation55_spill] sm:$0xff] %v14473_v45  ;;  %v14481_v57 = vmul.f32 %v14224_v54, %v845_v15  ;;  %v14486_v16 = vmul.f32 %v14224_v54, %v861_v11  ;;  %v863_v26 = vcvt.s32.f32 %v351_v25  ;;  %v304_v36 = vunpack.c.2.s8 %v144_v5  ;;  %v255_v1 = vld [vmem:[#allocation11 + $0x3b0] sm:$0xff] }
 0x143   :  { %17099 = vst [vmem:[#allocation56_spill] sm:$0xff] %v14476_v17  ;;  %v814_v8 = vcvt.s32.f32 %v302_v9  ;;  %v830_v7 = vcvt.s32.f32 %v318_v0  ;;  %v320_v6 = vunpack.c.3.s8 %v144_v5  ;;  %v14491_v18 = vmul.f32 %v14232_v55, %v847_v58 }
 0x144   :  { %17100 = vst [vmem:[#allocation57_spill] sm:$0xff] %v14481_v57  ;;  %17101 = vst [vmem:[#allocation58_spill] sm:$0xff] %v14486_v16  ;;  %v14494_v20 = vmul.f32 %v14232_v55, %v863_v26  ;;  %v301_v19 = vunpack.c.2.s8 %v141_v49  ;;  %v816_v9 = vcvt.s32.f32 %v304_v36  ;;  %v317_v45 = vunpack.c.3.s8 %v141_v49 }
 0x145   :  { %17102 = vst [vmem:[#allocation59_spill] sm:$0xff] %v14491_v18  ;;  %v14497_v11 = vmul.f32 %v14228_v4, %v814_v8  ;;  %v14500_v22 = vmul.f32 %v14228_v4, %v830_v7  ;;  %v832_v25 = vcvt.s32.f32 %v320_v6  ;;  %v303_v57 = vunpack.c.2.s8 %v143_v37 }
 0x146   :  { %17103 = vst [vmem:[#allocation60_spill] sm:$0xff] %v14494_v20  ;;  %v813_v15 = vcvt.s32.f32 %v301_v19  ;;  %v14507_v26 = vmul.f32 %v14236_v28, %v816_v9  ;;  %v319_v16 = vunpack.c.3.s8 %v143_v37  ;;  %v829_v7 = vcvt.s32.f32 %v317_v45 }
 0x147   :  { %17104 = vst [vmem:[#allocation61_spill] sm:$0xff] %v14497_v11  ;;  %17105 = vst [vmem:[#allocation62_spill] sm:$0xff] %v14500_v22  ;;  %v14510_v8 = vmul.f32 %v14236_v28, %v832_v25  ;;  %v815_v6 = vcvt.s32.f32 %v303_v57  ;;  %v270_v17 = vunpack.c.0.s8 %v142_v24  ;;  %v286_v18 = vunpack.c.1.s8 %v142_v24 }
 0x148   :  { %17106 = vst [vmem:[#allocation63_spill] sm:$0xff] %v14507_v26  ;;  %v14513_v36 = vmul.f32 %v14224_v54, %v813_v15  ;;  %v831_v0 = vcvt.s32.f32 %v319_v16  ;;  %v272_v20 = vunpack.c.0.s8 %v144_v5  ;;  %v14518_v58 = vmul.f32 %v14224_v54, %v829_v7  ;;  %v254_v26 = vld [vmem:[#allocation11 + $0x3a8] sm:$0xff] }
 0x149   :  { %17107 = vst [vmem:[#allocation64_spill] sm:$0xff] %v14510_v8  ;;  %v14521_v9 = vmul.f32 %v14232_v55, %v815_v6  ;;  %v782_v25 = vcvt.s32.f32 %v270_v17  ;;  %v288_v11 = vunpack.c.1.s8 %v144_v5  ;;  %v798_v15 = vcvt.s32.f32 %v286_v18 }
 0x14a   :  { %17108 = vst [vmem:[#allocation65_spill] sm:$0xff] %v14513_v36  ;;  %17109 = vst [vmem:[#allocation66_spill] sm:$0xff] %v14518_v58  ;;  %v14524_v45 = vmul.f32 %v14232_v55, %v831_v0  ;;  %v784_v57 = vcvt.s32.f32 %v272_v20  ;;  %v269_v22 = vunpack.c.0.s8 %v141_v49  ;;  %v285_v7 = vunpack.c.1.s8 %v141_v49  ;;  %v256_v36 = vld [vmem:[#allocation11 + $0x3b8] sm:$0xff] }
 0x14b   :  { %17110 = vst [vmem:[#allocation67_spill] sm:$0xff] %v14521_v9  ;;  %v14529_v24 = vmul.f32 %v14228_v4, %v782_v25  ;;  %v800_v16 = vcvt.s32.f32 %v288_v11  ;;  %v14534_v5 = vmul.f32 %v14228_v4, %v798_v15  ;;  %v271_v19 = vunpack.c.0.s8 %v143_v37  ;;  %v253_v9 = vld [vmem:[#allocation11 + $0x3a0] sm:$0xff] }
 0x14c   :  { %17111 = vst [vmem:[#allocation68_spill] sm:$0xff] %v14524_v45  ;;  %v14537_v17 = vmul.f32 %v14236_v28, %v784_v57  ;;  %v781_v20 = vcvt.s32.f32 %v269_v22  ;;  %v797_v0 = vcvt.s32.f32 %v285_v7  ;;  %v287_v25 = vunpack.c.1.s8 %v143_v37 }
 0x14d   :  { %17112 = vst [vmem:[#allocation69_spill] sm:$0xff] %v14529_v24  ;;  %17113 = vst [vmem:[#allocation70_spill] sm:$0xff] %v14534_v5  ;;  %v14540_v18 = vmul.f32 %v14236_v28, %v800_v16  ;;  %v750_v6 = vunpack.c.2.s8 %v254_v26  ;;  %v766_v15 = vunpack.c.3.s8 %v254_v26  ;;  %v783_v16 = vcvt.s32.f32 %v271_v19  ;;  %v239_v5 = vld [vmem:[#allocation11 + $0x330] sm:$0xff] }
 0x14e   :  { %17114 = vst [vmem:[#allocation71_spill] sm:$0xff] %v14537_v17  ;;  %v14545_v11 = vmul.f32 %v14224_v54, %v781_v20  ;;  %v14550_v22 = vmul.f32 %v14224_v54, %v797_v0  ;;  %v799_v7 = vcvt.s32.f32 %v287_v25  ;;  %v752_v58 = vunpack.c.2.s8 %v256_v36 }
 0x14f   :  { %17115 = vst [vmem:[#allocation72_spill] sm:$0xff] %v14540_v18  ;;  %v1262_v45 = vcvt.s32.f32 %v750_v6  ;;  %v1278_v37 = vcvt.s32.f32 %v766_v15  ;;  %v768_v8 = vunpack.c.3.s8 %v256_v36  ;;  %v14555_v49 = vmul.f32 %v14232_v55, %v783_v16 }
 0x150   :  { %17116 = vst [vmem:[#allocation73_spill] sm:$0xff] %v14545_v11  ;;  %17117 = vst [vmem:[#allocation74_spill] sm:$0xff] %v14550_v22  ;;  %v14558_v24 = vmul.f32 %v14232_v55, %v799_v7  ;;  %v749_v57 = vunpack.c.2.s8 %v253_v9  ;;  %v1264_v6 = vcvt.s32.f32 %v752_v58  ;;  %v765_v17 = vunpack.c.3.s8 %v253_v9 }
 0x151   :  { %17118 = vst [vmem:[#allocation75_spill] sm:$0xff] %v14555_v49  ;;  %v14561_v0 = vmul.f32 %v14228_v4, %v1262_v45  ;;  %v14564_v19 = vmul.f32 %v14228_v4, %v1278_v37  ;;  %v1280_v25 = vcvt.s32.f32 %v768_v8  ;;  %v751_v11 = vunpack.c.2.s8 %v255_v1 }
 0x152   :  { %17119 = vst [vmem:[#allocation76_spill] sm:$0xff] %v14558_v24  ;;  %v1261_v20 = vcvt.s32.f32 %v749_v57  ;;  %v14571_v7 = vmul.f32 %v14236_v28, %v1264_v6  ;;  %v767_v22 = vunpack.c.3.s8 %v255_v1  ;;  %v1277_v37 = vcvt.s32.f32 %v765_v17 }
 0x153   :  { %17120 = vst [vmem:[#allocation77_spill] sm:$0xff] %v14561_v0  ;;  %17121 = vst [vmem:[#allocation78_spill] sm:$0xff] %v14564_v19  ;;  %v14574_v45 = vmul.f32 %v14236_v28, %v1280_v25  ;;  %v1263_v8 = vcvt.s32.f32 %v751_v11  ;;  %v718_v18 = vunpack.c.0.s8 %v254_v26  ;;  %v734_v49 = vunpack.c.1.s8 %v254_v26 }
 0x154   :  { %17122 = vst [vmem:[#allocation79_spill] sm:$0xff] %v14571_v7  ;;  %v14577_v58 = vmul.f32 %v14224_v54, %v1261_v20  ;;  %v1279_v15 = vcvt.s32.f32 %v767_v22  ;;  %v720_v24 = vunpack.c.0.s8 %v256_v36  ;;  %v14582_v16 = vmul.f32 %v14224_v54, %v1277_v37  ;;  %v238_v7 = vld [vmem:[#allocation11 + $0x328] sm:$0xff] }
 0x155   :  { %17123 = vst [vmem:[#allocation80_spill] sm:$0xff] %v14574_v45  ;;  %v14585_v6 = vmul.f32 %v14232_v55, %v1263_v8  ;;  %v1230_v25 = vcvt.s32.f32 %v718_v18  ;;  %v736_v0 = vunpack.c.1.s8 %v256_v36  ;;  %v1246_v20 = vcvt.s32.f32 %v734_v49 }
 0x156   :  { %17124 = vst [vmem:[#allocation81_spill] sm:$0xff] %v14577_v58  ;;  %17125 = vst [vmem:[#allocation82_spill] sm:$0xff] %v14582_v16  ;;  %v14588_v17 = vmul.f32 %v14232_v55, %v1279_v15  ;;  %v1232_v11 = vcvt.s32.f32 %v720_v24  ;;  %v717_v19 = vunpack.c.0.s8 %v253_v9  ;;  %v733_v37 = vunpack.c.1.s8 %v253_v9  ;;  %v240_v58 = vld [vmem:[#allocation11 + $0x338] sm:$0xff] }
 0x157   :  { %17126 = vst [vmem:[#allocation83_spill] sm:$0xff] %v14585_v6  ;;  %v14593_v26 = vmul.f32 %v14228_v4, %v1230_v25  ;;  %v1248_v22 = vcvt.s32.f32 %v736_v0  ;;  %v14598_v36 = vmul.f32 %v14228_v4, %v1246_v20  ;;  %v719_v57 = vunpack.c.0.s8 %v255_v1  ;;  %v237_v6 = vld [vmem:[#allocation11 + $0x320] sm:$0xff] }
 0x158   :  { %17127 = vst [vmem:[#allocation84_spill] sm:$0xff] %v14588_v17  ;;  %v14601_v18 = vmul.f32 %v14236_v28, %v1232_v11  ;;  %v1229_v24 = vcvt.s32.f32 %v717_v19  ;;  %v1245_v15 = vcvt.s32.f32 %v733_v37  ;;  %v735_v25 = vunpack.c.1.s8 %v255_v1 }
 0x159   :  { %17128 = vst [vmem:[#allocation85_spill] sm:$0xff] %v14593_v26  ;;  %17129 = vst [vmem:[#allocation86_spill] sm:$0xff] %v14598_v36  ;;  %v14604_v49 = vmul.f32 %v14236_v28, %v1248_v22  ;;  %v686_v8 = vunpack.c.2.s8 %v238_v7  ;;  %v702_v20 = vunpack.c.3.s8 %v238_v7  ;;  %v1231_v22 = vcvt.s32.f32 %v719_v57  ;;  %v221_v36 = vld [vmem:[#allocation11 + $0x2a0] sm:$0xff] }
 0x15a   :  { %17130 = vst [vmem:[#allocation87_spill] sm:$0xff] %v14601_v18  ;;  %v14609_v0 = vmul.f32 %v14224_v54, %v1229_v24  ;;  %v14614_v19 = vmul.f32 %v14224_v54, %v1245_v15  ;;  %v1247_v37 = vcvt.s32.f32 %v735_v25  ;;  %v688_v16 = vunpack.c.2.s8 %v240_v58 }
 0x15b   :  { %17131 = vst [vmem:[#allocation88_spill] sm:$0xff] %v14604_v49  ;;  %v1198_v17 = vcvt.s32.f32 %v686_v8  ;;  %v1214_v1 = vcvt.s32.f32 %v702_v20  ;;  %v704_v45 = vunpack.c.3.s8 %v240_v58  ;;  %v14619_v9 = vmul.f32 %v14232_v55, %v1231_v22 }
 0x15c   :  { %17132 = vst [vmem:[#allocation89_spill] sm:$0xff] %v14609_v0  ;;  %17133 = vst [vmem:[#allocation90_spill] sm:$0xff] %v14614_v19  ;;  %v14622_v26 = vmul.f32 %v14232_v55, %v1247_v37  ;;  %v685_v11 = vunpack.c.2.s8 %v237_v6  ;;  %v1200_v8 = vcvt.s32.f32 %v688_v16  ;;  %v701_v18 = vunpack.c.3.s8 %v237_v6 }
 0x15d   :  { %17134 = vst [vmem:[#allocation91_spill] sm:$0xff] %v14619_v9  ;;  %v14625_v15 = vmul.f32 %v14228_v4, %v1198_v17  ;;  %v14628_v57 = vmul.f32 %v14228_v4, %v1214_v1  ;;  %v1216_v25 = vcvt.s32.f32 %v704_v45  ;;  %v687_v0 = vunpack.c.2.s8 %v239_v5 }
 0x15e   :  { %17135 = vst [vmem:[#allocation92_spill] sm:$0xff] %v14622_v26  ;;  %v1197_v24 = vcvt.s32.f32 %v685_v11  ;;  %v14635_v37 = vmul.f32 %v14236_v28, %v1200_v8  ;;  %v703_v19 = vunpack.c.3.s8 %v239_v5  ;;  %v1213_v1 = vcvt.s32.f32 %v701_v18 }
 0x15f   :  { %17136 = vst [vmem:[#allocation93_spill] sm:$0xff] %v14625_v15  ;;  %17137 = vst [vmem:[#allocation94_spill] sm:$0xff] %v14628_v57  ;;  %v14638_v17 = vmul.f32 %v14236_v28, %v1216_v25  ;;  %v1199_v45 = vcvt.s32.f32 %v687_v0  ;;  %v654_v49 = vunpack.c.0.s8 %v238_v7  ;;  %v670_v9 = vunpack.c.1.s8 %v238_v7 }
 0x160   :  { %17138 = vst [vmem:[#allocation95_spill] sm:$0xff] %v14635_v37  ;;  %v14641_v16 = vmul.f32 %v14224_v54, %v1197_v24  ;;  %v1215_v20 = vcvt.s32.f32 %v703_v19  ;;  %v656_v26 = vunpack.c.0.s8 %v240_v58  ;;  %v14646_v22 = vmul.f32 %v14224_v54, %v1213_v1  ;;  %v222_v37 = vld [vmem:[#allocation11 + $0x2a8] sm:$0xff] }
 0x161   :  { %17139 = vst [vmem:[#allocation96_spill] sm:$0xff] %v14638_v17  ;;  %v14649_v8 = vmul.f32 %v14232_v55, %v1199_v45  ;;  %v1166_v25 = vcvt.s32.f32 %v654_v49  ;;  %v672_v15 = vunpack.c.1.s8 %v240_v58  ;;  %v1182_v24 = vcvt.s32.f32 %v670_v9 }
 0x162   :  { %17140 = vst [vmem:[#allocation97_spill] sm:$0xff] %v14641_v16  ;;  %17141 = vst [vmem:[#allocation98_spill] sm:$0xff] %v14646_v22  ;;  %v14652_v18 = vmul.f32 %v14232_v55, %v1215_v20  ;;  %v1168_v0 = vcvt.s32.f32 %v656_v26  ;;  %v653_v57 = vunpack.c.0.s8 %v237_v6  ;;  %v669_v1 = vunpack.c.1.s8 %v237_v6  ;;  %v224_v16 = vld [vmem:[#allocation11 + $0x2b8] sm:$0xff] }
 0x163   :  { %17142 = vst [vmem:[#allocation99_spill] sm:$0xff] %v14649_v8  ;;  %v14657_v7 = vmul.f32 %v14228_v4, %v1166_v25  ;;  %v1184_v19 = vcvt.s32.f32 %v672_v15  ;;  %v14662_v58 = vmul.f32 %v14228_v4, %v1182_v24  ;;  %v655_v11 = vunpack.c.0.s8 %v239_v5 }
 0x164   :  { %17143 = vst [vmem:[#allocation100_spill] sm:$0xff] %v14652_v18  ;;  %v14665_v49 = vmul.f32 %v14236_v28, %v1168_v0  ;;  %v1165_v26 = vcvt.s32.f32 %v653_v57  ;;  %v1181_v20 = vcvt.s32.f32 %v669_v1  ;;  %v671_v25 = vunpack.c.1.s8 %v239_v5 }
 0x165   :  { %17144 = vst [vmem:[#allocation101_spill] sm:$0xff] %v14657_v7  ;;  %17145 = vst [vmem:[#allocation102_spill] sm:$0xff] %v14662_v58  ;;  %v14668_v9 = vmul.f32 %v14236_v28, %v1184_v19  ;;  %v622_v45 = vunpack.c.2.s8 %v222_v37  ;;  %v638_v24 = vunpack.c.3.s8 %v222_v37  ;;  %v1167_v19 = vcvt.s32.f32 %v655_v11 }
 0x166   :  { %17146 = vst [vmem:[#allocation103_spill] sm:$0xff] %v14665_v49  ;;  %v14673_v15 = vmul.f32 %v14224_v54, %v1165_v26  ;;  %v14678_v57 = vmul.f32 %v14224_v54, %v1181_v20  ;;  %v1183_v1 = vcvt.s32.f32 %v671_v25  ;;  %v624_v17 = vunpack.c.2.s8 %v224_v16  ;;  %v223_v49 = vld [vmem:[#allocation11 + $0x2b0] sm:$0xff] }
 0x167   :  { %17147 = vst [vmem:[#allocation104_spill] sm:$0xff] %v14668_v9  ;;  %v1134_v5 = vcvt.s32.f32 %v622_v45  ;;  %v1150_v22 = vcvt.s32.f32 %v638_v24  ;;  %v14683_v6 = vmul.f32 %v14232_v55, %v1167_v19  ;;  %v640_v0 = vunpack.c.3.s8 %v224_v16 }
 0x168   :  { %17148 = vst [vmem:[#allocation105_spill] sm:$0xff] %v14673_v15  ;;  %17149 = vst [vmem:[#allocation106_spill] sm:$0xff] %v14678_v57  ;;  %v14686_v7 = vmul.f32 %v14232_v55, %v1183_v1  ;;  %v1136_v45 = vcvt.s32.f32 %v624_v17  ;;  %v621_v26 = vunpack.c.2.s8 %v221_v36  ;;  %v637_v19 = vunpack.c.3.s8 %v221_v36 }
 0x169   :  { %17150 = vst [vmem:[#allocation107_spill] sm:$0xff] %v14683_v6  ;;  %v14689_v11 = vmul.f32 %v14228_v4, %v1134_v5  ;;  %v1152_v24 = vcvt.s32.f32 %v640_v0  ;;  %v639_v17 = vunpack.c.3.s8 %v223_v49  ;;  %v590_v58 = vunpack.c.0.s8 %v222_v37 }
 0x16a   :  { %17151 = vst [vmem:[#allocation108_spill] sm:$0xff] %v14686_v7  ;;  %v14699_v15 = vmul.f32 %v14236_v28, %v1136_v45  ;;  %v1149_v57 = vcvt.s32.f32 %v637_v19  ;;  %v606_v25 = vunpack.c.1.s8 %v222_v37  ;;  %v592_v0 = vunpack.c.0.s8 %v224_v16  ;;  %v208_v37 = vld [vmem:[#allocation11 + $0x238] sm:$0xff] }
 0x16b   :  { %17152 = vst [vmem:[#allocation109_spill] sm:$0xff] %v14689_v11  ;;  %v14702_v5 = vmul.f32 %v14236_v28, %v1152_v24  ;;  %v1151_v1 = vcvt.s32.f32 %v639_v17  ;;  %v608_v11 = vunpack.c.1.s8 %v224_v16  ;;  %v544_v47 = vunpack.c.1.s8 %v208_v37 }
 0x16c   :  { %17154 = vst [vmem:[#allocation111_spill] sm:$0xff] %v14699_v15  ;;  %v14710_v45 = vmul.f32 %v14224_v54, %v1149_v57  ;;  %v1118_v19 = vcvt.s32.f32 %v606_v25  ;;  %v589_v15 = vunpack.c.0.s8 %v221_v36 }
 0x16d   :  { %17155 = vst [vmem:[#allocation112_spill] sm:$0xff] %v14702_v5  ;;  %v1120_v17 = vcvt.s32.f32 %v608_v11  ;;  %v206_v5 = vld [vmem:[#allocation11 + $0x228] sm:$0xff] }
 0x16e   :  { %17157 = vst [vmem:[#allocation114_spill] sm:$0xff] %v14710_v45  ;;  %v14724_v57 = vmul.f32 %v14228_v4, %v1118_v19  ;;  %v1101_v25 = vcvt.s32.f32 %v589_v15  ;;  %v558_v45 = vunpack.c.2.s8 %v206_v5  ;;  %v574_v16 = vunpack.c.3.s8 %v206_v5  ;;  %v207_v15 = vld [vmem:[#allocation11 + $0x230] sm:$0xff] }
 0x16f   :  { %v575_v7 = vunpack.c.3.s8 %v207_v15 }
 0x170   :  { %17161 = vst [vmem:[#allocation118_spill] sm:$0xff] %v14724_v57 }
 0x180   :  { %v3722_v8 = vpop.xlane.xlu0 %3721 }
 0x181   :  { %v3723_v18 = vmul.f32 0.00390625, %v3722_v8  ;;  %v14692_v8 = vmul.f32 %v14228_v4, %v1150_v22  ;;  %v1133_v22 = vcvt.s32.f32 %v621_v26  ;;  %v1102_v26 = vcvt.s32.f32 %v590_v58 }
 0x183   :  { %v3724_v20 = vadd.f32 1e-05, %v3723_v18  ;;  %17153 = vst [vmem:[#allocation110_spill] sm:$0xff] %v14692_v8  ;;  %v623_v18 = vunpack.c.2.s8 %v223_v49  ;;  %v14707_v6 = vmul.f32 %v14224_v54, %v1133_v22  ;;  %v14721_v22 = vmul.f32 %v14228_v4, %v1102_v26 }
 0x184   :  { %v14734_v26 = vmul.f32 %v14236_v28, %v1120_v17 }
 0x185   :  { %13743 = vrsqrt.f32 %v3724_v20  ;;  %v1135_v9 = vcvt.s32.f32 %v623_v18  ;;  %17156 = vst [vmem:[#allocation113_spill] sm:$0xff] %v14707_v6  ;;  %v14718_v18 = vmul.f32 %v14232_v55, %v1151_v1  ;;  %v1104_v20 = vcvt.s32.f32 %v592_v0  ;;  %17160 = vst [vmem:[#allocation117_spill] sm:$0xff] %v14721_v22 }
 0x186   :  { %v591_v1 = vunpack.c.0.s8 %v223_v49  ;;  %17163 = vst [vmem:[#allocation120_spill] sm:$0xff] %v14734_v26  ;;  %v607_v6 = vunpack.c.1.s8 %v223_v49  ;;  %v560_v0 = vunpack.c.2.s8 %v208_v37  ;;  %v1086_v49 = vcvt.s32.f32 %v574_v16 }
 0x187   :  { %v14713_v24 = vmul.f32 %v14232_v55, %v1135_v9  ;;  %17159 = vst [vmem:[#allocation116_spill] sm:$0xff] %v14718_v18  ;;  %v605_v9 = vunpack.c.1.s8 %v221_v36  ;;  %v14729_v58 = vmul.f32 %v14236_v28, %v1104_v20  ;;  %v14737_v36 = vmul.f32 %v14224_v54, %v1101_v25 }
 0x188   :  { %v1103_v11 = vcvt.s32.f32 %v591_v1  ;;  %v1119_v18 = vcvt.s32.f32 %v607_v6  ;;  %v576_v22 = vunpack.c.3.s8 %v208_v37  ;;  %v1072_v57 = vcvt.s32.f32 %v560_v0 }
 0x189   :  { %17158 = vst [vmem:[#allocation115_spill] sm:$0xff] %v14713_v24  ;;  %17162 = vst [vmem:[#allocation119_spill] sm:$0xff] %v14729_v58  ;;  %v1117_v19 = vcvt.s32.f32 %v605_v9  ;;  %v205_v24 = vld [vmem:[#allocation11 + $0x220] sm:$0xff]  ;;  %v1070_v9 = vcvt.s32.f32 %v558_v45  ;;  %v14756_v6 = vmul.f32 %v14228_v4, %v1086_v49  ;;  %v559_v26 = vunpack.c.2.s8 %v207_v15 }
 0x18a   :  { %17164 = vst [vmem:[#allocation121_spill] sm:$0xff] %v14737_v36  ;;  %v14745_v17 = vmul.f32 %v14232_v55, %v1103_v11  ;;  %v14750_v1 = vmul.f32 %v14232_v55, %v1119_v18  ;;  %v557_v8 = vunpack.c.2.s8 %v205_v24  ;;  %v1088_v11 = vcvt.s32.f32 %v576_v22  ;;  %v3733_v36 = vld [vmem:[#allocation6] sm:$0x3] }
 0x18b   :  { %v14742_v20 = vmul.f32 %v14224_v54, %v1117_v19  ;;  %v14753_v19 = vmul.f32 %v14228_v4, %v1070_v9  ;;  %17169 = vst [vmem:[#allocation126_spill] sm:$0xff] %v14756_v6  ;;  %v573_v45 = vunpack.c.3.s8 %v205_v24  ;;  %v14762_v18 = vmul.f32 %v14236_v28, %v1072_v57 }
 0x18c   :  { %17166 = vst [vmem:[#allocation123_spill] sm:$0xff] %v14745_v17  ;;  %17167 = vst [vmem:[#allocation124_spill] sm:$0xff] %v14750_v1  ;;  %v1069_v0 = vcvt.s32.f32 %v557_v8  ;;  %v14767_v9 = vmul.f32 %v14236_v28, %v1088_v11  ;;  %v526_v25 = vunpack.c.0.s8 %v206_v5  ;;  %v3735_v17 = vld [vmem:[#allocation9] sm:$0x3]  ;;  %v1087_v6 = vcvt.s32.f32 %v575_v7 }
 0x18d   :  { %17165 = vst [vmem:[#allocation122_spill] sm:$0xff] %v14742_v20  ;;  %17168 = vst [vmem:[#allocation125_spill] sm:$0xff] %v14753_v19  ;;  %v1085_v49 = vcvt.s32.f32 %v573_v45  ;;  %v1071_v20 = vcvt.s32.f32 %v559_v26  ;;  %v542_v19 = vunpack.c.1.s8 %v206_v5  ;;  %v528_v1 = vunpack.c.0.s8 %v208_v37  ;;  %v14833_v37 = vld [vmem:[#allocation11 + $0x1d0] sm:$0xff] }
 0x18e   :  { %v1038_v45 = vcvt.s32.f32 %v526_v25  ;;  %v14784_v8 = vmul.f32 %v14232_v55, %v1087_v6  ;;  %v1056_v26 = vcvt.s32.f32 %v544_v47  ;;  %v541_v25 = vunpack.c.1.s8 %v205_v24  ;;  %v14806_v6 = vld [vmem:[#allocation11 + $0x1d8] sm:$0xff] }
 0x18f   :  { %v14776_v57 = vmul.f32 %v14224_v54, %v1085_v49  ;;  %v1040_v5 = vcvt.s32.f32 %v528_v1 }
 0x190   :  { %v14787_v49 = vmul.f32 %v14228_v4, %v1038_v45  ;;  %v527_v45 = vunpack.c.0.s8 %v207_v15 }
 0x192   :  { %v13744_v58 = vpop.eup %13743 }
 0x193   :  { %v3730_v16 = vrot.slane %v13744_v58, %v14048_v2  ;;  %v14771_v58 = vmul.f32 %v14224_v54, %v1069_v0  ;;  %v1054_v0 = vcvt.s32.f32 %v542_v19  ;;  %v14799_v19 = vld [vmem:[#allocation11 + $0x1c8] sm:$0xff] }
 0x195   :  { %v3732_v22 = vmul.f32 %v3730_v16, %v14214_v46  ;;  %v14781_v16 = vmul.f32 %v14232_v55, %v1071_v20  ;;  %v14790_v7 = vmul.f32 %v14228_v4, %v1054_v0  ;;  %v14804_v4 = vmul.f32 %v14236_v28, %v1056_v26 }
 0x196   :  { %v543_v0 = vunpack.c.1.s8 %v207_v15  ;;  %v498_v26 = vunpack.c.2.s8 %v14799_v19  ;;  %v514_v15 = vunpack.c.3.s8 %v14799_v19 }
 0x197   :  { %v3734_v11 = vmul.f32 %v3733_v36, %v3732_v22  ;;  %v525_v36 = vunpack.c.0.s8 %v205_v24  ;;  %v1053_v24 = vcvt.s32.f32 %v541_v25 }
 0x198   :  { %v1055_v25 = vcvt.s32.f32 %v543_v0  ;;  %v17173_v0 = vpack.c.bf16 %v14332_v23, %v14329_v43  ;;  %v17174_v23 = vpack.c.bf16 %v14342_v56, %v14337_v48 }
 0x199   :  { %v3736_v39 = vadd.f32 %v3735_v17, %v3734_v11  ;;  %v14797_v17 = vmul.f32 %v14236_v28, %v1040_v5  ;;  %v1037_v47 = vcvt.s32.f32 %v525_v36  ;;  %v14812_v5 = vld [vmem:[#allocation11 + $0x1c0] sm:$0xff]  ;;  %v14820_v28 = vmul.f32 %v14224_v54, %v1053_v24 }
 0x19a   :  { %v1039_v36 = vcvt.s32.f32 %v527_v45  ;;  %v497_v24 = vunpack.c.2.s8 %v14812_v5  ;;  %v17172_v45 = vpack.c.bf16 %v14326_v14, %v14323_v31  ;;  %v513_v14 = vunpack.c.3.s8 %v14812_v5 }
 0x19b   :  { %v3741_v22 = vrot.slane %v3736_v39, %v14048_v2  ;;  %v3745_v20 = vrot.slane %v3736_v39, %v14051_v3  ;;  %v14817_v1 = vmul.f32 %v14224_v54, %v1037_v47  ;;  %v516_v47 = vunpack.c.3.s8 %v14806_v6 }
 0x19c   :  { %v14842_v46 = vmul.f32 %v14232_v55, %v1039_v36  ;;  %v14845_v54 = vmul.f32 %v14232_v55, %v1055_v25  ;;  %v1009_v43 = vcvt.s32.f32 %v497_v24  ;;  %v17175_v55 = vpack.c.bf16 %v14348_v32, %v14345_v29  ;;  %v17219_v36 = vld [vmem:[#allocation64_spill] sm:$0xff] }
 0x19d   :  { %v14808_v11 = vpack.c.bf16 %v3741_v22, %v3741_v22  ;;  %v14810_v39 = vpack.c.bf16 %v3745_v20, %v3745_v20  ;;  %v500_v22 = vunpack.c.2.s8 %v14806_v6  ;;  %v1010_v20 = vcvt.s32.f32 %v498_v26 }
 0x19e   :  { %v1026_v26 = vcvt.s32.f32 %v514_v15  ;;  %v1028_v31 = vcvt.s32.f32 %v516_v47  ;;  %v1025_v48 = vcvt.s32.f32 %v513_v14  ;;  %v14872_v56 = vmul.f32 %v14240_v61, %v1009_v43 }
 0x19f   :  { %17170 = vst [vmem:[#allocation127_spill] sm:$0xff] %v14808_v11  ;;  %17171 = vst [vmem:[#allocation128_spill] sm:$0xff] %v14810_v39  ;;  %5318 = vmatprep.mubr.bf16.mxu0 %v14810_v39  ;;  %5359 = vmatprep.mubr.bf16.mxu1 %v14810_v39  ;;  %v1012_v2 = vcvt.s32.f32 %v500_v22  ;;  %v14850_v3 = vmul.f32 %v14244_v62, %v1010_v20  ;;  %v499_v22 = vunpack.c.2.s8 %v14833_v37  ;;  %v515_v29 = vunpack.c.3.s8 %v14833_v37 }
 0x1a0   :  { %5319 = vmatmul.mubr.bf16.vlgmr.msra.gmra.mxu0 %v14808_v11  ;;  %5360 = vmatmul.mubr.bf16.vlgmr.msra.gmra.mxu1 %v14808_v11  ;;  %v14862_v25 = vmul.f32 %v14244_v62, %v1026_v26  ;;  %v14869_v20 = vmul.f32 %v14252_v21, %v1028_v31  ;;  %v17176_v32 = vpack.c.bf16 %v14358_v35, %v14353_v30  ;;  %v468_v31 = vunpack.c.0.s8 %v14806_v6 }
 0x1a1   :  { %5369 = vmatpush1.bf16.msra.mxu0 %v17172_v45  ;;  %5410 = vmatpush1.bf16.msra.mxu1 %v17173_v0  ;;  %v14865_v15 = vmul.f32 %v14252_v21, %v1012_v2  ;;  %v17177_v47 = vpack.c.bf16 %v14366_v42, %v14363_v27  ;;  %v1011_v24 = vcvt.s32.f32 %v499_v22  ;;  %v466_v45 = vunpack.c.0.s8 %v14799_v19  ;;  %v17217_v2 = vld [vmem:[#allocation61_spill] sm:$0xff] }
 0x1a2   :  { %5400 = vmatprep.mubr.bf16.mxu0 %v14810_v39  ;;  %5441 = vmatprep.mubr.bf16.mxu1 %v14810_v39  ;;  %v482_v0 = vunpack.c.1.s8 %v14799_v19  ;;  %v17178_v26 = vpack.c.bf16 %v14372_v40, %v14369_v33  ;;  %v17179_v30 = vpack.c.bf16 %v14382_v60, %v14379_v59  ;;  %v14894_v27 = vmul.f32 %v14240_v61, %v1025_v48  ;;  %v17213_v40 = vld [vmem:[#allocation59_spill] sm:$0xff] }
 0x1a3   :  { %5370 = vmatprep.subr.bf16.mxu0 %v17174_v23  ;;  %5411 = vmatprep.subr.bf16.mxu1 %v17175_v55  ;;  %v1027_v42 = vcvt.s32.f32 %v515_v29  ;;  %v14898_v14 = vmul.f32 %v14248_v10, %v1011_v24  ;;  %v978_v19 = vcvt.s32.f32 %v466_v45  ;;  %v484_v33 = vunpack.c.1.s8 %v14806_v6 }
 0x1a4   :  { %v994_v43 = vcvt.s32.f32 %v482_v0  ;;  %v980_v60 = vcvt.s32.f32 %v468_v31  ;;  %v465_v23 = vunpack.c.0.s8 %v14812_v5  ;;  %v17180_v55 = vpack.c.bf16 %v14390_v13, %v14385_v34  ;;  %v14932_v0 = vld [vmem:[#allocation11 + $0x158] sm:$0xff]  ;;  %v14943_v31 = vld [vmem:[#allocation11 + $0x140] sm:$0xff]  ;;  %v17203_v34 = vld [vmem:[#allocation56_spill] sm:$0xff] }
 0x1a5   :  { %5371 = vmatpush1.bf16.msra.mxu0 %v17176_v32  ;;  %5412 = vmatpush1.bf16.msra.mxu1 %v17177_v47  ;;  %v14904_v59 = vmul.f32 %v14248_v10, %v1027_v42  ;;  %v17181_v22 = vpack.c.bf16 %v14396_v51, %v14393_v41  ;;  %v14914_v48 = vmul.f32 %v14244_v62, %v978_v19  ;;  %v996_v29 = vcvt.s32.f32 %v484_v33  ;;  %v178_v47 = vld [vmem:[#allocation11 + $0x148] sm:$0xff] }
 0x1a6   :  { %5372 = vmatprep.subr.bf16.mxu0 %v17178_v26  ;;  %5413 = vmatprep.subr.bf16.mxu1 %v17179_v30  ;;  %v14917_v6 = vmul.f32 %v14244_v62, %v994_v43  ;;  %v481_v32 = vunpack.c.1.s8 %v14812_v5  ;;  %v17182_v24 = vpack.c.bf16 %v14406_v53, %v14401_v44  ;;  %v17183_v13 = vpack.c.bf16 %v14412_v52, %v14409_v63  ;;  %v17185_v43 = vld [vmem:[#allocation44_spill] sm:$0xff] }
 0x1a7   :  { %v14929_v41 = vmul.f32 %v14252_v21, %v980_v60  ;;  %v977_v51 = vcvt.s32.f32 %v465_v23  ;;  %v467_v45 = vunpack.c.0.s8 %v14833_v37  ;;  %v14937_v44 = vmul.f32 %v14252_v21, %v996_v29  ;;  %v17188_v29 = vld [vmem:[#allocation45_spill] sm:$0xff] }
 0x1a8   :  { %v993_v53 = vcvt.s32.f32 %v481_v32  ;;  %v483_v63 = vunpack.c.1.s8 %v14833_v37  ;;  %v434_v30 = vunpack.c.2.s8 %v178_v47  ;;  %v450_v42 = vunpack.c.3.s8 %v178_v47  ;;  %v17201_v60 = vld [vmem:[#allocation53_spill] sm:$0xff] }
 0x1a9   :  { %5373 = vmatpush1.bf16.msra.mxu0 %v17180_v55  ;;  %5414 = vmatpush1.bf16.msra.mxu1 %v17181_v22  ;;  %v14941_v52 = vmul.f32 %v14240_v61, %v977_v51  ;;  %v979_v26 = vcvt.s32.f32 %v467_v45  ;;  %v17184_v19 = vpack.c.bf16 %v14422_v50, %v14417_v38  ;;  %v17186_v33 = vpack.c.bf16 %v14430_v12, %v17185_v43  ;;  %v17187_v22 = vld [vmem:[#allocation46_spill] sm:$0xff]  ;;  %v17191_v38 = vld [vmem:[#allocation47_spill] sm:$0xff] }
 0x1aa   :  { %5374 = vmatprep.subr.bf16.mxu0 %v17182_v24  ;;  %5415 = vmatprep.subr.bf16.mxu1 %v17183_v13  ;;  %v14954_v37 = vmul.f32 %v14240_v61, %v993_v53  ;;  %v995_v23 = vcvt.s32.f32 %v483_v63  ;;  %v436_v55 = vunpack.c.2.s8 %v14932_v0  ;;  %v17189_v32 = vpack.c.bf16 %v17187_v22, %v17188_v29  ;;  %v17190_v24 = vld [vmem:[#allocation48_spill] sm:$0xff]  ;;  %v17193_v29 = vld [vmem:[#allocation50_spill] sm:$0xff] }
 0x1ab   :  { %v17192_v50 = vpack.c.bf16 %v17190_v24, %v17191_v38  ;;  %v14964_v12 = vmul.f32 %v14248_v10, %v979_v26  ;;  %v946_v13 = vcvt.s32.f32 %v434_v30  ;;  %v962_v51 = vcvt.s32.f32 %v450_v42  ;;  %v14967_v53 = vld [vmem:[#allocation11 + $0x150] sm:$0xff] }
 0x1ac   :  { %v452_v45 = vunpack.c.3.s8 %v14932_v0  ;;  %v948_v43 = vcvt.s32.f32 %v436_v55  ;;  %v449_v42 = vunpack.c.3.s8 %v14943_v31  ;;  %v17196_v38 = vld [vmem:[#allocation52_spill] sm:$0xff]  ;;  %v402_v55 = vunpack.c.0.s8 %v178_v47 }
 0x1ad   :  { %5375 = vmatpush1.bf16.msra.mxu0 %v17184_v19  ;;  %5416 = vmatpush1.bf16.msra.mxu1 %v17186_v33  ;;  %v14972_v19 = vmul.f32 %v14248_v10, %v995_v23  ;;  %v433_v33 = vunpack.c.2.s8 %v14943_v31  ;;  %v14976_v22 = vmul.f32 %v14244_v62, %v946_v13  ;;  %v14979_v26 = vmul.f32 %v14244_v62, %v962_v51 }
 0x1ae   :  { %5376 = vmatprep.subr.bf16.mxu0 %v17189_v32  ;;  %5417 = vmatprep.subr.bf16.mxu1 %v17192_v50  ;;  %v964_v30 = vcvt.s32.f32 %v452_v45  ;;  %v17194_v32 = vld [vmem:[#allocation49_spill] sm:$0xff]  ;;  %v17197_v50 = vld [vmem:[#allocation51_spill] sm:$0xff]  ;;  %v14991_v13 = vmul.f32 %v14252_v21, %v948_v43  ;;  %v435_v51 = vunpack.c.2.s8 %v14967_v53  ;;  %v17200_v45 = vld [vmem:[#allocation54_spill] sm:$0xff]  ;;  %v451_v43 = vunpack.c.3.s8 %v14967_v53 }
 0x1af   :  { %v17195_v24 = vpack.c.bf16 %v17193_v29, %v17194_v32  ;;  %v17198_v23 = vpack.c.bf16 %v17196_v38, %v17197_v50  ;;  %v945_v63 = vcvt.s32.f32 %v433_v33  ;;  %v17202_v5 = vpack.c.bf16 %v17200_v45, %v17201_v60  ;;  %v17204_v29 = vld [vmem:[#allocation55_spill] sm:$0xff] }
 0x1b0   :  { %17199 = vst [vmem:[#allocation44_spill] sm:$0xff] %v14991_v13  ;;  %v17205_v32 = vpack.c.bf16 %v17203_v34, %v17204_v29  ;;  %v15003_v38 = vmul.f32 %v14252_v21, %v964_v30  ;;  %v961_v50 = vcvt.s32.f32 %v449_v42  ;;  %v418_v60 = vunpack.c.1.s8 %v178_v47  ;;  %v17209_v30 = vld [vmem:[#allocation58_spill] sm:$0xff]  ;;  %v17220_v13 = vld [vmem:[#allocation63_spill] sm:$0xff] }
 0x1b1   :  { %5377 = vmatpush1.bf16.msra.mxu0 %v17195_v24  ;;  %5418 = vmatpush1.bf16.msra.mxu1 %v17198_v23  ;;  %v15007_v33 = vmul.f32 %v14240_v61, %v945_v63  ;;  %v947_v23 = vcvt.s32.f32 %v435_v51  ;;  %v963_v45 = vcvt.s32.f32 %v451_v43  ;;  %v404_v29 = vunpack.c.0.s8 %v14932_v0  ;;  %v17212_v24 = vld [vmem:[#allocation60_spill] sm:$0xff] }
 0x1b2   :  { %5378 = vmatprep.subr.bf16.mxu0 %v17202_v5  ;;  %5419 = vmatprep.subr.bf16.mxu1 %v17205_v32  ;;  %17206 = vst [vmem:[#allocation46_spill] sm:$0xff] %v15003_v38  ;;  %v15012_v34 = vmul.f32 %v14240_v61, %v961_v50  ;;  %v17210_v32 = vld [vmem:[#allocation57_spill] sm:$0xff]  ;;  %v17214_v63 = vpack.c.bf16 %v17212_v24, %v17213_v40  ;;  %v914_v47 = vcvt.s32.f32 %v402_v55  ;;  %v930_v35 = vcvt.s32.f32 %v418_v60  ;;  %v17216_v50 = vld [vmem:[#allocation62_spill] sm:$0xff] }
 0x1b3   :  { %17207 = vst [vmem:[#allocation45_spill] sm:$0xff] %v15007_v33  ;;  %v17211_v42 = vpack.c.bf16 %v17209_v30, %v17210_v32  ;;  %v15022_v51 = vmul.f32 %v14248_v10, %v947_v23  ;;  %v420_v5 = vunpack.c.1.s8 %v14932_v0  ;;  %v17218_v43 = vpack.c.bf16 %v17216_v50, %v17217_v2  ;;  %v15050_v32 = vld [vmem:[#allocation11 + $0xd8] sm:$0xff] }
 0x1b4   :  { %17208 = vst [vmem:[#allocation48_spill] sm:$0xff] %v15012_v34  ;;  %v17221_v38 = vpack.c.bf16 %v17219_v36, %v17220_v13  ;;  %v15034_v40 = vmul.f32 %v14248_v10, %v963_v45  ;;  %v916_v24 = vcvt.s32.f32 %v404_v29  ;;  %v401_v55 = vunpack.c.0.s8 %v14943_v31  ;;  %v162_v36 = vld [vmem:[#allocation11 + $0xc8] sm:$0xff]  ;;  %v17233_v13 = vld [vmem:[#allocation70_spill] sm:$0xff]  ;;  %v17234_v30 = vld [vmem:[#allocation69_spill] sm:$0xff] }
 0x1b5   :  { %5379 = vmatpush1.bf16.msra.mxu0 %v17211_v42  ;;  %5420 = vmatpush1.bf16.msra.mxu1 %v17214_v63  ;;  %17215 = vst [vmem:[#allocation47_spill] sm:$0xff] %v15022_v51  ;;  %v15038_v23 = vmul.f32 %v14244_v62, %v914_v47  ;;  %v15041_v0 = vmul.f32 %v14244_v62, %v930_v35  ;;  %v932_v2 = vcvt.s32.f32 %v420_v5  ;;  %v417_v60 = vunpack.c.1.s8 %v14943_v31  ;;  %v17226_v42 = vld [vmem:[#allocation66_spill] sm:$0xff]  ;;  %v17227_v63 = vld [vmem:[#allocation65_spill] sm:$0xff]  ;;  %v17229_v35 = vld [vmem:[#allocation68_spill] sm:$0xff] }
 0x1b6   :  { %5380 = vmatprep.subr.bf16.mxu0 %v17218_v43  ;;  %5421 = vmatprep.subr.bf16.mxu1 %v17221_v38  ;;  %17222 = vst [vmem:[#allocation50_spill] sm:$0xff] %v15034_v40  ;;  %v15047_v38 = vmul.f32 %v14252_v21, %v916_v24  ;;  %v913_v45 = vcvt.s32.f32 %v401_v55  ;;  %v403_v29 = vunpack.c.0.s8 %v14967_v53  ;;  %v17228_v47 = vpack.c.bf16 %v17226_v42, %v17227_v63  ;;  %v17230_v5 = vld [vmem:[#allocation67_spill] sm:$0xff]  ;;  %v17236_v40 = vld [vmem:[#allocation72_spill] sm:$0xff] }
 0x1b7   :  { %17223 = vst [vmem:[#allocation49_spill] sm:$0xff] %v15038_v23  ;;  %17224 = vst [vmem:[#allocation52_spill] sm:$0xff] %v15041_v0  ;;  %v17231_v50 = vpack.c.bf16 %v17229_v35, %v17230_v5  ;;  %v15061_v43 = vmul.f32 %v14252_v21, %v932_v2  ;;  %v929_v24 = vcvt.s32.f32 %v417_v60  ;;  %v419_v55 = vunpack.c.1.s8 %v14967_v53  ;;  %v17237_v42 = vld [vmem:[#allocation71_spill] sm:$0xff]  ;;  %v17245_v2 = vld [vmem:[#allocation76_spill] sm:$0xff] }
 0x1b8   :  { %17225 = vst [vmem:[#allocation51_spill] sm:$0xff] %v15047_v38  ;;  %v17235_v51 = vpack.c.bf16 %v17233_v13, %v17234_v30  ;;  %v17238_v63 = vpack.c.bf16 %v17236_v40, %v17237_v42  ;;  %v915_v35 = vcvt.s32.f32 %v403_v29  ;;  %v370_v5 = vunpack.c.2.s8 %v162_v36  ;;  %v15073_v31 = vld [vmem:[#allocation11 + $0xc0] sm:$0xff]  ;;  %v15085_v29 = vld [vmem:[#allocation11 + $0xd0] sm:$0xff] }
 0x1b9   :  { %5381 = vmatpush1.bf16.msra.mxu0 %v17228_v47  ;;  %5422 = vmatpush1.bf16.msra.mxu1 %v17231_v50  ;;  %17232 = vst [vmem:[#allocation54_spill] sm:$0xff] %v15061_v43  ;;  %v15071_v47 = vmul.f32 %v14240_v61, %v913_v45  ;;  %v386_v50 = vunpack.c.3.s8 %v162_v36  ;;  %v15078_v53 = vmul.f32 %v14240_v61, %v929_v24  ;;  %v931_v30 = vcvt.s32.f32 %v419_v55  ;;  %v17242_v42 = vld [vmem:[#allocation74_spill] sm:$0xff]  ;;  %v17246_v38 = vld [vmem:[#allocation75_spill] sm:$0xff]  ;;  %v17250_v0 = vld [vmem:[#allocation77_spill] sm:$0xff] }
 0x1ba   :  { %5382 = vmatprep.subr.bf16.mxu0 %v17235_v51  ;;  %5423 = vmatprep.subr.bf16.mxu1 %v17238_v63  ;;  %v372_v51 = vunpack.c.2.s8 %v15050_v32  ;;  %v15082_v40 = vmul.f32 %v14248_v10, %v915_v35  ;;  %v882_v60 = vcvt.s32.f32 %v370_v5  ;;  %v388_v45 = vunpack.c.3.s8 %v15050_v32  ;;  %v17243_v63 = vld [vmem:[#allocation73_spill] sm:$0xff]  ;;  %v17249_v43 = vld [vmem:[#allocation78_spill] sm:$0xff]  ;;  %v17252_v34 = vld [vmem:[#allocation80_spill] sm:$0xff] }
 0x1bb   :  { %17239 = vst [vmem:[#allocation53_spill] sm:$0xff] %v15071_v47  ;;  %17240 = vst [vmem:[#allocation56_spill] sm:$0xff] %v15078_v53  ;;  %v898_v13 = vcvt.s32.f32 %v386_v50  ;;  %v17244_v23 = vpack.c.bf16 %v17242_v42, %v17243_v63  ;;  %v17247_v24 = vpack.c.bf16 %v17245_v2, %v17246_v38  ;;  %v15096_v35 = vmul.f32 %v14248_v10, %v931_v30  ;;  %v17253_v42 = vld [vmem:[#allocation79_spill] sm:$0xff] }
 0x1bc   :  { %17241 = vst [vmem:[#allocation55_spill] sm:$0xff] %v15082_v40  ;;  %v884_v5 = vcvt.s32.f32 %v372_v51  ;;  %v369_v50 = vunpack.c.2.s8 %v15073_v31  ;;  %v17251_v33 = vpack.c.bf16 %v17249_v43, %v17250_v0  ;;  %v15106_v38 = vmul.f32 %v14244_v62, %v882_v60  ;;  %v17262_v51 = vld [vmem:[#allocation84_spill] sm:$0xff]  ;;  %v17263_v55 = vld [vmem:[#allocation83_spill] sm:$0xff] }
 0x1bd   :  { %5383 = vmatpush1.bf16.msra.mxu0 %v17244_v23  ;;  %5424 = vmatpush1.bf16.msra.mxu1 %v17247_v24  ;;  %17248 = vst [vmem:[#allocation58_spill] sm:$0xff] %v15096_v35  ;;  %v17254_v23 = vpack.c.bf16 %v17252_v34, %v17253_v42  ;;  %v15109_v2 = vmul.f32 %v14244_v62, %v898_v13  ;;  %v900_v63 = vcvt.s32.f32 %v388_v45  ;;  %v385_v30 = vunpack.c.3.s8 %v15073_v31  ;;  %v17259_v45 = vld [vmem:[#allocation82_spill] sm:$0xff]  ;;  %v17260_v42 = vld [vmem:[#allocation81_spill] sm:$0xff]  ;;  %v17270_v47 = vld [vmem:[#allocation87_spill] sm:$0xff] }
 0x1be   :  { %5384 = vmatprep.subr.bf16.mxu0 %v17251_v33  ;;  %17255 = vst [vmem:[#allocation57_spill] sm:$0xff] %v15106_v38  ;;  %v15115_v24 = vmul.f32 %v14252_v21, %v884_v5  ;;  %v881_v33 = vcvt.s32.f32 %v369_v50  ;;  %v371_v0 = vunpack.c.2.s8 %v15085_v29  ;;  %v387_v13 = vunpack.c.3.s8 %v15085_v29  ;;  %v17266_v38 = vld [vmem:[#allocation86_spill] sm:$0xff] }
 0x1bf   :  { %5425 = vmatprep.subr.bf16.mxu1 %v17254_v23  ;;  %17256 = vst [vmem:[#allocation60_spill] sm:$0xff] %v15109_v2  ;;  %v15121_v43 = vmul.f32 %v14252_v21, %v900_v63  ;;  %v897_v60 = vcvt.s32.f32 %v385_v30  ;;  %v17261_v23 = vpack.c.bf16 %v17259_v45, %v17260_v42  ;;  %v17264_v5 = vpack.c.bf16 %v17262_v51, %v17263_v55  ;;  %v17267_v63 = vld [vmem:[#allocation85_spill] sm:$0xff]  ;;  %v17269_v30 = vld [vmem:[#allocation88_spill] sm:$0xff] }
 0x1c0   :  { %17257 = vst [vmem:[#allocation59_spill] sm:$0xff] %v15115_v24  ;;  %v15131_v50 = vmul.f32 %v14240_v61, %v881_v33  ;;  %v883_v40 = vcvt.s32.f32 %v371_v0  ;;  %v338_v35 = vunpack.c.0.s8 %v162_v36  ;;  %v354_v34 = vunpack.c.1.s8 %v162_v36  ;;  %v17284_v45 = vld [vmem:[#allocation93_spill] sm:$0xff]  ;;  %v17302_v24 = vld [vmem:[#allocation104_spill] sm:$0xff] }
 0x1c1   :  { %17258 = vst [vmem:[#allocation62_spill] sm:$0xff] %v15121_v43  ;;  %5385 = vmatpush2.bf16.msra.mxu0 %v17261_v23  ;;  %5426 = vmatpush2.bf16.msra.mxu1 %v17264_v5  ;;  %v17268_v2 = vpack.c.bf16 %v17266_v38, %v17267_v63  ;;  %v17271_v53 = vpack.c.bf16 %v17269_v30, %v17270_v47  ;;  %v899_v51 = vcvt.s32.f32 %v387_v13  ;;  %v340_v33 = vunpack.c.0.s8 %v15050_v32  ;;  %v17275_v23 = vld [vmem:[#allocation90_spill] sm:$0xff]  ;;  %v17276_v13 = vld [vmem:[#allocation89_spill] sm:$0xff]  ;;  %v17278_v63 = vld [vmem:[#allocation92_spill] sm:$0xff] }
 0x1c2   :  { %17265 = vst [vmem:[#allocation61_spill] sm:$0xff] %v15131_v50  ;;  %v15142_v55 = vmul.f32 %v14240_v61, %v897_v60  ;;  %v15146_v0 = vmul.f32 %v14248_v10, %v883_v40  ;;  %v850_v36 = vcvt.s32.f32 %v338_v35  ;;  %v866_v42 = vcvt.s32.f32 %v354_v34  ;;  %v17279_v40 = vld [vmem:[#allocation91_spill] sm:$0xff]  ;;  %v17283_v47 = vld [vmem:[#allocation94_spill] sm:$0xff]  ;;  %v17319_v43 = vld [vmem:[#allocation112_spill] sm:$0xff] }
 0x1c3   :  { %5386 = vmatprep.subr.bf16.mxu0 %v17268_v2  ;;  %5427 = vmatprep.subr.bf16.mxu1 %v17271_v53  ;;  %v356_v38 = vunpack.c.1.s8 %v15050_v32  ;;  %v15152_v53 = vmul.f32 %v14248_v10, %v899_v51  ;;  %v852_v2 = vcvt.s32.f32 %v340_v33  ;;  %v337_v60 = vunpack.c.0.s8 %v15073_v31  ;;  %v146_v33 = vld [vmem:[#allocation11 + $0x48] sm:$0xff] }
 0x1c4   :  { %17272 = vst [vmem:[#allocation64_spill] sm:$0xff] %v15142_v55  ;;  %17273 = vst [vmem:[#allocation63_spill] sm:$0xff] %v15146_v0  ;;  %v17277_v5 = vpack.c.bf16 %v17275_v23, %v17276_v13  ;;  %v17280_v30 = vpack.c.bf16 %v17278_v63, %v17279_v40  ;;  %v15162_v35 = vmul.f32 %v14244_v62, %v850_v36  ;;  %v353_v51 = vunpack.c.1.s8 %v15073_v31  ;;  %v17286_v23 = vld [vmem:[#allocation96_spill] sm:$0xff]  ;;  %v17287_v13 = vld [vmem:[#allocation95_spill] sm:$0xff] }
 0x1c5   :  { %17274 = vst [vmem:[#allocation66_spill] sm:$0xff] %v15152_v53  ;;  %v15165_v32 = vmul.f32 %v14244_v62, %v866_v42  ;;  %v868_v34 = vcvt.s32.f32 %v356_v38  ;;  %v17285_v50 = vpack.c.bf16 %v17283_v47, %v17284_v45  ;;  %v15177_v36 = vmul.f32 %v14252_v21, %v852_v2  ;;  %v15180_v40 = vld [vmem:[#allocation11 + $0x58] sm:$0xff]  ;;  %v17295_v53 = vld [vmem:[#allocation100_spill] sm:$0xff]  ;;  %v17296_v31 = vld [vmem:[#allocation99_spill] sm:$0xff] }
 0x1c6   :  { %5387 = vmatpush2.bf16.msra.mxu0 %v17277_v5  ;;  %5428 = vmatpush2.bf16.msra.mxu1 %v17280_v30  ;;  %17281 = vst [vmem:[#allocation65_spill] sm:$0xff] %v15162_v35  ;;  %v17288_v5 = vpack.c.bf16 %v17286_v23, %v17287_v13  ;;  %v849_v42 = vcvt.s32.f32 %v337_v60  ;;  %v339_v38 = vunpack.c.0.s8 %v15085_v29  ;;  %v865_v45 = vcvt.s32.f32 %v353_v51  ;;  %v15191_v60 = vld [vmem:[#allocation11 + $0x40] sm:$0xff]  ;;  %v17293_v63 = vld [vmem:[#allocation97_spill] sm:$0xff] }
 0x1c7   :  { %17282 = vst [vmem:[#allocation68_spill] sm:$0xff] %v15165_v32  ;;  %5388 = vmatprep.subr.bf16.mxu0 %v17285_v50  ;;  %17289 = vst [vmem:[#allocation67_spill] sm:$0xff] %v15177_v36  ;;  %v15185_v50 = vmul.f32 %v14252_v21, %v868_v34  ;;  %v355_v47 = vunpack.c.1.s8 %v15085_v29  ;;  %v306_v2 = vunpack.c.2.s8 %v146_v33  ;;  %v322_v13 = vunpack.c.3.s8 %v146_v33  ;;  %v17300_v32 = vld [vmem:[#allocation101_spill] sm:$0xff] }
 0x1c8   :  { %5429 = vmatprep.subr.bf16.mxu1 %v17288_v5  ;;  %v15189_v30 = vmul.f32 %v14240_v61, %v849_v42  ;;  %v851_v23 = vcvt.s32.f32 %v339_v38  ;;  %v17292_v5 = vld [vmem:[#allocation98_spill] sm:$0xff]  ;;  %v17297_v35 = vpack.c.bf16 %v17295_v53, %v17296_v31  ;;  %v15202_v29 = vmul.f32 %v14240_v61, %v865_v45  ;;  %v15215_v45 = vld [vmem:[#allocation11 + $0x50] sm:$0xff] }
 0x1c9   :  { %17290 = vst [vmem:[#allocation70_spill] sm:$0xff] %v15185_v50  ;;  %v17294_v0 = vpack.c.bf16 %v17292_v5, %v17293_v63  ;;  %v867_v51 = vcvt.s32.f32 %v355_v47  ;;  %v308_v42 = vunpack.c.2.s8 %v15180_v40  ;;  %v17299_v38 = vld [vmem:[#allocation102_spill] sm:$0xff]  ;;  %v17303_v63 = vld [vmem:[#allocation103_spill] sm:$0xff]  ;;  %v834_v31 = vcvt.s32.f32 %v322_v13  ;;  %v17312_v47 = vld [vmem:[#allocation108_spill] sm:$0xff] }
 0x1ca   :  { %17291 = vst [vmem:[#allocation69_spill] sm:$0xff] %v15189_v30  ;;  %5430 = vmatpush2.bf16.msra.mxu1 %v17297_v35  ;;  %17298 = vst [vmem:[#allocation72_spill] sm:$0xff] %v15202_v29  ;;  %v17301_v55 = vpack.c.bf16 %v17299_v38, %v17300_v32  ;;  %v15212_v53 = vmul.f32 %v14248_v10, %v851_v23  ;;  %v818_v35 = vcvt.s32.f32 %v306_v2  ;;  %v324_v5 = vunpack.c.3.s8 %v15180_v40  ;;  %v17309_v38 = vld [vmem:[#allocation106_spill] sm:$0xff]  ;;  %v17313_v30 = vld [vmem:[#allocation107_spill] sm:$0xff] }
 0x1cb   :  { %5389 = vmatpush2.bf16.msra.mxu0 %v17294_v0  ;;  %v17304_v0 = vpack.c.bf16 %v17302_v24, %v17303_v63  ;;  %v15220_v34 = vmul.f32 %v14248_v10, %v867_v51  ;;  %v305_v32 = vunpack.c.2.s8 %v15191_v60  ;;  %v15227_v23 = vmul.f32 %v14244_v62, %v834_v31  ;;  %v17310_v63 = vld [vmem:[#allocation105_spill] sm:$0xff] }
 0x1cc   :  { %5390 = vmatprep.subr.bf16.mxu0 %v17301_v55  ;;  %17305 = vst [vmem:[#allocation71_spill] sm:$0xff] %v15212_v53  ;;  %v820_v55 = vcvt.s32.f32 %v308_v42  ;;  %v15224_v24 = vmul.f32 %v14244_v62, %v818_v35  ;;  %v836_v2 = vcvt.s32.f32 %v324_v5  ;;  %v321_v13 = vunpack.c.3.s8 %v15191_v60  ;;  %v17316_v5 = vld [vmem:[#allocation110_spill] sm:$0xff]  ;;  %v17317_v36 = vld [vmem:[#allocation109_spill] sm:$0xff]  ;;  %v17334_v53 = vld [vmem:[#allocation119_spill] sm:$0xff] }
 0x1cd   :  { %5431 = vmatprep.subr.bf16.mxu1 %v17304_v0  ;;  %17306 = vst [vmem:[#allocation74_spill] sm:$0xff] %v15220_v34  ;;  %17308 = vst [vmem:[#allocation76_spill] sm:$0xff] %v15227_v23  ;;  %v17311_v0 = vpack.c.bf16 %v17309_v38, %v17310_v63  ;;  %v17314_v51 = vpack.c.bf16 %v17312_v47, %v17313_v30  ;;  %v817_v29 = vcvt.s32.f32 %v305_v32  ;;  %v307_v31 = vunpack.c.2.s8 %v15215_v45  ;;  %v17320_v38 = vld [vmem:[#allocation111_spill] sm:$0xff]  ;;  %v17326_v30 = vld [vmem:[#allocation116_spill] sm:$0xff] }
 0x1ce   :  { %17307 = vst [vmem:[#allocation73_spill] sm:$0xff] %v15224_v24  ;;  %v15239_v35 = vmul.f32 %v14252_v21, %v820_v55  ;;  %v17318_v50 = vpack.c.bf16 %v17316_v5, %v17317_v36  ;;  %v17321_v63 = vpack.c.bf16 %v17319_v43, %v17320_v38  ;;  %v15251_v47 = vmul.f32 %v14252_v21, %v836_v2  ;;  %v17323_v2 = vld [vmem:[#allocation114_spill] sm:$0xff]  ;;  %v17327_v24 = vld [vmem:[#allocation115_spill] sm:$0xff] }
 0x1cf   :  { %5391 = vmatpush2.bf16.msra.mxu0 %v17311_v0  ;;  %5432 = vmatpush2.bf16.msra.mxu1 %v17314_v51  ;;  %v833_v0 = vcvt.s32.f32 %v321_v13  ;;  %v323_v55 = vunpack.c.3.s8 %v15215_v45  ;;  %v15255_v32 = vmul.f32 %v14240_v61, %v817_v29  ;;  %v819_v51 = vcvt.s32.f32 %v307_v31 }
 0x1d0   :  { %17315 = vst [vmem:[#allocation75_spill] sm:$0xff] %v15239_v35  ;;  %5392 = vmatprep.subr.bf16.mxu0 %v17318_v50  ;;  %5433 = vmatprep.subr.bf16.mxu1 %v17321_v63  ;;  %17322 = vst [vmem:[#allocation78_spill] sm:$0xff] %v15251_v47  ;;  %v274_v42 = vunpack.c.0.s8 %v146_v33  ;;  %v290_v36 = vunpack.c.1.s8 %v146_v33  ;;  %v276_v38 = vunpack.c.0.s8 %v15180_v40  ;;  %v17324_v63 = vld [vmem:[#allocation113_spill] sm:$0xff]  ;;  %v17328_v29 = vpack.c.bf16 %v17326_v30, %v17327_v24  ;;  %v17333_v47 = vld [vmem:[#allocation120_spill] sm:$0xff] }
 0x1d1   :  { %v15260_v43 = vmul.f32 %v14240_v61, %v833_v0  ;;  %v835_v5 = vcvt.s32.f32 %v323_v55  ;;  %v17325_v13 = vpack.c.bf16 %v17323_v2, %v17324_v63  ;;  %v15270_v31 = vmul.f32 %v14248_v10, %v819_v51  ;;  %v17330_v0 = vld [vmem:[#allocation118_spill] sm:$0xff]  ;;  %v17331_v35 = vld [vmem:[#allocation117_spill] sm:$0xff] }
 0x1d2   :  { %v786_v33 = vcvt.s32.f32 %v274_v42  ;;  %v802_v23 = vcvt.s32.f32 %v290_v36  ;;  %v292_v50 = vunpack.c.1.s8 %v15180_v40  ;;  %v17332_v55 = vpack.c.bf16 %v17330_v0, %v17331_v35  ;;  %v15298_v63 = vld [vmem:[#allocation11 + $0x3d8] sm:$0xff] }
 0x1d3   :  { %5393 = vmatpush2.bf16.msra.mxu0 %v17325_v13  ;;  %5434 = vmatpush2.bf16.msra.mxu1 %v17328_v29  ;;  %17329 = vst [vmem:[#allocation77_spill] sm:$0xff] %v15270_v31  ;;  %v17335_v34 = vpack.c.bf16 %v17333_v47, %v17334_v53  ;;  %v15282_v24 = vmul.f32 %v14248_v10, %v835_v5  ;;  %v788_v30 = vcvt.s32.f32 %v276_v38  ;;  %v273_v42 = vunpack.c.0.s8 %v15191_v60  ;;  %v258_v53 = vld [vmem:[#allocation11 + $0x3c8] sm:$0xff]  ;;  %v17336_v13 = vld [vmem:[#allocation122_spill] sm:$0xff]  ;;  %v17337_v29 = vld [vmem:[#allocation121_spill] sm:$0xff] }
 0x1d4   :  { %5394 = vmatprep.subr.bf16.mxu0 %v17332_v55  ;;  %v15286_v51 = vmul.f32 %v14244_v62, %v786_v33  ;;  %v15289_v40 = vmul.f32 %v14244_v62, %v802_v23  ;;  %v804_v35 = vcvt.s32.f32 %v292_v50  ;;  %v289_v36 = vunpack.c.1.s8 %v15191_v60  ;;  %v17339_v23 = vld [vmem:[#allocation124_spill] sm:$0xff]  ;;  %v17340_v50 = vld [vmem:[#allocation123_spill] sm:$0xff]  ;;  %v17343_v2 = vld [vmem:[#allocation125_spill] sm:$0xff] }
 0x1d5   :  { %5435 = vmatprep.subr.bf16.mxu1 %v17335_v34  ;;  %v15295_v47 = vmul.f32 %v14252_v21, %v788_v30  ;;  %v785_v5 = vcvt.s32.f32 %v273_v42  ;;  %v275_v38 = vunpack.c.0.s8 %v15215_v45  ;;  %v17338_v33 = vpack.c.bf16 %v17336_v13, %v17337_v29  ;;  %v17342_v34 = vld [vmem:[#allocation126_spill] sm:$0xff] }
 0x1d6   :  { %v17341_v0 = vpack.c.bf16 %v17339_v23, %v17340_v50  ;;  %v15309_v55 = vmul.f32 %v14252_v21, %v804_v35  ;;  %v801_v30 = vcvt.s32.f32 %v289_v36  ;;  %v291_v42 = vunpack.c.1.s8 %v15215_v45  ;;  %v17399_v35 = vld [vmem:[#allocation65_spill] sm:$0xff] }
 0x1d7   :  { %5395 = vmatpush2.bf16.msra.mxu0 %v17338_v33  ;;  %v17344_v31 = vpack.c.bf16 %v17342_v34, %v17343_v2  ;;  %v17345_v13 = vpack.c.bf16 %v14767_v9, %v14762_v18  ;;  %v15319_v29 = vmul.f32 %v14240_v61, %v785_v5  ;;  %v787_v33 = vcvt.s32.f32 %v275_v38  ;;  %v15333_v5 = vld [vmem:[#allocation11 + $0x3d0] sm:$0xff] }
 0x1d8   :  { %5436 = vmatpush2.bf16.msra.mxu1 %v17341_v0  ;;  %v754_v23 = vunpack.c.2.s8 %v258_v53  ;;  %v770_v50 = vunpack.c.3.s8 %v258_v53  ;;  %v15321_v0 = vld [vmem:[#allocation11 + $0x3c0] sm:$0xff]  ;;  %v15326_v45 = vmul.f32 %v14240_v61, %v801_v30  ;;  %v803_v2 = vcvt.s32.f32 %v291_v42  ;;  %v17398_v42 = vld [vmem:[#allocation68_spill] sm:$0xff] }
 0x1d9   :  { %5396 = vmatprep.subr.bf16.mxu0 %v17344_v31  ;;  %5437 = vmatprep.subr.bf16.mxu1 %v17345_v13  ;;  %v756_v31 = vunpack.c.2.s8 %v15298_v63  ;;  %v15330_v18 = vmul.f32 %v14248_v10, %v787_v33  ;;  %v772_v34 = vunpack.c.3.s8 %v15298_v63  ;;  %v17346_v38 = vpack.c.bf16 %v14776_v57, %v14771_v58 }
 0x1da   :  { %v1266_v9 = vcvt.s32.f32 %v754_v23  ;;  %v1282_v36 = vcvt.s32.f32 %v770_v50  ;;  %v17347_v30 = vpack.c.bf16 %v14784_v8, %v14781_v16  ;;  %v15344_v13 = vmul.f32 %v14248_v10, %v803_v2 }
 0x1db   :  { %5397 = vmatpush2.bf16.msra.mxu0 %v17346_v38  ;;  %v1268_v33 = vcvt.s32.f32 %v756_v31  ;;  %v753_v23 = vunpack.c.2.s8 %v15321_v0  ;;  %v17348_v50 = vpack.c.bf16 %v14790_v7, %v14787_v49  ;;  %v17349_v58 = vpack.c.bf16 %v14804_v4, %v14797_v17  ;;  %v17383_v17 = vld [vmem:[#allocation57_spill] sm:$0xff]  ;;  %v17396_v31 = vld [vmem:[#allocation63_spill] sm:$0xff] }
 0x1dc   :  { %5438 = vmatpush2.bf16.msra.mxu1 %v17347_v30  ;;  %v15354_v8 = vmul.f32 %v14244_v62, %v1266_v9  ;;  %v15357_v57 = vmul.f32 %v14244_v62, %v1282_v36  ;;  %v1284_v16 = vcvt.s32.f32 %v772_v34  ;;  %v769_v2 = vunpack.c.3.s8 %v15321_v0 }
 0x1dd   :  { %5398 = vmatprep.subr.bf16.mxu0 %v17348_v50  ;;  %5439 = vmatprep.subr.bf16.mxu1 %v17349_v58  ;;  %v15363_v38 = vmul.f32 %v14252_v21, %v1268_v33  ;;  %v1265_v49 = vcvt.s32.f32 %v753_v23  ;;  %v755_v7 = vunpack.c.2.s8 %v15333_v5  ;;  %v771_v36 = vunpack.c.3.s8 %v15333_v5 }
 0x1de   :  { %v15369_v4 = vmul.f32 %v14252_v21, %v1284_v16  ;;  %v1281_v9 = vcvt.s32.f32 %v769_v2  ;;  %v17350_v34 = vpack.c.bf16 %v14820_v28, %v14817_v1  ;;  %v17351_v30 = vpack.c.bf16 %v14845_v54, %v14842_v46  ;;  %v17380_v1 = vld [vmem:[#allocation55_spill] sm:$0xff] }
 0x1df   :  { %v15379_v33 = vmul.f32 %v14240_v61, %v1265_v49  ;;  %v1267_v23 = vcvt.s32.f32 %v755_v7  ;;  %v722_v50 = vunpack.c.0.s8 %v258_v53  ;;  %v738_v58 = vunpack.c.1.s8 %v258_v53 }
 0x1e0   :  { %5399 = vmatpush2.bf16.msra.mxu0 %v17350_v34  ;;  %5440 = vmatpush2.bf16.msra.mxu1 %v17351_v30  ;;  %v17352_v16 = vpack.c.bf16 %v14862_v25, %v14850_v3  ;;  %v17353_v2 = vpack.c.bf16 %v14869_v20, %v14865_v15  ;;  %v15390_v46 = vmul.f32 %v14240_v61, %v1281_v9  ;;  %v1283_v28 = vcvt.s32.f32 %v771_v36  ;;  %v17379_v25 = vld [vmem:[#allocation58_spill] sm:$0xff] }
 0x1e1   :  { %v724_v54 = vunpack.c.0.s8 %v15298_v63  ;;  %v15394_v49 = vmul.f32 %v14248_v10, %v1267_v23  ;;  %v1234_v53 = vcvt.s32.f32 %v722_v50  ;;  %v1250_v7 = vcvt.s32.f32 %v738_v58  ;;  %v15416_v50 = vld [vmem:[#allocation11 + $0x348] sm:$0xff] }
 0x1e2   :  { %5450 = vmatprep.subr.bf16.mxu0 %v17352_v16  ;;  %5491 = vmatprep.subr.bf16.mxu1 %v17353_v2  ;;  %v740_v3 = vunpack.c.1.s8 %v15298_v63  ;;  %v15402_v15 = vmul.f32 %v14248_v10, %v1283_v28  ;;  %v721_v9 = vunpack.c.0.s8 %v15321_v0  ;;  %v17354_v36 = vpack.c.bf16 %v14894_v27, %v14872_v56  ;;  %v15428_v28 = vld [vmem:[#allocation11 + $0x358] sm:$0xff] }
 0x1e3   :  { %5401 = vmatmul.mubr.bf16.vlgmr.msra.gmra.mxu0 %v14808_v11  ;;  %5442 = vmatmul.mubr.bf16.vlgmr.msra.gmra.mxu1 %v14808_v11  ;;  %v1236_v20 = vcvt.s32.f32 %v724_v54  ;;  %v15410_v63 = vmul.f32 %v14244_v62, %v1234_v53  ;;  %v15413_v34 = vmul.f32 %v14244_v62, %v1250_v7  ;;  %v737_v23 = vunpack.c.1.s8 %v15321_v0 }
 0x1e4   :  { %5451 = vmatpush1.bf16.msra.mxu0 %v17354_v36  ;;  %5482 = vmatprep.mubr.bf16.mxu0 %v14810_v39  ;;  %v1252_v30 = vcvt.s32.f32 %v740_v3  ;;  %v17355_v58 = vpack.c.bf16 %v14904_v59, %v14898_v14  ;;  %v1233_v16 = vcvt.s32.f32 %v721_v9  ;;  %v723_v2 = vunpack.c.0.s8 %v15333_v5  ;;  %v15447_v9 = vld [vmem:[#allocation11 + $0x340] sm:$0xff] }
 0x1e5   :  { %5523 = vmatprep.mubr.bf16.mxu1 %v14810_v39  ;;  %v15425_v27 = vmul.f32 %v14252_v21, %v1236_v20  ;;  %v17356_v0 = vpack.c.bf16 %v14917_v6, %v14914_v48  ;;  %v17357_v14 = vpack.c.bf16 %v14937_v44, %v14929_v41  ;;  %v1249_v53 = vcvt.s32.f32 %v737_v23  ;;  %v17371_v44 = vld [vmem:[#allocation49_spill] sm:$0xff]  ;;  %v15576_v39 = vld [vmem:[#allocation11 + $0x2c0] sm:$0xff] }
 0x1e6   :  { %5492 = vmatpush1.bf16.msra.mxu1 %v17355_v58  ;;  %v15439_v54 = vmul.f32 %v14252_v21, %v1252_v30  ;;  %v739_v7 = vunpack.c.1.s8 %v15333_v5  ;;  %v15443_v3 = vmul.f32 %v14240_v61, %v1233_v16  ;;  %v1235_v20 = vcvt.s32.f32 %v723_v2 }
 0x1e7   :  { %5452 = vmatprep.subr.bf16.mxu0 %v17356_v0  ;;  %5493 = vmatprep.subr.bf16.mxu1 %v17357_v14  ;;  %v690_v48 = vunpack.c.2.s8 %v15416_v50  ;;  %v706_v6 = vunpack.c.3.s8 %v15416_v50  ;;  %v17358_v41 = vpack.c.bf16 %v14954_v37, %v14941_v52  ;;  %v15455_v36 = vmul.f32 %v14240_v61, %v1249_v53  ;;  %v15468_v0 = vld [vmem:[#allocation11 + $0x350] sm:$0xff]  ;;  %v17361_v14 = vld [vmem:[#allocation46_spill] sm:$0xff] }
 0x1e8   :  { %v1251_v5 = vcvt.s32.f32 %v739_v7  ;;  %v692_v30 = vunpack.c.2.s8 %v15428_v28  ;;  %v17359_v23 = vpack.c.bf16 %v14972_v19, %v14964_v12  ;;  %v17360_v58 = vpack.c.bf16 %v14979_v26, %v14976_v22  ;;  %v17362_v53 = vld [vmem:[#allocation44_spill] sm:$0xff]  ;;  %v17368_v12 = vld [vmem:[#allocation47_spill] sm:$0xff] }
 0x1e9   :  { %5453 = vmatpush1.bf16.msra.mxu0 %v17358_v41  ;;  %v15465_v52 = vmul.f32 %v14248_v10, %v1235_v20  ;;  %v1202_v37 = vcvt.s32.f32 %v690_v48  ;;  %v1218_v16 = vcvt.s32.f32 %v706_v6  ;;  %v708_v2 = vunpack.c.3.s8 %v15428_v28 }
 0x1ea   :  { %5494 = vmatpush1.bf16.msra.mxu1 %v17359_v23  ;;  %5454 = vmatprep.subr.bf16.mxu0 %v17360_v58  ;;  %v17363_v7 = vpack.c.bf16 %v17361_v14, %v17362_v53  ;;  %v15476_v19 = vmul.f32 %v14248_v10, %v1251_v5  ;;  %v1204_v22 = vcvt.s32.f32 %v692_v30  ;;  %v689_v26 = vunpack.c.2.s8 %v15447_v9  ;;  %v17364_v23 = vld [vmem:[#allocation48_spill] sm:$0xff]  ;;  %v17365_v58 = vld [vmem:[#allocation45_spill] sm:$0xff]  ;;  %v17374_v5 = vld [vmem:[#allocation51_spill] sm:$0xff] }
 0x1eb   :  { %v15480_v20 = vmul.f32 %v14244_v62, %v1202_v37  ;;  %v15483_v48 = vmul.f32 %v14244_v62, %v1218_v16  ;;  %v1220_v6 = vcvt.s32.f32 %v708_v2  ;;  %v705_v41 = vunpack.c.3.s8 %v15447_v9  ;;  %v17370_v2 = vld [vmem:[#allocation52_spill] sm:$0xff] }
 0x1ec   :  { %5495 = vmatprep.subr.bf16.mxu1 %v17363_v7  ;;  %v17366_v14 = vpack.c.bf16 %v17364_v23, %v17365_v58  ;;  %v15492_v30 = vmul.f32 %v14252_v21, %v1204_v22  ;;  %v1201_v53 = vcvt.s32.f32 %v689_v26  ;;  %v691_v37 = vunpack.c.2.s8 %v15468_v0  ;;  %v17367_v7 = vld [vmem:[#allocation50_spill] sm:$0xff]  ;;  %v17376_v23 = vld [vmem:[#allocation56_spill] sm:$0xff] }
 0x1ed   :  { %v17369_v16 = vpack.c.bf16 %v17367_v7, %v17368_v12  ;;  %v17372_v59 = vpack.c.bf16 %v17370_v2, %v17371_v44  ;;  %v15504_v58 = vmul.f32 %v14252_v21, %v1220_v6  ;;  %v707_v22 = vunpack.c.3.s8 %v15468_v0  ;;  %v17373_v26 = vld [vmem:[#allocation54_spill] sm:$0xff] }
 0x1ee   :  { %5455 = vmatpush1.bf16.msra.mxu0 %v17366_v14  ;;  %v1217_v14 = vcvt.s32.f32 %v705_v41  ;;  %v17375_v56 = vpack.c.bf16 %v17373_v26, %v17374_v5  ;;  %v15511_v12 = vmul.f32 %v14240_v61, %v1201_v53  ;;  %v1203_v7 = vcvt.s32.f32 %v691_v37  ;;  %v17377_v5 = vld [vmem:[#allocation53_spill] sm:$0xff] }
 0x1ef   :  { %5496 = vmatpush1.bf16.msra.mxu1 %v17369_v16  ;;  %5456 = vmatprep.subr.bf16.mxu0 %v17372_v59  ;;  %v658_v44 = vunpack.c.0.s8 %v15416_v50  ;;  %v674_v59 = vunpack.c.1.s8 %v15416_v50  ;;  %v1219_v41 = vcvt.s32.f32 %v707_v22  ;;  %v660_v2 = vunpack.c.0.s8 %v15428_v28 }
 0x1f0   :  { %5497 = vmatprep.subr.bf16.mxu1 %v17375_v56  ;;  %v15518_v6 = vmul.f32 %v14240_v61, %v1217_v14  ;;  %v17378_v56 = vpack.c.bf16 %v17376_v23, %v17377_v5  ;;  %v15525_v53 = vmul.f32 %v14248_v10, %v1203_v7  ;;  %v676_v50 = vunpack.c.1.s8 %v15428_v28  ;;  %v17382_v14 = vld [vmem:[#allocation60_spill] sm:$0xff]  ;;  %v17386_v5 = vld [vmem:[#allocation59_spill] sm:$0xff] }
 0x1f1   :  { %v1170_v37 = vcvt.s32.f32 %v658_v44  ;;  %v1186_v26 = vcvt.s32.f32 %v674_v59  ;;  %v17381_v16 = vpack.c.bf16 %v17379_v25, %v17380_v1  ;;  %v17384_v22 = vpack.c.bf16 %v17382_v14, %v17383_v17  ;;  %v17385_v59 = vld [vmem:[#allocation62_spill] sm:$0xff] }
 0x1f2   :  { %5457 = vmatpush1.bf16.msra.mxu0 %v17378_v56  ;;  %v15537_v23 = vmul.f32 %v14248_v10, %v1219_v41  ;;  %v1172_v7 = vcvt.s32.f32 %v660_v2  ;;  %v657_v44 = vunpack.c.0.s8 %v15447_v9  ;;  %v17387_v28 = vpack.c.bf16 %v17385_v59, %v17386_v5  ;;  %v226_v56 = vld [vmem:[#allocation11 + $0x2c8] sm:$0xff]  ;;  %v15556_v59 = vld [vmem:[#allocation11 + $0x2d8] sm:$0xff] }
 0x1f3   :  { %5498 = vmatpush1.bf16.msra.mxu1 %v17381_v16  ;;  %5458 = vmatprep.subr.bf16.mxu0 %v17384_v22  ;;  %v15544_v1 = vmul.f32 %v14244_v62, %v1170_v37  ;;  %v15547_v25 = vmul.f32 %v14244_v62, %v1186_v26  ;;  %v1188_v17 = vcvt.s32.f32 %v676_v50  ;;  %v673_v16 = vunpack.c.1.s8 %v15447_v9  ;;  %v17391_v37 = vld [vmem:[#allocation64_spill] sm:$0xff]  ;;  %v17392_v5 = vld [vmem:[#allocation61_spill] sm:$0xff] }
 0x1f4   :  { %5499 = vmatprep.subr.bf16.mxu1 %v17387_v28  ;;  %v15553_v2 = vmul.f32 %v14252_v21, %v1172_v7  ;;  %v1169_v14 = vcvt.s32.f32 %v657_v44  ;;  %v659_v22 = vunpack.c.0.s8 %v15468_v0  ;;  %v17393_v28 = vpack.c.bf16 %v17391_v37, %v17392_v5  ;;  %v17395_v7 = vld [vmem:[#allocation66_spill] sm:$0xff] }
 0x1f5   :  { %17388 = vst [vmem:[#allocation80_spill] sm:$0xff] %v15544_v1  ;;  %17389 = vst [vmem:[#allocation79_spill] sm:$0xff] %v15547_v25  ;;  %v15564_v9 = vmul.f32 %v14252_v21, %v1188_v17  ;;  %v1185_v50 = vcvt.s32.f32 %v673_v16  ;;  %v675_v41 = vunpack.c.1.s8 %v15468_v0  ;;  %v17397_v44 = vpack.c.bf16 %v17395_v7, %v17396_v31  ;;  %v17402_v17 = vld [vmem:[#allocation70_spill] sm:$0xff]  ;;  %v17403_v16 = vld [vmem:[#allocation67_spill] sm:$0xff] }
 0x1f6   :  { %17390 = vst [vmem:[#allocation82_spill] sm:$0xff] %v15553_v2  ;;  %5459 = vmatpush1.bf16.msra.mxu0 %v17393_v28  ;;  %v17400_v60 = vpack.c.bf16 %v17398_v42, %v17399_v35  ;;  %v15574_v37 = vmul.f32 %v14240_v61, %v1169_v14  ;;  %v1171_v5 = vcvt.s32.f32 %v659_v22  ;;  %v626_v28 = vunpack.c.2.s8 %v226_v56  ;;  %v17408_v2 = vld [vmem:[#allocation74_spill] sm:$0xff]  ;;  %v17412_v1 = vld [vmem:[#allocation73_spill] sm:$0xff] }
 0x1f7   :  { %17394 = vst [vmem:[#allocation81_spill] sm:$0xff] %v15564_v9  ;;  %5500 = vmatpush1.bf16.msra.mxu1 %v17397_v44  ;;  %v642_v26 = vunpack.c.3.s8 %v226_v56  ;;  %v17404_v11 = vpack.c.bf16 %v17402_v17, %v17403_v16  ;;  %v15584_v0 = vmul.f32 %v14240_v61, %v1185_v50  ;;  %v1187_v35 = vcvt.s32.f32 %v675_v41  ;;  %v15591_v44 = vld [vmem:[#allocation11 + $0x2d0] sm:$0xff]  ;;  %v17415_v50 = vld [vmem:[#allocation75_spill] sm:$0xff] }
 0x1f8   :  { %5460 = vmatprep.subr.bf16.mxu0 %v17400_v60  ;;  %17401 = vst [vmem:[#allocation84_spill] sm:$0xff] %v15574_v37  ;;  %v628_v60 = vunpack.c.2.s8 %v15556_v59  ;;  %v15588_v42 = vmul.f32 %v14248_v10, %v1171_v5  ;;  %v1138_v14 = vcvt.s32.f32 %v626_v28  ;;  %v644_v7 = vunpack.c.3.s8 %v15556_v59  ;;  %v17405_v17 = vld [vmem:[#allocation72_spill] sm:$0xff]  ;;  %v17409_v28 = vld [vmem:[#allocation71_spill] sm:$0xff] }
 0x1f9   :  { %5501 = vmatprep.subr.bf16.mxu1 %v17404_v11  ;;  %v1154_v22 = vcvt.s32.f32 %v642_v26  ;;  %v17406_v11 = vld [vmem:[#allocation69_spill] sm:$0xff]  ;;  %v15599_v41 = vmul.f32 %v14248_v10, %v1187_v35  ;;  %v625_v5 = vunpack.c.2.s8 %v15576_v39  ;;  %v17410_v26 = vpack.c.bf16 %v17408_v2, %v17409_v28  ;;  %v17411_v9 = vld [vmem:[#allocation76_spill] sm:$0xff] }
 0x1fa   :  { %v17407_v16 = vpack.c.bf16 %v17405_v17, %v17406_v11  ;;  %v1140_v31 = vcvt.s32.f32 %v628_v60  ;;  %v17413_v25 = vpack.c.bf16 %v17411_v9, %v17412_v1  ;;  %v15609_v17 = vmul.f32 %v14244_v62, %v1138_v14  ;;  %v17414_v60 = vld [vmem:[#allocation78_spill] sm:$0xff] }
 0x1fb   :  { %5502 = vmatpush1.bf16.msra.mxu1 %v17410_v26  ;;  %v15612_v11 = vmul.f32 %v14244_v62, %v1154_v22  ;;  %v641_v35 = vunpack.c.3.s8 %v15576_v39  ;;  %v17416_v37 = vpack.c.bf16 %v17414_v60, %v17415_v50  ;;  %v1137_v1 = vcvt.s32.f32 %v625_v5  ;;  %v17418_v60 = vld [vmem:[#allocation77_spill] sm:$0xff] }
 0x1fc   :  { %5461 = vmatpush1.bf16.msra.mxu0 %v17407_v16  ;;  %v1156_v16 = vcvt.s32.f32 %v644_v7  ;;  %v15621_v28 = vmul.f32 %v14252_v21, %v1140_v31  ;;  %v643_v7 = vunpack.c.3.s8 %v15591_v44  ;;  %v594_v5 = vunpack.c.0.s8 %v226_v56 }
 0x1fd   :  { %5462 = vmatprep.subr.bf16.mxu0 %v17413_v25  ;;  %5503 = vmatprep.subr.bf16.mxu1 %v17416_v37  ;;  %v627_v25 = vunpack.c.2.s8 %v15591_v44  ;;  %v13357_v9 = vpack.c.bf16 %v15612_v11, %v15609_v17  ;;  %v1153_v22 = vcvt.s32.f32 %v641_v35  ;;  %v17417_v37 = vpack.c.bf16 %v15260_v43, %v15255_v32 }
 0x1fe   :  { %v15627_v14 = vmul.f32 %v14252_v21, %v1156_v16  ;;  %v15634_v50 = vmul.f32 %v14240_v61, %v1137_v1  ;;  %v610_v26 = vunpack.c.1.s8 %v226_v56  ;;  %v17419_v2 = vpack.c.bf16 %v15282_v24, %v17418_v60 }
 0x1ff   :  { %v1139_v31 = vcvt.s32.f32 %v627_v25  ;;  %v17420_v16 = vpack.c.bf16 %v15289_v40, %v15286_v51  ;;  %v15645_v32 = vmul.f32 %v14240_v61, %v1153_v22  ;;  %v1155_v43 = vcvt.s32.f32 %v643_v7 }
 0x200   :  { %5463 = vmatpush1.bf16.msra.mxu0 %v17417_v37  ;;  %5504 = vmatpush1.bf16.msra.mxu1 %v17419_v2  ;;  %v13359_v35 = vpack.c.bf16 %v15627_v14, %v15621_v28  ;;  %v596_v1 = vunpack.c.0.s8 %v15556_v59  ;;  %v17421_v56 = vpack.c.bf16 %v15309_v55, %v15295_v47  ;;  %v1106_v2 = vcvt.s32.f32 %v594_v5 }
 0x201   :  { %5464 = vmatprep.subr.bf16.mxu0 %v17420_v16  ;;  %v15652_v24 = vmul.f32 %v14248_v10, %v1139_v31  ;;  %v1122_v25 = vcvt.s32.f32 %v610_v26  ;;  %v612_v51 = vunpack.c.1.s8 %v15556_v59  ;;  %v13356_v40 = vpack.c.bf16 %v15645_v32, %v15634_v50  ;;  %v210_v26 = vld [vmem:[#allocation11 + $0x248] sm:$0xff] }
 0x202   :  { %5505 = vmatprep.subr.bf16.mxu1 %v17421_v56  ;;  %v15658_v22 = vmul.f32 %v14248_v10, %v1155_v43  ;;  %v1108_v7 = vcvt.s32.f32 %v596_v1  ;;  %v593_v37 = vunpack.c.0.s8 %v15576_v39  ;;  %v17422_v47 = vpack.c.bf16 %v15326_v45, %v15319_v29  ;;  %v15683_v56 = vld [vmem:[#allocation11 + $0x258] sm:$0xff] }
 0x203   :  { %v15665_v55 = vmul.f32 %v14244_v62, %v1106_v2  ;;  %v15668_v31 = vmul.f32 %v14244_v62, %v1122_v25  ;;  %v1124_v59 = vcvt.s32.f32 %v612_v51  ;;  %v609_v5 = vunpack.c.1.s8 %v15576_v39 }
 0x204   :  { %5465 = vmatpush1.bf16.msra.mxu0 %v17422_v47  ;;  %v17423_v60 = vpack.c.bf16 %v15344_v13, %v15330_v18  ;;  %v17424_v16 = vpack.c.bf16 %v15357_v57, %v15354_v8  ;;  %v13358_v29 = vpack.c.bf16 %v15658_v22, %v15652_v24  ;;  %v15680_v45 = vmul.f32 %v14252_v21, %v1108_v7  ;;  %v17446_v24 = vld [vmem:[#allocation41_spill] sm:$0xff] }
 0x205   :  { %v1105_v43 = vcvt.s32.f32 %v593_v37  ;;  %v595_v1 = vunpack.c.0.s8 %v15591_v44  ;;  %v17425_v39 = vpack.c.bf16 %v15369_v4, %v15363_v38  ;;  %v13341_v18 = vpack.c.bf16 %v15668_v31, %v15665_v55  ;;  %v15697_v37 = vld [vmem:[#allocation11 + $0x240] sm:$0xff] }
 0x206   :  { %5506 = vmatpush1.bf16.msra.mxu1 %v17423_v60  ;;  %5466 = vmatprep.subr.bf16.mxu0 %v17424_v16  ;;  %v15691_v13 = vmul.f32 %v14252_v21, %v1124_v59  ;;  %v1121_v8 = vcvt.s32.f32 %v609_v5  ;;  %v611_v57 = vunpack.c.1.s8 %v15591_v44  ;;  %v562_v51 = vunpack.c.2.s8 %v210_v26 }
 0x207   :  { %5507 = vmatprep.subr.bf16.mxu1 %v17425_v39  ;;  %v15695_v2 = vmul.f32 %v14240_v61, %v1105_v43  ;;  %v1107_v25 = vcvt.s32.f32 %v595_v1  ;;  %v578_v7 = vunpack.c.3.s8 %v210_v26  ;;  %v17426_v38 = vpack.c.bf16 %v15390_v46, %v15379_v33  ;;  %v15718_v1 = vld [vmem:[#allocation11 + $0x250] sm:$0xff] }
 0x208   :  { %v13343_v4 = vpack.c.bf16 %v15691_v13, %v15680_v45  ;;  %v15705_v47 = vmul.f32 %v14240_v61, %v1121_v8  ;;  %v1123_v59 = vcvt.s32.f32 %v611_v57  ;;  %v564_v44 = vunpack.c.2.s8 %v15683_v56  ;;  %v17447_v45 = vld [vmem:[#allocation38_spill] sm:$0xff] }
 0x209   :  { %5467 = vmatpush2.bf16.msra.mxu0 %v17426_v38  ;;  %v17427_v5 = vpack.c.bf16 %v15402_v15, %v15394_v49  ;;  %v17428_v60 = vpack.c.bf16 %v15413_v34, %v15410_v63  ;;  %v15715_v33 = vmul.f32 %v14248_v10, %v1107_v25  ;;  %v1074_v46 = vcvt.s32.f32 %v562_v51 }
 0x20a   :  { %v1090_v16 = vcvt.s32.f32 %v578_v7  ;;  %v580_v43 = vunpack.c.3.s8 %v15683_v56  ;;  %v17429_v39 = vpack.c.bf16 %v15439_v54, %v15425_v27  ;;  %v13340_v49 = vpack.c.bf16 %v15705_v47, %v15695_v2  ;;  %v17448_v47 = vld [vmem:[#allocation40_spill] sm:$0xff] }
 0x20b   :  { %5508 = vmatpush2.bf16.msra.mxu1 %v17427_v5  ;;  %5468 = vmatprep.subr.bf16.mxu0 %v17428_v60  ;;  %v15726_v15 = vmul.f32 %v14248_v10, %v1123_v59  ;;  %v1076_v63 = vcvt.s32.f32 %v564_v44  ;;  %v561_v34 = vunpack.c.2.s8 %v15697_v37  ;;  %v15730_v8 = vmul.f32 %v14244_v62, %v1074_v46 }
 0x20c   :  { %5509 = vmatprep.subr.bf16.mxu1 %v17429_v39  ;;  %v15733_v57 = vmul.f32 %v14244_v62, %v1090_v16  ;;  %v1092_v25 = vcvt.s32.f32 %v580_v43  ;;  %v577_v51 = vunpack.c.3.s8 %v15697_v37  ;;  %v17430_v27 = vpack.c.bf16 %v15455_v36, %v15443_v3 }
 0x20d   :  { %v13342_v54 = vpack.c.bf16 %v15726_v15, %v15715_v33  ;;  %v15742_v7 = vmul.f32 %v14252_v21, %v1076_v63  ;;  %v1073_v38 = vcvt.s32.f32 %v561_v34  ;;  %v563_v59 = vunpack.c.2.s8 %v15718_v1 }
 0x20e   :  { %5469 = vmatpush2.bf16.msra.mxu0 %v17430_v27  ;;  %v17431_v44 = vpack.c.bf16 %v15476_v19, %v15465_v52  ;;  %v17432_v5 = vpack.c.bf16 %v15483_v48, %v15480_v20  ;;  %v13325_v3 = vpack.c.bf16 %v15733_v57, %v15730_v8  ;;  %v15754_v36 = vmul.f32 %v14252_v21, %v1092_v25 }
 0x20f   :  { %v1089_v60 = vcvt.s32.f32 %v577_v51  ;;  %v579_v46 = vunpack.c.3.s8 %v15718_v1  ;;  %v17433_v16 = vpack.c.bf16 %v15504_v58, %v15492_v30  ;;  %v15761_v52 = vmul.f32 %v14240_v61, %v1073_v38  ;;  %v17436_v38 = vld [vmem:[#allocation79_spill] sm:$0xff] }
 0x210   :  { %5510 = vmatpush2.bf16.msra.mxu1 %v17431_v44  ;;  %5470 = vmatprep.subr.bf16.mxu0 %v17432_v5  ;;  %v1075_v19 = vcvt.s32.f32 %v563_v59  ;;  %v530_v43 = vunpack.c.0.s8 %v210_v26  ;;  %v546_v20 = vunpack.c.1.s8 %v210_v26  ;;  %v13327_v48 = vpack.c.bf16 %v15754_v36, %v15742_v7  ;;  %v17437_v59 = vld [vmem:[#allocation80_spill] sm:$0xff] }
 0x211   :  { %5511 = vmatprep.subr.bf16.mxu1 %v17433_v16  ;;  %v15766_v39 = vmul.f32 %v14240_v61, %v1089_v60  ;;  %v1091_v63 = vcvt.s32.f32 %v579_v46  ;;  %v532_v34 = vunpack.c.0.s8 %v15683_v56  ;;  %v17434_v25 = vpack.c.bf16 %v15518_v6, %v15511_v12  ;;  %v17439_v46 = vld [vmem:[#allocation81_spill] sm:$0xff]  ;;  %v17440_v16 = vld [vmem:[#allocation82_spill] sm:$0xff] }
 0x212   :  { %v15773_v30 = vmul.f32 %v14248_v10, %v1075_v19  ;;  %v1042_v58 = vcvt.s32.f32 %v530_v43  ;;  %v1058_v51 = vcvt.s32.f32 %v546_v20  ;;  %v548_v26 = vunpack.c.1.s8 %v15683_v56  ;;  %v198_v20 = vld [vmem:[#allocation11 + $0x1e8] sm:$0xff] }
 0x213   :  { %5471 = vmatpush2.bf16.msra.mxu0 %v17434_v25  ;;  %v17435_v27 = vpack.c.bf16 %v15537_v23, %v15525_v53  ;;  %v17438_v44 = vpack.c.bf16 %v17436_v38, %v17437_v59  ;;  %v13324_v5 = vpack.c.bf16 %v15766_v39, %v15761_v52  ;;  %v15785_v12 = vmul.f32 %v14248_v10, %v1091_v63  ;;  %v15804_v38 = vld [vmem:[#allocation11 + $0x1f8] sm:$0xff] }
 0x214   :  { %v1044_v6 = vcvt.s32.f32 %v532_v34  ;;  %v529_v60 = vunpack.c.0.s8 %v15697_v37  ;;  %v17441_v56 = vpack.c.bf16 %v17439_v46, %v17440_v16  ;;  %v15792_v53 = vmul.f32 %v14244_v62, %v1042_v58  ;;  %v17442_v58 = vld [vmem:[#allocation84_spill] sm:$0xff]  ;;  %v15824_v16 = vld [vmem:[#allocation11 + $0x1e0] sm:$0xff] }
 0x215   :  { %5512 = vmatpush2.bf16.msra.mxu1 %v17435_v27  ;;  %5472 = vmatprep.subr.bf16.mxu0 %v17438_v44  ;;  %v15795_v23 = vmul.f32 %v14244_v62, %v1058_v51  ;;  %v1060_v19 = vcvt.s32.f32 %v548_v26  ;;  %v545_v43 = vunpack.c.1.s8 %v15697_v37  ;;  %v13326_v63 = vpack.c.bf16 %v15785_v12, %v15773_v30 }
 0x216   :  { %5513 = vmatprep.subr.bf16.mxu1 %v17441_v56  ;;  %v15801_v34 = vmul.f32 %v14252_v21, %v1044_v6  ;;  %v1041_v25 = vcvt.s32.f32 %v529_v60  ;;  %v531_v27 = vunpack.c.0.s8 %v15718_v1  ;;  %v17443_v59 = vpack.c.bf16 %v15584_v0, %v17442_v58 }
 0x217   :  { %v13309_v62 = vpack.c.bf16 %v15795_v23, %v15792_v53  ;;  %v15812_v37 = vmul.f32 %v14252_v21, %v1060_v19  ;;  %v1057_v51 = vcvt.s32.f32 %v545_v43  ;;  %v547_v26 = vunpack.c.1.s8 %v15718_v1  ;;  %v15839_v19 = vld [vmem:[#allocation11 + $0x1f0] sm:$0xff]  ;;  %v17445_v43 = vld [vmem:[#allocation39_spill] sm:$0xff] }
 0x218   :  { %5473 = vmatpush2.bf16.msra.mxu0 %v17443_v59  ;;  %v17444_v44 = vpack.c.bf16 %v15599_v41, %v15588_v42  ;;  %v15822_v0 = vmul.f32 %v14240_v61, %v1041_v25  ;;  %v1043_v6 = vcvt.s32.f32 %v531_v27  ;;  %v502_v60 = vunpack.c.2.s8 %v198_v20 }
 0x219   :  { %5474 = vmatprep.subr.bf16.mxu0 %v13357_v9  ;;  %v518_v46 = vunpack.c.3.s8 %v198_v20  ;;  %v13311_v21 = vpack.c.bf16 %v15812_v37, %v15801_v34  ;;  %v15832_v42 = vmul.f32 %v14240_v61, %v1057_v51  ;;  %v1059_v41 = vcvt.s32.f32 %v547_v26 }
 0x21a   :  { %5514 = vmatpush2.bf16.msra.mxu1 %v17444_v44  ;;  %v504_v17 = vunpack.c.2.s8 %v15804_v38  ;;  %v15836_v11 = vmul.f32 %v14248_v10, %v1043_v6  ;;  %v1014_v9 = vcvt.s32.f32 %v502_v60  ;;  %v520_v56 = vunpack.c.3.s8 %v15804_v38  ;;  %v15906_v6 = vld [vmem:[#allocation11 + $0x178] sm:$0xff] }
 0x21b   :  { %5515 = vmatprep.subr.bf16.mxu1 %v13359_v35  ;;  %v1030_v1 = vcvt.s32.f32 %v518_v46  ;;  %v13308_v61 = vpack.c.bf16 %v15832_v42, %v15822_v0  ;;  %v15847_v28 = vmul.f32 %v14248_v10, %v1059_v41  ;;  %v501_v35 = vunpack.c.2.s8 %v15824_v16  ;;  %v15896_v0 = vld [vmem:[#allocation11 + $0x168] sm:$0xff] }
 0x21c   :  { %5475 = vmatpush2.bf16.msra.mxu0 %v13356_v40  ;;  %v1016_v14 = vcvt.s32.f32 %v504_v17  ;;  %v1610_v50 = vmul.f32 %v17445_v43, %v1014_v9  ;;  %v1032_v40 = vcvt.s32.f32 %v520_v56  ;;  %v517_v34 = vunpack.c.3.s8 %v15824_v16 }
 0x21d   :  { %5476 = vmatprep.subr.bf16.mxu0 %v13341_v18  ;;  %v1626_v32 = vmul.f32 %v17445_v43, %v1030_v1  ;;  %v13310_v10 = vpack.c.bf16 %v15847_v28, %v15836_v11  ;;  %v503_v55 = vunpack.c.2.s8 %v15839_v19  ;;  %v519_v27 = vunpack.c.3.s8 %v15839_v19 }
 0x21e   :  { %5516 = vmatpush2.bf16.msra.mxu1 %v13358_v29  ;;  %v1612_v22 = vmul.f32 %v17446_v24, %v1016_v14  ;;  %v1013_v29 = vcvt.s32.f32 %v501_v35  ;;  %v1628_v18 = vmul.f32 %v17446_v24, %v1032_v40  ;;  %v1029_v25 = vcvt.s32.f32 %v517_v34 }
 0x21f   :  { %5517 = vmatprep.subr.bf16.mxu1 %v13343_v4  ;;  %v13297_v31 = vpack.c.bf16 %v1626_v32, %v1610_v50  ;;  %v1015_v4 = vcvt.s32.f32 %v503_v55  ;;  %v470_v58 = vunpack.c.0.s8 %v198_v20  ;;  %v486_v59 = vunpack.c.1.s8 %v198_v20  ;;  %v17449_v50 = vld [vmem:[#allocation127_spill] sm:$0xff] }
 0x220   :  { %5477 = vmatpush2.bf16.msra.mxu0 %v13340_v49  ;;  %v15872_v13 = vmul.f32 %v17447_v45, %v1013_v29  ;;  %v13299_v37 = vpack.c.bf16 %v1628_v18, %v1612_v22  ;;  %v1625_v51 = vmul.f32 %v17447_v45, %v1029_v25  ;;  %v1031_v26 = vcvt.s32.f32 %v519_v27  ;;  %v17450_v18 = vld [vmem:[#allocation128_spill] sm:$0xff] }
 0x221   :  { %5478 = vmatprep.subr.bf16.mxu0 %v13325_v3  ;;  %v472_v2 = vunpack.c.0.s8 %v15804_v38  ;;  %v1611_v49 = vmul.f32 %v17448_v47, %v1015_v4  ;;  %v982_v20 = vcvt.s32.f32 %v470_v58  ;;  %v998_v44 = vcvt.s32.f32 %v486_v59 }
 0x222   :  { %5518 = vmatpush2.bf16.msra.mxu1 %v13342_v54  ;;  %v488_v33 = vunpack.c.1.s8 %v15804_v38  ;;  %v13296_v15 = vpack.c.bf16 %v1625_v51, %v15872_v13  ;;  %v1627_v8 = vmul.f32 %v17448_v47, %v1031_v26  ;;  %v469_v54 = vunpack.c.0.s8 %v15824_v16 }
 0x223   :  { %5519 = vmatprep.subr.bf16.mxu1 %v13327_v48  ;;  %v984_v57 = vcvt.s32.f32 %v472_v2  ;;  %v1578_v7 = vmul.f32 %v17445_v43, %v982_v20  ;;  %v1594_v3 = vmul.f32 %v17445_v43, %v998_v44  ;;  %v485_v48 = vunpack.c.1.s8 %v15824_v16 }
 0x224   :  { %5479 = vmatpush2.bf16.msra.mxu0 %v13324_v5  ;;  %v1000_v36 = vcvt.s32.f32 %v488_v33  ;;  %v13298_v38 = vpack.c.bf16 %v1627_v8, %v1611_v49  ;;  %v981_v39 = vcvt.s32.f32 %v469_v54  ;;  %v471_v5 = vunpack.c.0.s8 %v15839_v19 }
 0x225   :  { %5480 = vmatprep.subr.bf16.mxu0 %v13309_v62  ;;  %v1580_v52 = vmul.f32 %v17446_v24, %v984_v57  ;;  %v13281_v60 = vpack.c.bf16 %v1594_v3, %v1578_v7  ;;  %v997_v16 = vcvt.s32.f32 %v485_v48  ;;  %v487_v30 = vunpack.c.1.s8 %v15839_v19  ;;  %v15913_v62 = vld [vmem:[#allocation11 + $0x160] sm:$0xff]  ;;  %v15919_v19 = vld [vmem:[#allocation11 + $0x170] sm:$0xff] }
 0x226   :  { %5520 = vmatpush2.bf16.msra.mxu1 %v13326_v63  ;;  %v1596_v46 = vmul.f32 %v17446_v24, %v1000_v36  ;;  %v1577_v12 = vmul.f32 %v17447_v45, %v981_v39  ;;  %v983_v63 = vcvt.s32.f32 %v471_v5  ;;  %v438_v53 = vunpack.c.2.s8 %v15896_v0 }
 0x227   :  { %5521 = vmatprep.subr.bf16.mxu1 %v13311_v21  ;;  %v454_v23 = vunpack.c.3.s8 %v15896_v0  ;;  %v1593_v41 = vmul.f32 %v17447_v45, %v997_v16  ;;  %v999_v21 = vcvt.s32.f32 %v487_v30  ;;  %v440_v17 = vunpack.c.2.s8 %v15906_v6 }
 0x228   :  { %5481 = vmatpush2.bf16.msra.mxu0 %v13308_v61  ;;  %v13283_v42 = vpack.c.bf16 %v1596_v46, %v1580_v52  ;;  %v1579_v11 = vmul.f32 %v17448_v47, %v983_v63  ;;  %v950_v9 = vcvt.s32.f32 %v438_v53  ;;  %v456_v56 = vunpack.c.3.s8 %v15906_v6  ;;  %v166_v52 = vld [vmem:[#allocation11 + $0xe8] sm:$0xff]  ;;  %v168_v46 = vld [vmem:[#allocation11 + $0xf8] sm:$0xff] }
 0x229   :  { %5532 = vmatprep.subr.bf16.mxu0 %v13297_v31  ;;  %v966_v1 = vcvt.s32.f32 %v454_v23  ;;  %v13280_v28 = vpack.c.bf16 %v1593_v41, %v1577_v12  ;;  %v1595_v61 = vmul.f32 %v17448_v47, %v999_v21  ;;  %v952_v14 = vcvt.s32.f32 %v440_v17  ;;  %v165_v41 = vld [vmem:[#allocation11 + $0xe0] sm:$0xff] }
 0x22a   :  { %5522 = vmatpush2.bf16.msra.mxu1 %v13310_v10  ;;  %v437_v35 = vunpack.c.2.s8 %v15913_v62  ;;  %v1546_v32 = vmul.f32 %v17445_v43, %v950_v9  ;;  %v968_v34 = vcvt.s32.f32 %v456_v56  ;;  %v453_v10 = vunpack.c.3.s8 %v15913_v62 }
 0x22b   :  { %5573 = vmatprep.subr.bf16.mxu1 %v13299_v37  ;;  %5483 = vmatmul.mubr.bf16.vlgmr.msra.gmra.mxu0 %v17449_v50  ;;  %v1562_v40 = vmul.f32 %v17445_v43, %v966_v1  ;;  %v13282_v22 = vpack.c.bf16 %v1595_v61, %v1579_v11  ;;  %v1548_v29 = vmul.f32 %v17446_v24, %v952_v14  ;;  %v439_v31 = vunpack.c.2.s8 %v15919_v19  ;;  %v167_v14 = vld [vmem:[#allocation11 + $0xf0] sm:$0xff] }
 0x22c   :  { %5533 = vmatpush1.bf16.msra.mxu0 %v13296_v15  ;;  %v949_v55 = vcvt.s32.f32 %v437_v35  ;;  %5564 = vmatprep.mubr.bf16.mxu0 %v17450_v18  ;;  %v1564_v27 = vmul.f32 %v17446_v24, %v968_v34  ;;  %v965_v13 = vcvt.s32.f32 %v453_v10  ;;  %v455_v4 = vunpack.c.3.s8 %v15919_v19 }
 0x22d   :  { %5524 = vmatmul.mubr.bf16.vlgmr.msra.gmra.mxu1 %v17449_v50  ;;  %v13265_v25 = vpack.c.bf16 %v1562_v40, %v1546_v32  ;;  %5534 = vmatprep.subr.bf16.mxu0 %v13281_v60  ;;  %v951_v59 = vcvt.s32.f32 %v439_v31  ;;  %v406_v37 = vunpack.c.0.s8 %v15896_v0  ;;  %v422_v51 = vunpack.c.1.s8 %v15896_v0 }
 0x22e   :  { %5574 = vmatpush1.bf16.msra.mxu1 %v13298_v38  ;;  %5605 = vmatprep.mubr.bf16.mxu1 %v17450_v18  ;;  %v1545_v58 = vmul.f32 %v17447_v45, %v949_v55  ;;  %v13267_v26 = vpack.c.bf16 %v1564_v27, %v1548_v29  ;;  %v1561_v2 = vmul.f32 %v17447_v45, %v965_v13  ;;  %v967_v49 = vcvt.s32.f32 %v455_v4 }
 0x22f   :  { %5575 = vmatprep.subr.bf16.mxu1 %v13283_v42  ;;  %v408_v20 = vunpack.c.0.s8 %v15906_v6  ;;  %v1547_v44 = vmul.f32 %v17448_v47, %v951_v59  ;;  %v918_v33 = vcvt.s32.f32 %v406_v37  ;;  %v934_v15 = vcvt.s32.f32 %v422_v51 }
 0x230   :  { %5535 = vmatpush1.bf16.msra.mxu0 %v13280_v28  ;;  %v424_v8 = vunpack.c.1.s8 %v15906_v6  ;;  %v13264_v57 = vpack.c.bf16 %v1561_v2, %v1545_v58  ;;  %v1563_v54 = vmul.f32 %v17448_v47, %v967_v49  ;;  %v405_v3 = vunpack.c.0.s8 %v15913_v62 }
 0x231   :  { %5536 = vmatprep.subr.bf16.mxu0 %v13265_v25  ;;  %v920_v7 = vcvt.s32.f32 %v408_v20  ;;  %v1514_v36 = vmul.f32 %v17445_v43, %v918_v33  ;;  %v1530_v48 = vmul.f32 %v17445_v43, %v934_v15  ;;  %v421_v38 = vunpack.c.1.s8 %v15913_v62 }
 0x232   :  { %5576 = vmatpush1.bf16.msra.mxu1 %v13282_v22  ;;  %v936_v0 = vcvt.s32.f32 %v424_v8  ;;  %v13266_v39 = vpack.c.bf16 %v1563_v54, %v1547_v44  ;;  %v917_v6 = vcvt.s32.f32 %v405_v3  ;;  %v407_v60 = vunpack.c.0.s8 %v15919_v19 }
 0x233   :  { %5577 = vmatprep.subr.bf16.mxu1 %v13267_v26  ;;  %v1516_v5 = vmul.f32 %v17446_v24, %v920_v7  ;;  %v13249_v16 = vpack.c.bf16 %v1530_v48, %v1514_v36  ;;  %v933_v12 = vcvt.s32.f32 %v421_v38  ;;  %v423_v63 = vunpack.c.1.s8 %v15919_v19 }
 0x234   :  { %5537 = vmatpush1.bf16.msra.mxu0 %v13264_v57  ;;  %v1532_v30 = vmul.f32 %v17446_v24, %v936_v0  ;;  %v1513_v53 = vmul.f32 %v17447_v45, %v917_v6  ;;  %v919_v23 = vcvt.s32.f32 %v407_v60  ;;  %v374_v62 = vunpack.c.2.s8 %v166_v52 }
 0x235   :  { %v390_v42 = vunpack.c.3.s8 %v166_v52  ;;  %5538 = vmatprep.subr.bf16.mxu0 %v13249_v16  ;;  %v1529_v17 = vmul.f32 %v17447_v45, %v933_v12  ;;  %v935_v11 = vcvt.s32.f32 %v423_v63  ;;  %v376_v9 = vunpack.c.2.s8 %v168_v46 }
 0x236   :  { %5578 = vmatpush1.bf16.msra.mxu1 %v13266_v39  ;;  %v13251_v21 = vpack.c.bf16 %v1532_v30, %v1516_v5  ;;  %v1515_v1 = vmul.f32 %v17448_v47, %v919_v23  ;;  %v886_v56 = vcvt.s32.f32 %v374_v62  ;;  %v392_v61 = vunpack.c.3.s8 %v168_v46  ;;  %v150_v39 = vld [vmem:[#allocation11 + $0x68] sm:$0xff] }
 0x237   :  { %v902_v28 = vcvt.s32.f32 %v390_v42  ;;  %v13248_v19 = vpack.c.bf16 %v1529_v17, %v1513_v53  ;;  %v1531_v35 = vmul.f32 %v17448_v47, %v935_v11  ;;  %v888_v32 = vcvt.s32.f32 %v376_v9 }
 0x238   :  { %5579 = vmatprep.subr.bf16.mxu1 %v13251_v21  ;;  %v373_v40 = vunpack.c.2.s8 %v165_v41  ;;  %v1482_v34 = vmul.f32 %v17445_v43, %v886_v56  ;;  %v904_v22 = vcvt.s32.f32 %v392_v61  ;;  %v389_v29 = vunpack.c.3.s8 %v165_v41 }
 0x239   :  { %v1498_v10 = vmul.f32 %v17445_v43, %v902_v28  ;;  %5539 = vmatpush1.bf16.msra.mxu0 %v13248_v19  ;;  %v13250_v55 = vpack.c.bf16 %v1531_v35, %v1515_v1  ;;  %v1484_v31 = vmul.f32 %v17446_v24, %v888_v32  ;;  %v375_v25 = vunpack.c.2.s8 %v167_v14  ;;  %v151_v35 = vld [vmem:[#allocation11 + $0x70] sm:$0xff] }
 0x23a   :  { %v885_v18 = vcvt.s32.f32 %v373_v40  ;;  %v1500_v13 = vmul.f32 %v17446_v24, %v904_v22  ;;  %v901_v4 = vcvt.s32.f32 %v389_v29  ;;  %v391_v58 = vunpack.c.3.s8 %v167_v14 }
 0x23b   :  { %v13233_v27 = vpack.c.bf16 %v1498_v10, %v1482_v34  ;;  %5580 = vmatpush1.bf16.msra.mxu1 %v13250_v55  ;;  %v887_v37 = vcvt.s32.f32 %v375_v25  ;;  %v342_v51 = vunpack.c.0.s8 %v166_v52  ;;  %v358_v26 = vunpack.c.1.s8 %v166_v52 }
 0x23c   :  { %v1481_v59 = vmul.f32 %v17447_v45, %v885_v18  ;;  %v13235_v2 = vpack.c.bf16 %v1500_v13, %v1484_v31  ;;  %v1497_v49 = vmul.f32 %v17447_v45, %v901_v4  ;;  %v903_v20 = vcvt.s32.f32 %v391_v58 }
 0x23d   :  { %5540 = vmatprep.subr.bf16.mxu0 %v13233_v27  ;;  %v344_v44 = vunpack.c.0.s8 %v168_v46  ;;  %v1483_v33 = vmul.f32 %v17448_v47, %v887_v37  ;;  %v854_v15 = vcvt.s32.f32 %v342_v51  ;;  %v870_v8 = vcvt.s32.f32 %v358_v26 }
 0x23e   :  { %v360_v57 = vunpack.c.1.s8 %v168_v46  ;;  %5581 = vmatprep.subr.bf16.mxu1 %v13235_v2  ;;  %v13232_v54 = vpack.c.bf16 %v1497_v49, %v1481_v59  ;;  %v1499_v7 = vmul.f32 %v17448_v47, %v903_v20  ;;  %v341_v36 = vunpack.c.0.s8 %v165_v41  ;;  %v152_v46 = vld [vmem:[#allocation11 + $0x78] sm:$0xff] }
 0x23f   :  { %v856_v3 = vcvt.s32.f32 %v344_v44  ;;  %v1450_v48 = vmul.f32 %v17445_v43, %v854_v15  ;;  %v1466_v0 = vmul.f32 %v17445_v43, %v870_v8  ;;  %v357_v52 = vunpack.c.1.s8 %v165_v41  ;;  %v149_v41 = vld [vmem:[#allocation11 + $0x60] sm:$0xff] }
 0x240   :  { %v872_v38 = vcvt.s32.f32 %v360_v57  ;;  %5541 = vmatpush1.bf16.msra.mxu0 %v13232_v54  ;;  %v13234_v5 = vpack.c.bf16 %v1499_v7, %v1483_v33  ;;  %v853_v60 = vcvt.s32.f32 %v341_v36  ;;  %v343_v16 = vunpack.c.0.s8 %v167_v14 }
 0x241   :  { %v1452_v6 = vmul.f32 %v17446_v24, %v856_v3  ;;  %v13217_v30 = vpack.c.bf16 %v1466_v0, %v1450_v48  ;;  %v869_v63 = vcvt.s32.f32 %v357_v52  ;;  %v359_v53 = vunpack.c.1.s8 %v167_v14 }
 0x242   :  { %v1468_v12 = vmul.f32 %v17446_v24, %v872_v38  ;;  %5582 = vmatpush1.bf16.msra.mxu1 %v13234_v5  ;;  %v1449_v23 = vmul.f32 %v17447_v45, %v853_v60  ;;  %v855_v62 = vcvt.s32.f32 %v343_v16  ;;  %v310_v42 = vunpack.c.2.s8 %v150_v39  ;;  %v262_v5 = vld [vmem:[#allocation11 + $0x3e8] sm:$0xff] }
 0x243   :  { %v326_v21 = vunpack.c.3.s8 %v150_v39  ;;  %5542 = vmatprep.subr.bf16.mxu0 %v13217_v30  ;;  %v1465_v11 = vmul.f32 %v17447_v45, %v869_v63  ;;  %v871_v9 = vcvt.s32.f32 %v359_v53  ;;  %v312_v1 = vunpack.c.2.s8 %v152_v46 }
 0x244   :  { %v13219_v17 = vpack.c.bf16 %v1468_v12, %v1452_v6  ;;  %v1451_v56 = vmul.f32 %v17448_v47, %v855_v62  ;;  %v822_v28 = vcvt.s32.f32 %v310_v42  ;;  %v328_v19 = vunpack.c.3.s8 %v152_v46 }
 0x245   :  { %v838_v61 = vcvt.s32.f32 %v326_v21  ;;  %v13216_v14 = vpack.c.bf16 %v1465_v11, %v1449_v23  ;;  %v1467_v32 = vmul.f32 %v17448_v47, %v871_v9  ;;  %v824_v40 = vcvt.s32.f32 %v312_v1 }
 0x246   :  { %5583 = vmatprep.subr.bf16.mxu1 %v13219_v17  ;;  %v309_v34 = vunpack.c.2.s8 %v149_v41  ;;  %v1418_v10 = vmul.f32 %v17445_v43, %v822_v28  ;;  %v840_v29 = vcvt.s32.f32 %v328_v19  ;;  %v325_v55 = vunpack.c.3.s8 %v149_v41 }
 0x247   :  { %v1434_v22 = vmul.f32 %v17445_v43, %v838_v61  ;;  %5543 = vmatpush1.bf16.msra.mxu0 %v13216_v14  ;;  %v13218_v31 = vpack.c.bf16 %v1467_v32, %v1451_v56  ;;  %v1420_v18 = vmul.f32 %v17446_v24, %v824_v40  ;;  %v311_v27 = vunpack.c.2.s8 %v151_v35  ;;  %v263_v32 = vld [vmem:[#allocation11 + $0x3f0] sm:$0xff] }
 0x248   :  { %v821_v25 = vcvt.s32.f32 %v309_v34  ;;  %v1436_v4 = vmul.f32 %v17446_v24, %v840_v29  ;;  %v837_v58 = vcvt.s32.f32 %v325_v55  ;;  %v327_v59 = vunpack.c.3.s8 %v151_v35 }
 0x249   :  { %v13201_v13 = vpack.c.bf16 %v1434_v22, %v1418_v10  ;;  %5584 = vmatpush1.bf16.msra.mxu1 %v13218_v31  ;;  %v823_v51 = vcvt.s32.f32 %v311_v27  ;;  %v278_v26 = vunpack.c.0.s8 %v150_v39  ;;  %v294_v2 = vunpack.c.1.s8 %v150_v39 }
 0x24a   :  { %v1417_v37 = vmul.f32 %v17447_v45, %v821_v25  ;;  %v13203_v49 = vpack.c.bf16 %v1436_v4, %v1420_v18  ;;  %v1433_v20 = vmul.f32 %v17447_v45, %v837_v58  ;;  %v839_v44 = vcvt.s32.f32 %v327_v59 }
 0x24b   :  { %5544 = vmatprep.subr.bf16.mxu0 %v13201_v13  ;;  %v280_v33 = vunpack.c.0.s8 %v152_v46  ;;  %v1419_v15 = vmul.f32 %v17448_v47, %v823_v51  ;;  %v790_v8 = vcvt.s32.f32 %v278_v26  ;;  %v806_v57 = vcvt.s32.f32 %v294_v2 }
 0x24c   :  { %v296_v54 = vunpack.c.1.s8 %v152_v46  ;;  %5585 = vmatprep.subr.bf16.mxu1 %v13203_v49  ;;  %v13200_v7 = vpack.c.bf16 %v1433_v20, %v1417_v37  ;;  %v1435_v3 = vmul.f32 %v17448_v47, %v839_v44  ;;  %v277_v48 = vunpack.c.0.s8 %v149_v41  ;;  %v264_v46 = vld [vmem:[#allocation11 + $0x3f8] sm:$0xff] }
 0x24d   :  { %v792_v36 = vcvt.s32.f32 %v280_v33  ;;  %v1386_v0 = vmul.f32 %v17445_v43, %v790_v8  ;;  %v1402_v38 = vmul.f32 %v17445_v43, %v806_v57  ;;  %v293_v39 = vunpack.c.1.s8 %v149_v41  ;;  %v261_v41 = vld [vmem:[#allocation11 + $0x3e0] sm:$0xff] }
 0x24e   :  { %v808_v52 = vcvt.s32.f32 %v296_v54  ;;  %5545 = vmatpush1.bf16.msra.mxu0 %v13200_v7  ;;  %v13202_v6 = vpack.c.bf16 %v1435_v3, %v1419_v15  ;;  %v789_v16 = vcvt.s32.f32 %v277_v48  ;;  %v279_v30 = vunpack.c.0.s8 %v151_v35 }
 0x24f   :  { %v1388_v60 = vmul.f32 %v17446_v24, %v792_v36  ;;  %v13185_v12 = vpack.c.bf16 %v1402_v38, %v1386_v0  ;;  %v805_v53 = vcvt.s32.f32 %v293_v39  ;;  %v295_v23 = vunpack.c.1.s8 %v151_v35 }
 0x250   :  { %v1404_v63 = vmul.f32 %v17446_v24, %v808_v52  ;;  %5586 = vmatpush1.bf16.msra.mxu1 %v13202_v6  ;;  %v1385_v62 = vmul.f32 %v17447_v45, %v789_v16  ;;  %v791_v42 = vcvt.s32.f32 %v279_v30  ;;  %v758_v21 = vunpack.c.2.s8 %v262_v5  ;;  %v246_v6 = vld [vmem:[#allocation11 + $0x368] sm:$0xff] }
 0x251   :  { %v774_v17 = vunpack.c.3.s8 %v262_v5  ;;  %5546 = vmatprep.subr.bf16.mxu0 %v13185_v12  ;;  %v1401_v9 = vmul.f32 %v17447_v45, %v805_v53  ;;  %v807_v1 = vcvt.s32.f32 %v295_v23  ;;  %v760_v56 = vunpack.c.2.s8 %v264_v46 }
 0x252   :  { %v13187_v11 = vpack.c.bf16 %v1404_v63, %v1388_v60  ;;  %v1387_v28 = vmul.f32 %v17448_v47, %v791_v42  ;;  %v1270_v61 = vcvt.s32.f32 %v758_v21  ;;  %v776_v14 = vunpack.c.3.s8 %v264_v46 }
 0x253   :  { %v1286_v19 = vcvt.s32.f32 %v774_v17  ;;  %v13184_v35 = vpack.c.bf16 %v1401_v9, %v1385_v62  ;;  %v1403_v40 = vmul.f32 %v17448_v47, %v807_v1  ;;  %v1272_v34 = vcvt.s32.f32 %v760_v56 }
 0x254   :  { %5587 = vmatprep.subr.bf16.mxu1 %v13187_v11  ;;  %v757_v10 = vunpack.c.2.s8 %v261_v41  ;;  %v1866_v22 = vmul.f32 %v17445_v43, %v1270_v61  ;;  %v1288_v55 = vcvt.s32.f32 %v776_v14  ;;  %v773_v31 = vunpack.c.3.s8 %v261_v41 }
 0x255   :  { %v1882_v29 = vmul.f32 %v17445_v43, %v1286_v19  ;;  %5547 = vmatpush1.bf16.msra.mxu0 %v13184_v35  ;;  %v13186_v18 = vpack.c.bf16 %v1403_v40, %v1387_v28  ;;  %v1868_v25 = vmul.f32 %v17446_v24, %v1272_v34  ;;  %v759_v13 = vunpack.c.2.s8 %v263_v32 }
 0x256   :  { %v1269_v27 = vcvt.s32.f32 %v757_v10  ;;  %v1884_v58 = vmul.f32 %v17446_v24, %v1288_v55  ;;  %v1285_v59 = vcvt.s32.f32 %v773_v31  ;;  %v775_v37 = vunpack.c.3.s8 %v263_v32 }
 0x257   :  { %v13425_v4 = vpack.c.bf16 %v1882_v29, %v1866_v22  ;;  %5588 = vmatpush1.bf16.msra.mxu1 %v13186_v18  ;;  %v1271_v26 = vcvt.s32.f32 %v759_v13  ;;  %v726_v2 = vunpack.c.0.s8 %v262_v5  ;;  %v742_v49 = vunpack.c.1.s8 %v262_v5 }
 0x258   :  { %v1865_v51 = vmul.f32 %v17447_v45, %v1269_v27  ;;  %v13427_v20 = vpack.c.bf16 %v1884_v58, %v1868_v25  ;;  %v1881_v44 = vmul.f32 %v17447_v45, %v1285_v59  ;;  %v1287_v33 = vcvt.s32.f32 %v775_v37 }
 0x259   :  { %5548 = vmatprep.subr.bf16.mxu0 %v13425_v4  ;;  %v728_v15 = vunpack.c.0.s8 %v264_v46  ;;  %v1867_v8 = vmul.f32 %v17448_v47, %v1271_v26  ;;  %v1238_v57 = vcvt.s32.f32 %v726_v2  ;;  %v1254_v54 = vcvt.s32.f32 %v742_v49 }
 0x25a   :  { %v744_v7 = vunpack.c.1.s8 %v264_v46  ;;  %5589 = vmatprep.subr.bf16.mxu1 %v13427_v20  ;;  %v13424_v3 = vpack.c.bf16 %v1881_v44, %v1865_v51  ;;  %v1883_v36 = vmul.f32 %v17448_v47, %v1287_v33  ;;  %v725_v0 = vunpack.c.0.s8 %v261_v41  ;;  %v248_v46 = vld [vmem:[#allocation11 + $0x378] sm:$0xff] }
 0x25b   :  { %v1240_v48 = vcvt.s32.f32 %v728_v15  ;;  %v1834_v38 = vmul.f32 %v17445_v43, %v1238_v57  ;;  %v1850_v52 = vmul.f32 %v17445_v43, %v1254_v54  ;;  %v741_v5 = vunpack.c.1.s8 %v261_v41  ;;  %v15999_v41 = vld [vmem:[#allocation11 + $0x360] sm:$0xff] }
 0x25c   :  { %v1256_v39 = vcvt.s32.f32 %v744_v7  ;;  %5549 = vmatpush2.bf16.msra.mxu0 %v13424_v3  ;;  %v13426_v60 = vpack.c.bf16 %v1883_v36, %v1867_v8  ;;  %v1237_v30 = vcvt.s32.f32 %v725_v0  ;;  %v727_v12 = vunpack.c.0.s8 %v263_v32 }
 0x25d   :  { %v1836_v16 = vmul.f32 %v17446_v24, %v1240_v48  ;;  %v13409_v63 = vpack.c.bf16 %v1850_v52, %v1834_v38  ;;  %v1253_v23 = vcvt.s32.f32 %v741_v5  ;;  %v743_v62 = vunpack.c.1.s8 %v263_v32  ;;  %v16003_v32 = vld [vmem:[#allocation11 + $0x370] sm:$0xff] }
 0x25e   :  { %v1852_v53 = vmul.f32 %v17446_v24, %v1256_v39  ;;  %5590 = vmatpush2.bf16.msra.mxu1 %v13426_v60  ;;  %v1833_v42 = vmul.f32 %v17447_v45, %v1237_v30  ;;  %v1239_v21 = vcvt.s32.f32 %v727_v12  ;;  %v694_v17 = vunpack.c.2.s8 %v246_v6  ;;  %v16022_v60 = vld [vmem:[#allocation11 + $0x2e8] sm:$0xff] }
 0x25f   :  { %v710_v11 = vunpack.c.3.s8 %v246_v6  ;;  %5550 = vmatprep.subr.bf16.mxu0 %v13409_v63  ;;  %v1849_v1 = vmul.f32 %v17447_v45, %v1253_v23  ;;  %v1255_v56 = vcvt.s32.f32 %v743_v62  ;;  %v696_v28 = vunpack.c.2.s8 %v248_v46  ;;  %v16026_v63 = vld [vmem:[#allocation11 + $0x2f8] sm:$0xff] }
 0x260   :  { %v13411_v9 = vpack.c.bf16 %v1852_v53, %v1836_v16  ;;  %v1835_v61 = vmul.f32 %v17448_v47, %v1239_v21  ;;  %v1206_v19 = vcvt.s32.f32 %v694_v17  ;;  %v712_v35 = vunpack.c.3.s8 %v248_v46  ;;  %v16028_v53 = vpop.f32.mrf.mxu0  ;;  %v16030_v23 = vpop.f32.mrf.mxu1 }
 0x261   :  { %v1222_v14 = vcvt.s32.f32 %v710_v11  ;;  %v13408_v40 = vpack.c.bf16 %v1849_v1, %v1833_v42  ;;  %v1851_v34 = vmul.f32 %v17448_v47, %v1255_v56  ;;  %v1208_v10 = vcvt.s32.f32 %v696_v28  ;;  %v16037_v56 = vld [vmem:[#allocation11 + $0x2e0] sm:$0xff] }
 0x262   :  { %5591 = vmatprep.subr.bf16.mxu1 %v13411_v9  ;;  %v693_v22 = vunpack.c.2.s8 %v15999_v41  ;;  %v1802_v29 = vmul.f32 %v17445_v43, %v1206_v19  ;;  %v1224_v31 = vcvt.s32.f32 %v712_v35  ;;  %v709_v18 = vunpack.c.3.s8 %v15999_v41  ;;  %v16039_v28 = vpop.f32.mrf.mxu0 }
 0x263   :  { %v1818_v55 = vmul.f32 %v17445_v43, %v1222_v14  ;;  %5551 = vmatpush2.bf16.msra.mxu0 %v13408_v40  ;;  %v13410_v25 = vpack.c.bf16 %v1851_v34, %v1835_v61  ;;  %v1804_v27 = vmul.f32 %v17446_v24, %v1208_v10  ;;  %v695_v4 = vunpack.c.2.s8 %v16003_v32  ;;  %v16041_v61 = vpop.f32.mrf.mxu1 }
 0x264   :  { %v1205_v13 = vcvt.s32.f32 %v693_v22  ;;  %v1820_v59 = vmul.f32 %v17446_v24, %v1224_v31  ;;  %v1221_v37 = vcvt.s32.f32 %v709_v18  ;;  %v711_v51 = vunpack.c.3.s8 %v16003_v32 }
 0x265   :  { %v13393_v58 = vpack.c.bf16 %v1818_v55, %v1802_v29  ;;  %5592 = vmatpush2.bf16.msra.mxu1 %v13410_v25  ;;  %v1207_v2 = vcvt.s32.f32 %v695_v4  ;;  %v662_v49 = vunpack.c.0.s8 %v246_v6  ;;  %v678_v20 = vunpack.c.1.s8 %v246_v6  ;;  %v16047_v29 = vld [vmem:[#allocation11 + $0x2f0] sm:$0xff]  ;;  %v5324_v55 = vpop.f32.mrf.mxu0  ;;  %v5365_v31 = vpop.f32.mrf.mxu1 }
 0x266   :  { %v1801_v26 = vmul.f32 %v17447_v45, %v1205_v13  ;;  %v13395_v44 = vpack.c.bf16 %v1820_v59, %v1804_v27  ;;  %v1817_v33 = vmul.f32 %v17447_v45, %v1221_v37  ;;  %v1223_v15 = vcvt.s32.f32 %v711_v51  ;;  %v213_v55 = vld [vmem:[#allocation11 + $0x260] sm:$0xff] }
 0x267   :  { %5552 = vmatprep.subr.bf16.mxu0 %v13393_v58  ;;  %v664_v8 = vunpack.c.0.s8 %v248_v46  ;;  %v1803_v57 = vmul.f32 %v17448_v47, %v1207_v2  ;;  %v1174_v54 = vcvt.s32.f32 %v662_v49  ;;  %v1190_v7 = vcvt.s32.f32 %v678_v20  ;;  %v5325_v51 = vpop.f32.mrf.mxu0 }
 0x268   :  { %v680_v3 = vunpack.c.1.s8 %v248_v46  ;;  %5593 = vmatprep.subr.bf16.mxu1 %v13395_v44  ;;  %v13392_v36 = vpack.c.bf16 %v1817_v33, %v1801_v26  ;;  %v1819_v48 = vmul.f32 %v17448_v47, %v1223_v15  ;;  %v661_v38 = vunpack.c.0.s8 %v15999_v41  ;;  %v5366_v26 = vpop.f32.mrf.mxu1 }
 0x269   :  { %v1176_v0 = vcvt.s32.f32 %v664_v8  ;;  %v1770_v52 = vmul.f32 %v17445_v43, %v1174_v54  ;;  %v1786_v39 = vmul.f32 %v17445_v43, %v1190_v7  ;;  %v677_v6 = vunpack.c.1.s8 %v15999_v41 }
 0x26a   :  { %v1192_v5 = vcvt.s32.f32 %v680_v3  ;;  %5553 = vmatpush2.bf16.msra.mxu0 %v13392_v36  ;;  %v13394_v16 = vpack.c.bf16 %v1819_v48, %v1803_v57  ;;  %v1173_v12 = vcvt.s32.f32 %v661_v38  ;;  %v663_v46 = vunpack.c.0.s8 %v16003_v32 }
 0x26b   :  { %v1772_v30 = vmul.f32 %v17446_v24, %v1176_v0  ;;  %v13377_v62 = vpack.c.bf16 %v1786_v39, %v1770_v52  ;;  %v1189_v21 = vcvt.s32.f32 %v677_v6  ;;  %v679_v17 = vunpack.c.1.s8 %v16003_v32 }
 0x26c   :  { %v1788_v42 = vmul.f32 %v17446_v24, %v1192_v5  ;;  %5594 = vmatpush2.bf16.msra.mxu1 %v13394_v16  ;;  %v1769_v11 = vmul.f32 %v17447_v45, %v1173_v12  ;;  %v1175_v41 = vcvt.s32.f32 %v663_v46  ;;  %v630_v9 = vunpack.c.2.s8 %v16022_v60 }
 0x26d   :  { %v646_v1 = vunpack.c.3.s8 %v16022_v60  ;;  %5554 = vmatprep.subr.bf16.mxu0 %v13377_v62  ;;  %v1785_v14 = vmul.f32 %v17447_v45, %v1189_v21  ;;  %v1191_v35 = vcvt.s32.f32 %v679_v17  ;;  %v632_v32 = vunpack.c.2.s8 %v16026_v63 }
 0x26e   :  { %v13379_v19 = vpack.c.bf16 %v1788_v42, %v1772_v30  ;;  %v1771_v40 = vmul.f32 %v17448_v47, %v1175_v41  ;;  %v1142_v34 = vcvt.s32.f32 %v630_v9  ;;  %v648_v22 = vunpack.c.3.s8 %v16026_v63 }
 0x26f   :  { %v1158_v10 = vcvt.s32.f32 %v646_v1  ;;  %v13376_v18 = vpack.c.bf16 %v1785_v14, %v1769_v11  ;;  %v1787_v25 = vmul.f32 %v17448_v47, %v1191_v35  ;;  %v1144_v27 = vcvt.s32.f32 %v632_v32  ;;  %v214_v11 = vld [vmem:[#allocation11 + $0x268] sm:$0xff] }
 0x270   :  { %5595 = vmatprep.subr.bf16.mxu1 %v13379_v19  ;;  %v629_v13 = vunpack.c.2.s8 %v16037_v56  ;;  %v1738_v4 = vmul.f32 %v17445_v43, %v1142_v34  ;;  %v1160_v59 = vcvt.s32.f32 %v648_v22  ;;  %v645_v37 = vunpack.c.3.s8 %v16037_v56  ;;  %v216_v19 = vld [vmem:[#allocation11 + $0x278] sm:$0xff] }
 0x271   :  { %v1754_v58 = vmul.f32 %v17445_v43, %v1158_v10  ;;  %5555 = vmatpush2.bf16.msra.mxu0 %v13376_v18  ;;  %v13378_v2 = vpack.c.bf16 %v1787_v25, %v1771_v40  ;;  %v1740_v49 = vmul.f32 %v17446_v24, %v1144_v27  ;;  %v631_v44 = vunpack.c.2.s8 %v16047_v29 }
 0x272   :  { %v1141_v20 = vcvt.s32.f32 %v629_v13  ;;  %v1756_v15 = vmul.f32 %v17446_v24, %v1160_v59  ;;  %v1157_v8 = vcvt.s32.f32 %v645_v37  ;;  %v647_v57 = vunpack.c.3.s8 %v16047_v29  ;;  %v215_v37 = vld [vmem:[#allocation11 + $0x270] sm:$0xff] }
 0x273   :  { %v13361_v33 = vpack.c.bf16 %v1754_v58, %v1738_v4  ;;  %5596 = vmatpush2.bf16.msra.mxu1 %v13378_v2  ;;  %v1143_v7 = vcvt.s32.f32 %v631_v44  ;;  %v598_v3 = vunpack.c.0.s8 %v16022_v60  ;;  %v614_v36 = vunpack.c.1.s8 %v16022_v60 }
 0x274   :  { %v1737_v54 = vmul.f32 %v17447_v45, %v1141_v20  ;;  %v13363_v48 = vpack.c.bf16 %v1756_v15, %v1740_v49  ;;  %v1753_v0 = vmul.f32 %v17447_v45, %v1157_v8  ;;  %v1159_v38 = vcvt.s32.f32 %v647_v57 }
 0x275   :  { %5556 = vmatprep.subr.bf16.mxu0 %v13361_v33  ;;  %v600_v52 = vunpack.c.0.s8 %v16026_v63  ;;  %v1739_v39 = vmul.f32 %v17448_v47, %v1143_v7  ;;  %v1110_v5 = vcvt.s32.f32 %v598_v3  ;;  %v1126_v6 = vcvt.s32.f32 %v614_v36 }
 0x276   :  { %v616_v16 = vunpack.c.1.s8 %v16026_v63  ;;  %5597 = vmatprep.subr.bf16.mxu1 %v13363_v48  ;;  %v13360_v30 = vpack.c.bf16 %v1753_v0, %v1737_v54  ;;  %v1755_v12 = vmul.f32 %v17448_v47, %v1159_v38  ;;  %v597_v60 = vunpack.c.0.s8 %v16037_v56 }
 0x277   :  { %v1112_v46 = vcvt.s32.f32 %v600_v52  ;;  %v1706_v62 = vmul.f32 %v17445_v43, %v1110_v5  ;;  %v1722_v42 = vmul.f32 %v17445_v43, %v1126_v6  ;;  %v613_v17 = vunpack.c.1.s8 %v16037_v56 }
 0x278   :  { %v1128_v21 = vcvt.s32.f32 %v616_v16  ;;  %5557 = vmatpush2.bf16.msra.mxu0 %v13360_v30  ;;  %v13362_v41 = vpack.c.bf16 %v1755_v12, %v1739_v39  ;;  %v1109_v63 = vcvt.s32.f32 %v597_v60  ;;  %v599_v1 = vunpack.c.0.s8 %v16047_v29 }
 0x279   :  { %v1708_v9 = vmul.f32 %v17446_v24, %v1112_v46  ;;  %v13345_v14 = vpack.c.bf16 %v1722_v42, %v1706_v62  ;;  %v1125_v32 = vcvt.s32.f32 %v613_v17  ;;  %v615_v40 = vunpack.c.1.s8 %v16047_v29 }
 0x27a   :  { %v1724_v35 = vmul.f32 %v17446_v24, %v1128_v21  ;;  %5598 = vmatpush2.bf16.msra.mxu1 %v13362_v41  ;;  %v1705_v34 = vmul.f32 %v17447_v45, %v1109_v63  ;;  %v1111_v10 = vcvt.s32.f32 %v599_v1  ;;  %v566_v56 = vunpack.c.2.s8 %v214_v11 }
 0x27b   :  { %v582_v22 = vunpack.c.3.s8 %v214_v11  ;;  %5558 = vmatprep.subr.bf16.mxu0 %v13345_v14  ;;  %v1721_v18 = vmul.f32 %v17447_v45, %v1125_v32  ;;  %v1127_v25 = vcvt.s32.f32 %v615_v40  ;;  %v568_v27 = vunpack.c.2.s8 %v216_v19 }
 0x27c   :  { %v13347_v31 = vpack.c.bf16 %v1724_v35, %v1708_v9  ;;  %v1707_v13 = vmul.f32 %v17448_v47, %v1111_v10  ;;  %v1078_v4 = vcvt.s32.f32 %v566_v56  ;;  %v584_v59 = vunpack.c.3.s8 %v216_v19 }
 0x27d   :  { %v1094_v58 = vcvt.s32.f32 %v582_v22  ;;  %v13344_v29 = vpack.c.bf16 %v1721_v18, %v1705_v34  ;;  %v1723_v51 = vmul.f32 %v17448_v47, %v1127_v25  ;;  %v1080_v26 = vcvt.s32.f32 %v568_v27 }
 0x27e   :  { %5599 = vmatprep.subr.bf16.mxu1 %v13347_v31  ;;  %v565_v2 = vunpack.c.2.s8 %v213_v55  ;;  %v1674_v49 = vmul.f32 %v17445_v43, %v1078_v4  ;;  %v1096_v44 = vcvt.s32.f32 %v584_v59  ;;  %v581_v33 = vunpack.c.3.s8 %v213_v55 }
 0x27f   :  { %v1690_v20 = vmul.f32 %v17445_v43, %v1094_v58  ;;  %5559 = vmatpush2.bf16.msra.mxu0 %v13344_v29  ;;  %v13346_v15 = vpack.c.bf16 %v1723_v51, %v1707_v13  ;;  %v1676_v8 = vmul.f32 %v17446_v24, %v1080_v26  ;;  %v567_v54 = vunpack.c.2.s8 %v215_v37 }
 0x280   :  { %v1077_v57 = vcvt.s32.f32 %v565_v2  ;;  %v1692_v3 = vmul.f32 %v17446_v24, %v1096_v44  ;;  %v1093_v36 = vcvt.s32.f32 %v581_v33  ;;  %v583_v48 = vunpack.c.3.s8 %v215_v37 }
 0x281   :  { %v13329_v7 = vpack.c.bf16 %v1690_v20, %v1674_v49  ;;  %5600 = vmatpush2.bf16.msra.mxu1 %v13346_v15  ;;  %v1079_v38 = vcvt.s32.f32 %v567_v54  ;;  %v534_v52 = vunpack.c.0.s8 %v214_v11  ;;  %v550_v39 = vunpack.c.1.s8 %v214_v11 }
 0x282   :  { %v1673_v0 = vmul.f32 %v17447_v45, %v1077_v57  ;;  %v13331_v5 = vpack.c.bf16 %v1692_v3, %v1676_v8  ;;  %v1689_v6 = vmul.f32 %v17447_v45, %v1093_v36  ;;  %v1095_v16 = vcvt.s32.f32 %v583_v48  ;;  %v3679_v48 = vld [vmem:[%s16908_s1 + $0x8] sm:$0xff] }
 0x283   :  { %5560 = vmatprep.subr.bf16.mxu0 %v13329_v7  ;;  %v536_v30 = vunpack.c.0.s8 %v216_v19  ;;  %v1675_v12 = vmul.f32 %v17448_v47, %v1079_v38  ;;  %v1046_v46 = vcvt.s32.f32 %v534_v52  ;;  %v1062_v60 = vcvt.s32.f32 %v550_v39 }
 0x284   :  { %v552_v62 = vunpack.c.1.s8 %v216_v19  ;;  %5601 = vmatprep.subr.bf16.mxu1 %v13331_v5  ;;  %v13328_v42 = vpack.c.bf16 %v1689_v6, %v1673_v0  ;;  %v1691_v21 = vmul.f32 %v17448_v47, %v1095_v16  ;;  %v533_v41 = vunpack.c.0.s8 %v213_v55 }
 0x285   :  { %v1048_v17 = vcvt.s32.f32 %v536_v30  ;;  %v1642_v9 = vmul.f32 %v17445_v43, %v1046_v46  ;;  %v1658_v11 = vmul.f32 %v17445_v43, %v1062_v60  ;;  %v549_v1 = vunpack.c.1.s8 %v213_v55 }
 0x286   :  { %v1064_v63 = vcvt.s32.f32 %v552_v62  ;;  %5561 = vmatpush2.bf16.msra.mxu0 %v13328_v42  ;;  %v13330_v14 = vpack.c.bf16 %v1691_v21, %v1675_v12  ;;  %v1045_v32 = vcvt.s32.f32 %v533_v41  ;;  %v535_v40 = vunpack.c.0.s8 %v215_v37 }
 0x287   :  { %v1644_v35 = vmul.f32 %v17446_v24, %v1048_v17  ;;  %v13313_v34 = vpack.c.bf16 %v1658_v11, %v1642_v9  ;;  %v1061_v10 = vcvt.s32.f32 %v549_v1  ;;  %v551_v56 = vunpack.c.1.s8 %v215_v37 }
 0x288   :  { %v1660_v19 = vmul.f32 %v17446_v24, %v1064_v63  ;;  %5602 = vmatpush2.bf16.msra.mxu1 %v13330_v14  ;;  %v1641_v22 = vmul.f32 %v17447_v45, %v1045_v32  ;;  %v1047_v31 = vcvt.s32.f32 %v535_v40  ;;  %v5630_v43 = vcombine.low %v16028_v53, %v16039_v28  ;;  %v17451_v53 = vld [vmem:[#allocation29_spill] sm:$0xff] }
 0x289   :  { %5562 = vmatprep.subr.bf16.mxu0 %v13313_v34  ;;  %v1657_v18 = vmul.f32 %v17447_v45, %v1061_v10  ;;  %v1063_v25 = vcvt.s32.f32 %v551_v56  ;;  %v13951_v27 = vmov 1966171168   ;;  %v5631_v24 = vcombine.low %v16030_v23, %v16041_v61 }
 0x28a   :  { %v13315_v55 = vpack.c.bf16 %v1660_v19, %v1644_v35  ;;  %v5635_v13 = vunpack.c.l.s4 %v13951_v27  ;;  %v1643_v4 = vmul.f32 %v17448_v47, %v1047_v31 }
 0x28b   :  { %v13312_v58 = vpack.c.bf16 %v1657_v18, %v1641_v22  ;;  %v1659_v59 = vmul.f32 %v17448_v47, %v1063_v25  ;;  %v3678_v25 = vld [vmem:[%s16908_s1] sm:$0xff]  ;;  %s13955_s1 = smov [#allocation4]  }
 0x28c   :  { %5603 = vmatprep.subr.bf16.mxu1 %v13315_v55  ;;  %v5636_v37 = vunpack.c.0.s8 %v5635_v13  ;;  %s133_s5 = sshll.u32 %s13955_s1, 4  ;;  %s134_s5 = int_to_ptr.vmem [resolvable:$true] %s133_s5 }
 0x28d   :  { %5563 = vmatpush2.bf16.msra.mxu0 %v13312_v58  ;;  %v13314_v29 = vpack.c.bf16 %v1659_v59, %v1643_v4  ;;  %s13897_s21 = scalar_lea.vmem %s134_s5, 16384  ;;  %p13902_p8 = scmp.lt.s32.totalorder %s134_s5, %s134_s5 }
 0x28e   :  { %v16099_v28 = vsub.s32 %v5636_v37, %v17451_v53  ;;  %p13898_p7 = scmp.ne.s32.totalorder %s134_s5, %s13897_s21  ;;  %p13903_p9 = scmp.lt.s32.totalorder %s13897_s21, %s13897_s21 }
 0x28f   :  { %5604 = vmatpush2.bf16.msra.mxu1 %v13314_v29 }
 0x290   :  { %v5640_v45 = vrot.slane %v5630_v43, %v16099_v28  ;;  %v5647_v51 = vrot.slane %v5631_v24, %v16099_v28  ;;  %5565 = vmatmul.mubr.bf16.vlgmr.msra.gmra.mxu0 %v17449_v50  ;;  %p13904_p10 = por %p13903_p9, %p13902_p8 }
 0x291   :  { %5814 = vmatprep.mubr.f32.mxu0 %v3679_v48 }
 0x292   :  { %v5662_v26 = vcombine.low %v5640_v45, %v5647_v51  ;;  %5606 = vmatmul.mubr.bf16.vlgmr.msra.gmra.mxu1 %v17449_v50  ;;  %v13952_v45 = vmov 0.0   ;;  %p13905_p11 = pnand %p13904_p10, %p13898_p7 }
 0x294   :  { %v5670_v3 = vrot.slane %v5662_v26, %v16099_v28 }
 0x2a3   :  { %v5402_v23 = vpop.f32.mrf.mxu0  ;;  %v5443_v61 = vpop.f32.mrf.mxu1 }
 0x2a5   :  { %v5404_v2 = vpop.f32.mrf.mxu0  ;;  %v5445_v47 = vpop.f32.mrf.mxu1 }
 0x2a6   :  { %v5632_v49 = vcombine.low %v5402_v23, %v5404_v2  ;;  %v5633_v20 = vcombine.low %v5443_v61, %v5445_v47  ;;  %v13954_v61 = vmov 1.0  }
 0x2a7   :  { %v5406_v44 = vpop.f32.mrf.mxu0  ;;  %v5447_v33 = vpop.f32.mrf.mxu1 }
 0x2a8   :  { %v5654_v15 = vrot.slane %v5632_v49, %v16099_v28  ;;  %v5661_v8 = vrot.slane %v5633_v20, %v16099_v28 }
 0x2a9   :  { %v5407_v57 = vpop.f32.mrf.mxu0  ;;  %v5448_v54 = vpop.f32.mrf.mxu1 }
 0x2aa   :  { %v5663_v7 = vcombine.low %v5654_v15, %v5661_v8 }
 0x2ac   :  { %v5677_v36 = vrot.slane %v5663_v7, %v16099_v28 }
 0x2ae   :  { %v5678_v50 = vcombine.low %v5670_v3, %v5677_v36 }
 0x2b0   :  { %v5736_v31 = vrot.slane %v5678_v50, %v16099_v28 }
 0x2eb   :  { %v5484_v0 = vpop.f32.mrf.mxu0 }
 0x2ed   :  { %v5525_v38 = vpop.f32.mrf.mxu1  ;;  %v5486_v52 = vpop.f32.mrf.mxu0 }
 0x2ee   :  { %v5679_v39 = vcombine.low %v5484_v0, %v5486_v52 }
 0x2ef   :  { %v5527_v5 = vpop.f32.mrf.mxu1  ;;  %v5488_v16 = vpop.f32.mrf.mxu0 }
 0x2f0   :  { %v5680_v6 = vcombine.low %v5525_v38, %v5527_v5  ;;  %v5689_v30 = vrot.slane %v5679_v39, %v16099_v28 }
 0x2f1   :  { %v5529_v12 = vpop.f32.mrf.mxu1  ;;  %v5489_v60 = vpop.f32.mrf.mxu0 }
 0x2f2   :  { %v5696_v46 = vrot.slane %v5680_v6, %v16099_v28 }
 0x2f3   :  { %v5530_v62 = vpop.f32.mrf.mxu1 }
 0x2f4   :  { %v5711_v42 = vcombine.low %v5689_v30, %v5696_v46 }
 0x2f6   :  { %v5719_v10 = vrot.slane %v5711_v42, %v16099_v28 }
 0x350   :  { %v5566_v21 = vpop.f32.mrf.mxu0 }
 0x352   :  { %v5607_v17 = vpop.f32.mrf.mxu1  ;;  %v5568_v41 = vpop.f32.mrf.mxu0 }
 0x353   :  { %v5681_v9 = vcombine.low %v5566_v21, %v5568_v41 }
 0x354   :  { %v5609_v11 = vpop.f32.mrf.mxu1  ;;  %v5570_v63 = vpop.f32.mrf.mxu0 }
 0x355   :  { %v5703_v1 = vrot.slane %v5681_v9, %v16099_v28  ;;  %v5682_v14 = vcombine.low %v5607_v17, %v5609_v11 }
 0x356   :  { %v5611_v35 = vpop.f32.mrf.mxu1  ;;  %v5571_v32 = vpop.f32.mrf.mxu0 }
 0x357   :  { %v5710_v40 = vrot.slane %v5682_v14, %v16099_v28 }
 0x358   :  { %v5612_v34 = vpop.f32.mrf.mxu1 }
 0x359   :  { %v5712_v19 = vcombine.low %v5703_v1, %v5710_v40 }
 0x35b   :  { %v5726_v56 = vrot.slane %v5712_v19, %v16099_v28 }
 0x35d   :  { %v5727_v22 = vcombine.low %v5719_v10, %v5726_v56 }
 0x35f   :  { %v5743_v43 = vrot.slane %v5727_v22, %v16099_v28 }
 0x361   :  { %v5747_v55 = vcombine.high %v5736_v31, %v5743_v43  ;;  %v5746_v18 = vcombine.low %v5736_v31, %v5743_v43 }
 0x363   :  { %5780 = vmatprep.subr.mxu0 %v5747_v55 }
 0x364   :  { %5781 = vmatpush1.xpose.msra.mxu0 %v5746_v18 }
 0x365   :  { %13721 = vmatprep.subr.mxu0 %v13952_v45 }
 0x367   :  { %5815 = vmatmul.mubr.f32.vlgmr.msra.gmra.mxu0 %v3678_v25 }
 0x368   :  { %13723 = vmatprep.mubr.msk.f32.mxu0 %vm13953_vm2, %v13952_v45 }
 0x427   :  { %v5816_v27 = vpop.f32.mrf.mxu0 }
 0x428   :  { %v5821_v13 = vsel %vm5820_vm1, %v5816_v27, -inf }
 0x429   :  { %5822 = vmax.xlane.f32.xlu1 %v5821_v13  ;;  %v5818_v4 = vpop.f32.mrf.mxu0 }
 0x4b2   :  { %v5823_v24 = vpop.xlane.xlu1 %5822 }
 0x4b3   :  { %v5824_v58 = vsub.f32 %v5816_v27, %v5823_v24 }
 0x4b5   :  { %v5825_v59 = vmul.f32 1.442695, %v5824_v58 }
 0x4b7   :  { %13745 = vpow2.f32 %v5825_v59 }
 0x4c4   :  { %v13746_v37 = vpop.eup %13745 }
 0x4c5   :  { %v5827_v29 = vsel %vm5820_vm1, %v13746_v37, 0.0 }
 0x4c6   :  { %5828 = vadd.xlane.f32.xlu1 %v5827_v29 }
 0x54f   :  { %v5829_v51 = vpop.xlane.xlu1 %5828 }
 0x550   :  { %13747 = vrcp.f32 %v5829_v51 }
 0x55d   :  { %v13748_v26 = vpop.eup %13747 }
 0x55e   :  { %v5831_v23 = vmul.f32 %v13748_v26, %v13746_v37 }
 0x560   :  { %5909 = vxpose.xlu0.b32.start.end [1/1] (short) (narrow) %v5831_v23, 8  ;;  %13722 = vmatpush3.xpose.msk.msra.mxu0 %vm5820_vm1, %v5831_v23 }
 0x561   :  { %5974 = vmatprep.subr.mxu0 %v3679_v48 }
 0x563   :  { %13724 = vmatmul.mubr.msk.f32.vlgmr.msra.gmra.mxu0 %vm5820_vm1, %v13954_v61 }
 0x564   :  { %5975 = vmatpush1.msra.mxu0 %v3678_v25  ;;  %6008 = vmatprep.mubr.f32.mxu0 %v13952_v45 }
 0x5dc   :  { %v5925_v2 = vpop.trf.xlu0 }
 0x5dd   :  { %12146 = vmatmul.mubr.msk.f32.vlgmr.msra.gmra.mxu0 %vm5820_vm1, %v5925_v2 }
 0x5de   :  { %13908 = shalt.err (!%p13905_p11)  }
 0x5df   :  { %136 = dma.hbm_to_vmem [thread:$0]  %s16913_s6, 16384, %s134_s5, [#allocation5]  ;;  %v13956_v44 = vmov 1935823168  }
 0x5e0   :  { %v6022_v33 = vunpack.c.l.s4 %v13956_v44 }
 0x5e2   :  { %v6023_v15 = vunpack.c.0.s8 %v6022_v33 }
 0x5e4   :  { %v6026_v57 = vsub.s32 %v6023_v15, %v17451_v53 }
 0x623   :  { %v5904_v47 = vpop.f32.mrf.mxu0 }
 0x624   :  { %v5908_v49 = vsel %vm5820_vm1, %v5904_v47, 0.0 }
 0x625   :  { %v13725_v20 = vpop.f32.mrf.mxu0 }
 0x69d   :  { %v6010_v8 = vpop.f32.mrf.mxu0 }
 0x69f   :  { %v6012_v54 = vpop.f32.mrf.mxu0 }
 0x6a0   :  { %v6017_v7 = vcombine.low %v6010_v8, %v6012_v54  ;;  %v6018_v3 = vcombine.high %v6010_v8, %v6012_v54 }
 0x6a2   :  { %v16133_v36 = vrot.slane %v6017_v7, %v6026_v57  ;;  %v16135_v50 = vrot.slane %v6018_v3, %v6026_v57 }
 0x6a3   :  { %13937 = dma.done.wait [#allocation5], 16384 }
 0x6a4   :  { %13938 = vsyncadd [#allocation5], 4294950912  ;;  %v17452_v48 = vld [vmem:[#allocation31_spill] sm:$0xff]  ;;  %11599 = vst [vmem:[%s16918_s11] sm:$0x1] %v5908_v49  ;;  %v17454_v5 = vld [vmem:[#allocation30_spill] sm:$0xff]  ;;  %s13957_s11 = smov [#allocation18]  }
 0x6a5   :  { %v9519_v0 = vrot.slane %v16133_v36, %v17452_v48  ;;  %v17453_v38 = vld [vmem:[#allocation43_spill] sm:$0xff]  ;;  %v16146_v6 = vrot.slane %v16133_v36, %v17454_v5  ;;  %v17455_v16 = vld [vmem:[#allocation42_spill] sm:$0xff]  ;;  %v6049_v12 = vld [vmem:[#allocation4 + $0x38] sm:$0xff]  ;;  %s11606_s25 = sshll.u32 %s13957_s11, 4  ;;  %s11607_s25 = int_to_ptr.vmem [resolvable:$true] %s11606_s25 }
 0x6a6   :  { %v9527_v52 = vrot.slane %v16133_v36, %v17453_v38  ;;  %v16150_v30 = vrot.slane %v16133_v36, %v17455_v16  ;;  %v7194_v46 = vld [vmem:[#allocation14] sm:$0x3]  ;;  %v6065_v60 = vld [vmem:[#allocation4 + $0xb8] sm:$0xff]  ;;  %v6199_v21 = vunpack.c.2.s8 %v6049_v12  ;;  %v6201_v17 = vunpack.c.3.s8 %v6049_v12  ;;  %v6047_v57 = vld [vmem:[#allocation4 + $0x28] sm:$0xff]  ;;  %s13909_s8 = scalar_lea.vmem %s11607_s25, 32  ;;  %p13914_p13 = scmp.lt.s32.totalorder %s11607_s25, %s11607_s25 }
 0x6a7   :  { %v9593_v53 = vpack.c.bf16 %v9519_v0, %v9519_v0  ;;  %v9592_v62 = vpack.c.bf16 %v16146_v6, %v16146_v6  ;;  %v16157_v41 = vrot.slane %v7194_v46, %v17452_v48  ;;  %v6263_v9 = vunpack.c.2.s8 %v6065_v60  ;;  %v6048_v11 = vld [vmem:[#allocation4 + $0x30] sm:$0xff]  ;;  %p13910_p12 = scmp.ne.s32.totalorder %s11607_s25, %s13909_s8  ;;  %p13915_p0 = scmp.lt.s32.totalorder %s13909_s8, %s13909_s8 }
 0x6a8   :  { %v9595_v39 = vpack.c.bf16 %v9527_v52, %v9527_v52  ;;  %v9594_v42 = vpack.c.bf16 %v16150_v30, %v16150_v30  ;;  %v6064_v63 = vld [vmem:[#allocation4 + $0xb0] sm:$0xff]  ;;  %v6265_v1 = vunpack.c.3.s8 %v6065_v60  ;;  %v6198_v14 = vunpack.c.2.s8 %v6048_v11 }
 0x6a9   :  { %11176 = vmatprep.mubr.bf16.mxu1 %v9593_v53  ;;  %v6200_v35 = vunpack.c.3.s8 %v6048_v11  ;;  %v16160_v32 = vrot.slane %v7194_v46, %v17454_v5  ;;  %v6711_v40 = vcvt.s32.f32 %v6199_v21  ;;  %v6713_v34 = vcvt.s32.f32 %v6201_v17  ;;  %v6063_v46 = vld [vmem:[#allocation4 + $0xa8] sm:$0xff]  ;;  %p13916_p1 = por %p13915_p0, %p13914_p13 }
 0x6aa   :  { %11217 = vmatprep.mubr.bf16.mxu0 %v9595_v39  ;;  %v6775_v19 = vcvt.s32.f32 %v6263_v9  ;;  %v6262_v10 = vunpack.c.2.s8 %v6064_v63  ;;  %v6777_v56 = vcvt.s32.f32 %v6265_v1  ;;  %v6710_v22 = vcvt.s32.f32 %v6198_v14 }
 0x6ab   :  { %v6712_v31 = vcvt.s32.f32 %v6200_v35  ;;  %v6264_v43 = vunpack.c.3.s8 %v6064_v63  ;;  %v7235_v55 = vmul.f32 %v16157_v41, %v6711_v40  ;;  %v7237_v18 = vmul.f32 %v16157_v41, %v6713_v34  ;;  %p13917_p2 = pnand %p13916_p1, %p13910_p12 }
 0x6ac   :  { %v7299_v25 = vmul.f32 %v16157_v41, %v6775_v19  ;;  %v6774_v27 = vcvt.s32.f32 %v6262_v10  ;;  %v7301_v13 = vmul.f32 %v16157_v41, %v6777_v56  ;;  %v7234_v4 = vmul.f32 %v16160_v32, %v6710_v22  ;;  %v6062_v56 = vld [vmem:[#allocation4 + $0xa0] sm:$0xff] }
 0x6ad   :  { %v7236_v24 = vmul.f32 %v16160_v32, %v6712_v31  ;;  %v6776_v58 = vcvt.s32.f32 %v6264_v43  ;;  %v13443_v59 = vpack.c.bf16 %v7237_v18, %v7235_v55  ;;  %v6195_v29 = vunpack.c.0.s8 %v6049_v12 }
 0x6ae   :  { %v7298_v37 = vmul.f32 %v16160_v32, %v6774_v27  ;;  %v6197_v45 = vunpack.c.1.s8 %v6049_v12  ;;  %v13475_v51 = vpack.c.bf16 %v7301_v13, %v7299_v25  ;;  %v6259_v61 = vunpack.c.0.s8 %v6065_v60 }
 0x6af   :  { %v13442_v26 = vpack.c.bf16 %v7236_v24, %v7234_v4  ;;  %v7300_v23 = vmul.f32 %v16160_v32, %v6776_v58  ;;  %11144 = vmatprep.subr.bf16.mxu1 %v13443_v59  ;;  %v6707_v2 = vcvt.s32.f32 %v6195_v29  ;;  %v6261_v49 = vunpack.c.1.s8 %v6065_v60 }
 0x6b0   :  { %v6709_v47 = vcvt.s32.f32 %v6197_v45  ;;  %v6194_v20 = vunpack.c.0.s8 %v6048_v11  ;;  %11185 = vmatprep.subr.bf16.mxu0 %v13475_v51  ;;  %v6771_v33 = vcvt.s32.f32 %v6259_v61  ;;  %v6196_v15 = vunpack.c.1.s8 %v6048_v11  ;;  %v6046_v11 = vld [vmem:[#allocation4 + $0x20] sm:$0xff] }
 0x6b1   :  { %11145 = vmatpush1.bf16.msra.mxu1 %v13442_v26  ;;  %v13474_v44 = vpack.c.bf16 %v7300_v23, %v7298_v37  ;;  %v6258_v8 = vunpack.c.0.s8 %v6064_v63  ;;  %v7231_v54 = vmul.f32 %v16157_v41, %v6707_v2  ;;  %v6773_v3 = vcvt.s32.f32 %v6261_v49 }
 0x6b2   :  { %v7233_v7 = vmul.f32 %v16157_v41, %v6709_v47  ;;  %v6706_v0 = vcvt.s32.f32 %v6194_v20  ;;  %v7295_v52 = vmul.f32 %v16157_v41, %v6771_v33  ;;  %v6708_v53 = vcvt.s32.f32 %v6196_v15 }
 0x6b3   :  { %11186 = vmatpush1.bf16.msra.mxu0 %v13474_v44  ;;  %v6260_v39 = vunpack.c.1.s8 %v6064_v63  ;;  %v6770_v12 = vcvt.s32.f32 %v6258_v8  ;;  %v7297_v21 = vmul.f32 %v16157_v41, %v6773_v3  ;;  %v6191_v9 = vunpack.c.2.s8 %v6047_v57 }
 0x6b4   :  { %v13441_v60 = vpack.c.bf16 %v7233_v7, %v7231_v54  ;;  %v7230_v17 = vmul.f32 %v16160_v32, %v6706_v0  ;;  %v7232_v1 = vmul.f32 %v16160_v32, %v6708_v53  ;;  %v6193_v40 = vunpack.c.3.s8 %v6047_v57 }
 0x6b5   :  { %v6772_v14 = vcvt.s32.f32 %v6260_v39  ;;  %v7294_v35 = vmul.f32 %v16160_v32, %v6770_v12  ;;  %v13473_v34 = vpack.c.bf16 %v7297_v21, %v7295_v52  ;;  %v6703_v19 = vcvt.s32.f32 %v6191_v9  ;;  %v6045_v21 = vld [vmem:[#allocation4 + $0x18] sm:$0xff] }
 0x6b6   :  { %11146 = vmatprep.subr.bf16.mxu1 %v13441_v60  ;;  %v6255_v10 = vunpack.c.2.s8 %v6063_v46  ;;  %v6257_v63 = vunpack.c.3.s8 %v6063_v46  ;;  %v13440_v22 = vpack.c.bf16 %v7232_v1, %v7230_v17  ;;  %v6705_v43 = vcvt.s32.f32 %v6193_v40 }
 0x6b7   :  { %v7296_v31 = vmul.f32 %v16160_v32, %v6772_v14  ;;  %v6190_v55 = vunpack.c.2.s8 %v6046_v11  ;;  %11187 = vmatprep.subr.bf16.mxu0 %v13473_v34  ;;  %v7227_v18 = vmul.f32 %v16157_v41, %v6703_v19  ;;  %v6192_v13 = vunpack.c.3.s8 %v6046_v11  ;;  %v6061_v34 = vld [vmem:[#allocation4 + $0x98] sm:$0xff] }
 0x6b8   :  { %v6767_v25 = vcvt.s32.f32 %v6255_v10  ;;  %v6769_v27 = vcvt.s32.f32 %v6257_v63  ;;  %11147 = vmatpush1.bf16.msra.mxu1 %v13440_v22  ;;  %v7229_v24 = vmul.f32 %v16157_v41, %v6705_v43  ;;  %v6254_v59 = vunpack.c.2.s8 %v6062_v56  ;;  %v6044_v22 = vld [vmem:[#allocation4 + $0x10] sm:$0xff] }
 0x6b9   :  { %v13472_v4 = vpack.c.bf16 %v7296_v31, %v7294_v35  ;;  %v6702_v58 = vcvt.s32.f32 %v6190_v55  ;;  %v6704_v45 = vcvt.s32.f32 %v6192_v13  ;;  %v6256_v51 = vunpack.c.3.s8 %v6062_v56 }
 0x6ba   :  { %v7291_v37 = vmul.f32 %v16157_v41, %v6767_v25  ;;  %v7293_v29 = vmul.f32 %v16157_v41, %v6769_v27  ;;  %v13439_v26 = vpack.c.bf16 %v7229_v24, %v7227_v18  ;;  %v6766_v61 = vcvt.s32.f32 %v6254_v59 }
 0x6bb   :  { %11188 = vmatpush1.bf16.msra.mxu0 %v13472_v4  ;;  %v7226_v23 = vmul.f32 %v16160_v32, %v6702_v58  ;;  %v6187_v2 = vunpack.c.0.s8 %v6047_v57  ;;  %v7228_v49 = vmul.f32 %v16160_v32, %v6704_v45  ;;  %v6768_v20 = vcvt.s32.f32 %v6256_v51 }
 0x6bc   :  { %v13471_v47 = vpack.c.bf16 %v7293_v29, %v7291_v37  ;;  %v6189_v44 = vunpack.c.1.s8 %v6047_v57  ;;  %11148 = vmatprep.subr.bf16.mxu1 %v13439_v26  ;;  %v7290_v33 = vmul.f32 %v16160_v32, %v6766_v61  ;;  %v6251_v8 = vunpack.c.0.s8 %v6063_v46 }
 0x6bd   :  { %v6699_v15 = vcvt.s32.f32 %v6187_v2  ;;  %v6253_v54 = vunpack.c.1.s8 %v6063_v46  ;;  %v13438_v7 = vpack.c.bf16 %v7228_v49, %v7226_v23  ;;  %v7292_v3 = vmul.f32 %v16160_v32, %v6768_v20 }
 0x6be   :  { %11189 = vmatprep.subr.bf16.mxu0 %v13471_v47  ;;  %v6701_v0 = vcvt.s32.f32 %v6189_v44  ;;  %v6186_v52 = vunpack.c.0.s8 %v6046_v11  ;;  %v6763_v39 = vcvt.s32.f32 %v6251_v8  ;;  %v6188_v60 = vunpack.c.1.s8 %v6046_v11 }
 0x6bf   :  { %v7223_v53 = vmul.f32 %v16157_v41, %v6699_v15  ;;  %v6765_v12 = vcvt.s32.f32 %v6253_v54  ;;  %11149 = vmatpush1.bf16.msra.mxu1 %v13438_v7  ;;  %v13470_v57 = vpack.c.bf16 %v7292_v3, %v7290_v33  ;;  %v6250_v1 = vunpack.c.0.s8 %v6062_v56 }
 0x6c0   :  { %v7225_v17 = vmul.f32 %v16157_v41, %v6701_v0  ;;  %v6698_v9 = vcvt.s32.f32 %v6186_v52  ;;  %v7287_v46 = vmul.f32 %v16157_v41, %v6763_v39  ;;  %v6700_v35 = vcvt.s32.f32 %v6188_v60 }
 0x6c1   :  { %v7289_v14 = vmul.f32 %v16157_v41, %v6765_v12  ;;  %v6252_v40 = vunpack.c.1.s8 %v6062_v56  ;;  %11190 = vmatpush1.bf16.msra.mxu0 %v13470_v57  ;;  %v6762_v63 = vcvt.s32.f32 %v6250_v1  ;;  %v6183_v11 = vunpack.c.2.s8 %v6045_v21  ;;  %v6060_v56 = vld [vmem:[#allocation4 + $0x90] sm:$0xff] }
 0x6c2   :  { %v13437_v19 = vpack.c.bf16 %v7225_v17, %v7223_v53  ;;  %v7222_v10 = vmul.f32 %v16160_v32, %v6698_v9  ;;  %v7224_v43 = vmul.f32 %v16160_v32, %v6700_v35  ;;  %v6185_v18 = vunpack.c.3.s8 %v6045_v21 }
 0x6c3   :  { %v13469_v31 = vpack.c.bf16 %v7289_v14, %v7287_v46  ;;  %v6764_v55 = vcvt.s32.f32 %v6252_v40  ;;  %v7286_v25 = vmul.f32 %v16160_v32, %v6762_v63  ;;  %v6695_v27 = vcvt.s32.f32 %v6183_v11 }
 0x6c4   :  { %11150 = vmatprep.subr.bf16.mxu1 %v13437_v19  ;;  %v6247_v13 = vunpack.c.2.s8 %v6061_v34  ;;  %v6249_v4 = vunpack.c.3.s8 %v6061_v34  ;;  %v13436_v24 = vpack.c.bf16 %v7224_v43, %v7222_v10  ;;  %v6697_v59 = vcvt.s32.f32 %v6185_v18  ;;  %v6043_v10 = vld [vmem:[#allocation4 + $0x8] sm:$0xff] }
 0x6c5   :  { %11191 = vmatprep.subr.bf16.mxu0 %v13469_v31  ;;  %v7288_v58 = vmul.f32 %v16160_v32, %v6764_v55  ;;  %v6182_v37 = vunpack.c.2.s8 %v6044_v22  ;;  %v7219_v29 = vmul.f32 %v16157_v41, %v6695_v27  ;;  %v6184_v26 = vunpack.c.3.s8 %v6044_v22 }
 0x6c6   :  { %v6759_v45 = vcvt.s32.f32 %v6247_v13  ;;  %v6761_v51 = vcvt.s32.f32 %v6249_v4  ;;  %11151 = vmatpush1.bf16.msra.mxu1 %v13436_v24  ;;  %v7221_v61 = vmul.f32 %v16157_v41, %v6697_v59  ;;  %v6246_v47 = vunpack.c.2.s8 %v6060_v56  ;;  %v6042_v24 = vld [vmem:[#allocation4] sm:$0xff] }
 0x6c7   :  { %v13468_v23 = vpack.c.bf16 %v7288_v58, %v7286_v25  ;;  %v6694_v2 = vcvt.s32.f32 %v6182_v37  ;;  %v6696_v44 = vcvt.s32.f32 %v6184_v26  ;;  %v6248_v33 = vunpack.c.3.s8 %v6060_v56  ;;  %v6059_v25 = vld [vmem:[#allocation4 + $0x88] sm:$0xff] }
 0x6c8   :  { %v7283_v49 = vmul.f32 %v16157_v41, %v6759_v45  ;;  %v7285_v20 = vmul.f32 %v16157_v41, %v6761_v51  ;;  %v13435_v15 = vpack.c.bf16 %v7221_v61, %v7219_v29  ;;  %v6758_v54 = vcvt.s32.f32 %v6246_v47 }
 0x6c9   :  { %11192 = vmatpush1.bf16.msra.mxu0 %v13468_v23  ;;  %v7218_v8 = vmul.f32 %v16160_v32, %v6694_v2  ;;  %v6179_v7 = vunpack.c.0.s8 %v6045_v21  ;;  %v7220_v0 = vmul.f32 %v16160_v32, %v6696_v44  ;;  %v6760_v52 = vcvt.s32.f32 %v6248_v33 }
 0x6ca   :  { %v13467_v3 = vpack.c.bf16 %v7285_v20, %v7283_v49  ;;  %v6181_v53 = vunpack.c.1.s8 %v6045_v21  ;;  %11152 = vmatprep.subr.bf16.mxu1 %v13435_v15  ;;  %v7282_v39 = vmul.f32 %v16160_v32, %v6758_v54  ;;  %v6243_v60 = vunpack.c.0.s8 %v6061_v34 }
 0x6cb   :  { %v6691_v12 = vcvt.s32.f32 %v6179_v7  ;;  %v6245_v57 = vunpack.c.1.s8 %v6061_v34  ;;  %v13434_v17 = vpack.c.bf16 %v7220_v0, %v7218_v8  ;;  %v7284_v9 = vmul.f32 %v16160_v32, %v6760_v52 }
 0x6cc   :  { %11193 = vmatprep.subr.bf16.mxu0 %v13467_v3  ;;  %v6693_v1 = vcvt.s32.f32 %v6181_v53  ;;  %v6178_v46 = vunpack.c.0.s8 %v6044_v22  ;;  %v6755_v35 = vcvt.s32.f32 %v6243_v60  ;;  %v6180_v19 = vunpack.c.1.s8 %v6044_v22 }
 0x6cd   :  { %v7215_v14 = vmul.f32 %v16157_v41, %v6691_v12  ;;  %v6757_v40 = vcvt.s32.f32 %v6245_v57  ;;  %11153 = vmatpush1.bf16.msra.mxu1 %v13434_v17  ;;  %v13466_v21 = vpack.c.bf16 %v7284_v9, %v7282_v39  ;;  %v6242_v31 = vunpack.c.0.s8 %v6060_v56 }
 0x6ce   :  { %v7217_v63 = vmul.f32 %v16157_v41, %v6693_v1  ;;  %v6690_v11 = vcvt.s32.f32 %v6178_v46  ;;  %v7279_v34 = vmul.f32 %v16157_v41, %v6755_v35  ;;  %v6692_v55 = vcvt.s32.f32 %v6180_v19 }
 0x6cf   :  { %v7281_v43 = vmul.f32 %v16157_v41, %v6757_v40  ;;  %v6244_v18 = vunpack.c.1.s8 %v6060_v56  ;;  %11194 = vmatpush1.bf16.msra.mxu0 %v13466_v21  ;;  %v6754_v4 = vcvt.s32.f32 %v6242_v31  ;;  %v6175_v22 = vunpack.c.2.s8 %v6043_v10  ;;  %v6058_v56 = vld [vmem:[#allocation4 + $0x80] sm:$0xff] }
 0x6d0   :  { %v13433_v27 = vpack.c.bf16 %v7217_v63, %v7215_v14  ;;  %v7214_v13 = vmul.f32 %v16160_v32, %v6690_v11  ;;  %v7216_v59 = vmul.f32 %v16160_v32, %v6692_v55  ;;  %v6177_v29 = vunpack.c.3.s8 %v6043_v10 }
 0x6d1   :  { %v13465_v58 = vpack.c.bf16 %v7281_v43, %v7279_v34  ;;  %v6756_v37 = vcvt.s32.f32 %v6244_v18  ;;  %v7278_v45 = vmul.f32 %v16160_v32, %v6754_v4  ;;  %v6687_v51 = vcvt.s32.f32 %v6175_v22 }
 0x6d2   :  { %11154 = vmatprep.subr.bf16.mxu1 %v13433_v27  ;;  %v6239_v26 = vunpack.c.2.s8 %v6059_v25  ;;  %v6241_v23 = vunpack.c.3.s8 %v6059_v25  ;;  %v13432_v61 = vpack.c.bf16 %v7216_v59, %v7214_v13  ;;  %v6689_v47 = vcvt.s32.f32 %v6177_v29  ;;  %v6057_v13 = vld [vmem:[#allocation4 + $0x78] sm:$0xff] }
 0x6d3   :  { %11195 = vmatprep.subr.bf16.mxu0 %v13465_v58  ;;  %v7280_v2 = vmul.f32 %v16160_v32, %v6756_v37  ;;  %v6174_v49 = vunpack.c.2.s8 %v6042_v24  ;;  %v7211_v20 = vmul.f32 %v16157_v41, %v6687_v51  ;;  %v6176_v15 = vunpack.c.3.s8 %v6042_v24 }
 0x6d4   :  { %v6751_v44 = vcvt.s32.f32 %v6239_v26  ;;  %v6753_v33 = vcvt.s32.f32 %v6241_v23  ;;  %11155 = vmatpush1.bf16.msra.mxu1 %v13432_v61  ;;  %v7213_v54 = vmul.f32 %v16157_v41, %v6689_v47  ;;  %v6238_v3 = vunpack.c.2.s8 %v6058_v56  ;;  %v6056_v61 = vld [vmem:[#allocation4 + $0x70] sm:$0xff] }
 0x6d5   :  { %v13464_v8 = vpack.c.bf16 %v7280_v2, %v7278_v45  ;;  %v6686_v7 = vcvt.s32.f32 %v6174_v49  ;;  %v6688_v53 = vcvt.s32.f32 %v6176_v15  ;;  %v6240_v39 = vunpack.c.3.s8 %v6058_v56  ;;  %v6073_v45 = vld [vmem:[#allocation4 + $0xf8] sm:$0xff] }
 0x6d6   :  { %v7275_v0 = vmul.f32 %v16157_v41, %v6751_v44  ;;  %v7277_v52 = vmul.f32 %v16157_v41, %v6753_v33  ;;  %v13431_v12 = vpack.c.bf16 %v7213_v54, %v7211_v20  ;;  %v6750_v57 = vcvt.s32.f32 %v6238_v3 }
 0x6d7   :  { %11196 = vmatpush1.bf16.msra.mxu0 %v13464_v8  ;;  %v7210_v60 = vmul.f32 %v16160_v32, %v6686_v7  ;;  %v6171_v17 = vunpack.c.0.s8 %v6043_v10  ;;  %v7212_v1 = vmul.f32 %v16160_v32, %v6688_v53  ;;  %v6752_v46 = vcvt.s32.f32 %v6240_v39 }
 0x6d8   :  { %v13463_v9 = vpack.c.bf16 %v7277_v52, %v7275_v0  ;;  %v6173_v14 = vunpack.c.1.s8 %v6043_v10  ;;  %11156 = vmatprep.subr.bf16.mxu1 %v13431_v12  ;;  %v7274_v35 = vmul.f32 %v16160_v32, %v6750_v57  ;;  %v6235_v19 = vunpack.c.0.s8 %v6059_v25 }
 0x6d9   :  { %v6683_v40 = vcvt.s32.f32 %v6171_v17  ;;  %v6237_v21 = vunpack.c.1.s8 %v6059_v25  ;;  %v13430_v63 = vpack.c.bf16 %v7212_v1, %v7210_v60  ;;  %v7276_v11 = vmul.f32 %v16160_v32, %v6752_v46 }
 0x6da   :  { %11197 = vmatprep.subr.bf16.mxu0 %v13463_v9  ;;  %v6685_v31 = vcvt.s32.f32 %v6173_v14  ;;  %v6170_v34 = vunpack.c.0.s8 %v6042_v24  ;;  %v6747_v55 = vcvt.s32.f32 %v6235_v19  ;;  %v6172_v27 = vunpack.c.1.s8 %v6042_v24 }
 0x6db   :  { %v7207_v43 = vmul.f32 %v16157_v41, %v6683_v40  ;;  %v6749_v18 = vcvt.s32.f32 %v6237_v21  ;;  %11157 = vmatpush1.bf16.msra.mxu1 %v13430_v63  ;;  %v13462_v10 = vpack.c.bf16 %v7276_v11, %v7274_v35  ;;  %v6234_v58 = vunpack.c.0.s8 %v6058_v56 }
 0x6dc   :  { %v7209_v4 = vmul.f32 %v16157_v41, %v6685_v31  ;;  %v6682_v22 = vcvt.s32.f32 %v6170_v34  ;;  %v7271_v25 = vmul.f32 %v16157_v41, %v6747_v55  ;;  %v6684_v37 = vcvt.s32.f32 %v6172_v27 }
 0x6dd   :  { %v7273_v59 = vmul.f32 %v16157_v41, %v6749_v18  ;;  %v6236_v29 = vunpack.c.1.s8 %v6058_v56  ;;  %11198 = vmatpush1.bf16.msra.mxu0 %v13462_v10  ;;  %v6746_v23 = vcvt.s32.f32 %v6234_v58  ;;  %v6231_v24 = vunpack.c.2.s8 %v6057_v13  ;;  %v6072_v56 = vld [vmem:[#allocation4 + $0xf0] sm:$0xff] }
 0x6de   :  { %v13429_v51 = vpack.c.bf16 %v7209_v4, %v7207_v43  ;;  %v7206_v26 = vmul.f32 %v16160_v32, %v6682_v22  ;;  %v7208_v47 = vmul.f32 %v16160_v32, %v6684_v37  ;;  %v6233_v20 = vunpack.c.3.s8 %v6057_v13 }
 0x6df   :  { %v13461_v2 = vpack.c.bf16 %v7273_v59, %v7271_v25  ;;  %v6748_v49 = vcvt.s32.f32 %v6236_v29  ;;  %v7270_v44 = vmul.f32 %v16160_v32, %v6746_v23  ;;  %v6743_v33 = vcvt.s32.f32 %v6231_v24 }
 0x6e0   :  { %11158 = vmatprep.subr.bf16.mxu1 %v13429_v51  ;;  %v6295_v15 = vunpack.c.2.s8 %v6073_v45  ;;  %v6297_v8 = vunpack.c.3.s8 %v6073_v45  ;;  %v13428_v54 = vpack.c.bf16 %v7208_v47, %v7206_v26  ;;  %v6745_v3 = vcvt.s32.f32 %v6233_v20  ;;  %v6055_v26 = vld [vmem:[#allocation4 + $0x68] sm:$0xff] }
 0x6e1   :  { %11199 = vmatprep.subr.bf16.mxu0 %v13461_v2  ;;  %v7272_v7 = vmul.f32 %v16160_v32, %v6748_v49  ;;  %v6230_v0 = vunpack.c.2.s8 %v6056_v61  ;;  %v7267_v52 = vmul.f32 %v16157_v41, %v6743_v33  ;;  %v6232_v12 = vunpack.c.3.s8 %v6056_v61 }
 0x6e2   :  { %v6807_v53 = vcvt.s32.f32 %v6295_v15  ;;  %v6809_v39 = vcvt.s32.f32 %v6297_v8  ;;  %11159 = vmatpush1.bf16.msra.mxu1 %v13428_v54  ;;  %v7269_v57 = vmul.f32 %v16157_v41, %v6745_v3  ;;  %v6294_v9 = vunpack.c.2.s8 %v6072_v56  ;;  %v6054_v54 = vld [vmem:[#allocation4 + $0x60] sm:$0xff] }
 0x6e3   :  { %v13460_v60 = vpack.c.bf16 %v7272_v7, %v7270_v44  ;;  %v6742_v17 = vcvt.s32.f32 %v6230_v0  ;;  %v6744_v14 = vcvt.s32.f32 %v6232_v12  ;;  %v6296_v35 = vunpack.c.3.s8 %v6072_v56  ;;  %v6071_v44 = vld [vmem:[#allocation4 + $0xe8] sm:$0xff] }
 0x6e4   :  { %v7331_v1 = vmul.f32 %v16157_v41, %v6807_v53  ;;  %v7333_v46 = vmul.f32 %v16157_v41, %v6809_v39  ;;  %v13459_v40 = vpack.c.bf16 %v7269_v57, %v7267_v52  ;;  %v6806_v21 = vcvt.s32.f32 %v6294_v9 }
 0x6e5   :  { %11200 = vmatpush1.bf16.msra.mxu0 %v13460_v60  ;;  %v7266_v19 = vmul.f32 %v16160_v32, %v6742_v17  ;;  %v6227_v63 = vunpack.c.0.s8 %v6057_v13  ;;  %v7268_v31 = vmul.f32 %v16160_v32, %v6744_v14  ;;  %v6808_v34 = vcvt.s32.f32 %v6296_v35 }
 0x6e6   :  { %v13491_v11 = vpack.c.bf16 %v7333_v46, %v7331_v1  ;;  %v6229_v43 = vunpack.c.1.s8 %v6057_v13  ;;  %11160 = vmatprep.subr.bf16.mxu1 %v13459_v40  ;;  %v7330_v55 = vmul.f32 %v16160_v32, %v6806_v21  ;;  %v6291_v27 = vunpack.c.0.s8 %v6073_v45 }
 0x6e7   :  { %v6739_v18 = vcvt.s32.f32 %v6227_v63  ;;  %v6293_v10 = vunpack.c.1.s8 %v6073_v45  ;;  %v13458_v4 = vpack.c.bf16 %v7268_v31, %v7266_v19  ;;  %v7332_v22 = vmul.f32 %v16160_v32, %v6808_v34 }
 0x6e8   :  { %11201 = vmatprep.subr.bf16.mxu0 %v13491_v11  ;;  %v6741_v58 = vcvt.s32.f32 %v6229_v43  ;;  %v6226_v25 = vunpack.c.0.s8 %v6056_v61  ;;  %v6803_v37 = vcvt.s32.f32 %v6291_v27  ;;  %v6228_v51 = vunpack.c.1.s8 %v6056_v61 }
 0x6e9   :  { %v7263_v59 = vmul.f32 %v16157_v41, %v6739_v18  ;;  %v6805_v29 = vcvt.s32.f32 %v6293_v10  ;;  %11161 = vmatpush2.bf16.msra.mxu1 %v13458_v4  ;;  %v13490_v13 = vpack.c.bf16 %v7332_v22, %v7330_v55  ;;  %v6290_v2 = vunpack.c.0.s8 %v6072_v56 }
 0x6ea   :  { %v7265_v23 = vmul.f32 %v16157_v41, %v6741_v58  ;;  %v6738_v24 = vcvt.s32.f32 %v6226_v25  ;;  %v7327_v45 = vmul.f32 %v16157_v41, %v6803_v37  ;;  %v6740_v49 = vcvt.s32.f32 %v6228_v51 }
 0x6eb   :  { %v7329_v47 = vmul.f32 %v16157_v41, %v6805_v29  ;;  %v6292_v20 = vunpack.c.1.s8 %v6072_v56  ;;  %11202 = vmatpush2.bf16.msra.mxu0 %v13490_v13  ;;  %v6802_v8 = vcvt.s32.f32 %v6290_v2  ;;  %v6223_v61 = vunpack.c.2.s8 %v6055_v26  ;;  %v6070_v56 = vld [vmem:[#allocation4 + $0xe0] sm:$0xff] }
 0x6ec   :  { %v13457_v33 = vpack.c.bf16 %v7265_v23, %v7263_v59  ;;  %v7262_v15 = vmul.f32 %v16160_v32, %v6738_v24  ;;  %v7264_v3 = vmul.f32 %v16160_v32, %v6740_v49  ;;  %v6225_v52 = vunpack.c.3.s8 %v6055_v26 }
 0x6ed   :  { %v13489_v7 = vpack.c.bf16 %v7329_v47, %v7327_v45  ;;  %v6804_v0 = vcvt.s32.f32 %v6292_v20  ;;  %v7326_v53 = vmul.f32 %v16160_v32, %v6802_v8  ;;  %v6735_v39 = vcvt.s32.f32 %v6223_v61 }
 0x6ee   :  { %11162 = vmatprep.subr.bf16.mxu1 %v13457_v33  ;;  %v6287_v12 = vunpack.c.2.s8 %v6071_v44  ;;  %v6289_v60 = vunpack.c.3.s8 %v6071_v44  ;;  %v13456_v57 = vpack.c.bf16 %v7264_v3, %v7262_v15  ;;  %v6737_v9 = vcvt.s32.f32 %v6225_v52  ;;  %v6053_v15 = vld [vmem:[#allocation4 + $0x58] sm:$0xff] }
 0x6ef   :  { %11203 = vmatprep.subr.bf16.mxu0 %v13489_v7  ;;  %v7328_v17 = vmul.f32 %v16160_v32, %v6804_v0  ;;  %v6222_v1 = vunpack.c.2.s8 %v6054_v54  ;;  %v7259_v46 = vmul.f32 %v16157_v41, %v6735_v39  ;;  %v6224_v40 = vunpack.c.3.s8 %v6054_v54 }
 0x6f0   :  { %v6799_v14 = vcvt.s32.f32 %v6287_v12  ;;  %v6801_v35 = vcvt.s32.f32 %v6289_v60  ;;  %11163 = vmatpush2.bf16.msra.mxu1 %v13456_v57  ;;  %v7261_v21 = vmul.f32 %v16157_v41, %v6737_v9  ;;  %v6286_v11 = vunpack.c.2.s8 %v6070_v56  ;;  %v6052_v57 = vld [vmem:[#allocation4 + $0x50] sm:$0xff] }
 0x6f1   :  { %v13488_v19 = vpack.c.bf16 %v7328_v17, %v7326_v53  ;;  %v6734_v63 = vcvt.s32.f32 %v6222_v1  ;;  %v6736_v43 = vcvt.s32.f32 %v6224_v40  ;;  %v6288_v55 = vunpack.c.3.s8 %v6070_v56  ;;  %v6069_v53 = vld [vmem:[#allocation4 + $0xd8] sm:$0xff] }
 0x6f2   :  { %v7323_v31 = vmul.f32 %v16157_v41, %v6799_v14  ;;  %v7325_v34 = vmul.f32 %v16157_v41, %v6801_v35  ;;  %v13455_v18 = vpack.c.bf16 %v7261_v21, %v7259_v46  ;;  %v6798_v10 = vcvt.s32.f32 %v6286_v11 }
 0x6f3   :  { %11204 = vmatpush2.bf16.msra.mxu0 %v13488_v19  ;;  %v7258_v27 = vmul.f32 %v16160_v32, %v6734_v63  ;;  %v6219_v4 = vunpack.c.0.s8 %v6055_v26  ;;  %v7260_v58 = vmul.f32 %v16160_v32, %v6736_v43  ;;  %v6800_v25 = vcvt.s32.f32 %v6288_v55 }
 0x6f4   :  { %v13487_v22 = vpack.c.bf16 %v7325_v34, %v7323_v31  ;;  %v6221_v59 = vunpack.c.1.s8 %v6055_v26  ;;  %11164 = vmatprep.subr.bf16.mxu1 %v13455_v18  ;;  %v7322_v37 = vmul.f32 %v16160_v32, %v6798_v10  ;;  %v6283_v51 = vunpack.c.0.s8 %v6071_v44 }
 0x6f5   :  { %v6731_v29 = vcvt.s32.f32 %v6219_v4  ;;  %v6285_v13 = vunpack.c.1.s8 %v6071_v44  ;;  %v13454_v23 = vpack.c.bf16 %v7260_v58, %v7258_v27  ;;  %v7324_v24 = vmul.f32 %v16160_v32, %v6800_v25 }
 0x6f6   :  { %11205 = vmatprep.subr.bf16.mxu0 %v13487_v22  ;;  %v6733_v2 = vcvt.s32.f32 %v6221_v59  ;;  %v6218_v45 = vunpack.c.0.s8 %v6054_v54  ;;  %v6795_v49 = vcvt.s32.f32 %v6283_v51  ;;  %v6220_v33 = vunpack.c.1.s8 %v6054_v54 }
 0x6f7   :  { %v7255_v47 = vmul.f32 %v16157_v41, %v6731_v29  ;;  %v6797_v20 = vcvt.s32.f32 %v6285_v13  ;;  %11165 = vmatpush2.bf16.msra.mxu1 %v13454_v23  ;;  %v13486_v26 = vpack.c.bf16 %v7324_v24, %v7322_v37  ;;  %v6282_v7 = vunpack.c.0.s8 %v6070_v56 }
 0x6f8   :  { %v7257_v8 = vmul.f32 %v16157_v41, %v6733_v2  ;;  %v6730_v61 = vcvt.s32.f32 %v6218_v45  ;;  %v7319_v44 = vmul.f32 %v16157_v41, %v6795_v49  ;;  %v6732_v0 = vcvt.s32.f32 %v6220_v33 }
 0x6f9   :  { %v7321_v3 = vmul.f32 %v16157_v41, %v6797_v20  ;;  %v6284_v52 = vunpack.c.1.s8 %v6070_v56  ;;  %11206 = vmatpush2.bf16.msra.mxu0 %v13486_v26  ;;  %v6794_v60 = vcvt.s32.f32 %v6282_v7  ;;  %v6215_v54 = vunpack.c.2.s8 %v6053_v15  ;;  %v6068_v56 = vld [vmem:[#allocation4 + $0xd0] sm:$0xff] }
 0x6fa   :  { %v13453_v39 = vpack.c.bf16 %v7257_v8, %v7255_v47  ;;  %v7254_v12 = vmul.f32 %v16160_v32, %v6730_v61  ;;  %v7256_v9 = vmul.f32 %v16160_v32, %v6732_v0  ;;  %v6217_v46 = vunpack.c.3.s8 %v6053_v15 }
 0x6fb   :  { %v13485_v17 = vpack.c.bf16 %v7321_v3, %v7319_v44  ;;  %v6796_v1 = vcvt.s32.f32 %v6284_v52  ;;  %v7318_v14 = vmul.f32 %v16160_v32, %v6794_v60  ;;  %v6727_v35 = vcvt.s32.f32 %v6215_v54 }
 0x6fc   :  { %11166 = vmatprep.subr.bf16.mxu1 %v13453_v39  ;;  %v6279_v40 = vunpack.c.2.s8 %v6069_v53  ;;  %v6281_v19 = vunpack.c.3.s8 %v6069_v53  ;;  %v13452_v21 = vpack.c.bf16 %v7256_v9, %v7254_v12  ;;  %v6729_v11 = vcvt.s32.f32 %v6217_v46  ;;  %v6051_v12 = vld [vmem:[#allocation4 + $0x48] sm:$0xff] }
 0x6fd   :  { %11207 = vmatprep.subr.bf16.mxu0 %v13485_v17  ;;  %v7320_v63 = vmul.f32 %v16160_v32, %v6796_v1  ;;  %v6214_v31 = vunpack.c.2.s8 %v6052_v57  ;;  %v7251_v34 = vmul.f32 %v16157_v41, %v6727_v35  ;;  %v6216_v18 = vunpack.c.3.s8 %v6052_v57 }
 0x6fe   :  { %v6791_v43 = vcvt.s32.f32 %v6279_v40  ;;  %v6793_v55 = vcvt.s32.f32 %v6281_v19  ;;  %11167 = vmatpush2.bf16.msra.mxu1 %v13452_v21  ;;  %v7253_v10 = vmul.f32 %v16157_v41, %v6729_v11  ;;  %v6278_v22 = vunpack.c.2.s8 %v6068_v56  ;;  %v6050_v21 = vld [vmem:[#allocation4 + $0x40] sm:$0xff] }
 0x6ff   :  { %v13484_v27 = vpack.c.bf16 %v7320_v63, %v7318_v14  ;;  %v6726_v4 = vcvt.s32.f32 %v6214_v31  ;;  %v6728_v59 = vcvt.s32.f32 %v6216_v18  ;;  %v6280_v37 = vunpack.c.3.s8 %v6068_v56  ;;  %v6067_v14 = vld [vmem:[#allocation4 + $0xc8] sm:$0xff] }
 0x700   :  { %v7315_v58 = vmul.f32 %v16157_v41, %v6791_v43  ;;  %v7317_v25 = vmul.f32 %v16157_v41, %v6793_v55  ;;  %v13451_v29 = vpack.c.bf16 %v7253_v10, %v7251_v34  ;;  %v6790_v13 = vcvt.s32.f32 %v6278_v22 }
 0x701   :  { %11208 = vmatpush2.bf16.msra.mxu0 %v13484_v27  ;;  %v7250_v51 = vmul.f32 %v16160_v32, %v6726_v4  ;;  %v6211_v23 = vunpack.c.0.s8 %v6053_v15  ;;  %v7252_v2 = vmul.f32 %v16160_v32, %v6728_v59  ;;  %v6792_v45 = vcvt.s32.f32 %v6280_v37 }
 0x702   :  { %v13483_v24 = vpack.c.bf16 %v7317_v25, %v7315_v58  ;;  %v6213_v47 = vunpack.c.1.s8 %v6053_v15  ;;  %11168 = vmatprep.subr.bf16.mxu1 %v13451_v29  ;;  %v7314_v49 = vmul.f32 %v16160_v32, %v6790_v13  ;;  %v6275_v33 = vunpack.c.0.s8 %v6069_v53 }
 0x703   :  { %v6723_v20 = vcvt.s32.f32 %v6211_v23  ;;  %v6277_v26 = vunpack.c.1.s8 %v6069_v53  ;;  %v13450_v8 = vpack.c.bf16 %v7252_v2, %v7250_v51  ;;  %v7316_v61 = vmul.f32 %v16160_v32, %v6792_v45 }
 0x704   :  { %11209 = vmatprep.subr.bf16.mxu0 %v13483_v24  ;;  %v6725_v7 = vcvt.s32.f32 %v6213_v47  ;;  %v6210_v44 = vunpack.c.0.s8 %v6052_v57  ;;  %v6787_v0 = vcvt.s32.f32 %v6275_v33  ;;  %v6212_v39 = vunpack.c.1.s8 %v6052_v57 }
 0x705   :  { %v7247_v3 = vmul.f32 %v16157_v41, %v6723_v20  ;;  %v6789_v52 = vcvt.s32.f32 %v6277_v26  ;;  %11169 = vmatpush2.bf16.msra.mxu1 %v13450_v8  ;;  %v13482_v15 = vpack.c.bf16 %v7316_v61, %v7314_v49  ;;  %v6274_v17 = vunpack.c.0.s8 %v6068_v56 }
 0x706   :  { %v7249_v60 = vmul.f32 %v16157_v41, %v6725_v7  ;;  %v6722_v54 = vcvt.s32.f32 %v6210_v44  ;;  %v7311_v53 = vmul.f32 %v16157_v41, %v6787_v0  ;;  %v6724_v1 = vcvt.s32.f32 %v6212_v39 }
 0x707   :  { %v7313_v9 = vmul.f32 %v16157_v41, %v6789_v52  ;;  %v6276_v46 = vunpack.c.1.s8 %v6068_v56  ;;  %11210 = vmatpush2.bf16.msra.mxu0 %v13482_v15  ;;  %v6786_v19 = vcvt.s32.f32 %v6274_v17  ;;  %v6207_v57 = vunpack.c.2.s8 %v6051_v12  ;;  %v6066_v56 = vld [vmem:[#allocation4 + $0xc0] sm:$0xff] }
 0x708   :  { %v13449_v35 = vpack.c.bf16 %v7249_v60, %v7247_v3  ;;  %v7246_v40 = vmul.f32 %v16160_v32, %v6722_v54  ;;  %v7248_v11 = vmul.f32 %v16160_v32, %v6724_v1  ;;  %v6209_v34 = vunpack.c.3.s8 %v6051_v12 }
 0x709   :  { %v13481_v63 = vpack.c.bf16 %v7313_v9, %v7311_v53  ;;  %v6788_v31 = vcvt.s32.f32 %v6276_v46  ;;  %v7310_v43 = vmul.f32 %v16160_v32, %v6786_v19  ;;  %v6719_v55 = vcvt.s32.f32 %v6207_v57 }
 0x70a   :  { %11170 = vmatprep.subr.bf16.mxu1 %v13449_v35  ;;  %v6271_v18 = vunpack.c.2.s8 %v6067_v14  ;;  %v6273_v27 = vunpack.c.3.s8 %v6067_v14  ;;  %v13448_v10 = vpack.c.bf16 %v7248_v11, %v7246_v40  ;;  %v6721_v22 = vcvt.s32.f32 %v6209_v34  ;;  %v16283_v40 = vld [vmem:[#allocation4 + $0x138] sm:$0xff] }
 0x70b   :  { %11211 = vmatprep.subr.bf16.mxu0 %v13481_v63  ;;  %v7312_v4 = vmul.f32 %v16160_v32, %v6788_v31  ;;  %v6206_v58 = vunpack.c.2.s8 %v6050_v21  ;;  %v7243_v25 = vmul.f32 %v16157_v41, %v6719_v55  ;;  %v6208_v29 = vunpack.c.3.s8 %v6050_v21 }
 0x70c   :  { %v6783_v59 = vcvt.s32.f32 %v6271_v18  ;;  %v6785_v37 = vcvt.s32.f32 %v6273_v27  ;;  %11171 = vmatpush2.bf16.msra.mxu1 %v13448_v10  ;;  %v7245_v13 = vmul.f32 %v16157_v41, %v6721_v22  ;;  %v6270_v24 = vunpack.c.2.s8 %v6066_v56  ;;  %v6080_v10 = vld [vmem:[#allocation4 + $0x130] sm:$0xff] }
 0x70d   :  { %v13480_v51 = vpack.c.bf16 %v7312_v4, %v7310_v43  ;;  %v6718_v23 = vcvt.s32.f32 %v6206_v58  ;;  %v6720_v47 = vcvt.s32.f32 %v6208_v29  ;;  %v6272_v49 = vunpack.c.3.s8 %v6066_v56  ;;  %v6097_v43 = vld [vmem:[#allocation4 + $0x1b8] sm:$0xff] }
 0x70e   :  { %v7307_v2 = vmul.f32 %v16157_v41, %v6783_v59  ;;  %v7309_v45 = vmul.f32 %v16157_v41, %v6785_v37  ;;  %v13447_v20 = vpack.c.bf16 %v7245_v13, %v7243_v25  ;;  %v6782_v26 = vcvt.s32.f32 %v6270_v24 }
 0x70f   :  { %11212 = vmatpush2.bf16.msra.mxu0 %v13480_v51  ;;  %v7242_v33 = vmul.f32 %v16160_v32, %v6718_v23  ;;  %v6203_v8 = vunpack.c.0.s8 %v6051_v12  ;;  %v7244_v7 = vmul.f32 %v16160_v32, %v6720_v47  ;;  %v6784_v44 = vcvt.s32.f32 %v6272_v49  ;;  %v16293_v51 = vld [vmem:[#allocation4 + $0x1b0] sm:$0xff] }
 0x710   :  { %v13479_v61 = vpack.c.bf16 %v7309_v45, %v7307_v2  ;;  %v6205_v3 = vunpack.c.1.s8 %v6051_v12  ;;  %11172 = vmatprep.subr.bf16.mxu1 %v13447_v20  ;;  %v7306_v0 = vmul.f32 %v16160_v32, %v6782_v26  ;;  %v6267_v39 = vunpack.c.0.s8 %v6067_v14 }
 0x711   :  { %v6715_v52 = vcvt.s32.f32 %v6203_v8  ;;  %v6269_v15 = vunpack.c.1.s8 %v6067_v14  ;;  %v13446_v60 = vpack.c.bf16 %v7244_v7, %v7242_v33  ;;  %v7308_v54 = vmul.f32 %v16160_v32, %v6784_v44 }
 0x712   :  { %11213 = vmatprep.subr.bf16.mxu0 %v13479_v61  ;;  %v6717_v17 = vcvt.s32.f32 %v6205_v3  ;;  %v6202_v53 = vunpack.c.0.s8 %v6050_v21  ;;  %v6779_v1 = vcvt.s32.f32 %v6267_v39  ;;  %v6204_v35 = vunpack.c.1.s8 %v6050_v21 }
 0x713   :  { %v7239_v9 = vmul.f32 %v16157_v41, %v6715_v52  ;;  %v6781_v46 = vcvt.s32.f32 %v6269_v15  ;;  %11173 = vmatpush2.bf16.msra.mxu1 %v13446_v60  ;;  %v13478_v12 = vpack.c.bf16 %v7308_v54, %v7306_v0  ;;  %v6266_v63 = vunpack.c.0.s8 %v6066_v56 }
 0x714   :  { %v7241_v19 = vmul.f32 %v16157_v41, %v6717_v17  ;;  %v6714_v57 = vcvt.s32.f32 %v6202_v53  ;;  %v7303_v14 = vmul.f32 %v16157_v41, %v6779_v1  ;;  %v6716_v31 = vcvt.s32.f32 %v6204_v35 }
 0x715   :  { %v7305_v11 = vmul.f32 %v16157_v41, %v6781_v46  ;;  %v6268_v34 = vunpack.c.1.s8 %v6066_v56  ;;  %11214 = vmatpush2.bf16.msra.mxu0 %v13478_v12  ;;  %v6778_v21 = vcvt.s32.f32 %v6266_v63  ;;  %v6327_v27 = vunpack.c.2.s8 %v16283_v40 }
 0x716   :  { %v13445_v55 = vpack.c.bf16 %v7241_v19, %v7239_v9  ;;  %v7238_v18 = vmul.f32 %v16160_v32, %v6714_v57  ;;  %v7240_v22 = vmul.f32 %v16160_v32, %v6716_v31  ;;  %v6329_v25 = vunpack.c.3.s8 %v16283_v40  ;;  %v6079_v31 = vld [vmem:[#allocation4 + $0x128] sm:$0xff] }
 0x717   :  { %v13477_v4 = vpack.c.bf16 %v7305_v11, %v7303_v14  ;;  %v6780_v58 = vcvt.s32.f32 %v6268_v34  ;;  %v7302_v59 = vmul.f32 %v16160_v32, %v6778_v21  ;;  %v6839_v37 = vcvt.s32.f32 %v6327_v27 }
 0x718   :  { %11174 = vmatprep.subr.bf16.mxu1 %v13445_v55  ;;  %v6391_v56 = vunpack.c.2.s8 %v6097_v43  ;;  %v6393_v29 = vunpack.c.3.s8 %v6097_v43  ;;  %v13444_v13 = vpack.c.bf16 %v7240_v22, %v7238_v18  ;;  %v6841_v24 = vcvt.s32.f32 %v6329_v25 }
 0x719   :  { %11215 = vmatprep.subr.bf16.mxu0 %v13477_v4  ;;  %v7304_v23 = vmul.f32 %v16160_v32, %v6780_v58  ;;  %v6326_v2 = vunpack.c.2.s8 %v6080_v10  ;;  %v7363_v45 = vmul.f32 %v16157_v41, %v6839_v37  ;;  %v6328_v20 = vunpack.c.3.s8 %v6080_v10  ;;  %v6095_v4 = vld [vmem:[#allocation4 + $0x1a8] sm:$0xff] }
 0x71a   :  { %v6903_v47 = vcvt.s32.f32 %v6391_v56  ;;  %v6905_v49 = vcvt.s32.f32 %v6393_v29  ;;  %11175 = vmatpush2.bf16.msra.mxu1 %v13444_v13  ;;  %v7365_v26 = vmul.f32 %v16157_v41, %v6841_v24  ;;  %v6390_v61 = vunpack.c.2.s8 %v16293_v51 }
 0x71b   :  { %v13476_v33 = vpack.c.bf16 %v7304_v23, %v7302_v59  ;;  %v6838_v8 = vcvt.s32.f32 %v6326_v2  ;;  %v6840_v3 = vcvt.s32.f32 %v6328_v20  ;;  %v6392_v0 = vunpack.c.3.s8 %v16293_v51  ;;  %v6078_v59 = vld [vmem:[#allocation4 + $0x120] sm:$0xff] }
 0x71c   :  { %v7427_v7 = vmul.f32 %v16157_v41, %v6903_v47  ;;  %v7429_v44 = vmul.f32 %v16157_v41, %v6905_v49  ;;  %v13507_v52 = vpack.c.bf16 %v7365_v26, %v7363_v45  ;;  %v6902_v15 = vcvt.s32.f32 %v6390_v61 }
 0x71d   :  { %11216 = vmatpush2.bf16.msra.mxu0 %v13476_v33  ;;  %v7362_v39 = vmul.f32 %v16160_v32, %v6838_v8  ;;  %v6323_v60 = vunpack.c.0.s8 %v16283_v40  ;;  %11177 = vmatmul.mubr.bf16.vlgmr.msra.gmra.mxu1 %v9592_v62  ;;  %v7364_v17 = vmul.f32 %v16160_v32, %v6840_v3  ;;  %v6904_v53 = vcvt.s32.f32 %v6392_v0 }
 0x71e   :  { %v13539_v54 = vpack.c.bf16 %v7429_v44, %v7427_v7  ;;  %v6325_v9 = vunpack.c.1.s8 %v16283_v40  ;;  %11226 = vmatprep.subr.bf16.mxu1 %v13507_v52  ;;  %v7426_v1 = vmul.f32 %v16160_v32, %v6902_v15  ;;  %v6387_v35 = vunpack.c.0.s8 %v6097_v43 }
 0x71f   :  { %v6835_v46 = vcvt.s32.f32 %v6323_v60  ;;  %v6389_v12 = vunpack.c.1.s8 %v6097_v43  ;;  %v13506_v19 = vpack.c.bf16 %v7364_v17, %v7362_v39  ;;  %v7428_v6 = vmul.f32 %v16160_v32, %v6904_v53 }
 0x720   :  { %11218 = vmatmul.mubr.bf16.vlgmr.msra.gmra.mxu0 %v9594_v42  ;;  %11267 = vmatprep.subr.bf16.mxu0 %v13539_v54  ;;  %v6837_v62 = vcvt.s32.f32 %v6325_v9  ;;  %v6322_v57 = vunpack.c.0.s8 %v6080_v10  ;;  %v6899_v14 = vcvt.s32.f32 %v6387_v35  ;;  %v6324_v11 = vunpack.c.1.s8 %v6080_v10 }
 0x721   :  { %v7359_v63 = vmul.f32 %v16157_v41, %v6835_v46  ;;  %v6901_v40 = vcvt.s32.f32 %v6389_v12  ;;  %11227 = vmatpush1.bf16.msra.mxu1 %v13506_v19  ;;  %v13538_v34 = vpack.c.bf16 %v7428_v6, %v7426_v1  ;;  %v6386_v30 = vunpack.c.0.s8 %v16293_v51 }
 0x722   :  { %v7361_v43 = vmul.f32 %v16157_v41, %v6837_v62  ;;  %v6834_v55 = vcvt.s32.f32 %v6322_v57  ;;  %v7423_v42 = vmul.f32 %v16157_v41, %v6899_v14  ;;  %v6836_v21 = vcvt.s32.f32 %v6324_v11 }
 0x723   :  { %v7425_v18 = vmul.f32 %v16157_v41, %v6901_v40  ;;  %v6388_v27 = vunpack.c.1.s8 %v16293_v51  ;;  %11268 = vmatpush1.bf16.msra.mxu0 %v13538_v34  ;;  %v6898_v58 = vcvt.s32.f32 %v6386_v30  ;;  %v6319_v25 = vunpack.c.2.s8 %v6079_v31  ;;  %v6094_v51 = vld [vmem:[#allocation4 + $0x1a0] sm:$0xff] }
 0x724   :  { %v13505_v22 = vpack.c.bf16 %v7361_v43, %v7359_v63  ;;  %v7358_v10 = vmul.f32 %v16160_v32, %v6834_v55  ;;  %v7360_v56 = vmul.f32 %v16160_v32, %v6836_v21  ;;  %v6321_v13 = vunpack.c.3.s8 %v6079_v31 }
 0x725   :  { %v13537_v37 = vpack.c.bf16 %v7425_v18, %v7423_v42  ;;  %v6900_v29 = vcvt.s32.f32 %v6388_v27  ;;  %v7422_v23 = vmul.f32 %v16160_v32, %v6898_v58  ;;  %v6831_v24 = vcvt.s32.f32 %v6319_v25  ;;  %v6077_v18 = vld [vmem:[#allocation4 + $0x118] sm:$0xff] }
 0x726   :  { %11228 = vmatprep.subr.bf16.mxu1 %v13505_v22  ;;  %v6383_v2 = vunpack.c.2.s8 %v6095_v4  ;;  %v6385_v45 = vunpack.c.3.s8 %v6095_v4  ;;  %v13504_v47 = vpack.c.bf16 %v7360_v56, %v7358_v10  ;;  %v6833_v20 = vcvt.s32.f32 %v6321_v13 }
 0x727   :  { %11269 = vmatprep.subr.bf16.mxu0 %v13537_v37  ;;  %v7424_v49 = vmul.f32 %v16160_v32, %v6900_v29  ;;  %v6318_v33 = vunpack.c.2.s8 %v6078_v59  ;;  %v7355_v26 = vmul.f32 %v16157_v41, %v6831_v24  ;;  %v6320_v7 = vunpack.c.3.s8 %v6078_v59  ;;  %v6093_v37 = vld [vmem:[#allocation4 + $0x198] sm:$0xff] }
 0x728   :  { %v6895_v8 = vcvt.s32.f32 %v6383_v2  ;;  %v6897_v61 = vcvt.s32.f32 %v6385_v45  ;;  %11229 = vmatpush1.bf16.msra.mxu1 %v13504_v47  ;;  %v7357_v3 = vmul.f32 %v16157_v41, %v6833_v20  ;;  %v6382_v52 = vunpack.c.2.s8 %v6094_v51 }
 0x729   :  { %v13536_v44 = vpack.c.bf16 %v7424_v49, %v7422_v23  ;;  %v6830_v0 = vcvt.s32.f32 %v6318_v33  ;;  %v6832_v60 = vcvt.s32.f32 %v6320_v7  ;;  %v6384_v54 = vunpack.c.3.s8 %v6094_v51  ;;  %v6076_v23 = vld [vmem:[#allocation4 + $0x110] sm:$0xff] }
 0x72a   :  { %v7419_v39 = vmul.f32 %v16157_v41, %v6895_v8  ;;  %v7421_v15 = vmul.f32 %v16157_v41, %v6897_v61  ;;  %v13503_v17 = vpack.c.bf16 %v7357_v3, %v7355_v26  ;;  %v6894_v9 = vcvt.s32.f32 %v6382_v52 }
 0x72b   :  { %11270 = vmatpush1.bf16.msra.mxu0 %v13536_v44  ;;  %v7354_v53 = vmul.f32 %v16160_v32, %v6830_v0  ;;  %v6315_v1 = vunpack.c.0.s8 %v6079_v31  ;;  %v7356_v35 = vmul.f32 %v16160_v32, %v6832_v60  ;;  %v6896_v12 = vcvt.s32.f32 %v6384_v54 }
 0x72c   :  { %v13535_v46 = vpack.c.bf16 %v7421_v15, %v7419_v39  ;;  %v6317_v19 = vunpack.c.1.s8 %v6079_v31  ;;  %11230 = vmatprep.subr.bf16.mxu1 %v13503_v17  ;;  %v7418_v6 = vmul.f32 %v16160_v32, %v6894_v9  ;;  %v6379_v57 = vunpack.c.0.s8 %v6095_v4 }
 0x72d   :  { %v6827_v62 = vcvt.s32.f32 %v6315_v1  ;;  %v6381_v63 = vunpack.c.1.s8 %v6095_v4  ;;  %v13502_v14 = vpack.c.bf16 %v7356_v35, %v7354_v53  ;;  %v7420_v40 = vmul.f32 %v16160_v32, %v6896_v12 }
 0x72e   :  { %11271 = vmatprep.subr.bf16.mxu0 %v13535_v46  ;;  %v6829_v11 = vcvt.s32.f32 %v6317_v19  ;;  %v6314_v34 = vunpack.c.0.s8 %v6078_v59  ;;  %v6891_v55 = vcvt.s32.f32 %v6379_v57  ;;  %v6316_v42 = vunpack.c.1.s8 %v6078_v59 }
 0x72f   :  { %v7351_v43 = vmul.f32 %v16157_v41, %v6827_v62  ;;  %v6893_v30 = vcvt.s32.f32 %v6381_v63  ;;  %11231 = vmatpush1.bf16.msra.mxu1 %v13502_v14  ;;  %v13534_v31 = vpack.c.bf16 %v7420_v40, %v7418_v6  ;;  %v6378_v22 = vunpack.c.0.s8 %v6094_v51 }
 0x730   :  { %v7353_v21 = vmul.f32 %v16157_v41, %v6829_v11  ;;  %v6826_v27 = vcvt.s32.f32 %v6314_v34  ;;  %v7415_v4 = vmul.f32 %v16157_v41, %v6891_v55  ;;  %v6828_v58 = vcvt.s32.f32 %v6316_v42 }
 0x731   :  { %v7417_v10 = vmul.f32 %v16157_v41, %v6893_v30  ;;  %v6380_v25 = vunpack.c.1.s8 %v6094_v51  ;;  %11272 = vmatpush1.bf16.msra.mxu0 %v13534_v31  ;;  %v6890_v13 = vcvt.s32.f32 %v6378_v22  ;;  %v6311_v59 = vunpack.c.2.s8 %v6077_v18  ;;  %v6092_v51 = vld [vmem:[#allocation4 + $0x190] sm:$0xff] }
 0x732   :  { %v13501_v56 = vpack.c.bf16 %v7353_v21, %v7351_v43  ;;  %v7350_v29 = vmul.f32 %v16160_v32, %v6826_v27  ;;  %v7352_v2 = vmul.f32 %v16160_v32, %v6828_v58  ;;  %v6313_v47 = vunpack.c.3.s8 %v6077_v18 }
 0x733   :  { %v13533_v24 = vpack.c.bf16 %v7417_v10, %v7415_v4  ;;  %v6892_v45 = vcvt.s32.f32 %v6380_v25  ;;  %v7414_v49 = vmul.f32 %v16160_v32, %v6890_v13  ;;  %v6823_v20 = vcvt.s32.f32 %v6311_v59  ;;  %v6075_v10 = vld [vmem:[#allocation4 + $0x108] sm:$0xff] }
 0x734   :  { %11232 = vmatprep.subr.bf16.mxu1 %v13501_v56  ;;  %v6375_v33 = vunpack.c.2.s8 %v6093_v37  ;;  %v6377_v26 = vunpack.c.3.s8 %v6093_v37  ;;  %v13500_v8 = vpack.c.bf16 %v7352_v2, %v7350_v29  ;;  %v6825_v7 = vcvt.s32.f32 %v6313_v47 }
 0x735   :  { %11273 = vmatprep.subr.bf16.mxu0 %v13533_v24  ;;  %v7416_v61 = vmul.f32 %v16160_v32, %v6892_v45  ;;  %v6310_v44 = vunpack.c.2.s8 %v6076_v23  ;;  %v7347_v3 = vmul.f32 %v16157_v41, %v6823_v20  ;;  %v6312_v39 = vunpack.c.3.s8 %v6076_v23  ;;  %v6091_v24 = vld [vmem:[#allocation4 + $0x188] sm:$0xff] }
 0x736   :  { %v6887_v0 = vcvt.s32.f32 %v6375_v33  ;;  %v6889_v52 = vcvt.s32.f32 %v6377_v26  ;;  %11233 = vmatpush1.bf16.msra.mxu1 %v13500_v8  ;;  %v7349_v60 = vmul.f32 %v16157_v41, %v6825_v7  ;;  %v6374_v17 = vunpack.c.2.s8 %v6092_v51 }
 0x737   :  { %v13532_v15 = vpack.c.bf16 %v7416_v61, %v7414_v49  ;;  %v6822_v54 = vcvt.s32.f32 %v6310_v44  ;;  %v6824_v1 = vcvt.s32.f32 %v6312_v39  ;;  %v6376_v46 = vunpack.c.3.s8 %v6092_v51  ;;  %v6074_v49 = vld [vmem:[#allocation4 + $0x100] sm:$0xff] }
 0x738   :  { %v7411_v53 = vmul.f32 %v16157_v41, %v6887_v0  ;;  %v7413_v9 = vmul.f32 %v16157_v41, %v6889_v52  ;;  %v13499_v35 = vpack.c.bf16 %v7349_v60, %v7347_v3  ;;  %v6886_v19 = vcvt.s32.f32 %v6374_v17 }
 0x739   :  { %11274 = vmatpush1.bf16.msra.mxu0 %v13532_v15  ;;  %v7346_v12 = vmul.f32 %v16160_v32, %v6822_v54  ;;  %v6307_v6 = vunpack.c.0.s8 %v6077_v18  ;;  %v7348_v57 = vmul.f32 %v16160_v32, %v6824_v1  ;;  %v6888_v63 = vcvt.s32.f32 %v6376_v46 }
 0x73a   :  { %v13531_v62 = vpack.c.bf16 %v7413_v9, %v7411_v53  ;;  %v6309_v14 = vunpack.c.1.s8 %v6077_v18  ;;  %11234 = vmatprep.subr.bf16.mxu1 %v13499_v35  ;;  %v7410_v40 = vmul.f32 %v16160_v32, %v6886_v19  ;;  %v6371_v34 = vunpack.c.0.s8 %v6093_v37 }
 0x73b   :  { %v6819_v11 = vcvt.s32.f32 %v6307_v6  ;;  %v6373_v43 = vunpack.c.1.s8 %v6093_v37  ;;  %v13498_v55 = vpack.c.bf16 %v7348_v57, %v7346_v12  ;;  %v7412_v30 = vmul.f32 %v16160_v32, %v6888_v63 }
 0x73c   :  { %11275 = vmatprep.subr.bf16.mxu0 %v13531_v62  ;;  %v6821_v42 = vcvt.s32.f32 %v6309_v14  ;;  %v6306_v31 = vunpack.c.0.s8 %v6076_v23  ;;  %v6883_v27 = vcvt.s32.f32 %v6371_v34  ;;  %v6308_v4 = vunpack.c.1.s8 %v6076_v23 }
 0x73d   :  { %v7343_v21 = vmul.f32 %v16157_v41, %v6819_v11  ;;  %v6885_v22 = vcvt.s32.f32 %v6373_v43  ;;  %11235 = vmatpush1.bf16.msra.mxu1 %v13498_v55  ;;  %v13530_v18 = vpack.c.bf16 %v7412_v30, %v7410_v40  ;;  %v6370_v56 = vunpack.c.0.s8 %v6092_v51 }
 0x73e   :  { %v7345_v58 = vmul.f32 %v16157_v41, %v6821_v42  ;;  %v6818_v25 = vcvt.s32.f32 %v6306_v31  ;;  %v7407_v37 = vmul.f32 %v16157_v41, %v6883_v27  ;;  %v6820_v13 = vcvt.s32.f32 %v6308_v4 }
 0x73f   :  { %v7409_v29 = vmul.f32 %v16157_v41, %v6885_v22  ;;  %v6372_v59 = vunpack.c.1.s8 %v6092_v51  ;;  %11276 = vmatpush1.bf16.msra.mxu0 %v13530_v18  ;;  %v6882_v47 = vcvt.s32.f32 %v6370_v56  ;;  %v6303_v23 = vunpack.c.2.s8 %v6075_v10  ;;  %v6090_v51 = vld [vmem:[#allocation4 + $0x180] sm:$0xff] }
 0x740   :  { %v13497_v2 = vpack.c.bf16 %v7345_v58, %v7343_v21  ;;  %v7342_v45 = vmul.f32 %v16160_v32, %v6818_v25  ;;  %v7344_v33 = vmul.f32 %v16160_v32, %v6820_v13  ;;  %v6305_v8 = vunpack.c.3.s8 %v6075_v10 }
 0x741   :  { %v13529_v20 = vpack.c.bf16 %v7409_v29, %v7407_v37  ;;  %v6884_v26 = vcvt.s32.f32 %v6372_v59  ;;  %v7406_v61 = vmul.f32 %v16160_v32, %v6882_v47  ;;  %v6815_v7 = vcvt.s32.f32 %v6303_v23  ;;  %v6089_v29 = vld [vmem:[#allocation4 + $0x178] sm:$0xff] }
 0x742   :  { %11236 = vmatprep.subr.bf16.mxu1 %v13497_v2  ;;  %v6367_v44 = vunpack.c.2.s8 %v6091_v24  ;;  %v6369_v3 = vunpack.c.3.s8 %v6091_v24  ;;  %v13496_v0 = vpack.c.bf16 %v7344_v33, %v7342_v45  ;;  %v6817_v39 = vcvt.s32.f32 %v6305_v8 }
 0x743   :  { %11277 = vmatprep.subr.bf16.mxu0 %v13529_v20  ;;  %v7408_v52 = vmul.f32 %v16160_v32, %v6884_v26  ;;  %v6302_v15 = vunpack.c.2.s8 %v6074_v49  ;;  %v7339_v60 = vmul.f32 %v16157_v41, %v6815_v7  ;;  %v6304_v53 = vunpack.c.3.s8 %v6074_v49  ;;  %v6105_v20 = vld [vmem:[#allocation4 + $0x1f8] sm:$0xff] }
 0x744   :  { %v6879_v54 = vcvt.s32.f32 %v6367_v44  ;;  %v6881_v17 = vcvt.s32.f32 %v6369_v3  ;;  %11237 = vmatpush1.bf16.msra.mxu1 %v13496_v0  ;;  %v7341_v1 = vmul.f32 %v16157_v41, %v6817_v39  ;;  %v6366_v35 = vunpack.c.2.s8 %v6090_v51 }
 0x745   :  { %v13528_v9 = vpack.c.bf16 %v7408_v52, %v7406_v61  ;;  %v6814_v46 = vcvt.s32.f32 %v6302_v15  ;;  %v6816_v6 = vcvt.s32.f32 %v6304_v53  ;;  %v6368_v62 = vunpack.c.3.s8 %v6090_v51  ;;  %v6088_v61 = vld [vmem:[#allocation4 + $0x170] sm:$0xff] }
 0x746   :  { %v7403_v12 = vmul.f32 %v16157_v41, %v6879_v54  ;;  %v7405_v19 = vmul.f32 %v16157_v41, %v6881_v17  ;;  %v13495_v57 = vpack.c.bf16 %v7341_v1, %v7339_v60  ;;  %v6878_v14 = vcvt.s32.f32 %v6366_v35 }
 0x747   :  { %11278 = vmatpush1.bf16.msra.mxu0 %v13528_v9  ;;  %v7338_v63 = vmul.f32 %v16160_v32, %v6814_v46  ;;  %v6299_v40 = vunpack.c.0.s8 %v6075_v10  ;;  %v7340_v34 = vmul.f32 %v16160_v32, %v6816_v6  ;;  %v6880_v43 = vcvt.s32.f32 %v6368_v62 }
 0x748   :  { %v13527_v11 = vpack.c.bf16 %v7405_v19, %v7403_v12  ;;  %v6301_v55 = vunpack.c.1.s8 %v6075_v10  ;;  %11238 = vmatprep.subr.bf16.mxu1 %v13495_v57  ;;  %v7402_v30 = vmul.f32 %v16160_v32, %v6878_v14  ;;  %v6363_v31 = vunpack.c.0.s8 %v6091_v24 }
 0x749   :  { %v6811_v42 = vcvt.s32.f32 %v6299_v40  ;;  %v6365_v21 = vunpack.c.1.s8 %v6091_v24  ;;  %v13494_v27 = vpack.c.bf16 %v7340_v34, %v7338_v63  ;;  %v7404_v22 = vmul.f32 %v16160_v32, %v6880_v43 }
 0x74a   :  { %11279 = vmatprep.subr.bf16.mxu0 %v13527_v11  ;;  %v6813_v4 = vcvt.s32.f32 %v6301_v55  ;;  %v6298_v18 = vunpack.c.0.s8 %v6074_v49  ;;  %v6875_v25 = vcvt.s32.f32 %v6363_v31  ;;  %v6300_v37 = vunpack.c.1.s8 %v6074_v49 }
 0x74b   :  { %v7335_v58 = vmul.f32 %v16157_v41, %v6811_v42  ;;  %v6877_v56 = vcvt.s32.f32 %v6365_v21  ;;  %11239 = vmatpush1.bf16.msra.mxu1 %v13494_v27  ;;  %v13526_v10 = vpack.c.bf16 %v7404_v22, %v7402_v30  ;;  %v6362_v2 = vunpack.c.0.s8 %v6090_v51 }
 0x74c   :  { %v7337_v13 = vmul.f32 %v16157_v41, %v6813_v4  ;;  %v6810_v59 = vcvt.s32.f32 %v6298_v18  ;;  %v7399_v24 = vmul.f32 %v16157_v41, %v6875_v25  ;;  %v6812_v47 = vcvt.s32.f32 %v6300_v37 }
 0x74d   :  { %v7401_v45 = vmul.f32 %v16157_v41, %v6877_v56  ;;  %v6364_v23 = vunpack.c.1.s8 %v6090_v51  ;;  %11280 = vmatpush1.bf16.msra.mxu0 %v13526_v10  ;;  %v6874_v8 = vcvt.s32.f32 %v6362_v2  ;;  %v6359_v49 = vunpack.c.2.s8 %v6089_v29  ;;  %v6104_v51 = vld [vmem:[#allocation4 + $0x1f0] sm:$0xff] }
 0x74e   :  { %v13493_v33 = vpack.c.bf16 %v7337_v13, %v7335_v58  ;;  %v7334_v26 = vmul.f32 %v16160_v32, %v6810_v59  ;;  %v7336_v44 = vmul.f32 %v16160_v32, %v6812_v47  ;;  %v6361_v0 = vunpack.c.3.s8 %v6089_v29 }
 0x74f   :  { %v13525_v7 = vpack.c.bf16 %v7401_v45, %v7399_v24  ;;  %v6876_v3 = vcvt.s32.f32 %v6364_v23  ;;  %v7398_v52 = vmul.f32 %v16160_v32, %v6874_v8  ;;  %v6871_v39 = vcvt.s32.f32 %v6359_v49  ;;  %v6087_v45 = vld [vmem:[#allocation4 + $0x168] sm:$0xff] }
 0x750   :  { %11240 = vmatprep.subr.bf16.mxu1 %v13493_v33  ;;  %v6423_v15 = vunpack.c.2.s8 %v6105_v20  ;;  %v6425_v60 = vunpack.c.3.s8 %v6105_v20  ;;  %v13492_v54 = vpack.c.bf16 %v7336_v44, %v7334_v26  ;;  %v6873_v53 = vcvt.s32.f32 %v6361_v0 }
 0x751   :  { %11281 = vmatprep.subr.bf16.mxu0 %v13525_v7  ;;  %v7400_v17 = vmul.f32 %v16160_v32, %v6876_v3  ;;  %v6358_v9 = vunpack.c.2.s8 %v6088_v61  ;;  %v7395_v1 = vmul.f32 %v16157_v41, %v6871_v39  ;;  %v6360_v12 = vunpack.c.3.s8 %v6088_v61  ;;  %v6103_v7 = vld [vmem:[#allocation4 + $0x1e8] sm:$0xff] }
 0x752   :  { %v6935_v46 = vcvt.s32.f32 %v6423_v15  ;;  %v6937_v35 = vcvt.s32.f32 %v6425_v60  ;;  %11241 = vmatpush1.bf16.msra.mxu1 %v13492_v54  ;;  %v7397_v6 = vmul.f32 %v16157_v41, %v6873_v53  ;;  %v6422_v57 = vunpack.c.2.s8 %v6104_v51 }
 0x753   :  { %v13524_v19 = vpack.c.bf16 %v7400_v17, %v7398_v52  ;;  %v6870_v62 = vcvt.s32.f32 %v6358_v9  ;;  %v6872_v40 = vcvt.s32.f32 %v6360_v12  ;;  %v6424_v11 = vunpack.c.3.s8 %v6104_v51  ;;  %v6086_v52 = vld [vmem:[#allocation4 + $0x160] sm:$0xff] }
 0x754   :  { %v7459_v63 = vmul.f32 %v16157_v41, %v6935_v46  ;;  %v7461_v14 = vmul.f32 %v16157_v41, %v6937_v35  ;;  %v13523_v34 = vpack.c.bf16 %v7397_v6, %v7395_v1  ;;  %v6934_v55 = vcvt.s32.f32 %v6422_v57 }
 0x755   :  { %11282 = vmatpush1.bf16.msra.mxu0 %v13524_v19  ;;  %v7394_v43 = vmul.f32 %v16160_v32, %v6870_v62  ;;  %v6355_v30 = vunpack.c.0.s8 %v6089_v29  ;;  %v7396_v31 = vmul.f32 %v16160_v32, %v6872_v40  ;;  %v6936_v21 = vcvt.s32.f32 %v6424_v11 }
 0x756   :  { %v13555_v42 = vpack.c.bf16 %v7461_v14, %v7459_v63  ;;  %v6357_v27 = vunpack.c.1.s8 %v6089_v29  ;;  %11242 = vmatprep.subr.bf16.mxu1 %v13523_v34  ;;  %v7458_v22 = vmul.f32 %v16160_v32, %v6934_v55  ;;  %v6419_v18 = vunpack.c.0.s8 %v6105_v20 }
 0x757   :  { %v6867_v4 = vcvt.s32.f32 %v6355_v30  ;;  %v6421_v58 = vunpack.c.1.s8 %v6105_v20  ;;  %v13522_v25 = vpack.c.bf16 %v7396_v31, %v7394_v43  ;;  %v7460_v56 = vmul.f32 %v16160_v32, %v6936_v21 }
 0x758   :  { %11283 = vmatprep.subr.bf16.mxu0 %v13555_v42  ;;  %v6869_v37 = vcvt.s32.f32 %v6357_v27  ;;  %v6354_v10 = vunpack.c.0.s8 %v6088_v61  ;;  %v6931_v59 = vcvt.s32.f32 %v6419_v18  ;;  %v6356_v24 = vunpack.c.1.s8 %v6088_v61 }
 0x759   :  { %v7391_v13 = vmul.f32 %v16157_v41, %v6867_v4  ;;  %v6933_v2 = vcvt.s32.f32 %v6421_v58  ;;  %11243 = vmatpush2.bf16.msra.mxu1 %v13522_v25  ;;  %v13554_v29 = vpack.c.bf16 %v7460_v56, %v7458_v22  ;;  %v6418_v33 = vunpack.c.0.s8 %v6104_v51 }
 0x75a   :  { %v7393_v47 = vmul.f32 %v16157_v41, %v6869_v37  ;;  %v6866_v23 = vcvt.s32.f32 %v6354_v10  ;;  %v7455_v20 = vmul.f32 %v16157_v41, %v6931_v59  ;;  %v6868_v8 = vcvt.s32.f32 %v6356_v24 }
 0x75b   :  { %v7457_v26 = vmul.f32 %v16157_v41, %v6933_v2  ;;  %v6420_v49 = vunpack.c.1.s8 %v6104_v51  ;;  %11284 = vmatpush2.bf16.msra.mxu0 %v13554_v29  ;;  %v6930_v0 = vcvt.s32.f32 %v6418_v33  ;;  %v6351_v61 = vunpack.c.2.s8 %v6087_v45  ;;  %v6102_v51 = vld [vmem:[#allocation4 + $0x1e0] sm:$0xff] }
 0x75c   :  { %v13521_v44 = vpack.c.bf16 %v7393_v47, %v7391_v13  ;;  %v7390_v3 = vmul.f32 %v16160_v32, %v6866_v23  ;;  %v7392_v15 = vmul.f32 %v16160_v32, %v6868_v8  ;;  %v6353_v54 = vunpack.c.3.s8 %v6087_v45 }
 0x75d   :  { %v13553_v39 = vpack.c.bf16 %v7457_v26, %v7455_v20  ;;  %v6932_v60 = vcvt.s32.f32 %v6420_v49  ;;  %v7454_v17 = vmul.f32 %v16160_v32, %v6930_v0  ;;  %v6863_v53 = vcvt.s32.f32 %v6351_v61  ;;  %v6085_v26 = vld [vmem:[#allocation4 + $0x158] sm:$0xff] }
 0x75e   :  { %11244 = vmatprep.subr.bf16.mxu1 %v13521_v44  ;;  %v6415_v9 = vunpack.c.2.s8 %v6103_v7  ;;  %v6417_v1 = vunpack.c.3.s8 %v6103_v7  ;;  %v13520_v46 = vpack.c.bf16 %v7392_v15, %v7390_v3  ;;  %v6865_v12 = vcvt.s32.f32 %v6353_v54 }
 0x75f   :  { %11285 = vmatprep.subr.bf16.mxu0 %v13553_v39  ;;  %v7456_v35 = vmul.f32 %v16160_v32, %v6932_v60  ;;  %v6350_v19 = vunpack.c.2.s8 %v6086_v52  ;;  %v7387_v6 = vmul.f32 %v16157_v41, %v6863_v53  ;;  %v6352_v63 = vunpack.c.3.s8 %v6086_v52  ;;  %v6101_v39 = vld [vmem:[#allocation4 + $0x1d8] sm:$0xff] }
 0x760   :  { %v6927_v62 = vcvt.s32.f32 %v6415_v9  ;;  %v6929_v57 = vcvt.s32.f32 %v6417_v1  ;;  %11245 = vmatpush2.bf16.msra.mxu1 %v13520_v46  ;;  %v7389_v40 = vmul.f32 %v16157_v41, %v6865_v12  ;;  %v6414_v34 = vunpack.c.2.s8 %v6102_v51 }
 0x761   :  { %v13552_v14 = vpack.c.bf16 %v7456_v35, %v7454_v17  ;;  %v6862_v11 = vcvt.s32.f32 %v6350_v19  ;;  %v6864_v30 = vcvt.s32.f32 %v6352_v63  ;;  %v6416_v42 = vunpack.c.3.s8 %v6102_v51  ;;  %v6084_v17 = vld [vmem:[#allocation4 + $0x150] sm:$0xff] }
 0x762   :  { %v7451_v43 = vmul.f32 %v16157_v41, %v6927_v62  ;;  %v7453_v55 = vmul.f32 %v16157_v41, %v6929_v57  ;;  %v13519_v31 = vpack.c.bf16 %v7389_v40, %v7387_v6  ;;  %v6926_v27 = vcvt.s32.f32 %v6414_v34 }
 0x763   :  { %11286 = vmatpush2.bf16.msra.mxu0 %v13552_v14  ;;  %v7386_v21 = vmul.f32 %v16160_v32, %v6862_v11  ;;  %v6347_v22 = vunpack.c.0.s8 %v6087_v45  ;;  %v7388_v18 = vmul.f32 %v16160_v32, %v6864_v30  ;;  %v6928_v58 = vcvt.s32.f32 %v6416_v42 }
 0x764   :  { %v13551_v4 = vpack.c.bf16 %v7453_v55, %v7451_v43  ;;  %v6349_v25 = vunpack.c.1.s8 %v6087_v45  ;;  %11246 = vmatprep.subr.bf16.mxu1 %v13519_v31  ;;  %v7450_v56 = vmul.f32 %v16160_v32, %v6926_v27  ;;  %v6411_v10 = vunpack.c.0.s8 %v6103_v7 }
 0x765   :  { %v6859_v37 = vcvt.s32.f32 %v6347_v22  ;;  %v6413_v13 = vunpack.c.1.s8 %v6103_v7  ;;  %v13518_v59 = vpack.c.bf16 %v7388_v18, %v7386_v21  ;;  %v7452_v2 = vmul.f32 %v16160_v32, %v6928_v58 }
 0x766   :  { %11287 = vmatprep.subr.bf16.mxu0 %v13551_v4  ;;  %v6861_v24 = vcvt.s32.f32 %v6349_v25  ;;  %v6346_v29 = vunpack.c.0.s8 %v6086_v52  ;;  %v6923_v23 = vcvt.s32.f32 %v6411_v10  ;;  %v6348_v20 = vunpack.c.1.s8 %v6086_v52 }
 0x767   :  { %v7383_v47 = vmul.f32 %v16157_v41, %v6859_v37  ;;  %v6925_v33 = vcvt.s32.f32 %v6413_v13  ;;  %11247 = vmatpush2.bf16.msra.mxu1 %v13518_v59  ;;  %v13550_v45 = vpack.c.bf16 %v7452_v2, %v7450_v56  ;;  %v6410_v44 = vunpack.c.0.s8 %v6102_v51 }
 0x768   :  { %v7385_v8 = vmul.f32 %v16157_v41, %v6861_v24  ;;  %v6858_v49 = vcvt.s32.f32 %v6346_v29  ;;  %v7447_v7 = vmul.f32 %v16157_v41, %v6923_v23  ;;  %v6860_v0 = vcvt.s32.f32 %v6348_v20 }
 0x769   :  { %v7449_v3 = vmul.f32 %v16157_v41, %v6925_v33  ;;  %v6412_v61 = vunpack.c.1.s8 %v6102_v51  ;;  %11288 = vmatpush2.bf16.msra.mxu0 %v13550_v45  ;;  %v6922_v54 = vcvt.s32.f32 %v6410_v44  ;;  %v6343_v52 = vunpack.c.2.s8 %v6085_v26  ;;  %v6100_v51 = vld [vmem:[#allocation4 + $0x1d0] sm:$0xff] }
 0x76a   :  { %v13517_v15 = vpack.c.bf16 %v7385_v8, %v7383_v47  ;;  %v7382_v60 = vmul.f32 %v16160_v32, %v6858_v49  ;;  %v7384_v9 = vmul.f32 %v16160_v32, %v6860_v0  ;;  %v6345_v46 = vunpack.c.3.s8 %v6085_v26 }
 0x76b   :  { %v13549_v53 = vpack.c.bf16 %v7449_v3, %v7447_v7  ;;  %v6924_v1 = vcvt.s32.f32 %v6412_v61  ;;  %v7446_v35 = vmul.f32 %v16160_v32, %v6922_v54  ;;  %v6855_v12 = vcvt.s32.f32 %v6343_v52  ;;  %v6083_v3 = vld [vmem:[#allocation4 + $0x148] sm:$0xff] }
 0x76c   :  { %11248 = vmatprep.subr.bf16.mxu1 %v13517_v15  ;;  %v6407_v19 = vunpack.c.2.s8 %v6101_v39  ;;  %v6409_v6 = vunpack.c.3.s8 %v6101_v39  ;;  %v13516_v62 = vpack.c.bf16 %v7384_v9, %v7382_v60  ;;  %v6857_v63 = vcvt.s32.f32 %v6345_v46 }
 0x76d   :  { %11289 = vmatprep.subr.bf16.mxu0 %v13549_v53  ;;  %v7448_v57 = vmul.f32 %v16160_v32, %v6924_v1  ;;  %v6342_v14 = vunpack.c.2.s8 %v6084_v17  ;;  %v7379_v40 = vmul.f32 %v16157_v41, %v6855_v12  ;;  %v6344_v43 = vunpack.c.3.s8 %v6084_v17  ;;  %v6099_v53 = vld [vmem:[#allocation4 + $0x1c8] sm:$0xff] }
 0x76e   :  { %v6919_v11 = vcvt.s32.f32 %v6407_v19  ;;  %v6921_v34 = vcvt.s32.f32 %v6409_v6  ;;  %11249 = vmatpush2.bf16.msra.mxu1 %v13516_v62  ;;  %v7381_v30 = vmul.f32 %v16157_v41, %v6857_v63  ;;  %v6406_v31 = vunpack.c.2.s8 %v6100_v51 }
 0x76f   :  { %v13548_v55 = vpack.c.bf16 %v7448_v57, %v7446_v35  ;;  %v6854_v42 = vcvt.s32.f32 %v6342_v14  ;;  %v6856_v22 = vcvt.s32.f32 %v6344_v43  ;;  %v6408_v4 = vunpack.c.3.s8 %v6100_v51  ;;  %v6082_v35 = vld [vmem:[#allocation4 + $0x140] sm:$0xff] }
 0x770   :  { %v7443_v21 = vmul.f32 %v16157_v41, %v6919_v11  ;;  %v7445_v27 = vmul.f32 %v16157_v41, %v6921_v34  ;;  %v13515_v18 = vpack.c.bf16 %v7381_v30, %v7379_v40  ;;  %v6918_v25 = vcvt.s32.f32 %v6406_v31 }
 0x771   :  { %11290 = vmatpush2.bf16.msra.mxu0 %v13548_v55  ;;  %v7378_v58 = vmul.f32 %v16160_v32, %v6854_v42  ;;  %v6339_v56 = vunpack.c.0.s8 %v6085_v26  ;;  %v7380_v10 = vmul.f32 %v16160_v32, %v6856_v22  ;;  %v6920_v13 = vcvt.s32.f32 %v6408_v4 }
 0x772   :  { %v13547_v37 = vpack.c.bf16 %v7445_v27, %v7443_v21  ;;  %v6341_v59 = vunpack.c.1.s8 %v6085_v26  ;;  %11250 = vmatprep.subr.bf16.mxu1 %v13515_v18  ;;  %v7442_v2 = vmul.f32 %v16160_v32, %v6918_v25  ;;  %v6403_v29 = vunpack.c.0.s8 %v6101_v39 }
 0x773   :  { %v6851_v24 = vcvt.s32.f32 %v6339_v56  ;;  %v6405_v47 = vunpack.c.1.s8 %v6101_v39  ;;  %v13514_v23 = vpack.c.bf16 %v7380_v10, %v7378_v58  ;;  %v7444_v33 = vmul.f32 %v16160_v32, %v6920_v13 }
 0x774   :  { %11291 = vmatprep.subr.bf16.mxu0 %v13547_v37  ;;  %v6853_v20 = vcvt.s32.f32 %v6341_v59  ;;  %v6338_v45 = vunpack.c.0.s8 %v6084_v17  ;;  %v6915_v49 = vcvt.s32.f32 %v6403_v29  ;;  %v6340_v7 = vunpack.c.1.s8 %v6084_v17 }
 0x775   :  { %v7375_v8 = vmul.f32 %v16157_v41, %v6851_v24  ;;  %v6917_v44 = vcvt.s32.f32 %v6405_v47  ;;  %11251 = vmatpush2.bf16.msra.mxu1 %v13514_v23  ;;  %v13546_v26 = vpack.c.bf16 %v7444_v33, %v7442_v2  ;;  %v6402_v15 = vunpack.c.0.s8 %v6100_v51 }
 0x776   :  { %v7377_v0 = vmul.f32 %v16157_v41, %v6853_v20  ;;  %v6850_v61 = vcvt.s32.f32 %v6338_v45  ;;  %v7439_v39 = vmul.f32 %v16157_v41, %v6915_v49  ;;  %v6852_v54 = vcvt.s32.f32 %v6340_v7 }
 0x777   :  { %v7441_v60 = vmul.f32 %v16157_v41, %v6917_v44  ;;  %v6404_v52 = vunpack.c.1.s8 %v6100_v51  ;;  %11292 = vmatpush2.bf16.msra.mxu0 %v13546_v26  ;;  %v6914_v46 = vcvt.s32.f32 %v6402_v15  ;;  %v6335_v17 = vunpack.c.2.s8 %v6083_v3  ;;  %v6098_v51 = vld [vmem:[#allocation4 + $0x1c0] sm:$0xff] }
 0x778   :  { %v13513_v9 = vpack.c.bf16 %v7377_v0, %v7375_v8  ;;  %v7374_v1 = vmul.f32 %v16160_v32, %v6850_v61  ;;  %v7376_v19 = vmul.f32 %v16160_v32, %v6852_v54  ;;  %v6337_v62 = vunpack.c.3.s8 %v6083_v3 }
 0x779   :  { %v13545_v12 = vpack.c.bf16 %v7441_v60, %v7439_v39  ;;  %v6916_v6 = vcvt.s32.f32 %v6404_v52  ;;  %v7438_v57 = vmul.f32 %v16160_v32, %v6914_v46  ;;  %v6847_v63 = vcvt.s32.f32 %v6335_v17 }
 0x77a   :  { %11252 = vmatprep.subr.bf16.mxu1 %v13513_v9  ;;  %v6399_v14 = vunpack.c.2.s8 %v6099_v53  ;;  %v6401_v40 = vunpack.c.3.s8 %v6099_v53  ;;  %v13512_v11 = vpack.c.bf16 %v7376_v19, %v7374_v1  ;;  %v6849_v43 = vcvt.s32.f32 %v6337_v62  ;;  %v6113_v62 = vld [vmem:[#allocation4 + $0x238] sm:$0xff] }
 0x77b   :  { %11293 = vmatprep.subr.bf16.mxu0 %v13545_v12  ;;  %v7440_v34 = vmul.f32 %v16160_v32, %v6916_v6  ;;  %v6334_v55 = vunpack.c.2.s8 %v6082_v35  ;;  %v7371_v30 = vmul.f32 %v16157_v41, %v6847_v63  ;;  %v6336_v21 = vunpack.c.3.s8 %v6082_v35  ;;  %v17456_v6 = vld [vmem:[#allocation35_spill] sm:$0xff] }
 0x77c   :  { %v6911_v42 = vcvt.s32.f32 %v6399_v14  ;;  %v6913_v31 = vcvt.s32.f32 %v6401_v40  ;;  %11253 = vmatpush2.bf16.msra.mxu1 %v13512_v11  ;;  %v7373_v22 = vmul.f32 %v16157_v41, %v6849_v43  ;;  %v6398_v18 = vunpack.c.2.s8 %v6098_v51  ;;  %v17457_v40 = vld [vmem:[#allocation37_spill] sm:$0xff] }
 0x77d   :  { %v13544_v27 = vpack.c.bf16 %v7440_v34, %v7438_v57  ;;  %v6846_v4 = vcvt.s32.f32 %v6334_v55  ;;  %v6848_v56 = vcvt.s32.f32 %v6336_v21  ;;  %v6400_v37 = vunpack.c.3.s8 %v6098_v51  ;;  %v16438_v34 = vld [vmem:[#allocation4 + $0x2b8] sm:$0xff]  ;;  %v17458_v55 = vld [vmem:[#allocation34_spill] sm:$0xff]  ;;  %v16445_v21 = vld [vmem:[#allocation4 + $0x230] sm:$0xff] }
 0x77e   :  { %v7435_v58 = vmul.f32 %v16157_v41, %v6911_v42  ;;  %v7437_v25 = vmul.f32 %v16157_v41, %v6913_v31  ;;  %v13511_v10 = vpack.c.bf16 %v7373_v22, %v7371_v30  ;;  %v6910_v59 = vcvt.s32.f32 %v6398_v18  ;;  %v17459_v42 = vld [vmem:[#allocation36_spill] sm:$0xff] }
 0x77f   :  { %11294 = vmatpush2.bf16.msra.mxu0 %v13544_v27  ;;  %v7370_v13 = vmul.f32 %v16160_v32, %v6846_v4  ;;  %v6331_v2 = vunpack.c.0.s8 %v6083_v3  ;;  %v7372_v29 = vmul.f32 %v16160_v32, %v6848_v56  ;;  %v6912_v47 = vcvt.s32.f32 %v6400_v37 }
 0x780   :  { %v13543_v24 = vpack.c.bf16 %v7437_v25, %v7435_v58  ;;  %v6333_v23 = vunpack.c.1.s8 %v6083_v3  ;;  %11254 = vmatprep.subr.bf16.mxu1 %v13511_v10  ;;  %v7434_v33 = vmul.f32 %v16160_v32, %v6910_v59  ;;  %v6395_v45 = vunpack.c.0.s8 %v6099_v53  ;;  %v16448_v58 = vld [vmem:[#allocation4 + $0x2b0] sm:$0xff] }
 0x781   :  { %v6843_v20 = vcvt.s32.f32 %v6331_v2  ;;  %v6397_v8 = vunpack.c.1.s8 %v6099_v53  ;;  %v13510_v49 = vpack.c.bf16 %v7372_v29, %v7370_v13  ;;  %v7436_v44 = vmul.f32 %v16160_v32, %v6912_v47 }
 0x782   :  { %11295 = vmatprep.subr.bf16.mxu0 %v13543_v24  ;;  %v6845_v7 = vcvt.s32.f32 %v6333_v23  ;;  %v6330_v26 = vunpack.c.0.s8 %v6082_v35  ;;  %v6907_v61 = vcvt.s32.f32 %v6395_v45  ;;  %v6332_v39 = vunpack.c.1.s8 %v6082_v35 }
 0x783   :  { %v7367_v0 = vmul.f32 %v16157_v41, %v6843_v20  ;;  %v6909_v15 = vcvt.s32.f32 %v6397_v8  ;;  %11255 = vmatpush2.bf16.msra.mxu1 %v13510_v49  ;;  %v13542_v60 = vpack.c.bf16 %v7436_v44, %v7434_v33  ;;  %v6394_v52 = vunpack.c.0.s8 %v6098_v51 }
 0x784   :  { %v7369_v3 = vmul.f32 %v16157_v41, %v6845_v7  ;;  %v6842_v54 = vcvt.s32.f32 %v6330_v26  ;;  %v7431_v9 = vmul.f32 %v16157_v41, %v6907_v61  ;;  %v6844_v1 = vcvt.s32.f32 %v6332_v39 }
 0x785   :  { %v7433_v53 = vmul.f32 %v16157_v41, %v6909_v15  ;;  %v6396_v46 = vunpack.c.1.s8 %v6098_v51  ;;  %11296 = vmatpush2.bf16.msra.mxu0 %v13542_v60  ;;  %v6906_v19 = vcvt.s32.f32 %v6394_v52  ;;  %v9535_v35 = vrot.slane %v16133_v36, %v17456_v6 }
 0x786   :  { %v13509_v17 = vpack.c.bf16 %v7369_v3, %v7367_v0  ;;  %v7366_v12 = vmul.f32 %v16160_v32, %v6842_v54  ;;  %v7368_v63 = vmul.f32 %v16160_v32, %v6844_v1  ;;  %v9543_v11 = vrot.slane %v16133_v36, %v17457_v40 }
 0x787   :  { %v13541_v57 = vpack.c.bf16 %v7433_v53, %v7431_v9  ;;  %v6908_v14 = vcvt.s32.f32 %v6396_v46  ;;  %v7430_v51 = vmul.f32 %v16160_v32, %v6906_v19  ;;  %v9597_v43 = vpack.c.bf16 %v9535_v35, %v9535_v35 }
 0x788   :  { %11256 = vmatprep.subr.bf16.mxu1 %v13509_v17  ;;  %v9531_v30 = vrot.slane %v16133_v36, %v17458_v55  ;;  %v9539_v31 = vrot.slane %v16133_v36, %v17459_v42  ;;  %v13508_v27 = vpack.c.bf16 %v7368_v63, %v7366_v12  ;;  %v9599_v4 = vpack.c.bf16 %v9543_v11, %v9543_v11 }
 0x789   :  { %11297 = vmatprep.subr.bf16.mxu0 %v13541_v57  ;;  %v7432_v22 = vmul.f32 %v16160_v32, %v6908_v14  ;;  %v6455_v18 = vunpack.c.2.s8 %v6113_v62  ;;  %11258 = vmatprep.mubr.bf16.mxu1 %v9597_v43  ;;  %v6457_v37 = vunpack.c.3.s8 %v6113_v62  ;;  %v6519_v10 = vunpack.c.2.s8 %v16438_v34  ;;  %v16467_v57 = vld [vmem:[#allocation4 + $0x228] sm:$0xff] }
 0x78a   :  { %v9596_v25 = vpack.c.bf16 %v9531_v30, %v9531_v30  ;;  %v9598_v56 = vpack.c.bf16 %v9539_v31, %v9539_v31  ;;  %11257 = vmatpush2.bf16.msra.mxu1 %v13508_v27  ;;  %11299 = vmatprep.mubr.bf16.mxu0 %v9599_v4  ;;  %v6521_v59 = vunpack.c.3.s8 %v16438_v34  ;;  %v6454_v2 = vunpack.c.2.s8 %v16445_v21 }
 0x78b   :  { %v13540_v13 = vpack.c.bf16 %v7432_v22, %v7430_v51  ;;  %v6967_v36 = vcvt.s32.f32 %v6455_v18  ;;  %v6969_v24 = vcvt.s32.f32 %v6457_v37  ;;  %v7031_v29 = vcvt.s32.f32 %v6519_v10  ;;  %v6127_v18 = vld [vmem:[#allocation4 + $0x2a8] sm:$0xff] }
 0x78c   :  { %v6456_v47 = vunpack.c.3.s8 %v16445_v21  ;;  %v6518_v23 = vunpack.c.2.s8 %v16448_v58  ;;  %v7033_v20 = vcvt.s32.f32 %v6521_v59  ;;  %v6966_v45 = vcvt.s32.f32 %v6454_v2  ;;  %v6110_v2 = vld [vmem:[#allocation4 + $0x220] sm:$0xff] }
 0x78d   :  { %11298 = vmatpush2.bf16.msra.mxu0 %v13540_v13  ;;  %v7491_v33 = vmul.f32 %v16157_v41, %v6967_v36  ;;  %v6520_v8 = vunpack.c.3.s8 %v16448_v58  ;;  %11259 = vmatmul.mubr.bf16.vlgmr.msra.gmra.mxu1 %v9596_v25  ;;  %v7493_v49 = vmul.f32 %v16157_v41, %v6969_v24  ;;  %v7555_v44 = vmul.f32 %v16157_v41, %v7031_v29 }
 0x78e   :  { %v6968_v7 = vcvt.s32.f32 %v6456_v47  ;;  %v7030_v26 = vcvt.s32.f32 %v6518_v23  ;;  %v7557_v0 = vmul.f32 %v16157_v41, %v7033_v20  ;;  %v7490_v61 = vmul.f32 %v16160_v32, %v6966_v45  ;;  %v6126_v23 = vld [vmem:[#allocation4 + $0x2a0] sm:$0xff] }
 0x78f   :  { %v7032_v15 = vcvt.s32.f32 %v6520_v8  ;;  %v6451_v39 = vunpack.c.0.s8 %v6113_v62  ;;  %v13571_v60 = vpack.c.bf16 %v7493_v49, %v7491_v33  ;;  %v6453_v52 = vunpack.c.1.s8 %v6113_v62 }
 0x790   :  { %11300 = vmatmul.mubr.bf16.vlgmr.msra.gmra.mxu0 %v9598_v56  ;;  %v7492_v3 = vmul.f32 %v16160_v32, %v6968_v7  ;;  %v7554_v54 = vmul.f32 %v16160_v32, %v7030_v26  ;;  %v13603_v9 = vpack.c.bf16 %v7557_v0, %v7555_v44  ;;  %v6515_v46 = vunpack.c.0.s8 %v16438_v34 }
 0x791   :  { %v7556_v53 = vmul.f32 %v16160_v32, %v7032_v15  ;;  %v6963_v1 = vcvt.s32.f32 %v6451_v39  ;;  %11308 = vmatprep.subr.bf16.mxu1 %v13571_v60  ;;  %v6965_v12 = vcvt.s32.f32 %v6453_v52  ;;  %v6517_v19 = vunpack.c.1.s8 %v16438_v34 }
 0x792   :  { %v13570_v17 = vpack.c.bf16 %v7492_v3, %v7490_v61  ;;  %v6450_v35 = vunpack.c.0.s8 %v16445_v21  ;;  %11349 = vmatprep.subr.bf16.mxu0 %v13603_v9  ;;  %v7027_v62 = vcvt.s32.f32 %v6515_v46  ;;  %v6452_v11 = vunpack.c.1.s8 %v16445_v21 }
 0x793   :  { %v13602_v63 = vpack.c.bf16 %v7556_v53, %v7554_v54  ;;  %v7487_v14 = vmul.f32 %v16157_v41, %v6963_v1  ;;  %v7489_v51 = vmul.f32 %v16157_v41, %v6965_v12  ;;  %v7029_v43 = vcvt.s32.f32 %v6517_v19 }
 0x794   :  { %11309 = vmatpush1.bf16.msra.mxu1 %v13570_v17  ;;  %v6962_v30 = vcvt.s32.f32 %v6450_v35  ;;  %v6514_v31 = vunpack.c.0.s8 %v16448_v58  ;;  %v7551_v34 = vmul.f32 %v16157_v41, %v7027_v62  ;;  %v6964_v27 = vcvt.s32.f32 %v6452_v11 }
 0x795   :  { %11350 = vmatpush1.bf16.msra.mxu0 %v13602_v63  ;;  %v6516_v22 = vunpack.c.1.s8 %v16448_v58  ;;  %v6447_v4 = vunpack.c.2.s8 %v16467_v57  ;;  %v13569_v25 = vpack.c.bf16 %v7489_v51, %v7487_v14  ;;  %v7553_v56 = vmul.f32 %v16157_v41, %v7029_v43 }
 0x796   :  { %v7486_v21 = vmul.f32 %v16160_v32, %v6962_v30  ;;  %v7026_v37 = vcvt.s32.f32 %v6514_v31  ;;  %v7488_v10 = vmul.f32 %v16160_v32, %v6964_v27  ;;  %v6449_v36 = vunpack.c.3.s8 %v16467_v57 }
 0x797   :  { %v7028_v13 = vcvt.s32.f32 %v6516_v22  ;;  %v6959_v59 = vcvt.s32.f32 %v6447_v4  ;;  %11310 = vmatprep.subr.bf16.mxu1 %v13569_v25  ;;  %v13601_v24 = vpack.c.bf16 %v7553_v56, %v7551_v34  ;;  %v6511_v29 = vunpack.c.2.s8 %v6127_v18  ;;  %v16492_v34 = vld [vmem:[#allocation4 + $0x218] sm:$0xff] }
 0x798   :  { %v7550_v58 = vmul.f32 %v16160_v32, %v7026_v37  ;;  %v6513_v47 = vunpack.c.3.s8 %v6127_v18  ;;  %v13568_v33 = vpack.c.bf16 %v7488_v10, %v7486_v21  ;;  %v6961_v45 = vcvt.s32.f32 %v6449_v36 }
 0x799   :  { %v7552_v20 = vmul.f32 %v16160_v32, %v7028_v13  ;;  %v7483_v8 = vmul.f32 %v16157_v41, %v6959_v59  ;;  %11351 = vmatprep.subr.bf16.mxu0 %v13601_v24  ;;  %v7023_v49 = vcvt.s32.f32 %v6511_v29  ;;  %v6446_v7 = vunpack.c.2.s8 %v6110_v2  ;;  %v6125_v59 = vld [vmem:[#allocation4 + $0x298] sm:$0xff] }
 0x79a   :  { %v7025_v44 = vcvt.s32.f32 %v6513_v47  ;;  %v6448_v26 = vunpack.c.3.s8 %v6110_v2  ;;  %11311 = vmatpush1.bf16.msra.mxu1 %v13568_v33  ;;  %v7485_v61 = vmul.f32 %v16157_v41, %v6961_v45  ;;  %v6510_v15 = vunpack.c.2.s8 %v6126_v23 }
 0x79b   :  { %v13600_v0 = vpack.c.bf16 %v7552_v20, %v7550_v58  ;;  %v6512_v39 = vunpack.c.3.s8 %v6126_v23  ;;  %v7547_v60 = vmul.f32 %v16157_v41, %v7023_v49  ;;  %v6958_v54 = vcvt.s32.f32 %v6446_v7 }
 0x79c   :  { %v7549_v3 = vmul.f32 %v16157_v41, %v7025_v44  ;;  %v6960_v52 = vcvt.s32.f32 %v6448_v26  ;;  %v13567_v9 = vpack.c.bf16 %v7485_v61, %v7483_v8  ;;  %v7022_v53 = vcvt.s32.f32 %v6510_v15  ;;  %v6108_v8 = vld [vmem:[#allocation4 + $0x210] sm:$0xff] }
 0x79d   :  { %11352 = vmatpush1.bf16.msra.mxu0 %v13600_v0  ;;  %v7024_v1 = vcvt.s32.f32 %v6512_v39  ;;  %v6443_v46 = vunpack.c.0.s8 %v16467_v57  ;;  %v7482_v12 = vmul.f32 %v16160_v32, %v6958_v54  ;;  %v6445_v35 = vunpack.c.1.s8 %v16467_v57  ;;  %v6124_v26 = vld [vmem:[#allocation4 + $0x290] sm:$0xff] }
 0x79e   :  { %v13599_v17 = vpack.c.bf16 %v7549_v3, %v7547_v60  ;;  %v7484_v19 = vmul.f32 %v16160_v32, %v6960_v52  ;;  %11312 = vmatprep.subr.bf16.mxu1 %v13567_v9  ;;  %v7546_v63 = vmul.f32 %v16160_v32, %v7022_v53  ;;  %v6507_v11 = vunpack.c.0.s8 %v6127_v18 }
 0x79f   :  { %v7548_v14 = vmul.f32 %v16160_v32, %v7024_v1  ;;  %v6955_v62 = vcvt.s32.f32 %v6443_v46  ;;  %v6957_v43 = vcvt.s32.f32 %v6445_v35  ;;  %v6509_v30 = vunpack.c.1.s8 %v6127_v18 }
 0x7a0   :  { %11353 = vmatprep.subr.bf16.mxu0 %v13599_v17  ;;  %v13566_v51 = vpack.c.bf16 %v7484_v19, %v7482_v12  ;;  %v6442_v31 = vunpack.c.0.s8 %v6110_v2  ;;  %v7019_v4 = vcvt.s32.f32 %v6507_v11  ;;  %v6444_v25 = vunpack.c.1.s8 %v6110_v2 }
 0x7a1   :  { %v13598_v27 = vpack.c.bf16 %v7548_v14, %v7546_v63  ;;  %v7479_v22 = vmul.f32 %v16157_v41, %v6955_v62  ;;  %v7481_v57 = vmul.f32 %v16157_v41, %v6957_v43  ;;  %v7021_v56 = vcvt.s32.f32 %v6509_v30 }
 0x7a2   :  { %11313 = vmatpush1.bf16.msra.mxu1 %v13566_v51  ;;  %v6954_v21 = vcvt.s32.f32 %v6442_v31  ;;  %v6506_v37 = vunpack.c.0.s8 %v6126_v23  ;;  %v7543_v10 = vmul.f32 %v16157_v41, %v7019_v4  ;;  %v6956_v13 = vcvt.s32.f32 %v6444_v25 }
 0x7a3   :  { %11354 = vmatpush1.bf16.msra.mxu0 %v13598_v27  ;;  %v6508_v36 = vunpack.c.1.s8 %v6126_v23  ;;  %v6439_v18 = vunpack.c.2.s8 %v16492_v34  ;;  %v13565_v24 = vpack.c.bf16 %v7481_v57, %v7479_v22  ;;  %v7545_v58 = vmul.f32 %v16157_v41, %v7021_v56 }
 0x7a4   :  { %v7478_v29 = vmul.f32 %v16160_v32, %v6954_v21  ;;  %v7018_v2 = vcvt.s32.f32 %v6506_v37  ;;  %v7480_v47 = vmul.f32 %v16160_v32, %v6956_v13  ;;  %v6441_v20 = vunpack.c.3.s8 %v16492_v34 }
 0x7a5   :  { %v7020_v33 = vcvt.s32.f32 %v6508_v36  ;;  %v6951_v45 = vcvt.s32.f32 %v6439_v18  ;;  %11314 = vmatprep.subr.bf16.mxu1 %v13565_v24  ;;  %v13597_v49 = vpack.c.bf16 %v7545_v58, %v7543_v10  ;;  %v6503_v44 = vunpack.c.2.s8 %v6125_v59  ;;  %v16514_v10 = vld [vmem:[#allocation4 + $0x208] sm:$0xff] }
 0x7a6   :  { %v7542_v23 = vmul.f32 %v16160_v32, %v7018_v2  ;;  %v6505_v7 = vunpack.c.3.s8 %v6125_v59  ;;  %v13564_v0 = vpack.c.bf16 %v7480_v47, %v7478_v29  ;;  %v6953_v15 = vcvt.s32.f32 %v6441_v20 }
 0x7a7   :  { %v7544_v61 = vmul.f32 %v16160_v32, %v7020_v33  ;;  %v7475_v39 = vmul.f32 %v16157_v41, %v6951_v45  ;;  %11355 = vmatprep.subr.bf16.mxu0 %v13597_v49  ;;  %v7015_v60 = vcvt.s32.f32 %v6503_v44  ;;  %v6438_v54 = vunpack.c.2.s8 %v6108_v8  ;;  %v6123_v45 = vld [vmem:[#allocation4 + $0x288] sm:$0xff] }
 0x7a8   :  { %v7017_v3 = vcvt.s32.f32 %v6505_v7  ;;  %v6440_v52 = vunpack.c.3.s8 %v6108_v8  ;;  %11315 = vmatpush1.bf16.msra.mxu1 %v13564_v0  ;;  %v7477_v53 = vmul.f32 %v16157_v41, %v6953_v15  ;;  %v6502_v1 = vunpack.c.2.s8 %v6124_v26 }
 0x7a9   :  { %v13596_v9 = vpack.c.bf16 %v7544_v61, %v7542_v23  ;;  %v6504_v46 = vunpack.c.3.s8 %v6124_v26  ;;  %v7539_v17 = vmul.f32 %v16157_v41, %v7015_v60  ;;  %v6950_v19 = vcvt.s32.f32 %v6438_v54 }
 0x7aa   :  { %v7541_v12 = vmul.f32 %v16157_v41, %v7017_v3  ;;  %v6952_v35 = vcvt.s32.f32 %v6440_v52  ;;  %v13563_v63 = vpack.c.bf16 %v7477_v53, %v7475_v39  ;;  %v7014_v14 = vcvt.s32.f32 %v6502_v1  ;;  %v6106_v39 = vld [vmem:[#allocation4 + $0x200] sm:$0xff] }
 0x7ab   :  { %11356 = vmatpush1.bf16.msra.mxu0 %v13596_v9  ;;  %v7016_v62 = vcvt.s32.f32 %v6504_v46  ;;  %v6435_v11 = vunpack.c.0.s8 %v16492_v34  ;;  %v7474_v43 = vmul.f32 %v16160_v32, %v6950_v19  ;;  %v6437_v31 = vunpack.c.1.s8 %v16492_v34  ;;  %v6122_v52 = vld [vmem:[#allocation4 + $0x280] sm:$0xff] }
 0x7ac   :  { %v13595_v51 = vpack.c.bf16 %v7541_v12, %v7539_v17  ;;  %v7476_v30 = vmul.f32 %v16160_v32, %v6952_v35  ;;  %11316 = vmatprep.subr.bf16.mxu1 %v13563_v63  ;;  %v7538_v27 = vmul.f32 %v16160_v32, %v7014_v14  ;;  %v6499_v25 = vunpack.c.0.s8 %v6125_v59 }
 0x7ad   :  { %v7540_v22 = vmul.f32 %v16160_v32, %v7016_v62  ;;  %v6947_v4 = vcvt.s32.f32 %v6435_v11  ;;  %v6949_v56 = vcvt.s32.f32 %v6437_v31  ;;  %v6501_v21 = vunpack.c.1.s8 %v6125_v59 }
 0x7ae   :  { %11357 = vmatprep.subr.bf16.mxu0 %v13595_v51  ;;  %v13562_v57 = vpack.c.bf16 %v7476_v30, %v7474_v43  ;;  %v6434_v37 = vunpack.c.0.s8 %v6108_v8  ;;  %v7011_v18 = vcvt.s32.f32 %v6499_v25  ;;  %v6436_v24 = vunpack.c.1.s8 %v6108_v8 }
 0x7af   :  { %v13594_v13 = vpack.c.bf16 %v7540_v22, %v7538_v27  ;;  %v7471_v36 = vmul.f32 %v16157_v41, %v6947_v4  ;;  %v7473_v34 = vmul.f32 %v16157_v41, %v6949_v56  ;;  %v7013_v58 = vcvt.s32.f32 %v6501_v21 }
 0x7b0   :  { %11317 = vmatpush1.bf16.msra.mxu1 %v13562_v57  ;;  %v6946_v29 = vcvt.s32.f32 %v6434_v37  ;;  %v6498_v2 = vunpack.c.0.s8 %v6124_v26  ;;  %v7535_v47 = vmul.f32 %v16157_v41, %v7011_v18  ;;  %v6948_v33 = vcvt.s32.f32 %v6436_v24 }
 0x7b1   :  { %11358 = vmatpush1.bf16.msra.mxu0 %v13594_v13  ;;  %v6500_v20 = vunpack.c.1.s8 %v6124_v26  ;;  %v6431_v59 = vunpack.c.2.s8 %v16514_v10  ;;  %v13561_v49 = vpack.c.bf16 %v7473_v34, %v7471_v36  ;;  %v7537_v23 = vmul.f32 %v16157_v41, %v7013_v58 }
 0x7b2   :  { %v7470_v44 = vmul.f32 %v16160_v32, %v6946_v29  ;;  %v7010_v8 = vcvt.s32.f32 %v6498_v2  ;;  %v7472_v7 = vmul.f32 %v16160_v32, %v6948_v33  ;;  %v6433_v61 = vunpack.c.3.s8 %v16514_v10 }
 0x7b3   :  { %v7012_v0 = vcvt.s32.f32 %v6500_v20  ;;  %v6943_v15 = vcvt.s32.f32 %v6431_v59  ;;  %11318 = vmatprep.subr.bf16.mxu1 %v13561_v49  ;;  %v13593_v60 = vpack.c.bf16 %v7537_v23, %v7535_v47  ;;  %v6495_v3 = vunpack.c.2.s8 %v6123_v45  ;;  %v16536_v47 = vld [vmem:[#allocation4 + $0x278] sm:$0xff] }
 0x7b4   :  { %v7534_v26 = vmul.f32 %v16160_v32, %v7010_v8  ;;  %v6497_v54 = vunpack.c.3.s8 %v6123_v45  ;;  %v13560_v9 = vpack.c.bf16 %v7472_v7, %v7470_v44  ;;  %v6945_v1 = vcvt.s32.f32 %v6433_v61 }
 0x7b5   :  { %v7536_v53 = vmul.f32 %v16160_v32, %v7012_v0  ;;  %v7467_v46 = vmul.f32 %v16157_v41, %v6943_v15  ;;  %11359 = vmatprep.subr.bf16.mxu0 %v13593_v60  ;;  %v7007_v17 = vcvt.s32.f32 %v6495_v3  ;;  %v6430_v19 = vunpack.c.2.s8 %v6106_v39  ;;  %v6137_v15 = vld [vmem:[#allocation4 + $0x2f8] sm:$0xff] }
 0x7b6   :  { %v7009_v12 = vcvt.s32.f32 %v6497_v54  ;;  %v6432_v35 = vunpack.c.3.s8 %v6106_v39  ;;  %11319 = vmatpush1.bf16.msra.mxu1 %v13560_v9  ;;  %v7469_v14 = vmul.f32 %v16157_v41, %v6945_v1  ;;  %v6494_v62 = vunpack.c.2.s8 %v6122_v52 }
 0x7b7   :  { %v13592_v63 = vpack.c.bf16 %v7536_v53, %v7534_v26  ;;  %v6496_v11 = vunpack.c.3.s8 %v6122_v52  ;;  %v7531_v51 = vmul.f32 %v16157_v41, %v7007_v17  ;;  %v6942_v30 = vcvt.s32.f32 %v6430_v19 }
 0x7b8   :  { %v7533_v43 = vmul.f32 %v16157_v41, %v7009_v12  ;;  %v6944_v31 = vcvt.s32.f32 %v6432_v35  ;;  %v13559_v27 = vpack.c.bf16 %v7469_v14, %v7467_v46  ;;  %v7006_v22 = vcvt.s32.f32 %v6494_v62  ;;  %v6120_v46 = vld [vmem:[#allocation4 + $0x270] sm:$0xff] }
 0x7b9   :  { %11360 = vmatpush1.bf16.msra.mxu0 %v13592_v63  ;;  %v7008_v4 = vcvt.s32.f32 %v6496_v11  ;;  %v6427_v25 = vunpack.c.0.s8 %v16514_v10  ;;  %v7466_v56 = vmul.f32 %v16160_v32, %v6942_v30  ;;  %v6429_v37 = vunpack.c.1.s8 %v16514_v10  ;;  %v6136_v35 = vld [vmem:[#allocation4 + $0x2f0] sm:$0xff] }
 0x7ba   :  { %v13591_v57 = vpack.c.bf16 %v7533_v43, %v7531_v51  ;;  %v7468_v21 = vmul.f32 %v16160_v32, %v6944_v31  ;;  %11320 = vmatprep.subr.bf16.mxu1 %v13559_v27  ;;  %v7530_v13 = vmul.f32 %v16160_v32, %v7006_v22  ;;  %v6491_v24 = vunpack.c.0.s8 %v6123_v45 }
 0x7bb   :  { %v7532_v36 = vmul.f32 %v16160_v32, %v7008_v4  ;;  %v6939_v18 = vcvt.s32.f32 %v6427_v25  ;;  %v6941_v58 = vcvt.s32.f32 %v6429_v37  ;;  %v6493_v29 = vunpack.c.1.s8 %v6123_v45 }
 0x7bc   :  { %11361 = vmatprep.subr.bf16.mxu0 %v13591_v57  ;;  %v13558_v34 = vpack.c.bf16 %v7468_v21, %v7466_v56  ;;  %v6426_v2 = vunpack.c.0.s8 %v6106_v39  ;;  %v7003_v59 = vcvt.s32.f32 %v6491_v24  ;;  %v6428_v49 = vunpack.c.1.s8 %v6106_v39 }
 0x7bd   :  { %v13590_v33 = vpack.c.bf16 %v7532_v36, %v7530_v13  ;;  %v7463_v20 = vmul.f32 %v16157_v41, %v6939_v18  ;;  %v7465_v10 = vmul.f32 %v16157_v41, %v6941_v58  ;;  %v7005_v23 = vcvt.s32.f32 %v6493_v29 }
 0x7be   :  { %11321 = vmatpush1.bf16.msra.mxu1 %v13558_v34  ;;  %v6938_v44 = vcvt.s32.f32 %v6426_v2  ;;  %v6490_v8 = vunpack.c.0.s8 %v6122_v52  ;;  %v7527_v7 = vmul.f32 %v16157_v41, %v7003_v59  ;;  %v6940_v0 = vcvt.s32.f32 %v6428_v49 }
 0x7bf   :  { %11362 = vmatpush1.bf16.msra.mxu0 %v13590_v33  ;;  %v6492_v61 = vunpack.c.1.s8 %v6122_v52  ;;  %v6487_v45 = vunpack.c.2.s8 %v16536_v47  ;;  %v13557_v60 = vpack.c.bf16 %v7465_v10, %v7463_v20  ;;  %v7529_v26 = vmul.f32 %v16157_v41, %v7005_v23 }
 0x7c0   :  { %v7462_v3 = vmul.f32 %v16160_v32, %v6938_v44  ;;  %v7002_v39 = vcvt.s32.f32 %v6490_v8  ;;  %v7464_v54 = vmul.f32 %v16160_v32, %v6940_v0  ;;  %v6489_v53 = vunpack.c.3.s8 %v16536_v47 }
 0x7c1   :  { %v7004_v9 = vcvt.s32.f32 %v6492_v61  ;;  %v6999_v1 = vcvt.s32.f32 %v6487_v45  ;;  %11322 = vmatprep.subr.bf16.mxu1 %v13557_v60  ;;  %v13589_v17 = vpack.c.bf16 %v7529_v26, %v7527_v7  ;;  %v6551_v12 = vunpack.c.2.s8 %v6137_v15  ;;  %v16558_v7 = vld [vmem:[#allocation4 + $0x268] sm:$0xff] }
 0x7c2   :  { %v7526_v52 = vmul.f32 %v16160_v32, %v7002_v39  ;;  %v6553_v19 = vunpack.c.3.s8 %v6137_v15  ;;  %v13556_v63 = vpack.c.bf16 %v7464_v54, %v7462_v3  ;;  %v7001_v62 = vcvt.s32.f32 %v6489_v53 }
 0x7c3   :  { %v7528_v14 = vmul.f32 %v16160_v32, %v7004_v9  ;;  %v7523_v11 = vmul.f32 %v16157_v41, %v6999_v1  ;;  %11363 = vmatprep.subr.bf16.mxu0 %v13589_v17  ;;  %v7063_v51 = vcvt.s32.f32 %v6551_v12  ;;  %v6486_v30 = vunpack.c.2.s8 %v6120_v46  ;;  %v6135_v1 = vld [vmem:[#allocation4 + $0x2e8] sm:$0xff] }
 0x7c4   :  { %v7065_v43 = vcvt.s32.f32 %v6553_v19  ;;  %v6488_v31 = vunpack.c.3.s8 %v6120_v46  ;;  %11323 = vmatpush1.bf16.msra.mxu1 %v13556_v63  ;;  %v7525_v22 = vmul.f32 %v16157_v41, %v7001_v62  ;;  %v6550_v4 = vunpack.c.2.s8 %v6136_v35 }
 0x7c5   :  { %v13588_v27 = vpack.c.bf16 %v7528_v14, %v7526_v52  ;;  %v6552_v25 = vunpack.c.3.s8 %v6136_v35  ;;  %v7587_v57 = vmul.f32 %v16157_v41, %v7063_v51  ;;  %v6998_v21 = vcvt.s32.f32 %v6486_v30 }
 0x7c6   :  { %v7589_v56 = vmul.f32 %v16157_v41, %v7065_v43  ;;  %v7000_v37 = vcvt.s32.f32 %v6488_v31  ;;  %v13587_v13 = vpack.c.bf16 %v7525_v22, %v7523_v11  ;;  %v7062_v36 = vcvt.s32.f32 %v6550_v4  ;;  %v6118_v11 = vld [vmem:[#allocation4 + $0x260] sm:$0xff] }
 0x7c7   :  { %11364 = vmatpush1.bf16.msra.mxu0 %v13588_v27  ;;  %v7064_v18 = vcvt.s32.f32 %v6552_v25  ;;  %v6483_v24 = vunpack.c.0.s8 %v16536_v47  ;;  %v7522_v58 = vmul.f32 %v16160_v32, %v6998_v21  ;;  %v6485_v2 = vunpack.c.1.s8 %v16536_v47  ;;  %v6134_v31 = vld [vmem:[#allocation4 + $0x2e0] sm:$0xff] }
 0x7c8   :  { %v13619_v34 = vpack.c.bf16 %v7589_v56, %v7587_v57  ;;  %v7524_v29 = vmul.f32 %v16160_v32, %v7000_v37  ;;  %11324 = vmatprep.subr.bf16.mxu1 %v13587_v13  ;;  %v7586_v33 = vmul.f32 %v16160_v32, %v7062_v36  ;;  %v6547_v49 = vunpack.c.0.s8 %v6137_v15 }
 0x7c9   :  { %v7588_v20 = vmul.f32 %v16160_v32, %v7064_v18  ;;  %v6995_v59 = vcvt.s32.f32 %v6483_v24  ;;  %v6997_v23 = vcvt.s32.f32 %v6485_v2  ;;  %v6549_v44 = vunpack.c.1.s8 %v6137_v15 }
 0x7ca   :  { %11365 = vmatprep.subr.bf16.mxu0 %v13619_v34  ;;  %v13586_v10 = vpack.c.bf16 %v7524_v29, %v7522_v58  ;;  %v6482_v8 = vunpack.c.0.s8 %v6120_v46  ;;  %v7059_v45 = vcvt.s32.f32 %v6547_v49  ;;  %v6484_v60 = vunpack.c.1.s8 %v6120_v46 }
 0x7cb   :  { %v13618_v0 = vpack.c.bf16 %v7588_v20, %v7586_v33  ;;  %v7519_v61 = vmul.f32 %v16157_v41, %v6995_v59  ;;  %v7521_v47 = vmul.f32 %v16157_v41, %v6997_v23  ;;  %v7061_v26 = vcvt.s32.f32 %v6549_v44 }
 0x7cc   :  { %11325 = vmatpush2.bf16.msra.mxu1 %v13586_v10  ;;  %v6994_v3 = vcvt.s32.f32 %v6482_v8  ;;  %v6546_v39 = vunpack.c.0.s8 %v6136_v35  ;;  %v7583_v54 = vmul.f32 %v16157_v41, %v7059_v45  ;;  %v6996_v9 = vcvt.s32.f32 %v6484_v60 }
 0x7cd   :  { %11366 = vmatpush2.bf16.msra.mxu0 %v13618_v0  ;;  %v6548_v53 = vunpack.c.1.s8 %v6136_v35  ;;  %v6479_v15 = vunpack.c.2.s8 %v16558_v7  ;;  %v13585_v17 = vpack.c.bf16 %v7521_v47, %v7519_v61  ;;  %v7585_v52 = vmul.f32 %v16157_v41, %v7061_v26 }
 0x7ce   :  { %v7518_v12 = vmul.f32 %v16160_v32, %v6994_v3  ;;  %v7058_v46 = vcvt.s32.f32 %v6546_v39  ;;  %v7520_v19 = vmul.f32 %v16160_v32, %v6996_v9  ;;  %v6481_v14 = vunpack.c.3.s8 %v16558_v7 }
 0x7cf   :  { %v7060_v63 = vcvt.s32.f32 %v6548_v53  ;;  %v6991_v62 = vcvt.s32.f32 %v6479_v15  ;;  %11326 = vmatprep.subr.bf16.mxu1 %v13585_v17  ;;  %v13617_v51 = vpack.c.bf16 %v7585_v52, %v7583_v54  ;;  %v6543_v43 = vunpack.c.2.s8 %v6135_v1  ;;  %v16580_v54 = vld [vmem:[#allocation4 + $0x258] sm:$0xff] }
 0x7d0   :  { %v7582_v35 = vmul.f32 %v16160_v32, %v7058_v46  ;;  %v6545_v30 = vunpack.c.3.s8 %v6135_v1  ;;  %v13584_v27 = vpack.c.bf16 %v7520_v19, %v7518_v12  ;;  %v6993_v4 = vcvt.s32.f32 %v6481_v14 }
 0x7d1   :  { %v7584_v22 = vmul.f32 %v16160_v32, %v7060_v63  ;;  %v7515_v25 = vmul.f32 %v16157_v41, %v6991_v62  ;;  %11367 = vmatprep.subr.bf16.mxu0 %v13617_v51  ;;  %v7055_v57 = vcvt.s32.f32 %v6543_v43  ;;  %v6478_v21 = vunpack.c.2.s8 %v6118_v11  ;;  %v6133_v62 = vld [vmem:[#allocation4 + $0x2d8] sm:$0xff] }
 0x7d2   :  { %v7057_v56 = vcvt.s32.f32 %v6545_v30  ;;  %v6480_v37 = vunpack.c.3.s8 %v6118_v11  ;;  %11327 = vmatpush2.bf16.msra.mxu1 %v13584_v27  ;;  %v7517_v36 = vmul.f32 %v16157_v41, %v6993_v4  ;;  %v6542_v18 = vunpack.c.2.s8 %v6134_v31 }
 0x7d3   :  { %v13616_v13 = vpack.c.bf16 %v7584_v22, %v7582_v35  ;;  %v6544_v24 = vunpack.c.3.s8 %v6134_v31  ;;  %v7579_v34 = vmul.f32 %v16157_v41, %v7055_v57  ;;  %v6990_v29 = vcvt.s32.f32 %v6478_v21 }
 0x7d4   :  { %v7581_v58 = vmul.f32 %v16157_v41, %v7057_v56  ;;  %v6992_v2 = vcvt.s32.f32 %v6480_v37  ;;  %v13583_v33 = vpack.c.bf16 %v7517_v36, %v7515_v25  ;;  %v7054_v20 = vcvt.s32.f32 %v6542_v18  ;;  %v6116_v25 = vld [vmem:[#allocation4 + $0x250] sm:$0xff] }
 0x7d5   :  { %11368 = vmatpush2.bf16.msra.mxu0 %v13616_v13  ;;  %v7056_v59 = vcvt.s32.f32 %v6544_v24  ;;  %v6475_v49 = vunpack.c.0.s8 %v16558_v7  ;;  %v7514_v23 = vmul.f32 %v16160_v32, %v6990_v29  ;;  %v6477_v8 = vunpack.c.1.s8 %v16558_v7  ;;  %v6132_v37 = vld [vmem:[#allocation4 + $0x2d0] sm:$0xff] }
 0x7d6   :  { %v13615_v10 = vpack.c.bf16 %v7581_v58, %v7579_v34  ;;  %v7516_v44 = vmul.f32 %v16160_v32, %v6992_v2  ;;  %11328 = vmatprep.subr.bf16.mxu1 %v13583_v33  ;;  %v7578_v0 = vmul.f32 %v16160_v32, %v7054_v20  ;;  %v6539_v60 = vunpack.c.0.s8 %v6135_v1 }
 0x7d7   :  { %v7580_v61 = vmul.f32 %v16160_v32, %v7056_v59  ;;  %v6987_v45 = vcvt.s32.f32 %v6475_v49  ;;  %v6989_v26 = vcvt.s32.f32 %v6477_v8  ;;  %v6541_v3 = vunpack.c.1.s8 %v6135_v1 }
 0x7d8   :  { %11369 = vmatprep.subr.bf16.mxu0 %v13615_v10  ;;  %v13582_v47 = vpack.c.bf16 %v7516_v44, %v7514_v23  ;;  %v6474_v39 = vunpack.c.0.s8 %v6118_v11  ;;  %v7051_v15 = vcvt.s32.f32 %v6539_v60  ;;  %v6476_v17 = vunpack.c.1.s8 %v6118_v11 }
 0x7d9   :  { %v13614_v9 = vpack.c.bf16 %v7580_v61, %v7578_v0  ;;  %v7511_v53 = vmul.f32 %v16157_v41, %v6987_v45  ;;  %v7513_v7 = vmul.f32 %v16157_v41, %v6989_v26  ;;  %v7053_v52 = vcvt.s32.f32 %v6541_v3 }
 0x7da   :  { %11329 = vmatpush2.bf16.msra.mxu1 %v13582_v47  ;;  %v6986_v12 = vcvt.s32.f32 %v6474_v39  ;;  %v6538_v46 = vunpack.c.0.s8 %v6134_v31  ;;  %v7575_v19 = vmul.f32 %v16157_v41, %v7051_v15  ;;  %v6988_v63 = vcvt.s32.f32 %v6476_v17 }
 0x7db   :  { %11370 = vmatpush2.bf16.msra.mxu0 %v13614_v9  ;;  %v6540_v14 = vunpack.c.1.s8 %v6134_v31  ;;  %v6471_v1 = vunpack.c.2.s8 %v16580_v54  ;;  %v13581_v51 = vpack.c.bf16 %v7513_v7, %v7511_v53  ;;  %v7577_v35 = vmul.f32 %v16157_v41, %v7053_v52 }
 0x7dc   :  { %v7510_v43 = vmul.f32 %v16160_v32, %v6986_v12  ;;  %v7050_v11 = vcvt.s32.f32 %v6538_v46  ;;  %v7512_v30 = vmul.f32 %v16160_v32, %v6988_v63  ;;  %v6473_v22 = vunpack.c.3.s8 %v16580_v54 }
 0x7dd   :  { %v7052_v27 = vcvt.s32.f32 %v6540_v14  ;;  %v6983_v4 = vcvt.s32.f32 %v6471_v1  ;;  %11330 = vmatprep.subr.bf16.mxu1 %v13581_v51  ;;  %v13613_v57 = vpack.c.bf16 %v7577_v35, %v7575_v19  ;;  %v6535_v56 = vunpack.c.2.s8 %v6133_v62  ;;  %v16602_v19 = vld [vmem:[#allocation4 + $0x248] sm:$0xff] }
 0x7de   :  { %v7574_v31 = vmul.f32 %v16160_v32, %v7050_v11  ;;  %v6537_v21 = vunpack.c.3.s8 %v6133_v62  ;;  %v13580_v13 = vpack.c.bf16 %v7512_v30, %v7510_v43  ;;  %v6985_v18 = vcvt.s32.f32 %v6473_v22 }
 0x7df   :  { %v7576_v36 = vmul.f32 %v16160_v32, %v7052_v27  ;;  %v7507_v24 = vmul.f32 %v16157_v41, %v6983_v4  ;;  %11371 = vmatprep.subr.bf16.mxu0 %v13613_v57  ;;  %v7047_v34 = vcvt.s32.f32 %v6535_v56  ;;  %v6470_v29 = vunpack.c.2.s8 %v6116_v25  ;;  %v16608_v4 = vld [vmem:[#allocation4 + $0x2c8] sm:$0xff] }
 0x7e0   :  { %v7049_v58 = vcvt.s32.f32 %v6537_v21  ;;  %v6472_v2 = vunpack.c.3.s8 %v6116_v25  ;;  %11331 = vmatpush2.bf16.msra.mxu1 %v13580_v13  ;;  %v7509_v20 = vmul.f32 %v16157_v41, %v6985_v18  ;;  %v6534_v59 = vunpack.c.2.s8 %v6132_v37 }
 0x7e1   :  { %v13612_v33 = vpack.c.bf16 %v7576_v36, %v7574_v31  ;;  %v6536_v49 = vunpack.c.3.s8 %v6132_v37  ;;  %v7571_v10 = vmul.f32 %v16157_v41, %v7047_v34  ;;  %v6982_v44 = vcvt.s32.f32 %v6470_v29 }
 0x7e2   :  { %v7573_v23 = vmul.f32 %v16157_v41, %v7049_v58  ;;  %v6984_v8 = vcvt.s32.f32 %v6472_v2  ;;  %v13579_v0 = vpack.c.bf16 %v7509_v20, %v7507_v24  ;;  %v7046_v61 = vcvt.s32.f32 %v6534_v59  ;;  %v6114_v24 = vld [vmem:[#allocation4 + $0x240] sm:$0xff] }
 0x7e3   :  { %11372 = vmatpush2.bf16.msra.mxu0 %v13612_v33  ;;  %v7048_v45 = vcvt.s32.f32 %v6536_v49  ;;  %v6467_v60 = vunpack.c.0.s8 %v16580_v54  ;;  %v7506_v26 = vmul.f32 %v16160_v32, %v6982_v44  ;;  %v6469_v39 = vunpack.c.1.s8 %v16580_v54  ;;  %v16617_v2 = vld [vmem:[#allocation4 + $0x2c0] sm:$0xff] }
 0x7e4   :  { %v13611_v47 = vpack.c.bf16 %v7573_v23, %v7571_v10  ;;  %v7508_v3 = vmul.f32 %v16160_v32, %v6984_v8  ;;  %11332 = vmatprep.subr.bf16.mxu1 %v13579_v0  ;;  %v7570_v9 = vmul.f32 %v16160_v32, %v7046_v61  ;;  %v6531_v17 = vunpack.c.0.s8 %v6133_v62 }
 0x7e5   :  { %v7572_v53 = vmul.f32 %v16160_v32, %v7048_v45  ;;  %v6979_v15 = vcvt.s32.f32 %v6467_v60  ;;  %v6981_v52 = vcvt.s32.f32 %v6469_v39  ;;  %v6533_v12 = vunpack.c.1.s8 %v6133_v62 }
 0x7e6   :  { %11373 = vmatprep.subr.bf16.mxu0 %v13611_v47  ;;  %v13578_v7 = vpack.c.bf16 %v7508_v3, %v7506_v26  ;;  %v6466_v46 = vunpack.c.0.s8 %v6116_v25  ;;  %v7043_v1 = vcvt.s32.f32 %v6531_v17  ;;  %v6468_v51 = vunpack.c.1.s8 %v6116_v25 }
 0x7e7   :  { %v13610_v63 = vpack.c.bf16 %v7572_v53, %v7570_v9  ;;  %v7503_v14 = vmul.f32 %v16157_v41, %v6979_v15  ;;  %v7505_v54 = vmul.f32 %v16157_v41, %v6981_v52  ;;  %v7045_v35 = vcvt.s32.f32 %v6533_v12  ;;  %v16629_v52 = vpop.f32.mrf.mxu0 }
 0x7e8   :  { %11333 = vmatpush2.bf16.msra.mxu1 %v13578_v7  ;;  %v6978_v43 = vcvt.s32.f32 %v6466_v46  ;;  %v6530_v11 = vunpack.c.0.s8 %v6132_v37  ;;  %v7567_v30 = vmul.f32 %v16157_v41, %v7043_v1  ;;  %v6980_v27 = vcvt.s32.f32 %v6468_v51  ;;  %v16627_v7 = vpop.f32.mrf.mxu1 }
 0x7e9   :  { %11374 = vmatpush2.bf16.msra.mxu0 %v13610_v63  ;;  %v6532_v22 = vunpack.c.1.s8 %v6132_v37  ;;  %v6463_v62 = vunpack.c.2.s8 %v16602_v19  ;;  %v13577_v57 = vpack.c.bf16 %v7505_v54, %v7503_v14  ;;  %v7569_v31 = vmul.f32 %v16157_v41, %v7045_v35 }
 0x7ea   :  { %v7502_v25 = vmul.f32 %v16160_v32, %v6978_v43  ;;  %v7042_v56 = vcvt.s32.f32 %v6530_v11  ;;  %v7504_v21 = vmul.f32 %v16160_v32, %v6980_v27  ;;  %v6465_v36 = vunpack.c.3.s8 %v16602_v19 }
 0x7eb   :  { %v7044_v13 = vcvt.s32.f32 %v6532_v22  ;;  %v6975_v18 = vcvt.s32.f32 %v6463_v62  ;;  %11334 = vmatprep.subr.bf16.mxu1 %v13577_v57  ;;  %v13609_v34 = vpack.c.bf16 %v7569_v31, %v7567_v30  ;;  %v6527_v58 = vunpack.c.2.s8 %v16608_v4  ;;  %v16638_v22 = vpop.f32.mrf.mxu1  ;;  %v16640_v62 = vpop.f32.mrf.mxu0 }
 0x7ec   :  { %v7566_v37 = vmul.f32 %v16160_v32, %v7042_v56  ;;  %v6529_v29 = vunpack.c.3.s8 %v16608_v4  ;;  %v13576_v33 = vpack.c.bf16 %v7504_v21, %v7502_v25  ;;  %v6977_v59 = vcvt.s32.f32 %v6465_v36 }
 0x7ed   :  { %v7568_v20 = vmul.f32 %v16160_v32, %v7044_v13  ;;  %v7499_v49 = vmul.f32 %v16157_v41, %v6975_v18  ;;  %11375 = vmatprep.subr.bf16.mxu0 %v13609_v34  ;;  %v7039_v10 = vcvt.s32.f32 %v6527_v58  ;;  %v6462_v44 = vunpack.c.2.s8 %v6114_v24  ;;  %v11182_v18 = vpop.f32.mrf.mxu1  ;;  %v11223_v34 = vpop.f32.mrf.mxu0 }
 0x7ee   :  { %v7041_v23 = vcvt.s32.f32 %v6529_v29  ;;  %v6464_v8 = vunpack.c.3.s8 %v6114_v24  ;;  %11335 = vmatpush2.bf16.msra.mxu1 %v13576_v33  ;;  %v7501_v61 = vmul.f32 %v16157_v41, %v6977_v59  ;;  %v6526_v45 = vunpack.c.2.s8 %v16617_v2 }
 0x7ef   :  { %v13608_v0 = vpack.c.bf16 %v7568_v20, %v7566_v37  ;;  %v6528_v60 = vunpack.c.3.s8 %v16617_v2  ;;  %v7563_v47 = vmul.f32 %v16157_v41, %v7039_v10  ;;  %v6974_v3 = vcvt.s32.f32 %v6462_v44  ;;  %v11183_v10 = vpop.f32.mrf.mxu1 }
 0x7f0   :  { %v7565_v26 = vmul.f32 %v16157_v41, %v7041_v23  ;;  %v6976_v39 = vcvt.s32.f32 %v6464_v8  ;;  %v13575_v9 = vpack.c.bf16 %v7501_v61, %v7499_v49  ;;  %v7038_v53 = vcvt.s32.f32 %v6526_v45  ;;  %v6145_v49 = vld [vmem:[#allocation4 + $0x338] sm:$0xff]  ;;  %v11224_v23 = vpop.f32.mrf.mxu0 }
 0x7f1   :  { %11376 = vmatpush2.bf16.msra.mxu0 %v13608_v0  ;;  %v7040_v15 = vcvt.s32.f32 %v6528_v60  ;;  %v6459_v17 = vunpack.c.0.s8 %v16602_v19  ;;  %v7498_v46 = vmul.f32 %v16160_v32, %v6974_v3  ;;  %v6461_v14 = vunpack.c.1.s8 %v16602_v19 }
 0x7f2   :  { %v13607_v12 = vpack.c.bf16 %v7565_v26, %v7563_v47  ;;  %v7500_v63 = vmul.f32 %v16160_v32, %v6976_v39  ;;  %11336 = vmatprep.subr.bf16.mxu1 %v13575_v9  ;;  %v7562_v1 = vmul.f32 %v16160_v32, %v7038_v53  ;;  %v6523_v35 = vunpack.c.0.s8 %v16608_v4  ;;  %v16661_v26 = vld [vmem:[#allocation4 + $0x330] sm:$0xff] }
 0x7f3   :  { %v7564_v51 = vmul.f32 %v16160_v32, %v7040_v15  ;;  %v6971_v54 = vcvt.s32.f32 %v6459_v17  ;;  %v6973_v11 = vcvt.s32.f32 %v6461_v14  ;;  %v6525_v30 = vunpack.c.1.s8 %v16608_v4  ;;  %v16664_v53 = vld [vmem:[#allocation4 + $0x3b0] sm:$0xff] }
 0x7f4   :  { %11377 = vmatprep.subr.bf16.mxu0 %v13607_v12  ;;  %v13574_v43 = vpack.c.bf16 %v7500_v63, %v7498_v46  ;;  %v6458_v27 = vunpack.c.0.s8 %v6114_v24  ;;  %v7035_v31 = vcvt.s32.f32 %v6523_v35  ;;  %v6460_v25 = vunpack.c.1.s8 %v6114_v24 }
 0x7f5   :  { %v13606_v57 = vpack.c.bf16 %v7564_v51, %v7562_v1  ;;  %v7495_v19 = vmul.f32 %v16157_v41, %v6971_v54  ;;  %v7497_v56 = vmul.f32 %v16157_v41, %v6973_v11  ;;  %v7037_v21 = vcvt.s32.f32 %v6525_v30 }
 0x7f6   :  { %11337 = vmatpush2.bf16.msra.mxu1 %v13574_v43  ;;  %v6970_v13 = vcvt.s32.f32 %v6458_v27  ;;  %v6522_v36 = vunpack.c.0.s8 %v16617_v2  ;;  %v7559_v4 = vmul.f32 %v16157_v41, %v7035_v31  ;;  %v6972_v37 = vcvt.s32.f32 %v6460_v25 }
 0x7f7   :  { %11378 = vmatpush2.bf16.msra.mxu0 %v13606_v57  ;;  %v6524_v58 = vunpack.c.1.s8 %v16617_v2  ;;  %v9551_v29 = vrot.slane %v16135_v50, %v17452_v48  ;;  %v13573_v33 = vpack.c.bf16 %v7497_v56, %v7495_v19  ;;  %v7561_v24 = vmul.f32 %v16157_v41, %v7037_v21  ;;  %v16654_v2 = vld [vmem:[#allocation4 + $0x3b8] sm:$0xff] }
 0x7f8   :  { %v7494_v20 = vmul.f32 %v16160_v32, %v6970_v13  ;;  %v7034_v59 = vcvt.s32.f32 %v6522_v36  ;;  %v7496_v44 = vmul.f32 %v16160_v32, %v6972_v37  ;;  %v9559_v61 = vrot.slane %v16135_v50, %v17453_v38 }
 0x7f9   :  { %v7036_v8 = vcvt.s32.f32 %v6524_v58  ;;  %v9601_v0 = vpack.c.bf16 %v9551_v29, %v9551_v29  ;;  %11338 = vmatprep.subr.bf16.mxu1 %v13573_v33  ;;  %v13605_v48 = vpack.c.bf16 %v7561_v24, %v7559_v4  ;;  %v9547_v60 = vrot.slane %v16135_v50, %v17454_v5 }
 0x7fa   :  { %v7558_v45 = vmul.f32 %v16160_v32, %v7034_v59  ;;  %v9555_v47 = vrot.slane %v16135_v50, %v17455_v16  ;;  %v13572_v3 = vpack.c.bf16 %v7496_v44, %v7494_v20  ;;  %v9603_v9 = vpack.c.bf16 %v9559_v61, %v9559_v61  ;;  %v16683_v44 = vld [vmem:[#allocation4 + $0x328] sm:$0xff] }
 0x7fb   :  { %v7560_v39 = vmul.f32 %v16160_v32, %v7036_v8  ;;  %11340 = vmatprep.mubr.bf16.mxu1 %v9601_v0  ;;  %v6583_v38 = vunpack.c.2.s8 %v6145_v49  ;;  %11379 = vmatprep.subr.bf16.mxu0 %v13605_v48  ;;  %v9600_v15 = vpack.c.bf16 %v9547_v60, %v9547_v60  ;;  %v6585_v12 = vunpack.c.3.s8 %v6145_v49 }
 0x7fc   :  { %v9602_v17 = vpack.c.bf16 %v9555_v47, %v9555_v47  ;;  %v6647_v46 = vunpack.c.2.s8 %v16654_v2  ;;  %11339 = vmatpush2.bf16.msra.mxu1 %v13572_v3  ;;  %11381 = vmatprep.mubr.bf16.mxu0 %v9603_v9  ;;  %v6649_v63 = vunpack.c.3.s8 %v16654_v2  ;;  %v6582_v14 = vunpack.c.2.s8 %v16661_v26 }
 0x7fd   :  { %v13604_v5 = vpack.c.bf16 %v7560_v39, %v7558_v45  ;;  %v7095_v16 = vcvt.s32.f32 %v6583_v38  ;;  %v7097_v1 = vcvt.s32.f32 %v6585_v12  ;;  %v6584_v54 = vunpack.c.3.s8 %v16661_v26  ;;  %v6159_v38 = vld [vmem:[#allocation4 + $0x3a8] sm:$0xff] }
 0x7fe   :  { %v7159_v51 = vcvt.s32.f32 %v6647_v46  ;;  %v6646_v35 = vunpack.c.2.s8 %v16664_v53  ;;  %v7161_v11 = vcvt.s32.f32 %v6649_v63  ;;  %v7094_v30 = vcvt.s32.f32 %v6582_v14  ;;  %v6142_v14 = vld [vmem:[#allocation4 + $0x320] sm:$0xff] }
 0x7ff   :  { %11380 = vmatpush2.bf16.msra.mxu0 %v13604_v5  ;;  %v7619_v43 = vmul.f32 %v16157_v41, %v7095_v16  ;;  %v6648_v27 = vunpack.c.3.s8 %v16664_v53  ;;  %11341 = vmatmul.mubr.bf16.vlgmr.msra.gmra.mxu1 %v9600_v15  ;;  %v7621_v57 = vmul.f32 %v16157_v41, %v7097_v1  ;;  %v7096_v31 = vcvt.s32.f32 %v6584_v54 }
 0x800   :  { %v7683_v19 = vmul.f32 %v16157_v41, %v7159_v51  ;;  %v7158_v25 = vcvt.s32.f32 %v6646_v35  ;;  %v7685_v56 = vmul.f32 %v16157_v41, %v7161_v11  ;;  %v7618_v21 = vmul.f32 %v16160_v32, %v7094_v30  ;;  %v6158_v35 = vld [vmem:[#allocation4 + $0x3a0] sm:$0xff] }
 0x801   :  { %v7160_v13 = vcvt.s32.f32 %v6648_v27  ;;  %v6579_v36 = vunpack.c.0.s8 %v6145_v49  ;;  %v13635_v18 = vpack.c.bf16 %v7621_v57, %v7619_v43  ;;  %v7620_v34 = vmul.f32 %v16160_v32, %v7096_v31 }
 0x802   :  { %11382 = vmatmul.mubr.bf16.vlgmr.msra.gmra.mxu0 %v9602_v17  ;;  %v7682_v4 = vmul.f32 %v16160_v32, %v7158_v25  ;;  %v6581_v37 = vunpack.c.1.s8 %v6145_v49  ;;  %v13667_v58 = vpack.c.bf16 %v7685_v56, %v7683_v19  ;;  %v6643_v24 = vunpack.c.0.s8 %v16654_v2 }
 0x803   :  { %v7684_v29 = vmul.f32 %v16160_v32, %v7160_v13  ;;  %v7091_v33 = vcvt.s32.f32 %v6579_v36  ;;  %11390 = vmatprep.subr.bf16.mxu1 %v13635_v18  ;;  %v13634_v20 = vpack.c.bf16 %v7620_v34, %v7618_v21  ;;  %v6645_v10 = vunpack.c.1.s8 %v16654_v2 }
 0x804   :  { %v7093_v59 = vcvt.s32.f32 %v6581_v37  ;;  %v6578_v23 = vunpack.c.0.s8 %v16661_v26  ;;  %11431 = vmatprep.subr.bf16.mxu0 %v13667_v58  ;;  %v7155_v49 = vcvt.s32.f32 %v6643_v24  ;;  %v6580_v61 = vunpack.c.1.s8 %v16661_v26 }
 0x805   :  { %v13666_v8 = vpack.c.bf16 %v7684_v29, %v7682_v4  ;;  %v7615_v0 = vmul.f32 %v16157_v41, %v7091_v33  ;;  %11391 = vmatpush1.bf16.msra.mxu1 %v13634_v20  ;;  %v7157_v45 = vcvt.s32.f32 %v6645_v10  ;;  %v6642_v47 = vunpack.c.0.s8 %v16664_v53 }
 0x806   :  { %v7617_v48 = vmul.f32 %v16157_v41, %v7093_v59  ;;  %v7090_v60 = vcvt.s32.f32 %v6578_v23  ;;  %v7679_v2 = vmul.f32 %v16157_v41, %v7155_v49  ;;  %v7092_v3 = vcvt.s32.f32 %v6580_v61 }
 0x807   :  { %11432 = vmatpush1.bf16.msra.mxu0 %v13666_v8  ;;  %v6644_v39 = vunpack.c.1.s8 %v16664_v53  ;;  %v6575_v9 = vunpack.c.2.s8 %v16683_v44  ;;  %v7681_v17 = vmul.f32 %v16157_v41, %v7157_v45  ;;  %v7154_v12 = vcvt.s32.f32 %v6642_v47 }
 0x808   :  { %v13633_v15 = vpack.c.bf16 %v7617_v48, %v7615_v0  ;;  %v7614_v26 = vmul.f32 %v16160_v32, %v7090_v60  ;;  %v7616_v46 = vmul.f32 %v16160_v32, %v7092_v3  ;;  %v6577_v16 = vunpack.c.3.s8 %v16683_v44 }
 0x809   :  { %v7156_v5 = vcvt.s32.f32 %v6644_v39  ;;  %v7087_v63 = vcvt.s32.f32 %v6575_v9  ;;  %v13665_v1 = vpack.c.bf16 %v7681_v17, %v7679_v2  ;;  %v7678_v53 = vmul.f32 %v16160_v32, %v7154_v12  ;;  %v16708_v2 = vld [vmem:[#allocation4 + $0x318] sm:$0xff] }
 0x80a   :  { %11392 = vmatprep.subr.bf16.mxu1 %v13633_v15  ;;  %v6639_v51 = vunpack.c.2.s8 %v6159_v38  ;;  %v6641_v54 = vunpack.c.3.s8 %v6159_v38  ;;  %v13632_v43 = vpack.c.bf16 %v7616_v46, %v7614_v26  ;;  %v7089_v30 = vcvt.s32.f32 %v6577_v16 }
 0x80b   :  { %v7680_v11 = vmul.f32 %v16160_v32, %v7156_v5  ;;  %v7611_v27 = vmul.f32 %v16157_v41, %v7087_v63  ;;  %11433 = vmatprep.subr.bf16.mxu0 %v13665_v1  ;;  %v6574_v31 = vunpack.c.2.s8 %v6142_v14  ;;  %v6576_v25 = vunpack.c.3.s8 %v6142_v14  ;;  %v6157_v63 = vld [vmem:[#allocation4 + $0x398] sm:$0xff] }
 0x80c   :  { %v7151_v57 = vcvt.s32.f32 %v6639_v51  ;;  %v7153_v19 = vcvt.s32.f32 %v6641_v54  ;;  %11393 = vmatpush1.bf16.msra.mxu1 %v13632_v43  ;;  %v7613_v21 = vmul.f32 %v16157_v41, %v7089_v30  ;;  %v6638_v13 = vunpack.c.2.s8 %v6158_v35 }
 0x80d   :  { %v13664_v56 = vpack.c.bf16 %v7680_v11, %v7678_v53  ;;  %v6640_v36 = vunpack.c.3.s8 %v6158_v35  ;;  %v7086_v4 = vcvt.s32.f32 %v6574_v31  ;;  %v7088_v37 = vcvt.s32.f32 %v6576_v25  ;;  %v6156_v25 = vld [vmem:[#allocation4 + $0x390] sm:$0xff] }
 0x80e   :  { %v7675_v18 = vmul.f32 %v16157_v41, %v7151_v57  ;;  %v7677_v34 = vmul.f32 %v16157_v41, %v7153_v19  ;;  %v13631_v58 = vpack.c.bf16 %v7613_v21, %v7611_v27  ;;  %v7150_v29 = vcvt.s32.f32 %v6638_v13  ;;  %v6140_v27 = vld [vmem:[#allocation4 + $0x310] sm:$0xff] }
 0x80f   :  { %11434 = vmatpush1.bf16.msra.mxu0 %v13664_v56  ;;  %v7152_v33 = vcvt.s32.f32 %v6640_v36  ;;  %v6571_v24 = vunpack.c.0.s8 %v16683_v44  ;;  %v7610_v59 = vmul.f32 %v16160_v32, %v7086_v4  ;;  %v7612_v10 = vmul.f32 %v16160_v32, %v7088_v37 }
 0x810   :  { %v13663_v20 = vpack.c.bf16 %v7677_v34, %v7675_v18  ;;  %v6573_v23 = vunpack.c.1.s8 %v16683_v44  ;;  %11394 = vmatprep.subr.bf16.mxu1 %v13631_v58  ;;  %v7674_v8 = vmul.f32 %v16160_v32, %v7150_v29  ;;  %v6635_v61 = vunpack.c.0.s8 %v6159_v38 }
 0x811   :  { %v7676_v0 = vmul.f32 %v16160_v32, %v7152_v33  ;;  %v7083_v49 = vcvt.s32.f32 %v6571_v24  ;;  %v13630_v48 = vpack.c.bf16 %v7612_v10, %v7610_v59  ;;  %v6637_v60 = vunpack.c.1.s8 %v6159_v38 }
 0x812   :  { %11435 = vmatprep.subr.bf16.mxu0 %v13663_v20  ;;  %v7085_v45 = vcvt.s32.f32 %v6573_v23  ;;  %v6570_v47 = vunpack.c.0.s8 %v6142_v14  ;;  %v7147_v9 = vcvt.s32.f32 %v6635_v61  ;;  %v6572_v15 = vunpack.c.1.s8 %v6142_v14 }
 0x813   :  { %v13662_v3 = vpack.c.bf16 %v7676_v0, %v7674_v8  ;;  %v7607_v39 = vmul.f32 %v16157_v41, %v7083_v49  ;;  %11395 = vmatpush1.bf16.msra.mxu1 %v13630_v48  ;;  %v7149_v17 = vcvt.s32.f32 %v6637_v60  ;;  %v6634_v12 = vunpack.c.0.s8 %v6158_v35 }
 0x814   :  { %v7609_v44 = vmul.f32 %v16157_v41, %v7085_v45  ;;  %v7082_v26 = vcvt.s32.f32 %v6570_v47  ;;  %v7671_v46 = vmul.f32 %v16157_v41, %v7147_v9  ;;  %v7084_v5 = vcvt.s32.f32 %v6572_v15 }
 0x815   :  { %11436 = vmatpush1.bf16.msra.mxu0 %v13662_v3  ;;  %v6636_v16 = vunpack.c.1.s8 %v6158_v35  ;;  %v6567_v38 = vunpack.c.2.s8 %v16708_v2  ;;  %v7673_v53 = vmul.f32 %v16157_v41, %v7149_v17  ;;  %v7146_v14 = vcvt.s32.f32 %v6634_v12 }
 0x816   :  { %v13629_v1 = vpack.c.bf16 %v7609_v44, %v7607_v39  ;;  %v7606_v51 = vmul.f32 %v16160_v32, %v7082_v26  ;;  %v7608_v54 = vmul.f32 %v16160_v32, %v7084_v5  ;;  %v6569_v11 = vunpack.c.3.s8 %v16708_v2 }
 0x817   :  { %v7148_v43 = vcvt.s32.f32 %v6636_v16  ;;  %v7079_v30 = vcvt.s32.f32 %v6567_v38  ;;  %v13661_v57 = vpack.c.bf16 %v7673_v53, %v7671_v46  ;;  %v7670_v35 = vmul.f32 %v16160_v32, %v7146_v14  ;;  %v16730_v46 = vld [vmem:[#allocation4 + $0x308] sm:$0xff] }
 0x818   :  { %11396 = vmatprep.subr.bf16.mxu1 %v13629_v1  ;;  %v6631_v19 = vunpack.c.2.s8 %v6157_v63  ;;  %v6633_v31 = vunpack.c.3.s8 %v6157_v63  ;;  %v13628_v56 = vpack.c.bf16 %v7608_v54, %v7606_v51  ;;  %v7081_v13 = vcvt.s32.f32 %v6569_v11 }
 0x819   :  { %v7672_v21 = vmul.f32 %v16160_v32, %v7148_v43  ;;  %v7603_v36 = vmul.f32 %v16157_v41, %v7079_v30  ;;  %11437 = vmatprep.subr.bf16.mxu0 %v13661_v57  ;;  %v6566_v4 = vunpack.c.2.s8 %v6140_v27  ;;  %v6568_v37 = vunpack.c.3.s8 %v6140_v27  ;;  %v6155_v30 = vld [vmem:[#allocation4 + $0x388] sm:$0xff] }
 0x81a   :  { %v7143_v18 = vcvt.s32.f32 %v6631_v19  ;;  %v7145_v34 = vcvt.s32.f32 %v6633_v31  ;;  %11397 = vmatpush1.bf16.msra.mxu1 %v13628_v56  ;;  %v7605_v29 = vmul.f32 %v16157_v41, %v7081_v13  ;;  %v6630_v33 = vunpack.c.2.s8 %v6156_v25 }
 0x81b   :  { %v13660_v58 = vpack.c.bf16 %v7672_v21, %v7670_v35  ;;  %v6632_v24 = vunpack.c.3.s8 %v6156_v25  ;;  %v7078_v10 = vcvt.s32.f32 %v6566_v4  ;;  %v7080_v23 = vcvt.s32.f32 %v6568_v37  ;;  %v6154_v37 = vld [vmem:[#allocation4 + $0x380] sm:$0xff] }
 0x81c   :  { %v7667_v20 = vmul.f32 %v16157_v41, %v7143_v18  ;;  %v7669_v59 = vmul.f32 %v16157_v41, %v7145_v34  ;;  %v13627_v8 = vpack.c.bf16 %v7605_v29, %v7603_v36  ;;  %v7142_v0 = vcvt.s32.f32 %v6630_v33  ;;  %v6138_v36 = vld [vmem:[#allocation4 + $0x300] sm:$0xff] }
 0x81d   :  { %11438 = vmatpush1.bf16.msra.mxu0 %v13660_v58  ;;  %v7144_v49 = vcvt.s32.f32 %v6632_v24  ;;  %v6563_v61 = vunpack.c.0.s8 %v16708_v2  ;;  %v7602_v45 = vmul.f32 %v16160_v32, %v7078_v10  ;;  %v7604_v60 = vmul.f32 %v16160_v32, %v7080_v23 }
 0x81e   :  { %v13659_v48 = vpack.c.bf16 %v7669_v59, %v7667_v20  ;;  %v6565_v47 = vunpack.c.1.s8 %v16708_v2  ;;  %11398 = vmatprep.subr.bf16.mxu1 %v13627_v8  ;;  %v7666_v3 = vmul.f32 %v16160_v32, %v7142_v0  ;;  %v6627_v15 = vunpack.c.0.s8 %v6157_v63 }
 0x81f   :  { %v7668_v39 = vmul.f32 %v16160_v32, %v7144_v49  ;;  %v7075_v9 = vcvt.s32.f32 %v6563_v61  ;;  %v13626_v44 = vpack.c.bf16 %v7604_v60, %v7602_v45  ;;  %v6629_v26 = vunpack.c.1.s8 %v6157_v63 }
 0x820   :  { %11439 = vmatprep.subr.bf16.mxu0 %v13659_v48  ;;  %v7077_v17 = vcvt.s32.f32 %v6565_v47  ;;  %v6562_v12 = vunpack.c.0.s8 %v6140_v27  ;;  %v7139_v38 = vcvt.s32.f32 %v6627_v15  ;;  %v6564_v1 = vunpack.c.1.s8 %v6140_v27 }
 0x821   :  { %v13658_v5 = vpack.c.bf16 %v7668_v39, %v7666_v3  ;;  %v7599_v16 = vmul.f32 %v16157_v41, %v7075_v9  ;;  %11399 = vmatpush1.bf16.msra.mxu1 %v13626_v44  ;;  %v7141_v53 = vcvt.s32.f32 %v6629_v26  ;;  %v6626_v14 = vunpack.c.0.s8 %v6156_v25 }
 0x822   :  { %v7601_v2 = vmul.f32 %v16157_v41, %v7077_v17  ;;  %v7074_v51 = vcvt.s32.f32 %v6562_v12  ;;  %v7663_v54 = vmul.f32 %v16157_v41, %v7139_v38  ;;  %v7076_v43 = vcvt.s32.f32 %v6564_v1 }
 0x823   :  { %11440 = vmatpush1.bf16.msra.mxu0 %v13658_v5  ;;  %v6628_v11 = vunpack.c.1.s8 %v6156_v25  ;;  %v6559_v63 = vunpack.c.2.s8 %v16730_v46  ;;  %v7665_v35 = vmul.f32 %v16157_v41, %v7141_v53  ;;  %v7138_v27 = vcvt.s32.f32 %v6626_v14 }
 0x824   :  { %v13625_v57 = vpack.c.bf16 %v7601_v2, %v7599_v16  ;;  %v7598_v19 = vmul.f32 %v16160_v32, %v7074_v51  ;;  %v7600_v31 = vmul.f32 %v16160_v32, %v7076_v43  ;;  %v6561_v21 = vunpack.c.3.s8 %v16730_v46 }
 0x825   :  { %v7140_v56 = vcvt.s32.f32 %v6628_v11  ;;  %v7071_v13 = vcvt.s32.f32 %v6559_v63  ;;  %v13657_v18 = vpack.c.bf16 %v7665_v35, %v7663_v54  ;;  %v7662_v25 = vmul.f32 %v16160_v32, %v7138_v27  ;;  %v16752_v54 = vld [vmem:[#allocation4 + $0x378] sm:$0xff] }
 0x826   :  { %11400 = vmatprep.subr.bf16.mxu1 %v13625_v57  ;;  %v6623_v34 = vunpack.c.2.s8 %v6155_v30  ;;  %v6625_v4 = vunpack.c.3.s8 %v6155_v30  ;;  %v13624_v58 = vpack.c.bf16 %v7600_v31, %v7598_v19  ;;  %v7073_v33 = vcvt.s32.f32 %v6561_v21 }
 0x827   :  { %v7664_v29 = vmul.f32 %v16160_v32, %v7140_v56  ;;  %v7595_v24 = vmul.f32 %v16157_v41, %v7071_v13  ;;  %11441 = vmatprep.subr.bf16.mxu0 %v13657_v18  ;;  %v6558_v10 = vunpack.c.2.s8 %v6138_v36  ;;  %v6560_v23 = vunpack.c.3.s8 %v6138_v36  ;;  %v6169_v13 = vld [vmem:[#allocation4 + $0x3f8] sm:$0xff] }
 0x828   :  { %v7135_v20 = vcvt.s32.f32 %v6623_v34  ;;  %v7137_v59 = vcvt.s32.f32 %v6625_v4  ;;  %11401 = vmatpush1.bf16.msra.mxu1 %v13624_v58  ;;  %v7597_v0 = vmul.f32 %v16157_v41, %v7073_v33  ;;  %v6622_v49 = vunpack.c.2.s8 %v6154_v37 }
 0x829   :  { %v13656_v8 = vpack.c.bf16 %v7664_v29, %v7662_v25  ;;  %v6624_v61 = vunpack.c.3.s8 %v6154_v37  ;;  %v7070_v60 = vcvt.s32.f32 %v6558_v10  ;;  %v7072_v47 = vcvt.s32.f32 %v6560_v23  ;;  %v6168_v23 = vld [vmem:[#allocation4 + $0x3f0] sm:$0xff] }
 0x82a   :  { %v7659_v48 = vmul.f32 %v16157_v41, %v7135_v20  ;;  %v7661_v45 = vmul.f32 %v16157_v41, %v7137_v59  ;;  %v13623_v3 = vpack.c.bf16 %v7597_v0, %v7595_v24  ;;  %v7134_v39 = vcvt.s32.f32 %v6622_v49  ;;  %v6152_v24 = vld [vmem:[#allocation4 + $0x370] sm:$0xff] }
 0x82b   :  { %11442 = vmatpush1.bf16.msra.mxu0 %v13656_v8  ;;  %v7136_v9 = vcvt.s32.f32 %v6624_v61  ;;  %v6555_v15 = vunpack.c.0.s8 %v16730_v46  ;;  %v7594_v17 = vmul.f32 %v16160_v32, %v7070_v60  ;;  %v7596_v26 = vmul.f32 %v16160_v32, %v7072_v47 }
 0x82c   :  { %v13655_v44 = vpack.c.bf16 %v7661_v45, %v7659_v48  ;;  %v6557_v12 = vunpack.c.1.s8 %v16730_v46  ;;  %11402 = vmatprep.subr.bf16.mxu1 %v13623_v3  ;;  %v7658_v5 = vmul.f32 %v16160_v32, %v7134_v39  ;;  %v6619_v1 = vunpack.c.0.s8 %v6155_v30 }
 0x82d   :  { %v7660_v16 = vmul.f32 %v16160_v32, %v7136_v9  ;;  %v7067_v38 = vcvt.s32.f32 %v6555_v15  ;;  %v13622_v2 = vpack.c.bf16 %v7596_v26, %v7594_v17  ;;  %v6621_v51 = vunpack.c.1.s8 %v6155_v30 }
 0x82e   :  { %11443 = vmatprep.subr.bf16.mxu0 %v13655_v44  ;;  %v7069_v53 = vcvt.s32.f32 %v6557_v12  ;;  %v6554_v14 = vunpack.c.0.s8 %v6138_v36  ;;  %v7131_v63 = vcvt.s32.f32 %v6619_v1  ;;  %v6556_v57 = vunpack.c.1.s8 %v6138_v36 }
 0x82f   :  { %v13654_v43 = vpack.c.bf16 %v7660_v16, %v7658_v5  ;;  %v7591_v11 = vmul.f32 %v16157_v41, %v7067_v38  ;;  %11403 = vmatpush1.bf16.msra.mxu1 %v13622_v2  ;;  %v7133_v35 = vcvt.s32.f32 %v6621_v51  ;;  %v6618_v27 = vunpack.c.0.s8 %v6154_v37 }
 0x830   :  { %v7593_v46 = vmul.f32 %v16157_v41, %v7069_v53  ;;  %v7066_v19 = vcvt.s32.f32 %v6554_v14  ;;  %v7655_v31 = vmul.f32 %v16157_v41, %v7131_v63  ;;  %v7068_v56 = vcvt.s32.f32 %v6556_v57 }
 0x831   :  { %11444 = vmatpush1.bf16.msra.mxu0 %v13654_v43  ;;  %v6620_v21 = vunpack.c.1.s8 %v6154_v37  ;;  %v6615_v30 = vunpack.c.2.s8 %v16752_v54  ;;  %v7657_v25 = vmul.f32 %v16157_v41, %v7133_v35  ;;  %v7130_v36 = vcvt.s32.f32 %v6618_v27 }
 0x832   :  { %v13621_v18 = vpack.c.bf16 %v7593_v46, %v7591_v11  ;;  %v7590_v34 = vmul.f32 %v16160_v32, %v7066_v19  ;;  %v7592_v4 = vmul.f32 %v16160_v32, %v7068_v56  ;;  %v6617_v29 = vunpack.c.3.s8 %v16752_v54 }
 0x833   :  { %v7132_v58 = vcvt.s32.f32 %v6620_v21  ;;  %v7127_v33 = vcvt.s32.f32 %v6615_v30  ;;  %v13653_v20 = vpack.c.bf16 %v7657_v25, %v7655_v31  ;;  %v7654_v37 = vmul.f32 %v16160_v32, %v7130_v36  ;;  %v16774_v31 = vld [vmem:[#allocation4 + $0x368] sm:$0xff] }
 0x834   :  { %11404 = vmatprep.subr.bf16.mxu1 %v13621_v18  ;;  %v6679_v59 = vunpack.c.2.s8 %v6169_v13  ;;  %v6681_v10 = vunpack.c.3.s8 %v6169_v13  ;;  %v13620_v8 = vpack.c.bf16 %v7592_v4, %v7590_v34  ;;  %v7129_v49 = vcvt.s32.f32 %v6617_v29 }
 0x835   :  { %v7656_v0 = vmul.f32 %v16160_v32, %v7132_v58  ;;  %v7651_v61 = vmul.f32 %v16157_v41, %v7127_v33  ;;  %11445 = vmatprep.subr.bf16.mxu0 %v13653_v20  ;;  %v6614_v60 = vunpack.c.2.s8 %v6152_v24  ;;  %v6616_v47 = vunpack.c.3.s8 %v6152_v24  ;;  %v6167_v33 = vld [vmem:[#allocation4 + $0x3e8] sm:$0xff] }
 0x836   :  { %v7191_v48 = vcvt.s32.f32 %v6679_v59  ;;  %v7193_v45 = vcvt.s32.f32 %v6681_v10  ;;  %11405 = vmatpush1.bf16.msra.mxu1 %v13620_v8  ;;  %v7653_v39 = vmul.f32 %v16157_v41, %v7129_v49  ;;  %v6678_v9 = vunpack.c.2.s8 %v6168_v23 }
 0x837   :  { %v13652_v3 = vpack.c.bf16 %v7656_v0, %v7654_v37  ;;  %v6680_v15 = vunpack.c.3.s8 %v6168_v23  ;;  %v7126_v26 = vcvt.s32.f32 %v6614_v60  ;;  %v7128_v12 = vcvt.s32.f32 %v6616_v47  ;;  %v6166_v47 = vld [vmem:[#allocation4 + $0x3e0] sm:$0xff] }
 0x838   :  { %v7715_v44 = vmul.f32 %v16157_v41, %v7191_v48  ;;  %v7717_v17 = vmul.f32 %v16157_v41, %v7193_v45  ;;  %v13651_v5 = vpack.c.bf16 %v7653_v39, %v7651_v61  ;;  %v7190_v16 = vcvt.s32.f32 %v6678_v9  ;;  %v6150_v61 = vld [vmem:[#allocation4 + $0x360] sm:$0xff] }
 0x839   :  { %11446 = vmatpush1.bf16.msra.mxu0 %v13652_v3  ;;  %v7192_v38 = vcvt.s32.f32 %v6680_v15  ;;  %v6611_v1 = vunpack.c.0.s8 %v16752_v54  ;;  %v7650_v53 = vmul.f32 %v16160_v32, %v7126_v26  ;;  %v7652_v51 = vmul.f32 %v16160_v32, %v7128_v12 }
 0x83a   :  { %v13683_v2 = vpack.c.bf16 %v7717_v17, %v7715_v44  ;;  %v6613_v14 = vunpack.c.1.s8 %v16752_v54  ;;  %11406 = vmatprep.subr.bf16.mxu1 %v13651_v5  ;;  %v7714_v43 = vmul.f32 %v16160_v32, %v7190_v16  ;;  %v6675_v57 = vunpack.c.0.s8 %v6169_v13 }
 0x83b   :  { %v7716_v11 = vmul.f32 %v16160_v32, %v7192_v38  ;;  %v7123_v63 = vcvt.s32.f32 %v6611_v1  ;;  %v13650_v46 = vpack.c.bf16 %v7652_v51, %v7650_v53  ;;  %v6677_v19 = vunpack.c.1.s8 %v6169_v13 }
 0x83c   :  { %11447 = vmatprep.subr.bf16.mxu0 %v13683_v2  ;;  %v7125_v35 = vcvt.s32.f32 %v6613_v14  ;;  %v6610_v27 = vunpack.c.0.s8 %v6152_v24  ;;  %v7187_v30 = vcvt.s32.f32 %v6675_v57  ;;  %v6612_v18 = vunpack.c.1.s8 %v6152_v24 }
 0x83d   :  { %v13682_v56 = vpack.c.bf16 %v7716_v11, %v7714_v43  ;;  %v7647_v21 = vmul.f32 %v16157_v41, %v7123_v63  ;;  %11407 = vmatpush2.bf16.msra.mxu1 %v13650_v46  ;;  %v7189_v25 = vcvt.s32.f32 %v6677_v19  ;;  %v6674_v36 = vunpack.c.0.s8 %v6168_v23 }
 0x83e   :  { %v7649_v54 = vmul.f32 %v16157_v41, %v7125_v35  ;;  %v7122_v34 = vcvt.s32.f32 %v6610_v27  ;;  %v7711_v4 = vmul.f32 %v16157_v41, %v7187_v30  ;;  %v7124_v58 = vcvt.s32.f32 %v6612_v18 }
 0x83f   :  { %11448 = vmatpush2.bf16.msra.mxu0 %v13682_v56  ;;  %v6676_v29 = vunpack.c.1.s8 %v6168_v23  ;;  %v6607_v13 = vunpack.c.2.s8 %v16774_v31  ;;  %v7713_v37 = vmul.f32 %v16157_v41, %v7189_v25  ;;  %v7186_v24 = vcvt.s32.f32 %v6674_v36 }
 0x840   :  { %v13649_v20 = vpack.c.bf16 %v7649_v54, %v7647_v21  ;;  %v7646_v59 = vmul.f32 %v16160_v32, %v7122_v34  ;;  %v7648_v10 = vmul.f32 %v16160_v32, %v7124_v58  ;;  %v6609_v0 = vunpack.c.3.s8 %v16774_v31 }
 0x841   :  { %v7188_v8 = vcvt.s32.f32 %v6676_v29  ;;  %v7119_v49 = vcvt.s32.f32 %v6607_v13  ;;  %v13681_v48 = vpack.c.bf16 %v7713_v37, %v7711_v4  ;;  %v7710_v23 = vmul.f32 %v16160_v32, %v7186_v24  ;;  %v16796_v4 = vld [vmem:[#allocation4 + $0x358] sm:$0xff] }
 0x842   :  { %11408 = vmatprep.subr.bf16.mxu1 %v13649_v20  ;;  %v6671_v45 = vunpack.c.2.s8 %v6167_v33  ;;  %v6673_v60 = vunpack.c.3.s8 %v6167_v33  ;;  %v13648_v3 = vpack.c.bf16 %v7648_v10, %v7646_v59  ;;  %v7121_v9 = vcvt.s32.f32 %v6609_v0 }
 0x843   :  { %v7712_v39 = vmul.f32 %v16160_v32, %v7188_v8  ;;  %v7643_v15 = vmul.f32 %v16157_v41, %v7119_v49  ;;  %11449 = vmatprep.subr.bf16.mxu0 %v13681_v48  ;;  %v6606_v26 = vunpack.c.2.s8 %v6150_v61  ;;  %v6608_v12 = vunpack.c.3.s8 %v6150_v61  ;;  %v16802_v49 = vld [vmem:[#allocation4 + $0x3d8] sm:$0xff] }
 0x844   :  { %v7183_v44 = vcvt.s32.f32 %v6671_v45  ;;  %v7185_v17 = vcvt.s32.f32 %v6673_v60  ;;  %11409 = vmatpush2.bf16.msra.mxu1 %v13648_v3  ;;  %v7645_v16 = vmul.f32 %v16157_v41, %v7121_v9  ;;  %v6670_v38 = vunpack.c.2.s8 %v6166_v47 }
 0x845   :  { %v13680_v5 = vpack.c.bf16 %v7712_v39, %v7710_v23  ;;  %v6672_v1 = vunpack.c.3.s8 %v6166_v47  ;;  %v7118_v51 = vcvt.s32.f32 %v6606_v26  ;;  %v7120_v14 = vcvt.s32.f32 %v6608_v12 }
 0x846   :  { %v7707_v2 = vmul.f32 %v16157_v41, %v7183_v44  ;;  %v7709_v53 = vmul.f32 %v16157_v41, %v7185_v17  ;;  %v13647_v43 = vpack.c.bf16 %v7645_v16, %v7643_v15  ;;  %v7182_v11 = vcvt.s32.f32 %v6670_v38  ;;  %v16810_v44 = vld [vmem:[#allocation4 + $0x350] sm:$0xff] }
 0x847   :  { %11450 = vmatpush2.bf16.msra.mxu0 %v13680_v5  ;;  %v7184_v63 = vcvt.s32.f32 %v6672_v1  ;;  %v6603_v57 = vunpack.c.0.s8 %v16774_v31  ;;  %v7642_v35 = vmul.f32 %v16160_v32, %v7118_v51  ;;  %v7644_v19 = vmul.f32 %v16160_v32, %v7120_v14  ;;  %v16815_v5 = vld [vmem:[#allocation4 + $0x3d0] sm:$0xff] }
 0x848   :  { %v13679_v46 = vpack.c.bf16 %v7709_v53, %v7707_v2  ;;  %v6605_v27 = vunpack.c.1.s8 %v16774_v31  ;;  %11410 = vmatprep.subr.bf16.mxu1 %v13647_v43  ;;  %v7706_v56 = vmul.f32 %v16160_v32, %v7182_v11  ;;  %v6667_v18 = vunpack.c.0.s8 %v6167_v33 }
 0x849   :  { %v7708_v21 = vmul.f32 %v16160_v32, %v7184_v63  ;;  %v7115_v30 = vcvt.s32.f32 %v6603_v57  ;;  %v13646_v54 = vpack.c.bf16 %v7644_v19, %v7642_v35  ;;  %v6669_v34 = vunpack.c.1.s8 %v6167_v33 }
 0x84a   :  { %11451 = vmatprep.subr.bf16.mxu0 %v13679_v46  ;;  %v7117_v25 = vcvt.s32.f32 %v6605_v27  ;;  %v6602_v36 = vunpack.c.0.s8 %v6150_v61  ;;  %v7179_v13 = vcvt.s32.f32 %v6667_v18  ;;  %v6604_v20 = vunpack.c.1.s8 %v6150_v61 }
 0x84b   :  { %v13678_v58 = vpack.c.bf16 %v7708_v21, %v7706_v56  ;;  %v7639_v29 = vmul.f32 %v16157_v41, %v7115_v30  ;;  %11411 = vmatpush2.bf16.msra.mxu1 %v13646_v54  ;;  %v7181_v37 = vcvt.s32.f32 %v6669_v34  ;;  %v6666_v24 = vunpack.c.0.s8 %v6166_v47 }
 0x84c   :  { %v7641_v31 = vmul.f32 %v16157_v41, %v7117_v25  ;;  %v7114_v59 = vcvt.s32.f32 %v6602_v36  ;;  %v7703_v10 = vmul.f32 %v16157_v41, %v7179_v13  ;;  %v7116_v8 = vcvt.s32.f32 %v6604_v20 }
 0x84d   :  { %11452 = vmatpush2.bf16.msra.mxu0 %v13678_v58  ;;  %v6668_v0 = vunpack.c.1.s8 %v6166_v47  ;;  %v6599_v33 = vunpack.c.2.s8 %v16796_v4  ;;  %v7705_v23 = vmul.f32 %v16157_v41, %v7181_v37  ;;  %v7178_v45 = vcvt.s32.f32 %v6666_v24  ;;  %v16806_v60 = vpop.f32.mrf.mxu1 }
 0x84e   :  { %v13645_v48 = vpack.c.bf16 %v7641_v31, %v7639_v29  ;;  %v7638_v61 = vmul.f32 %v16160_v32, %v7114_v59  ;;  %v7640_v3 = vmul.f32 %v16160_v32, %v7116_v8  ;;  %v6601_v9 = vunpack.c.3.s8 %v16796_v4 }
 0x84f   :  { %v7180_v39 = vcvt.s32.f32 %v6668_v0  ;;  %v7111_v15 = vcvt.s32.f32 %v6599_v33  ;;  %v13677_v47 = vpack.c.bf16 %v7705_v23, %v7703_v10  ;;  %v7702_v17 = vmul.f32 %v16160_v32, %v7178_v45  ;;  %v16819_v38 = vpop.f32.mrf.mxu1 }
 0x850   :  { %11412 = vmatprep.subr.bf16.mxu1 %v13645_v48  ;;  %v6663_v26 = vunpack.c.2.s8 %v16802_v49  ;;  %v6665_v12 = vunpack.c.3.s8 %v16802_v49  ;;  %v16817_v16 = vpop.f32.mrf.mxu0  ;;  %v13644_v1 = vpack.c.bf16 %v7640_v3, %v7638_v61  ;;  %v7113_v53 = vcvt.s32.f32 %v6601_v9  ;;  %v16841_v3 = vld [vmem:[#allocation4 + $0x348] sm:$0xff] }
 0x851   :  { %v7704_v2 = vmul.f32 %v16160_v32, %v7180_v39  ;;  %v7635_v51 = vmul.f32 %v16157_v41, %v7111_v15  ;;  %11453 = vmatprep.subr.bf16.mxu0 %v13677_v47  ;;  %v6598_v11 = vunpack.c.2.s8 %v16810_v44  ;;  %v6600_v63 = vunpack.c.3.s8 %v16810_v44  ;;  %v11264_v46 = vpop.f32.mrf.mxu1 }
 0x852   :  { %v7175_v14 = vcvt.s32.f32 %v6663_v26  ;;  %v7177_v43 = vcvt.s32.f32 %v6665_v12  ;;  %v16825_v57 = vpop.f32.mrf.mxu0  ;;  %11413 = vmatpush2.bf16.msra.mxu1 %v13644_v1  ;;  %v7637_v19 = vmul.f32 %v16157_v41, %v7113_v53  ;;  %v6662_v27 = vunpack.c.2.s8 %v16815_v5 }
 0x853   :  { %v13676_v35 = vpack.c.bf16 %v7704_v2, %v7702_v17  ;;  %v6664_v56 = vunpack.c.3.s8 %v16815_v5  ;;  %v7110_v18 = vcvt.s32.f32 %v6598_v11  ;;  %v7112_v54 = vcvt.s32.f32 %v6600_v63  ;;  %v11265_v34 = vpop.f32.mrf.mxu1 }
 0x854   :  { %v7699_v21 = vmul.f32 %v16157_v41, %v7175_v14  ;;  %v7701_v30 = vmul.f32 %v16157_v41, %v7177_v43  ;;  %v11305_v25 = vpop.f32.mrf.mxu0  ;;  %v13643_v36 = vpack.c.bf16 %v7637_v19, %v7635_v51  ;;  %v7174_v58 = vcvt.s32.f32 %v6662_v27  ;;  %v6163_v51 = vld [vmem:[#allocation4 + $0x3c8] sm:$0xff]  ;;  %v6146_v27 = vld [vmem:[#allocation4 + $0x340] sm:$0xff] }
 0x855   :  { %11454 = vmatpush2.bf16.msra.mxu0 %v13676_v35  ;;  %v7176_v29 = vcvt.s32.f32 %v6664_v56  ;;  %v6595_v13 = vunpack.c.0.s8 %v16796_v4  ;;  %v7634_v31 = vmul.f32 %v16160_v32, %v7110_v18  ;;  %v7636_v37 = vmul.f32 %v16160_v32, %v7112_v54  ;;  %v6162_v18 = vld [vmem:[#allocation4 + $0x3c0] sm:$0xff] }
 0x856   :  { %v13675_v20 = vpack.c.bf16 %v7701_v30, %v7699_v21  ;;  %v6597_v59 = vunpack.c.1.s8 %v16796_v4  ;;  %v11306_v24 = vpop.f32.mrf.mxu0  ;;  %11414 = vmatprep.subr.bf16.mxu1 %v13643_v36  ;;  %v7698_v10 = vmul.f32 %v16160_v32, %v7174_v58  ;;  %v6659_v33 = vunpack.c.0.s8 %v16802_v49 }
 0x857   :  { %v7700_v8 = vmul.f32 %v16160_v32, %v7176_v29  ;;  %v7107_v0 = vcvt.s32.f32 %v6595_v13  ;;  %v13642_v48 = vpack.c.bf16 %v7636_v37, %v7634_v31  ;;  %v6661_v61 = vunpack.c.1.s8 %v16802_v49 }
 0x858   :  { %11455 = vmatprep.subr.bf16.mxu0 %v13675_v20  ;;  %v7109_v23 = vcvt.s32.f32 %v6597_v59  ;;  %v6594_v45 = vunpack.c.0.s8 %v16810_v44  ;;  %v7171_v9 = vcvt.s32.f32 %v6659_v33  ;;  %v6596_v15 = vunpack.c.1.s8 %v16810_v44 }
 0x859   :  { %v13674_v39 = vpack.c.bf16 %v7700_v8, %v7698_v10  ;;  %v7631_v4 = vmul.f32 %v16157_v41, %v7107_v0  ;;  %11415 = vmatpush2.bf16.msra.mxu1 %v13642_v48  ;;  %v7173_v17 = vcvt.s32.f32 %v6661_v61  ;;  %v6658_v12 = vunpack.c.0.s8 %v16815_v5 }
 0x85a   :  { %v7633_v47 = vmul.f32 %v16157_v41, %v7109_v23  ;;  %v7106_v26 = vcvt.s32.f32 %v6594_v45  ;;  %v7695_v49 = vmul.f32 %v16157_v41, %v7171_v9  ;;  %v7108_v1 = vcvt.s32.f32 %v6596_v15 }
 0x85b   :  { %11456 = vmatpush2.bf16.msra.mxu0 %v13674_v39  ;;  %v6660_v2 = vunpack.c.1.s8 %v16815_v5  ;;  %v6591_v53 = vunpack.c.2.s8 %v16841_v3  ;;  %v7697_v43 = vmul.f32 %v16157_v41, %v7173_v17  ;;  %v7170_v11 = vcvt.s32.f32 %v6658_v12 }
 0x85c   :  { %v13641_v14 = vpack.c.bf16 %v7633_v47, %v7631_v4  ;;  %v7630_v44 = vmul.f32 %v16160_v32, %v7106_v26  ;;  %v7632_v63 = vmul.f32 %v16160_v32, %v7108_v1  ;;  %v6593_v35 = vunpack.c.3.s8 %v16841_v3 }
 0x85d   :  { %v7172_v46 = vcvt.s32.f32 %v6660_v2  ;;  %v7103_v19 = vcvt.s32.f32 %v6591_v53  ;;  %v13673_v56 = vpack.c.bf16 %v7697_v43, %v7695_v49  ;;  %v7694_v5 = vmul.f32 %v16160_v32, %v7170_v11 }
 0x85e   :  { %11416 = vmatprep.subr.bf16.mxu1 %v13641_v14  ;;  %v6655_v21 = vunpack.c.2.s8 %v6163_v51  ;;  %v6657_v30 = vunpack.c.3.s8 %v6163_v51  ;;  %v13640_v54 = vpack.c.bf16 %v7632_v63, %v7630_v44  ;;  %v7105_v34 = vcvt.s32.f32 %v6593_v35 }
 0x85f   :  { %v7696_v25 = vmul.f32 %v16160_v32, %v7172_v46  ;;  %v7627_v36 = vmul.f32 %v16157_v41, %v7103_v19  ;;  %11457 = vmatprep.subr.bf16.mxu0 %v13673_v56  ;;  %v6590_v13 = vunpack.c.2.s8 %v6146_v27  ;;  %v6592_v20 = vunpack.c.3.s8 %v6146_v27 }
 0x860   :  { %v7167_v58 = vcvt.s32.f32 %v6655_v21  ;;  %v7169_v29 = vcvt.s32.f32 %v6657_v30  ;;  %11417 = vmatpush2.bf16.msra.mxu1 %v13640_v54  ;;  %v7629_v37 = vmul.f32 %v16157_v41, %v7105_v34  ;;  %v6654_v59 = vunpack.c.2.s8 %v6162_v18 }
 0x861   :  { %v13672_v31 = vpack.c.bf16 %v7696_v25, %v7694_v5  ;;  %v6656_v24 = vunpack.c.3.s8 %v6162_v18  ;;  %v7102_v0 = vcvt.s32.f32 %v6590_v13  ;;  %v7104_v33 = vcvt.s32.f32 %v6592_v20  ;;  %v17460_v13 = vld [vmem:[#allocation32_spill] sm:$0xff] }
 0x862   :  { %v7691_v10 = vmul.f32 %v16157_v41, %v7167_v58  ;;  %v7693_v8 = vmul.f32 %v16157_v41, %v7169_v29  ;;  %v13639_v48 = vpack.c.bf16 %v7629_v37, %v7627_v36  ;;  %v7166_v23 = vcvt.s32.f32 %v6654_v59 }
 0x863   :  { %11458 = vmatpush2.bf16.msra.mxu0 %v13672_v31  ;;  %v7168_v61 = vcvt.s32.f32 %v6656_v24  ;;  %v6587_v45 = vunpack.c.0.s8 %v16841_v3  ;;  %v7626_v4 = vmul.f32 %v16160_v32, %v7102_v0  ;;  %v7628_v9 = vmul.f32 %v16160_v32, %v7104_v33  ;;  %v11526_v24 = vld [vmem:[#allocation15 + $0xf8] sm:$0xff] }
 0x864   :  { %v13671_v39 = vpack.c.bf16 %v7693_v8, %v7691_v10  ;;  %v6589_v15 = vunpack.c.1.s8 %v16841_v3  ;;  %11418 = vmatprep.subr.bf16.mxu1 %v13639_v48  ;;  %v7690_v47 = vmul.f32 %v16160_v32, %v7166_v23  ;;  %v6651_v12 = vunpack.c.0.s8 %v6163_v51  ;;  %v17461_v8 = vld [vmem:[#allocation33_spill] sm:$0xff]  ;;  %v11510_v48 = vld [vmem:[#allocation15 + $0x78] sm:$0xff]  ;;  %v11509_v23 = vld [vmem:[#allocation15 + $0x70] sm:$0xff] }
 0x865   :  { %v7692_v17 = vmul.f32 %v16160_v32, %v7168_v61  ;;  %v7099_v26 = vcvt.s32.f32 %v6587_v45  ;;  %v13638_v49 = vpack.c.bf16 %v7628_v9, %v7626_v4  ;;  %v6653_v2 = vunpack.c.1.s8 %v6163_v51  ;;  %v11507_v45 = vld [vmem:[#allocation15 + $0x60] sm:$0xff]  ;;  %v11521_v4 = vld [vmem:[#allocation15 + $0xd0] sm:$0xff]  ;;  %v11520_v9 = vld [vmem:[#allocation15 + $0xc8] sm:$0xff] }
 0x866   :  { %11459 = vmatprep.subr.bf16.mxu0 %v13671_v39  ;;  %v7101_v1 = vcvt.s32.f32 %v6589_v15  ;;  %v6586_v53 = vunpack.c.0.s8 %v6146_v27  ;;  %v7163_v44 = vcvt.s32.f32 %v6651_v12  ;;  %v6588_v11 = vunpack.c.1.s8 %v6146_v27  ;;  %v11522_v39 = vld [vmem:[#allocation15 + $0xd8] sm:$0xff]  ;;  %v11504_v15 = vld [vmem:[#allocation15 + $0x48] sm:$0xff]  ;;  %v11517_v12 = vld [vmem:[#allocation15 + $0xb0] sm:$0xff] }
 0x867   :  { %v13670_v14 = vpack.c.bf16 %v7692_v17, %v7690_v47  ;;  %v7623_v43 = vmul.f32 %v16157_v41, %v7099_v26  ;;  %11419 = vmatpush2.bf16.msra.mxu1 %v13638_v49  ;;  %v7165_v63 = vcvt.s32.f32 %v6653_v2  ;;  %v6650_v35 = vunpack.c.0.s8 %v6162_v18  ;;  %v11503_v47 = vld [vmem:[#allocation15 + $0x40] sm:$0xff]  ;;  %v11518_v17 = vld [vmem:[#allocation15 + $0xb8] sm:$0xff]  ;;  %v11501_v49 = vld [vmem:[#allocation15 + $0x30] sm:$0xff] }
 0x868   :  { %v7625_v3 = vmul.f32 %v16157_v41, %v7101_v1  ;;  %v7098_v46 = vcvt.s32.f32 %v6586_v53  ;;  %v7687_v19 = vmul.f32 %v16157_v41, %v7163_v44  ;;  %v7100_v56 = vcvt.s32.f32 %v6588_v11  ;;  %v11502_v26 = vld [vmem:[#allocation15 + $0x38] sm:$0xff]  ;;  %v11516_v1 = vld [vmem:[#allocation15 + $0xa8] sm:$0xff]  ;;  %v11515_v53 = vld [vmem:[#allocation15 + $0xa0] sm:$0xff] }
 0x869   :  { %11460 = vmatpush2.bf16.msra.mxu0 %v13670_v14  ;;  %v6652_v5 = vunpack.c.1.s8 %v6162_v18  ;;  %v9567_v51 = vrot.slane %v16135_v50, %v17456_v6  ;;  %v7689_v30 = vmul.f32 %v16157_v41, %v7165_v63  ;;  %v7162_v27 = vcvt.s32.f32 %v6650_v35  ;;  %v11500_v2 = vld [vmem:[#allocation15 + $0x28] sm:$0xff]  ;;  %v11499_v14 = vld [vmem:[#allocation15 + $0x20] sm:$0xff]  ;;  %v11498_v44 = vld [vmem:[#allocation15 + $0x18] sm:$0xff] }
 0x86a   :  { %v13637_v21 = vpack.c.bf16 %v7625_v3, %v7623_v43  ;;  %v7622_v54 = vmul.f32 %v16160_v32, %v7098_v46  ;;  %v7624_v25 = vmul.f32 %v16160_v32, %v7100_v56  ;;  %v9575_v58 = vrot.slane %v16135_v50, %v17457_v40  ;;  %v11514_v43 = vld [vmem:[#allocation15 + $0x98] sm:$0xff]  ;;  %v11513_v11 = vld [vmem:[#allocation15 + $0x90] sm:$0xff]  ;;  %v11512_v63 = vld [vmem:[#allocation15 + $0x88] sm:$0xff] }
 0x86b   :  { %v7164_v34 = vcvt.s32.f32 %v6652_v5  ;;  %v9605_v36 = vpack.c.bf16 %v9567_v51, %v9567_v51  ;;  %v13669_v29 = vpack.c.bf16 %v7689_v30, %v7687_v19  ;;  %v7686_v18 = vmul.f32 %v16160_v32, %v7162_v27  ;;  %v11497_v3 = vld [vmem:[#allocation15 + $0x10] sm:$0xff]  ;;  %v11496_v46 = vld [vmem:[#allocation15 + $0x8] sm:$0xff]  ;;  %v11511_v35 = vld [vmem:[#allocation15 + $0x80] sm:$0xff] }
 0x86c   :  { %11420 = vmatprep.subr.bf16.mxu1 %v13637_v21  ;;  %v11179_v6 = vadd.f32 %v16627_v7, %v17460_v13  ;;  %v9563_v41 = vrot.slane %v16135_v50, %v17458_v55  ;;  %v13636_v20 = vpack.c.bf16 %v7624_v25, %v7622_v54  ;;  %v9607_v37 = vpack.c.bf16 %v9575_v58, %v9575_v58  ;;  %v11495_v19 = vld [vmem:[#allocation15] sm:$0xff] }
 0x86d   :  { %v7688_v31 = vmul.f32 %v16160_v32, %v7164_v34  ;;  %11422 = vmatprep.mubr.bf16.mxu1 %v9605_v36  ;;  %v9571_v59 = vrot.slane %v16135_v50, %v17459_v42  ;;  %11461 = vmatprep.subr.bf16.mxu0 %v13669_v29  ;;  %v11181_v0 = vadd.f32 %v16638_v22, %v17461_v8  ;;  %v11525_v50 = vld [vmem:[#allocation15 + $0xf0] sm:$0xff]  ;;  %v11524_v22 = vld [vmem:[#allocation15 + $0xe8] sm:$0xff] }
 0x86e   :  { %v11220_v40 = vadd.f32 %v16629_v52, %v11179_v6  ;;  %v9604_v10 = vpack.c.bf16 %v9563_v41, %v9563_v41  ;;  %11421 = vmatpush2.bf16.msra.mxu1 %v13636_v20  ;;  %11463 = vmatprep.mubr.bf16.mxu0 %v9607_v37 }
 0x86f   :  { %v13668_v7 = vpack.c.bf16 %v7688_v31, %v7686_v18  ;;  %v9606_v55 = vpack.c.bf16 %v9571_v59, %v9571_v59  ;;  %v11222_v33 = vadd.f32 %v16640_v62, %v11181_v0  ;;  %13686 = vmatprep.subr.mxu1 %v11526_v24  ;;  %v11508_v62 = vld [vmem:[#allocation15 + $0x68] sm:$0xff] }
 0x870   :  { %v11261_v32 = vadd.f32 %v16806_v60, %v11220_v40  ;;  %v11523_v60 = vld [vmem:[#allocation15 + $0xe0] sm:$0xff] }
 0x871   :  { %11462 = vmatpush2.bf16.msra.mxu0 %v13668_v7  ;;  %11423 = vmatmul.mubr.bf16.vlgmr.msra.gmra.mxu1 %v9604_v10  ;;  %v11263_v52 = vadd.f32 %v16819_v38, %v11222_v33  ;;  %v11505_v38 = vld [vmem:[#allocation15 + $0x50] sm:$0xff] }
 0x872   :  { %v16890_v42 = vadd.f32 %v16817_v16, %v11261_v32  ;;  %13687 = vmatpush3.msra.mxu1 %v11510_v48  ;;  %v11506_v16 = vld [vmem:[#allocation15 + $0x58] sm:$0xff] }
 0x873   :  { %v16894_v61 = vadd.f32 %v16825_v57, %v11263_v52  ;;  %13688 = vmatprep.subr.mxu1 %v11525_v50  ;;  %v11519_v57 = vld [vmem:[#allocation15 + $0xc0] sm:$0xff] }
 0x874   :  { %11464 = vmatmul.mubr.bf16.vlgmr.msra.gmra.mxu0 %v9606_v55  ;;  %13689 = vmatpush3.msra.mxu1 %v11509_v23  ;;  %v17462_v55 = vlaneseq }
 0x875   :  { %13690 = vmatprep.subr.mxu1 %v11524_v22 }
 0x876   :  { %13691 = vmatpush3.msra.mxu1 %v11508_v62  ;;  %vm11492_vm3 = vcmp.lt.s32.totalorder %v17462_v55, 256 }
 0x877   :  { %13692 = vmatprep.subr.mxu1 %v11523_v60 }
 0x878   :  { %13693 = vmatpush3.msra.mxu1 %v11507_v45 }
 0x879   :  { %13694 = vmatprep.subr.mxu1 %v11522_v39 }
 0x87a   :  { %13695 = vmatpush3.msra.mxu1 %v11506_v16 }
 0x87b   :  { %13696 = vmatprep.subr.mxu1 %v11521_v4 }
 0x87c   :  { %13697 = vmatpush3.msra.mxu1 %v11505_v38 }
 0x87d   :  { %13698 = vmatprep.subr.mxu1 %v11520_v9 }
 0x87e   :  { %13699 = vmatpush3.msra.mxu1 %v11504_v15 }
 0x87f   :  { %13700 = vmatprep.subr.mxu1 %v11519_v57 }
 0x880   :  { %13701 = vmatpush3.msra.mxu1 %v11503_v47 }
 0x881   :  { %13702 = vmatprep.subr.mxu1 %v11518_v17 }
 0x882   :  { %13703 = vmatpush3.msra.mxu1 %v11502_v26 }
 0x883   :  { %13704 = vmatprep.subr.mxu1 %v11517_v12 }
 0x884   :  { %13705 = vmatpush3.msra.mxu1 %v11501_v49 }
 0x885   :  { %13706 = vmatprep.subr.mxu1 %v11516_v1 }
 0x886   :  { %13707 = vmatpush3.msra.mxu1 %v11500_v2 }
 0x887   :  { %13708 = vmatprep.subr.mxu1 %v11515_v53 }
 0x888   :  { %13709 = vmatpush3.msra.mxu1 %v11499_v14 }
 0x889   :  { %13710 = vmatprep.subr.mxu1 %v11514_v43 }
 0x88a   :  { %13711 = vmatpush3.msra.mxu1 %v11498_v44 }
 0x88b   :  { %13712 = vmatprep.subr.mxu1 %v11513_v11 }
 0x88c   :  { %13713 = vmatpush3.msra.mxu1 %v11497_v3 }
 0x88d   :  { %13714 = vmatprep.subr.mxu1 %v11512_v63 }
 0x88e   :  { %13715 = vmatpush3.msra.mxu1 %v11496_v46 }
 0x88f   :  { %13716 = vmatprep.subr.mxu1 %v11511_v35 }
 0x890   :  { %13717 = vmatpush3.msra.mxu1 %v11495_v19 }
 0x8bf   :  { %v11342_v56 = vpop.f32.mrf.mxu1 }
 0x8c0   :  { %v11343_v5 = vadd.f32 %v11342_v56, %v16890_v42 }
 0x8c1   :  { %v11344_v21 = vpop.f32.mrf.mxu1 }
 0x8c2   :  { %v11383_v51 = vpop.f32.mrf.mxu0  ;;  %v11345_v54 = vadd.f32 %v11344_v21, %v16894_v61 }
 0x8c3   :  { %v11384_v30 = vadd.f32 %v11383_v51, %v11343_v5  ;;  %v11346_v25 = vpop.f32.mrf.mxu1 }
 0x8c4   :  { %v11385_v27 = vpop.f32.mrf.mxu0 }
 0x8c5   :  { %v11386_v34 = vadd.f32 %v11385_v27, %v11345_v54  ;;  %v11347_v58 = vpop.f32.mrf.mxu1 }
 0x8c6   :  { %v11387_v36 = vpop.f32.mrf.mxu0 }
 0x8c8   :  { %v11388_v29 = vpop.f32.mrf.mxu0 }
 0x931   :  { %v11424_v18 = vpop.f32.mrf.mxu1 }
 0x932   :  { %v11425_v13 = vadd.f32 %v11424_v18, %v11384_v30 }
 0x933   :  { %v11426_v41 = vpop.f32.mrf.mxu1 }
 0x934   :  { %v11465_v6 = vpop.f32.mrf.mxu0  ;;  %v11427_v20 = vadd.f32 %v11426_v41, %v11386_v34 }
 0x935   :  { %v11428_v37 = vpop.f32.mrf.mxu1  ;;  %v11466_v59 = vadd.f32 %v11465_v6, %v11425_v13 }
 0x936   :  { %v11467_v31 = vpop.f32.mrf.mxu0 }
 0x937   :  { %v11468_v24 = vadd.f32 %v11467_v31, %v11427_v20  ;;  %v11429_v10 = vpop.f32.mrf.mxu1 }
 0x938   :  { %v11469_v40 = vpop.f32.mrf.mxu0 }
 0x939   :  { %v11474_v8 = vcombine.low %v11466_v59, %v11468_v24  ;;  %11592 = vmatprep.mubr.f32.mxu1 %v11468_v24 }
 0x93a   :  { %v11470_v0 = vpop.f32.mrf.mxu0  ;;  %11593 = vmatmul.mubr.f32.vlgmr.msra.gmra.mxu1 %v11466_v59 }
 0x93b   :  { %v11481_v7 = vrot.slane %v11474_v8, %v16099_v28 }
 0x93d   :  { %v11488_v33 = vrot.slane %v11481_v7, %v16099_v28 }
 0x93f   :  { %11494 = vst.msk [vmem:[#allocation18] sm:$0x3] %vm11492_vm3, %v11488_v33 }
 0x940   :  { %13920 = shalt.err (!%p13917_p2)
}
 0x941   :  { %11609 = dma.vmem_to_hbm [thread:$0]  %s11607_s25, 32, %s16917_s10, [#allocation8]   ;;  %v11527_v48 = vld [vmem:[#allocation17] sm:$0x1] }
 0x9fa   :  { %v13718_v32 = vpop.f32.mrf.mxu1 }
 0x9fc   :  { %v13719_v50 = vpop.f32.mrf.mxu1 }
 0x9fd   :  { %v13720_v42 = vadd.f32 %v13719_v50, %v13718_v32 }
 0x9ff   :  { %v11595_v28 = vadd.f32 %v13720_v42, %v11527_v48 }
 0xa01   :  { %11598 = vst [vmem:[%s16919_s12] sm:$0x1] %v11595_v28 }
 0xa02   :  { %13939 = dma.done.wait [#allocation8], 32  }
 0xa03   :  { %13940 = vsyncadd [#allocation8], 4294967264 }
 0xa04   :  { %11621 = vsyncpa [#allocation7], 1 }
 0xa05   :  { %11622 = vsyncpa [#allocation10], 1 }
 0xa06   :  { %11623 = vsyncpa [#allocation13], 1 }
 0xa07   :  { %11624 = vsyncpa [#allocation16], 1 }
 0xa08   :  { %11625 = vsyncpa [#allocation8], 1 }
 0xa09   :  { %11626 = vsyncmov [#allocation5] }
 0xa0c   :  { %s11627_s30 = vpop.sfrf %11626 }
 0xa0d   :  { %p12659_p3 = scmp.ne.s32.totalorder %s11627_s30, 0 }
 0xa0f   :  { %11631 = shalt.err (%p12659_p3)  }

</bundles_post_ra>
